<compile_context>
chip_gen: v6e
topology: v6e:2x2x1
jax: 0.10.0
libtpu: 0.0.40
codegen_flags: <defaults>
</compile_context>

<pallas_src>
import functools

import jax
import jax.numpy as jnp
import numpy as np
from jax.experimental import pallas as pl
from jax.experimental.pallas import tpu as pltpu

_NSTAT = 7  # pos_loss, positive, shrink_mask, l1_num, thr_mask, dice_inter, dice_pred


def _db_loss_kernel(sp_ref, tp_ref, bp_ref, sg_ref, sm_ref, tg_ref, tmk_ref,
                    neg_ref, part_ref, acc_ref, *, rb, rbp):
    f32 = jnp.float32
    si = pl.program_id(2)

    sp = sp_ref[...].astype(f32)    # shrink (probability) prediction
    tp = tp_ref[...].astype(f32)    # threshold prediction
    bp = bp_ref[...].astype(f32)    # binary prediction
    sg = sg_ref[...].astype(f32)    # shrink gt
    sm = sm_ref[...].astype(f32)    # shrink mask
    tg = tg_ref[...].astype(f32)    # threshold gt
    tmk = tmk_ref[...].astype(f32)  # threshold mask

    @pl.when(si == 0)
    def _init():
        acc_ref[...] = jnp.zeros_like(acc_ref)

    # ---- Balanced BCE, elementwise part ----
    # torch.nn.functional.binary_cross_entropy clamps log terms at -100.
    log_p = jnp.maximum(jnp.log(sp), -100.0)
    log_1mp = jnp.maximum(jnp.log(1.0 - sp), -100.0)
    bce = -(sg * log_p + (1.0 - sg) * log_1mp)

    positive = sg * sm
    pos_loss = bce * positive
    neg_loss = bce * sm - pos_loss          # == bce * (1 - gt) * mask (binary gt)
    # Per-pixel negative losses go out (bf16) for the OHEM top-k selection.
    neg_ref[...] = neg_loss.astype(neg_ref.dtype)

    stats = (
        pos_loss,                 # 0: sum of positive BCE losses
        positive,                 # 1: positive count (== dice's sum(gt*mask))
        sm,                       # 2: shrink-mask sum (neg count derived in wrapper)
        jnp.abs(tp - tg) * tmk,   # 3: masked-L1 numerator
        tmk,                      # 4: threshold-mask sum
        bp * positive,            # 5: dice intersection
        bp * sm,                  # 6: dice pred-side union term
    )
    # Elementwise accumulation into VMEM scratch (VALU / vld / vst slots only;
    # no per-step cross-sublane XLU reductions).
    for q, v in enumerate(stats):
        rows = pl.ds(q * rbp, rb)
        acc_ref[rows, :] = acc_ref[rows, :] + v

    # One sublane reduction per statistic, only at the last inner spatial step.
    @pl.when(si == pl.num_programs(2) - 1)
    def _flush():
        for q in range(_NSTAT):
            part_ref[pl.ds(q, 1), :] = jnp.sum(
                acc_ref[pl.ds(q * rbp, rb), :], axis=0, keepdims=True)


def _pick_spatial_tile(hw_pad, rb, max_tile=16384, target_block_bytes=1 << 20):
    """Largest multiple-of-128 divisor of hw_pad within the VMEM-friendly cap."""
    cap = min(max_tile,
              max(128, (target_block_bytes // (max(rb, 1) * 4)) // 128 * 128),
              hw_pad)
    cap = max(128, (cap // 128) * 128)
    for t in range(cap, 0, -128):
        if hw_pad % t == 0:
            return t
    return 128  # unreachable: hw_pad is a multiple of 128


def _run_kernel(pred, shrink_map, shrink_mask, threshold_map, threshold_mask,
                neg_dtype=jnp.bfloat16):
    n, c, h, w = pred.shape
    assert c == 3
    hw = h * w
    # Lane-align the flattened spatial dim once (zero pad) instead of
    # materializing strided per-channel copies for hw % 128 != 0 resolutions.
    hw_pad = -(-hw // 128) * 128
    pad_cols = hw_pad - hw

    rb = 8 if n % 8 == 0 else n        # row block: multiple of 8 or full batch
    rbp = -(-rb // 8) * 8              # 8-aligned scratch stride per statistic
    num_rb = n // rb
    t = _pick_spatial_tile(hw_pad, rb)
    n_sb = hw_pad // t                 # spatial blocks
    # Keep >= 2 blocks on the parallel part of the grid when possible so both
    # v7x TensorCores stream; split the spatial axis when the batch collapses.
    if num_rb >= 2 or n_sb < 2:
        n_so = 1
    else:
        n_so = next((d for d in range(2, min(n_sb, 8) + 1) if n_sb % d == 0), 1)
    n_si = n_sb // n_so
    grid = (num_rb, n_so, n_si)

    def flat_pad(x):
        x = x.reshape(n, hw)
        return jnp.pad(x, ((0, 0), (0, pad_cols))) if pad_cols else x

    sg = flat_pad(shrink_map)
    sm = flat_pad(shrink_mask)
    tg = flat_pad(threshold_map)
    tmk = flat_pad(threshold_mask)

    # pred is fed once, reshaped (free when unpadded) to (N, 3*HWp); the three
    # BlockSpecs select the channel via the index_map (no strided copies).
    pred3 = pred.reshape(n, 3, hw)
    if pad_cols:
        pred3 = jnp.pad(pred3, ((0, 0), (0, 0), (0, pad_cols)))
    pred_flat = pred3.reshape(n, 3 * hw_pad)

    def chan_map(ci):
        return lambda r, so, si: (r, ci * n_sb + so * n_si + si)

    def sp_map(r, so, si):
        return (r, so * n_si + si)

    map_spec = pl.BlockSpec((rb, t), sp_map)
    in_specs = ([pl.BlockSpec((rb, t), chan_map(ci)) for ci in range(3)]
                + [map_spec] * 4)

    out_shape = (
        jax.ShapeDtypeStruct((n, hw_pad), neg_dtype),                  # neg BCE map
        jax.ShapeDtypeStruct((num_rb, n_so, _NSTAT, t), jnp.float32),  # lane partials
    )
    out_specs = (
        pl.BlockSpec((rb, t), sp_map),
        pl.BlockSpec((None, None, _NSTAT, t), lambda r, so, si: (r, so, 0, 0)),
    )
    scratch_shapes = [pltpu.VMEM((_NSTAT * rbp, t), jnp.float32)]

    isz = lambda a: jnp.dtype(a.dtype).itemsize
    blk = rb * t
    in_bytes_px = 3 * isz(pred) + isz(sg) + isz(sm) + isz(tg) + isz(tmk)
    vmem_est = (2 * blk * in_bytes_px                        # input double-buffers
                + 2 * blk * jnp.dtype(neg_dtype).itemsize    # neg-map out buffers
                + 2 * _NSTAT * t * 4                         # partials out block
                + _NSTAT * rbp * t * 4)                      # accumulator scratch
    vmem_limit = int(min(max(2 * vmem_est, 24 << 20), 48 << 20))

    bytes_accessed = (n * hw_pad * (in_bytes_px + jnp.dtype(neg_dtype).itemsize)
                      + num_rb * n_so * _NSTAT * t * 4)

    neg_loss, partials = pl.pallas_call(
        functools.partial(_db_loss_kernel, rb=rb, rbp=rbp),
        grid=grid,
        in_specs=in_specs,
        out_specs=out_specs,
        out_shape=out_shape,
        scratch_shapes=scratch_shapes,
        compiler_params=pltpu.CompilerParams(
            dimension_semantics=("parallel", "parallel", "arbitrary"),
            vmem_limit_bytes=vmem_limit),
        cost_estimate=pl.CostEstimate(
            flops=30 * n * hw_pad,
            transcendentals=2 * n * hw_pad,
            bytes_accessed=int(bytes_accessed)),
    )(pred_flat, pred_flat, pred_flat, sg, sm, tg, tmk)
    return neg_loss, partials


@functools.partial(jax.jit, static_argnames=("alpha", "beta", "ohem_ratio", "eps"))
def db_loss(pred, shrink_map, shrink_mask, threshold_map, threshold_mask,
            alpha=1.0, beta=10.0, ohem_ratio=3.0, eps=1e-6):
    """pred: (N, 3, H, W); maps: (N, 1, H, W); masks: (N, H, W).

    Maps / masks may be int8/uint8 and pred may be bf16: the kernel widens
    everything to f32 in-register, cutting HBM read bytes at no accuracy cost
    for binary maps."""
    neg_loss, partials = _run_kernel(pred, shrink_map, shrink_mask,
                                     threshold_map, threshold_mask)
    s = jnp.sum(partials, axis=(0, 1, 3))   # collapse blocks + lanes -> (7,)
    pos_loss_sum, pos_sum, sm_sum = s[0], s[1], s[2]
    l1_num, tmk_sum = s[3], s[4]
    inter, pred_u = s[5], s[6]
    neg_sum = sm_sum - pos_sum              # sum((1-gt)*mask)
    gt_u = pos_sum                          # sum(gt*mask) for the dice union

    # --- BalanceCrossEntropyLoss (OHEM negative selection, plain JAX) ---
    positive_count = jnp.floor(pos_sum)                        # int(...) in torch
    negative_count = jnp.minimum(jnp.floor(neg_sum),
                                 jnp.floor(positive_count * ohem_ratio))
    # TODO(synk): replace the full descending sort with an in-kernel histogram
    # threshold / bounded top-k (dynamic k has no clean Pallas TPU equivalent);
    # kept exact here to match PyTorch topk semantics.
    neg_flat = neg_loss.reshape(-1).astype(jnp.float32)
    neg_sorted = -jnp.sort(-neg_flat)
    idx = jnp.arange(neg_sorted.shape[0], dtype=jnp.float32)
    neg_topk_sum = jnp.sum(jnp.where(idx < negative_count, neg_sorted, 0.0))
    loss_shrink_maps = (pos_loss_sum + neg_topk_sum) / (
        positive_count + negative_count + eps)

    # --- MaskL1Loss ---
    loss_threshold_maps = l1_num / (tmk_sum + eps)

    # --- DiceLoss ---
    loss_binary_maps = 1.0 - 2.0 * inter / (pred_u + gt_u + eps)

    loss_all = alpha * loss_shrink_maps + beta * loss_threshold_maps + loss_binary_maps
    return dict(
        loss_shrink_maps=loss_shrink_maps,
        loss_threshold_maps=loss_threshold_maps,
        loss_binary_maps=loss_binary_maps,
        loss=loss_all,
    )


def _reference(pred, shrink_map, shrink_mask, threshold_map, threshold_mask,
               alpha=1.0, beta=10.0, ohem_ratio=3.0, eps=1e-6):
    """Pure-JAX reference mirroring the PyTorch DBLoss forward."""
    sp, tp, bp = pred[:, 0], pred[:, 1], pred[:, 2]
    sg, tg = shrink_map[:, 0], threshold_map[:, 0]
    sm, tmk = shrink_mask, threshold_mask
    log_p = jnp.maximum(jnp.log(sp), -100.0)
    log_1mp = jnp.maximum(jnp.log(1.0 - sp), -100.0)
    bce = -(sg * log_p + (1.0 - sg) * log_1mp)
    positive = sg * sm
    negative = (1.0 - sg) * sm
    pos_count = jnp.floor(positive.sum())
    neg_count = jnp.minimum(jnp.floor(negative.sum()),
                            jnp.floor(pos_count * ohem_ratio))
    neg_loss = bce * negative
    neg_sorted = -jnp.sort(-neg_loss.reshape(-1))
    idx = jnp.arange(neg_sorted.shape[0], dtype=jnp.float32)
    topk = jnp.sum(jnp.where(idx < neg_count, neg_sorted, 0.0))
    shrink = ((bce * positive).sum() + topk) / (pos_count + neg_count + eps)
    thresh = (jnp.abs(tp - tg) * tmk).sum() / (tmk.sum() + eps)
    dice = 1.0 - 2.0 * (bp * sg * sm).sum() / ((bp * sm).sum() + (sg * sm).sum() + eps)
    return shrink, thresh, dice, alpha * shrink + beta * thresh + dice


if __name__ == "__main__":
    def run_case(n, h, w, case):
        key = jax.random.fold_in(jax.random.PRNGKey(0), case)
        k1, k2, k3, k4, k5 = jax.random.split(key, 5)
        pred = jax.nn.sigmoid(jax.random.normal(k1, (n, 3, h, w), jnp.float32))
        shrink_map = (jax.random.uniform(k2, (n, 1, h, w)) > 0.5).astype(jnp.float32)
        shrink_mask = (jax.random.uniform(k3, (n, h, w)) > 0.2).astype(jnp.float32)
        threshold_map = jax.random.uniform(k4, (n, 1, h, w), jnp.float32)
        threshold_mask = (jax.random.uniform(k5, (n, h, w)) > 0.2).astype(jnp.float32)

        # Binary maps / masks go to the kernel as int8 (fewer HBM read bytes);
        # the kernel widens in-register, so results match the f32 reference.
        out = db_loss(pred,
                      shrink_map.astype(jnp.int8),
                      shrink_mask.astype(jnp.int8),
                      threshold_map,
                      threshold_mask.astype(jnp.int8),
                      alpha=1.0, beta=10.0, ohem_ratio=3.0, eps=1e-6)
        out = jax.block_until_ready(out)

        ref_s, ref_t, ref_d, ref_all = _reference(
            pred, shrink_map, shrink_mask, threshold_map, threshold_mask)
        np.testing.assert_allclose(np.asarray(out["loss_shrink_maps"]),
                                   np.asarray(ref_s), rtol=2e-3, atol=1e-5)
        np.testing.assert_allclose(np.asarray(out["loss_threshold_maps"]),
                                   np.asarray(ref_t), rtol=2e-3, atol=1e-5)
        np.testing.assert_allclose(np.asarray(out["loss_binary_maps"]),
                                   np.asarray(ref_d), rtol=2e-3, atol=1e-5)
        np.testing.assert_allclose(np.asarray(out["loss"]),
                                   np.asarray(ref_all), rtol=2e-3, atol=1e-5)

    # Small shapes consistent with the module (N, 3, H, W).
    run_case(2, 64, 64, 0)   # H*W multiple of 128 (no padding path)
    run_case(2, 60, 60, 1)   # H*W % 128 != 0 -> lane-padding path
    print("KERNEL_OK")
</pallas_src>

<mosaic_0001>
module attributes {stable_mosaic.version = 11 : i64} {
  func.func @_db_loss_kernel(%arg0: i32, %arg1: i32, %arg2: i32, %arg3: memref<2x4096xf32, #tpu.memory_space<vmem>>, %arg4: memref<2x4096xf32, #tpu.memory_space<vmem>>, %arg5: memref<2x4096xf32, #tpu.memory_space<vmem>>, %arg6: memref<2x4096xi8, #tpu.memory_space<vmem>>, %arg7: memref<2x4096xi8, #tpu.memory_space<vmem>>, %arg8: memref<2x4096xf32, #tpu.memory_space<vmem>>, %arg9: memref<2x4096xi8, #tpu.memory_space<vmem>>, %arg10: memref<2x4096xbf16, #tpu.memory_space<vmem>>, %arg11: memref<1x1x7x4096xf32, #tpu.memory_space<vmem>>, %arg12: memref<56x4096xf32, #tpu.memory_space<vmem>>) attributes {dimension_semantics = [#tpu.dimension_semantics<parallel>, #tpu.dimension_semantics<parallel>, #tpu.dimension_semantics<arbitrary>], iteration_bounds = array<i64: 1, 1, 1>, scalar_prefetch = 0 : i64, scratch_operands = 1 : i64, tpu.core_type = #tpu.core_type<tc>, window_params = [{transform_indices = @transform_0, window_bounds = array<i64: 2, 4096>}, {transform_indices = @transform_1, window_bounds = array<i64: 2, 4096>}, {transform_indices = @transform_2, window_bounds = array<i64: 2, 4096>}, {transform_indices = @transform_3, window_bounds = array<i64: 2, 4096>}, {transform_indices = @transform_4, window_bounds = array<i64: 2, 4096>}, {transform_indices = @transform_5, window_bounds = array<i64: 2, 4096>}, {transform_indices = @transform_6, window_bounds = array<i64: 2, 4096>}, {transform_indices = @transform_7, window_bounds = array<i64: 2, 4096>}, {transform_indices = @transform_8, window_bounds = array<i64: 1, 1, 7, 4096>}]} {
    %c0 = arith.constant 0 : index
    %c0_0 = arith.constant 0 : index
    %0 = vector.load %arg3[%c0, %c0_0] : memref<2x4096xf32, #tpu.memory_space<vmem>>, vector<2x4096xf32>
    %c0_1 = arith.constant 0 : index
    %c0_2 = arith.constant 0 : index
    %1 = vector.load %arg4[%c0_1, %c0_2] : memref<2x4096xf32, #tpu.memory_space<vmem>>, vector<2x4096xf32>
    %c0_3 = arith.constant 0 : index
    %c0_4 = arith.constant 0 : index
    %2 = vector.load %arg5[%c0_3, %c0_4] : memref<2x4096xf32, #tpu.memory_space<vmem>>, vector<2x4096xf32>
    %c0_5 = arith.constant 0 : index
    %c0_6 = arith.constant 0 : index
    %3 = vector.load %arg6[%c0_5, %c0_6] : memref<2x4096xi8, #tpu.memory_space<vmem>>, vector<2x4096xi8>
    %4 = arith.sitofp %3 : vector<2x4096xi8> to vector<2x4096xf32>
    %c0_7 = arith.constant 0 : index
    %c0_8 = arith.constant 0 : index
    %5 = vector.load %arg7[%c0_7, %c0_8] : memref<2x4096xi8, #tpu.memory_space<vmem>>, vector<2x4096xi8>
    %6 = arith.sitofp %5 : vector<2x4096xi8> to vector<2x4096xf32>
    %c0_9 = arith.constant 0 : index
    %c0_10 = arith.constant 0 : index
    %7 = vector.load %arg8[%c0_9, %c0_10] : memref<2x4096xf32, #tpu.memory_space<vmem>>, vector<2x4096xf32>
    %c0_11 = arith.constant 0 : index
    %c0_12 = arith.constant 0 : index
    %8 = vector.load %arg9[%c0_11, %c0_12] : memref<2x4096xi8, #tpu.memory_space<vmem>>, vector<2x4096xi8>
    %9 = arith.sitofp %8 : vector<2x4096xi8> to vector<2x4096xf32>
    %c0_i32 = arith.constant 0 : i32
    %10 = arith.cmpi eq, %arg2, %c0_i32 : i32
    %11 = arith.extui %10 : i1 to i32
    %c0_i32_13 = arith.constant 0 : i32
    %12 = arith.cmpi ne, %11, %c0_i32_13 : i32
    scf.if %12 {
      %cst_44 = arith.constant 0.000000e+00 : f32
      %63 = vector.broadcast %cst_44 : f32 to vector<56x4096xf32>
      %c0_45 = arith.constant 0 : index
      %c0_46 = arith.constant 0 : index
      %64 = vector.load %arg12[%c0_45, %c0_46] : memref<56x4096xf32, #tpu.memory_space<vmem>>, vector<56x4096xf32>
      tpu.vector_store %arg12[%c0_45, %c0_46], %63 {strides = array<i32>} : memref<56x4096xf32, #tpu.memory_space<vmem>>, vector<56x4096xf32>,
    } else {
    }
    %13 = math.log %0 : vector<2x4096xf32>
    %cst = arith.constant -1.000000e+02 : f32
    %14 = vector.broadcast %cst : f32 to vector<2x4096xf32>
    %15 = arith.maximumf %13, %14 : vector<2x4096xf32>
    %cst_14 = arith.constant 1.000000e+00 : f32
    %16 = vector.broadcast %cst_14 : f32 to vector<2x4096xf32>
    %17 = arith.subf %16, %0 : vector<2x4096xf32>
    %18 = math.log %17 : vector<2x4096xf32>
    %cst_15 = arith.constant -1.000000e+02 : f32
    %19 = vector.broadcast %cst_15 : f32 to vector<2x4096xf32>
    %20 = arith.maximumf %18, %19 : vector<2x4096xf32>
    %21 = arith.mulf %4, %15 : vector<2x4096xf32>
    %cst_16 = arith.constant 1.000000e+00 : f32
    %22 = vector.broadcast %cst_16 : f32 to vector<2x4096xf32>
    %23 = arith.subf %22, %4 : vector<2x4096xf32>
    %24 = arith.mulf %23, %20 : vector<2x4096xf32>
    %25 = arith.addf %21, %24 : vector<2x4096xf32>
    %cst_17 = arith.constant 0.000000e+00 : f32
    %26 = vector.broadcast %cst_17 : f32 to vector<2x4096xf32>
    %27 = arith.subf %26, %25 : vector<2x4096xf32>
    %28 = arith.mulf %4, %6 : vector<2x4096xf32>
    %29 = arith.mulf %27, %28 : vector<2x4096xf32>
    %30 = arith.mulf %27, %6 : vector<2x4096xf32>
    %31 = arith.subf %30, %29 : vector<2x4096xf32>
    %32 = arith.truncf %31 : vector<2x4096xf32> to vector<2x4096xbf16>
    %c0_18 = arith.constant 0 : index
    %c0_19 = arith.constant 0 : index
    %33 = vector.load %arg10[%c0_18, %c0_19] : memref<2x4096xbf16, #tpu.memory_space<vmem>>, vector<2x4096xbf16>
    tpu.vector_store %arg10[%c0_18, %c0_19], %32 {strides = array<i32>} : memref<2x4096xbf16, #tpu.memory_space<vmem>>, vector<2x4096xbf16>,
    %34 = arith.subf %1, %7 : vector<2x4096xf32>
    %35 = math.absf %34 : vector<2x4096xf32>
    %36 = arith.mulf %35, %9 : vector<2x4096xf32>
    %37 = arith.mulf %2, %28 : vector<2x4096xf32>
    %38 = arith.mulf %2, %6 : vector<2x4096xf32>
    %c0_20 = arith.constant 0 : index
    %c0_21 = arith.constant 0 : index
    %39 = vector.load %arg12[%c0_20, %c0_21] : memref<56x4096xf32, #tpu.memory_space<vmem>>, vector<2x4096xf32>
    %40 = arith.addf %39, %29 : vector<2x4096xf32>
    %c0_22 = arith.constant 0 : index
    %c0_23 = arith.constant 0 : index
    %41 = vector.load %arg12[%c0_22, %c0_23] : memref<56x4096xf32, #tpu.memory_space<vmem>>, vector<2x4096xf32>
    tpu.vector_store %arg12[%c0_22, %c0_23], %40 {strides = array<i32>} : memref<56x4096xf32, #tpu.memory_space<vmem>>, vector<2x4096xf32>,
    %c8 = arith.constant 8 : index
    %c0_24 = arith.constant 0 : index
    %42 = vector.load %arg12[%c8, %c0_24] : memref<56x4096xf32, #tpu.memory_space<vmem>>, vector<2x4096xf32>
    %43 = arith.addf %42, %28 : vector<2x4096xf32>
    %c8_25 = arith.constant 8 : index
    %c0_26 = arith.constant 0 : index
    %44 = vector.load %arg12[%c8_25, %c0_26] : memref<56x4096xf32, #tpu.memory_space<vmem>>, vector<2x4096xf32>
    tpu.vector_store %arg12[%c8_25, %c0_26], %43 {strides = array<i32>} : memref<56x4096xf32, #tpu.memory_space<vmem>>, vector<2x4096xf32>,
    %c16 = arith.constant 16 : index
    %c0_27 = arith.constant 0 : index
    %45 = vector.load %arg12[%c16, %c0_27] : memref<56x4096xf32, #tpu.memory_space<vmem>>, vector<2x4096xf32>
    %46 = arith.addf %45, %6 : vector<2x4096xf32>
    %c16_28 = arith.constant 16 : index
    %c0_29 = arith.constant 0 : index
    %47 = vector.load %arg12[%c16_28, %c0_29] : memref<56x4096xf32, #tpu.memory_space<vmem>>, vector<2x4096xf32>
    tpu.vector_store %arg12[%c16_28, %c0_29], %46 {strides = array<i32>} : memref<56x4096xf32, #tpu.memory_space<vmem>>, vector<2x4096xf32>,
    %c24 = arith.constant 24 : index
    %c0_30 = arith.constant 0 : index
    %48 = vector.load %arg12[%c24, %c0_30] : memref<56x4096xf32, #tpu.memory_space<vmem>>, vector<2x4096xf32>
    %49 = arith.addf %48, %36 : vector<2x4096xf32>
    %c24_31 = arith.constant 24 : index
    %c0_32 = arith.constant 0 : index
    %50 = vector.load %arg12[%c24_31, %c0_32] : memref<56x4096xf32, #tpu.memory_space<vmem>>, vector<2x4096xf32>
    tpu.vector_store %arg12[%c24_31, %c0_32], %49 {strides = array<i32>} : memref<56x4096xf32, #tpu.memory_space<vmem>>, vector<2x4096xf32>,
    %c32 = arith.constant 32 : index
    %c0_33 = arith.constant 0 : index
    %51 = vector.load %arg12[%c32, %c0_33] : memref<56x4096xf32, #tpu.memory_space<vmem>>, vector<2x4096xf32>
    %52 = arith.addf %51, %9 : vector<2x4096xf32>
    %c32_34 = arith.constant 32 : index
    %c0_35 = arith.constant 0 : index
    %53 = vector.load %arg12[%c32_34, %c0_35] : memref<56x4096xf32, #tpu.memory_space<vmem>>, vector<2x4096xf32>
    tpu.vector_store %arg12[%c32_34, %c0_35], %52 {strides = array<i32>} : memref<56x4096xf32, #tpu.memory_space<vmem>>, vector<2x4096xf32>,
    %c40 = arith.constant 40 : index
    %c0_36 = arith.constant 0 : index
    %54 = vector.load %arg12[%c40, %c0_36] : memref<56x4096xf32, #tpu.memory_space<vmem>>, vector<2x4096xf32>
    %55 = arith.addf %54, %37 : vector<2x4096xf32>
    %c40_37 = arith.constant 40 : index
    %c0_38 = arith.constant 0 : index
    %56 = vector.load %arg12[%c40_37, %c0_38] : memref<56x4096xf32, #tpu.memory_space<vmem>>, vector<2x4096xf32>
    tpu.vector_store %arg12[%c40_37, %c0_38], %55 {strides = array<i32>} : memref<56x4096xf32, #tpu.memory_space<vmem>>, vector<2x4096xf32>,
    %c48 = arith.constant 48 : index
    %c0_39 = arith.constant 0 : index
    %57 = vector.load %arg12[%c48, %c0_39] : memref<56x4096xf32, #tpu.memory_space<vmem>>, vector<2x4096xf32>
    %58 = arith.addf %57, %38 : vector<2x4096xf32>
    %c48_40 = arith.constant 48 : index
    %c0_41 = arith.constant 0 : index
    %59 = vector.load %arg12[%c48_40, %c0_41] : memref<56x4096xf32, #tpu.memory_space<vmem>>, vector<2x4096xf32>
    tpu.vector_store %arg12[%c48_40, %c0_41], %58 {strides = array<i32>} : memref<56x4096xf32, #tpu.memory_space<vmem>>, vector<2x4096xf32>,
    %c0_i32_42 = arith.constant 0 : i32
    %60 = arith.cmpi eq, %arg2, %c0_i32_42 : i32
    %61 = arith.extui %60 : i1 to i32
    %c0_i32_43 = arith.constant 0 : i32
    %62 = arith.cmpi ne, %61, %c0_i32_43 : i32
    scf.if %62 {
      %c0_44 = arith.constant 0 : index
      %c0_45 = arith.constant 0 : index
      %63 = vector.load %arg12[%c0_44, %c0_45] : memref<56x4096xf32, #tpu.memory_space<vmem>>, vector<2x4096xf32>
      %cst_46 = arith.constant dense<0.000000e+00> : vector<4096xf32>
      %64 = vector.multi_reduction <add>, %63, %cst_46 [0] : vector<2x4096xf32> to vector<4096xf32>
      %65 = vector.shape_cast %64 : vector<4096xf32> to vector<1x4096xf32>
      %c0_47 = arith.constant 0 : index
      %c0_48 = arith.constant 0 : index
      %c0_49 = arith.constant 0 : index
      %c0_50 = arith.constant 0 : index
      %66 = vector.load %arg11[%c0_47, %c0_48, %c0_49, %c0_50] : memref<1x1x7x4096xf32, #tpu.memory_space<vmem>>, vector<1x1x1x4096xf32>
      %67 = vector.shape_cast %66 : vector<1x1x1x4096xf32> to vector<1x4096xf32>
      %68 = vector.shape_cast %65 : vector<1x4096xf32> to vector<1x1x1x4096xf32>
      tpu.vector_store %arg11[%c0_47, %c0_48, %c0_49, %c0_50], %68 {strides = array<i32>} : memref<1x1x7x4096xf32, #tpu.memory_space<vmem>>, vector<1x1x1x4096xf32>,
      %c8_51 = arith.constant 8 : index
      %c0_52 = arith.constant 0 : index
      %69 = vector.load %arg12[%c8_51, %c0_52] : memref<56x4096xf32, #tpu.memory_space<vmem>>, vector<2x4096xf32>
      %cst_53 = arith.constant dense<0.000000e+00> : vector<4096xf32>
      %70 = vector.multi_reduction <add>, %69, %cst_53 [0] : vector<2x4096xf32> to vector<4096xf32>
      %71 = vector.shape_cast %70 : vector<4096xf32> to vector<1x4096xf32>
      %c0_54 = arith.constant 0 : index
      %c0_55 = arith.constant 0 : index
      %c1 = arith.constant 1 : index
      %c0_56 = arith.constant 0 : index
      %72 = vector.load %arg11[%c0_54, %c0_55, %c1, %c0_56] : memref<1x1x7x4096xf32, #tpu.memory_space<vmem>>, vector<1x1x1x4096xf32>
      %73 = vector.shape_cast %72 : vector<1x1x1x4096xf32> to vector<1x4096xf32>
      %74 = vector.shape_cast %71 : vector<1x4096xf32> to vector<1x1x1x4096xf32>
      tpu.vector_store %arg11[%c0_54, %c0_55, %c1, %c0_56], %74 {strides = array<i32>} : memref<1x1x7x4096xf32, #tpu.memory_space<vmem>>, vector<1x1x1x4096xf32>,
      %c16_57 = arith.constant 16 : index
      %c0_58 = arith.constant 0 : index
      %75 = vector.load %arg12[%c16_57, %c0_58] : memref<56x4096xf32, #tpu.memory_space<vmem>>, vector<2x4096xf32>
      %cst_59 = arith.constant dense<0.000000e+00> : vector<4096xf32>
      %76 = vector.multi_reduction <add>, %75, %cst_59 [0] : vector<2x4096xf32> to vector<4096xf32>
      %77 = vector.shape_cast %76 : vector<4096xf32> to vector<1x4096xf32>
      %c0_60 = arith.constant 0 : index
      %c0_61 = arith.constant 0 : index
      %c2 = arith.constant 2 : index
      %c0_62 = arith.constant 0 : index
      %78 = vector.load %arg11[%c0_60, %c0_61, %c2, %c0_62] : memref<1x1x7x4096xf32, #tpu.memory_space<vmem>>, vector<1x1x1x4096xf32>
      %79 = vector.shape_cast %78 : vector<1x1x1x4096xf32> to vector<1x4096xf32>
      %80 = vector.shape_cast %77 : vector<1x4096xf32> to vector<1x1x1x4096xf32>
      tpu.vector_store %arg11[%c0_60, %c0_61, %c2, %c0_62], %80 {strides = array<i32>} : memref<1x1x7x4096xf32, #tpu.memory_space<vmem>>, vector<1x1x1x4096xf32>,
      %c24_63 = arith.constant 24 : index
      %c0_64 = arith.constant 0 : index
      %81 = vector.load %arg12[%c24_63, %c0_64] : memref<56x4096xf32, #tpu.memory_space<vmem>>, vector<2x4096xf32>
      %cst_65 = arith.constant dense<0.000000e+00> : vector<4096xf32>
      %82 = vector.multi_reduction <add>, %81, %cst_65 [0] : vector<2x4096xf32> to vector<4096xf32>
      %83 = vector.shape_cast %82 : vector<4096xf32> to vector<1x4096xf32>
      %c0_66 = arith.constant 0 : index
      %c0_67 = arith.constant 0 : index
      %c3 = arith.constant 3 : index
      %c0_68 = arith.constant 0 : index
      %84 = vector.load %arg11[%c0_66, %c0_67, %c3, %c0_68] : memref<1x1x7x4096xf32, #tpu.memory_space<vmem>>, vector<1x1x1x4096xf32>
      %85 = vector.shape_cast %84 : vector<1x1x1x4096xf32> to vector<1x4096xf32>
      %86 = vector.shape_cast %83 : vector<1x4096xf32> to vector<1x1x1x4096xf32>
      tpu.vector_store %arg11[%c0_66, %c0_67, %c3, %c0_68], %86 {strides = array<i32>} : memref<1x1x7x4096xf32, #tpu.memory_space<vmem>>, vector<1x1x1x4096xf32>,
      %c32_69 = arith.constant 32 : index
      %c0_70 = arith.constant 0 : index
      %87 = vector.load %arg12[%c32_69, %c0_70] : memref<56x4096xf32, #tpu.memory_space<vmem>>, vector<2x4096xf32>
      %cst_71 = arith.constant dense<0.000000e+00> : vector<4096xf32>
      %88 = vector.multi_reduction <add>, %87, %cst_71 [0] : vector<2x4096xf32> to vector<4096xf32>
      %89 = vector.shape_cast %88 : vector<4096xf32> to vector<1x4096xf32>
      %c0_72 = arith.constant 0 : index
      %c0_73 = arith.constant 0 : index
      %c4 = arith.constant 4 : index
      %c0_74 = arith.constant 0 : index
      %90 = vector.load %arg11[%c0_72, %c0_73, %c4, %c0_74] : memref<1x1x7x4096xf32, #tpu.memory_space<vmem>>, vector<1x1x1x4096xf32>
      %91 = vector.shape_cast %90 : vector<1x1x1x4096xf32> to vector<1x4096xf32>
      %92 = vector.shape_cast %89 : vector<1x4096xf32> to vector<1x1x1x4096xf32>
      tpu.vector_store %arg11[%c0_72, %c0_73, %c4, %c0_74], %92 {strides = array<i32>} : memref<1x1x7x4096xf32, #tpu.memory_space<vmem>>, vector<1x1x1x4096xf32>,
      %c40_75 = arith.constant 40 : index
      %c0_76 = arith.constant 0 : index
      %93 = vector.load %arg12[%c40_75, %c0_76] : memref<56x4096xf32, #tpu.memory_space<vmem>>, vector<2x4096xf32>
      %cst_77 = arith.constant dense<0.000000e+00> : vector<4096xf32>
      %94 = vector.multi_reduction <add>, %93, %cst_77 [0] : vector<2x4096xf32> to vector<4096xf32>
      %95 = vector.shape_cast %94 : vector<4096xf32> to vector<1x4096xf32>
      %c0_78 = arith.constant 0 : index
      %c0_79 = arith.constant 0 : index
      %c5 = arith.constant 5 : index
      %c0_80 = arith.constant 0 : index
      %96 = vector.load %arg11[%c0_78, %c0_79, %c5, %c0_80] : memref<1x1x7x4096xf32, #tpu.memory_space<vmem>>, vector<1x1x1x4096xf32>
      %97 = vector.shape_cast %96 : vector<1x1x1x4096xf32> to vector<1x4096xf32>
      %98 = vector.shape_cast %95 : vector<1x4096xf32> to vector<1x1x1x4096xf32>
      tpu.vector_store %arg11[%c0_78, %c0_79, %c5, %c0_80], %98 {strides = array<i32>} : memref<1x1x7x4096xf32, #tpu.memory_space<vmem>>, vector<1x1x1x4096xf32>,
      %c48_81 = arith.constant 48 : index
      %c0_82 = arith.constant 0 : index
      %99 = vector.load %arg12[%c48_81, %c0_82] : memref<56x4096xf32, #tpu.memory_space<vmem>>, vector<2x4096xf32>
      %cst_83 = arith.constant dense<0.000000e+00> : vector<4096xf32>
      %100 = vector.multi_reduction <add>, %99, %cst_83 [0] : vector<2x4096xf32> to vector<4096xf32>
      %101 = vector.shape_cast %100 : vector<4096xf32> to vector<1x4096xf32>
      %c0_84 = arith.constant 0 : index
      %c0_85 = arith.constant 0 : index
      %c6 = arith.constant 6 : index
      %c0_86 = arith.constant 0 : index
      %102 = vector.load %arg11[%c0_84, %c0_85, %c6, %c0_86] : memref<1x1x7x4096xf32, #tpu.memory_space<vmem>>, vector<1x1x1x4096xf32>
      %103 = vector.shape_cast %102 : vector<1x1x1x4096xf32> to vector<1x4096xf32>
      %104 = vector.shape_cast %101 : vector<1x4096xf32> to vector<1x1x1x4096xf32>
      tpu.vector_store %arg11[%c0_84, %c0_85, %c6, %c0_86], %104 {strides = array<i32>} : memref<1x1x7x4096xf32, #tpu.memory_space<vmem>>, vector<1x1x1x4096xf32>,
    } else {
    }
    return
  }
  func.func @transform_0(%arg0: i32, %arg1: i32, %arg2: i32) -> (i32, i32) {
    %c1_i32 = arith.constant 1 : i32
    %0 = arith.muli %arg1, %c1_i32 : i32
    %c0_i32 = arith.constant 0 : i32
    %1 = arith.addi %c0_i32, %0 : i32
    %2 = arith.addi %1, %arg2 : i32
    %c0_i32_0 = arith.constant 0 : i32
    return %arg0, %2 : i32, i32
  }
  func.func @transform_1(%arg0: i32, %arg1: i32, %arg2: i32) -> (i32, i32) {
    %c1_i32 = arith.constant 1 : i32
    %0 = arith.muli %arg1, %c1_i32 : i32
    %c1_i32_0 = arith.constant 1 : i32
    %1 = arith.addi %c1_i32_0, %0 : i32
    %2 = arith.addi %1, %arg2 : i32
    %c0_i32 = arith.constant 0 : i32
    return %arg0, %2 : i32, i32
  }
  func.func @transform_2(%arg0: i32, %arg1: i32, %arg2: i32) -> (i32, i32) {
    %c1_i32 = arith.constant 1 : i32
    %0 = arith.muli %arg1, %c1_i32 : i32
    %c2_i32 = arith.constant 2 : i32
    %1 = arith.addi %c2_i32, %0 : i32
    %2 = arith.addi %1, %arg2 : i32
    %c0_i32 = arith.constant 0 : i32
    return %arg0, %2 : i32, i32
  }
  func.func @transform_3(%arg0: i32, %arg1: i32, %arg2: i32) -> (i32, i32) {
    %c1_i32 = arith.constant 1 : i32
    %0 = arith.muli %arg1, %c1_i32 : i32
    %1 = arith.addi %0, %arg2 : i32
    %c0_i32 = arith.constant 0 : i32
    return %arg0, %1 : i32, i32
  }
  func.func @transform_4(%arg0: i32, %arg1: i32, %arg2: i32) -> (i32, i32) {
    %c1_i32 = arith.constant 1 : i32
    %0 = arith.muli %arg1, %c1_i32 : i32
    %1 = arith.addi %0, %arg2 : i32
    %c0_i32 = arith.constant 0 : i32
    return %arg0, %1 : i32, i32
  }
  func.func @transform_5(%arg0: i32, %arg1: i32, %arg2: i32) -> (i32, i32) {
    %c1_i32 = arith.constant 1 : i32
    %0 = arith.muli %arg1, %c1_i32 : i32
    %1 = arith.addi %0, %arg2 : i32
    %c0_i32 = arith.constant 0 : i32
    return %arg0, %1 : i32, i32
  }
  func.func @transform_6(%arg0: i32, %arg1: i32, %arg2: i32) -> (i32, i32) {
    %c1_i32 = arith.constant 1 : i32
    %0 = arith.muli %arg1, %c1_i32 : i32
    %1 = arith.addi %0, %arg2 : i32
    %c0_i32 = arith.constant 0 : i32
    return %arg0, %1 : i32, i32
  }
  func.func @transform_7(%arg0: i32, %arg1: i32, %arg2: i32) -> (i32, i32) {
    %c1_i32 = arith.constant 1 : i32
    %0 = arith.muli %arg1, %c1_i32 : i32
    %1 = arith.addi %0, %arg2 : i32
    %c0_i32 = arith.constant 0 : i32
    return %arg0, %1 : i32, i32
  }
  func.func @transform_8(%arg0: i32, %arg1: i32, %arg2: i32) -> (i32, i32, i32, i32) {
    %c0_i32 = arith.constant 0 : i32
    %c0_i32_0 = arith.constant 0 : i32
    %c0_i32_1 = arith.constant 0 : i32
    return %arg0, %arg1, %c0_i32, %c0_i32_0 : i32, i32, i32, i32
  }
}

</mosaic_0001>

<bundles_post_ra>
// kernel: db_loss.1
= control target key start
LH: loop header
LB: loop body
LE: loop exit
PB: predicated region body
PF: predicated region fallthrough
CT: control target
= control target key end

     0   :  { %v6864_v0 = vmov 0.0   ;;  %v6865_v3 = vmov 1983009808   ;;  %v6866_v6 = vmov 1966171168   ;;  %vm3218_vm0 = vcmask 1041408   ;;  %s8799_s3 = inlined_call_operand.vmem [shape: s8[2,4096], index: 3, kind: input, shape index: {}]   ;;  %s8800_s4 = inlined_call_operand.vmem [shape: s8[2,4096], index: 4, kind: input, shape index: {}]   ;;  %s8801_s6 = inlined_call_operand.vmem [shape: s8[2,4096], index: 6, kind: input, shape index: {}]   ;;  %s8802_s1 = inlined_call_operand.vmem [shape: f32[2,12288], index: 1, kind: input, shape index: {}, may-alias: {0,1,2}]   ;;  %s8803_s5 = inlined_call_operand.vmem [shape: f32[2,4096], index: 5, kind: input, shape index: {}]   ;;  %s8804_s2 = inlined_call_operand.vmem [shape: f32[2,12288], index: 2, kind: input, shape index: {}, may-alias: {0,1,2}]   ;;  %s8805_s0 = inlined_call_operand.vmem [shape: f32[2,12288], index: 0, kind: input, shape index: {}, may-alias: {0,1,2}]   ;;  %s8806_s8 = inlined_call_operand.vmem [shape: f32[1,1,7,4096], index: 8, kind: output, shape index: {1}]   ;;  %s8807_s7 = inlined_call_operand.vmem [shape: bf16[2,4096], index: 7, kind: output, shape index: {0}]  }
   0x1   :  { %371 = vst [vmem:[#allocation2 + $0x5f8] sm:$0xff] %v6864_v0  ;;  %339 = vst [vmem:[#allocation2 + $0x2b0] sm:$0xff] %v6864_v0  ;;  %v219_v1 = vld [vmem:[%s8799_s3] sm:$0xff]  ;;  %v7142_v4 = vunpack.c.l.s4 %v6865_v3  ;;  %v7144_v7 = vunpack.c.l.s4 %v6866_v6  ;;  %v7149_v16 = vld [vmem:[%s8799_s3 + $0x8] sm:$0xff] }
   0x2   :  { %340 = vst [vmem:[#allocation2 + $0x3b0] sm:$0xff] %v6864_v0  ;;  %341 = vst [vmem:[#allocation2 + $0x4d8] sm:$0xff] %v6864_v0  ;;  %v255_v2 = vld [vmem:[%s8800_s4] sm:$0xff]  ;;  %v223_v8 = vunpack.c.0.s8 %v219_v1  ;;  %v224_v10 = vunpack.c.1.s8 %v219_v1  ;;  %v225_v12 = vunpack.c.2.s8 %v219_v1  ;;  %v226_v14 = vunpack.c.3.s8 %v219_v1  ;;  %v7154_v17 = vld [vmem:[%s8800_s4 + $0x8] sm:$0xff] }
   0x3   :  { %342 = vst [vmem:[#allocation2 + $0x18] sm:$0xff] %v6864_v0  ;;  %343 = vst [vmem:[#allocation2 + $0x450] sm:$0xff] %v6864_v0  ;;  %v259_v9 = vunpack.c.0.s8 %v255_v2  ;;  %v260_v11 = vunpack.c.1.s8 %v255_v2  ;;  %v261_v13 = vunpack.c.2.s8 %v255_v2  ;;  %v262_v15 = vunpack.c.3.s8 %v255_v2  ;;  %v7203_v41 = vld [vmem:[%s8799_s3 + $0x10] sm:$0xff] }
   0x4   :  { %344 = vst [vmem:[#allocation2 + $0x328] sm:$0xff] %v6864_v0  ;;  %345 = vst [vmem:[#allocation2 + $0x440] sm:$0xff] %v6864_v0  ;;  %v7156_v18 = vcvt.s32.f32 %v223_v8  ;;  %v7160_v20 = vcvt.s32.f32 %v224_v10  ;;  %v7164_v22 = vcvt.s32.f32 %v225_v12  ;;  %v7168_v24 = vcvt.s32.f32 %v226_v14  ;;  %v7222_v61 = vld [vmem:[%s8800_s4 + $0x10] sm:$0xff] }
   0x5   :  { %346 = vst [vmem:[#allocation2 + $0x378] sm:$0xff] %v6864_v0  ;;  %347 = vst [vmem:[#allocation2 + $0x108] sm:$0xff] %v6864_v0  ;;  %v7158_v19 = vcvt.s32.f32 %v259_v9  ;;  %v7162_v21 = vcvt.s32.f32 %v260_v11  ;;  %v7166_v23 = vcvt.s32.f32 %v261_v13  ;;  %v7170_v25 = vcvt.s32.f32 %v262_v15 }
   0x6   :  { %348 = vst [vmem:[#allocation2 + $0x510] sm:$0xff] %v6864_v0  ;;  %349 = vst [vmem:[#allocation2 + $0x490] sm:$0xff] %v6864_v0  ;;  %v227_v28 = vunpack.c.0.s8 %v7149_v16  ;;  %v263_v29 = vunpack.c.0.s8 %v7154_v17  ;;  %v228_v32 = vunpack.c.1.s8 %v7149_v16  ;;  %v264_v33 = vunpack.c.1.s8 %v7154_v17 }
   0x7   :  { %350 = vst [vmem:[#allocation2 + $0x318] sm:$0xff] %v6864_v0  ;;  %351 = vst [vmem:[#allocation2 + $0x548] sm:$0xff] %v6864_v0  ;;  %v7174_v26 = vmul.f32 %v7158_v19, %v7156_v18  ;;  %v7178_v27 = vmul.f32 %v7162_v21, %v7160_v20  ;;  %v7184_v30 = vmul.f32 %v7166_v23, %v7164_v22  ;;  %v229_v1 = vunpack.c.2.s8 %v7149_v16 }
   0x8   :  { %352 = vst [vmem:[#allocation2 + $0x500] sm:$0xff] %v6864_v0  ;;  %353 = vst [vmem:[#allocation2 + $0x6d0] sm:$0xff] %v6864_v0  ;;  %v7188_v31 = vmul.f32 %v7170_v25, %v7168_v24  ;;  %v1983_v34 = vld [vmem:[#allocation2 + $0x5f8] sm:$0x3]  ;;  %v7196_v39 = vcvt.s32.f32 %v227_v28  ;;  %v7198_v40 = vcvt.s32.f32 %v263_v29  ;;  %v7217_v60 = vcvt.s32.f32 %v228_v32 }
   0x9   :  { %354 = vst [vmem:[#allocation2 + $0x320] sm:$0xff] %v6864_v0  ;;  %355 = vst [vmem:[#allocation2 + $0x2c0] sm:$0xff] %v6864_v0  ;;  %v2015_v36 = vcombine.high %v7174_v26, %v7174_v26  ;;  %v2016_v38 = vcombine.high %v7178_v27, %v7178_v27  ;;  %v2047_v42 = vadd.f32 %v1983_v34, %v7174_v26  ;;  %v265_v3 = vunpack.c.2.s8 %v7154_v17 }
   0xa   :  { %356 = vst [vmem:[#allocation2 + $0x588] sm:$0xff] %v6864_v0  ;;  %357 = vst [vmem:[#allocation2 + $0x598] sm:$0xff] %v6864_v0  ;;  %v2017_v47 = vcombine.high %v7184_v30, %v7184_v30  ;;  %v2018_v48 = vcombine.high %v7188_v31, %v7188_v31  ;;  %v7214_v54 = vmul.f32 %v7198_v40, %v7196_v39  ;;  %v230_v6 = vunpack.c.3.s8 %v7149_v16 }
   0xb   :  { %358 = vst [vmem:[#allocation2 + $0x60] sm:$0xff] %v6864_v0  ;;  %359 = vst [vmem:[#allocation2 + $0x3c8] sm:$0xff] %v6864_v0  ;;  %v266_v8 = vunpack.c.3.s8 %v7154_v17  ;;  %v231_v9 = vunpack.c.0.s8 %v7203_v41  ;;  %v7238_v12 = vcvt.s32.f32 %v229_v1  ;;  %v267_v13 = vunpack.c.0.s8 %v7222_v61  ;;  %v7293_v1 = vld [vmem:[%s8800_s4 + $0x18] sm:$0xff] }
   0xc   :  { %360 = vst [vmem:[#allocation2 + $0x6d8] sm:$0xff] %v6864_v0  ;;  %361 = vst [vmem:[#allocation2 + $0x670] sm:$0xff] %v6864_v0  ;;  %v2019_v63 = vcombine.high %v7214_v54, %v7214_v54  ;;  %v7241_v15 = vcvt.s32.f32 %v265_v3  ;;  %v7243_v28 = vcvt.s32.f32 %v230_v6  ;;  %v274_v5 = vunpack.c.3.s8 %v7293_v1 }
   0xd   :  { %362 = vst [vmem:[#allocation2 + $0x348] sm:$0xff] %v6864_v0  ;;  %363 = vst [vmem:[#allocation2 + $0x118] sm:$0xff] %v6864_v0  ;;  %v7245_v16 = vcvt.s32.f32 %v266_v8  ;;  %v7247_v17 = vcvt.s32.f32 %v231_v9  ;;  %v234_v9 = vunpack.c.3.s8 %v7203_v41 }
   0xe   :  { %364 = vst [vmem:[#allocation2 + $0xa0] sm:$0xff] %v6864_v0  ;;  %365 = vst [vmem:[#allocation2 + $0x1a0] sm:$0xff] %v6864_v0 }
   0xf   :  { %366 = vst [vmem:[#allocation2 + $0x260] sm:$0xff] %v6864_v0  ;;  %367 = vst [vmem:[#allocation2 + $0xe0] sm:$0xff] %v6864_v0 }
  0x10   :  { %368 = vst [vmem:[#allocation2 + $0x3a0] sm:$0xff] %v6864_v0  ;;  %369 = vst [vmem:[#allocation2 + $0x538] sm:$0xff] %v6864_v0 }
  0x11   :  { %370 = vst [vmem:[#allocation2 + $0x3c0] sm:$0xff] %v6864_v0  ;;  %372 = vst [vmem:[#allocation2 + $0x4a0] sm:$0xff] %v6864_v0 }
  0x12   :  { %373 = vst [vmem:[#allocation2 + $0x4e8] sm:$0xff] %v6864_v0  ;;  %374 = vst [vmem:[#allocation2 + $0x3d8] sm:$0xff] %v6864_v0 }
  0x13   :  { %375 = vst [vmem:[#allocation2 + $0x680] sm:$0xff] %v6864_v0  ;;  %376 = vst [vmem:[#allocation2 + $0x3d0] sm:$0xff] %v6864_v0 }
  0x14   :  { %377 = vst [vmem:[#allocation2 + $0x80] sm:$0xff] %v6864_v0  ;;  %378 = vst [vmem:[#allocation2 + $0x6a0] sm:$0xff] %v6864_v0 }
  0x15   :  { %379 = vst [vmem:[#allocation2 + $0x90] sm:$0xff] %v6864_v0  ;;  %380 = vst [vmem:[#allocation2 + $0x5c0] sm:$0xff] %v6864_v0 }
  0x16   :  { %381 = vst [vmem:[#allocation2 + $0x5d0] sm:$0xff] %v6864_v0  ;;  %382 = vst [vmem:[#allocation2 + $0x4f0] sm:$0xff] %v6864_v0 }
  0x17   :  { %383 = vst [vmem:[#allocation2 + $0x610] sm:$0xff] %v6864_v0  ;;  %384 = vst [vmem:[#allocation2 + $0x220] sm:$0xff] %v6864_v0 }
  0x18   :  { %385 = vst [vmem:[#allocation2 + $0x58] sm:$0xff] %v6864_v0  ;;  %386 = vst [vmem:[#allocation2 + $0x3f0] sm:$0xff] %v6864_v0  ;;  %v1984_v35 = vld [vmem:[#allocation2 + $0x4a0] sm:$0x3] }
  0x19   :  { %387 = vst [vmem:[#allocation2 + $0x5e8] sm:$0xff] %v6864_v0  ;;  %388 = vst [vmem:[#allocation2 + $0xb0] sm:$0xff] %v6864_v0  ;;  %v1985_v37 = vld [vmem:[#allocation2 + $0x4e8] sm:$0x3]  ;;  %v1986_v44 = vld [vmem:[#allocation2 + $0x3d8] sm:$0x3]  ;;  %v2048_v49 = vadd.f32 %v2015_v36, %v1984_v35  ;;  %v7252_v35 = vcvt.s32.f32 %v267_v13  ;;  %v232_v36 = vunpack.c.1.s8 %v7203_v41 }
  0x1a   :  { %389 = vst [vmem:[#allocation2 + $0x368] sm:$0xff] %v6864_v0  ;;  %390 = vst [vmem:[#allocation2 + $0x4b0] sm:$0xff] %v6864_v0  ;;  %v2049_v43 = vadd.f32 %v1985_v37, %v7178_v27  ;;  %v1987_v45 = vld [vmem:[#allocation2 + $0x680] sm:$0x3]  ;;  %v1988_v46 = vld [vmem:[#allocation2 + $0x3d0] sm:$0x3]  ;;  %v2050_v50 = vadd.f32 %v2016_v38, %v1986_v44  ;;  %v7257_v37 = vmul.f32 %v7241_v15, %v7238_v12  ;;  %v233_v44 = vunpack.c.2.s8 %v7203_v41 }
  0x1b   :  { %391 = vst [vmem:[#allocation2 + $0x2d8] sm:$0xff] %v6864_v0  ;;  %392 = vst [vmem:[#allocation2 + $0x410] sm:$0xff] %v6864_v0  ;;  %v2051_v51 = vadd.f32 %v1987_v45, %v7184_v30  ;;  %v1989_v52 = vld [vmem:[#allocation2 + $0x80] sm:$0x3]  ;;  %v2052_v56 = vadd.f32 %v2017_v47, %v1988_v46  ;;  %v7261_v38 = vmul.f32 %v7245_v16, %v7243_v28  ;;  %v271_v41 = vunpack.c.0.s8 %v7293_v1 }
  0x1c   :  { %393 = vst [vmem:[#allocation2 + $0x408] sm:$0xff] %v6864_v0  ;;  %394 = vst [vmem:[#allocation2 + $0x4e0] sm:$0xff] %v6864_v0  ;;  %v1990_v53 = vld [vmem:[#allocation2 + $0x6a0] sm:$0x3]  ;;  %v1991_v55 = vld [vmem:[#allocation2 + $0x90] sm:$0x3]  ;;  %v2053_v57 = vadd.f32 %v1989_v52, %v7188_v31  ;;  %v2021_v52 = vcombine.high %v7257_v37, %v7257_v37 }
  0x1d   :  { %395 = vst [vmem:[#allocation2 + $0x358] sm:$0xff] %v6864_v0  ;;  %396 = vst [vmem:[#allocation2 + $0x68] sm:$0xff] %v6864_v0  ;;  %v2054_v58 = vadd.f32 %v2018_v48, %v1990_v53  ;;  %v1992_v59 = vld [vmem:[#allocation2 + $0x5c0] sm:$0x3]  ;;  %v2055_v62 = vadd.f32 %v1991_v55, %v7214_v54  ;;  %v1993_v2 = vld [vmem:[#allocation2 + $0x5d0] sm:$0x3]  ;;  %v7267_v48 = vmul.f32 %v7252_v35, %v7247_v17 }
  0x1e   :  { %397 = vst [vmem:[#allocation2 + $0x188] sm:$0xff] %v6864_v0  ;;  %398 = vst [vmem:[#allocation2 + $0x640] sm:$0xff] %v6864_v0  ;;  %v2056_v10 = vadd.f32 %v2019_v63, %v1992_v59  ;;  %v1994_v14 = vld [vmem:[#allocation2 + $0x4f0] sm:$0x3]  ;;  %v1996_v46 = vld [vmem:[#allocation2 + $0x220] sm:$0x3]  ;;  %v2022_v55 = vcombine.high %v7261_v38, %v7261_v38  ;;  %v7288_v63 = vcvt.s32.f32 %v233_v44 }
  0x1f   :  { %399 = vst [vmem:[#allocation2 + $0x528] sm:$0xff] %v6864_v0  ;;  %400 = vst [vmem:[#allocation2 + $0x5d8] sm:$0xff] %v6864_v0  ;;  %v1997_v34 = vld [vmem:[#allocation2 + $0x58] sm:$0x3]  ;;  %v1998_v47 = vld [vmem:[#allocation2 + $0x3f0] sm:$0x3]  ;;  %v2023_v59 = vcombine.high %v7267_v48, %v7267_v48 }
  0x20   :  { %401 = vst [vmem:[#allocation2 + $0x650] sm:$0xff] %v6864_v0  ;;  %402 = vst [vmem:[#allocation2 + $0x340] sm:$0xff] %v6864_v0  ;;  %v2061_v53 = vadd.f32 %v1997_v34, %v7261_v38  ;;  %v2062_v3 = vadd.f32 %v2022_v55, %v1998_v47 }
  0x21   :  { %403 = vst [vmem:[#allocation2 + $0x6b0] sm:$0xff] %v6864_v0  ;;  %404 = vst [vmem:[#allocation2 + $0x2b8] sm:$0xff] %v6864_v0  ;;  %v2001_v6 = vld [vmem:[#allocation2 + $0x368] sm:$0x3] }
  0x22   :  { %405 = vst [vmem:[#allocation2 + $0x5b0] sm:$0xff] %v6864_v0  ;;  %406 = vst [vmem:[#allocation2 + $0x6f0] sm:$0xff] %v6864_v0  ;;  %v2004_v44 = vld [vmem:[#allocation2 + $0x410] sm:$0x3] }
  0x23   :  { %407 = vst [vmem:[#allocation2 + $0x550] sm:$0xff] %v6864_v0  ;;  %408 = vst [vmem:[#allocation2 + $0x688] sm:$0xff] %v6864_v0 }
  0x24   :  { %409 = vst [vmem:[#allocation2 + $0xb8] sm:$0xff] %v6864_v0  ;;  %410 = vst [vmem:[#allocation2 + $0x128] sm:$0xff] %v6864_v0 }
  0x25   :  { %411 = vst [vmem:[#allocation2 + $0x648] sm:$0xff] %v6864_v0  ;;  %412 = vst [vmem:[#allocation2 + $0x190] sm:$0xff] %v6864_v0 }
  0x26   :  { %413 = vst [vmem:[#allocation2 + $0x88] sm:$0xff] %v6864_v0  ;;  %414 = vst [vmem:[#allocation2 + $0x148] sm:$0xff] %v6864_v0 }
  0x27   :  { %415 = vst [vmem:[#allocation2 + $0x630] sm:$0xff] %v6864_v0  ;;  %416 = vst [vmem:[#allocation2 + $0x130] sm:$0xff] %v6864_v0 }
  0x28   :  { %417 = vst [vmem:[#allocation2 + $0x1e8] sm:$0xff] %v6864_v0  ;;  %418 = vst [vmem:[#allocation2 + $0x1f8] sm:$0xff] %v6864_v0 }
  0x29   :  { %419 = vst [vmem:[#allocation2 + $0x338] sm:$0xff] %v6864_v0  ;;  %420 = vst [vmem:[#allocation2 + $0x228] sm:$0xff] %v6864_v0 }
  0x2a   :  { %421 = vst [vmem:[#allocation2 + $0x428] sm:$0xff] %v6864_v0  ;;  %422 = vst [vmem:[#allocation2 + $0x270] sm:$0xff] %v6864_v0 }
  0x2b   :  { %423 = vst [vmem:[#allocation2 + $0x350] sm:$0xff] %v6864_v0  ;;  %424 = vst [vmem:[#allocation2 + $0xf8] sm:$0xff] %v6864_v0 }
  0x2c   :  { %425 = vst [vmem:[#allocation2 + $0x20] sm:$0xff] %v6864_v0  ;;  %426 = vst [vmem:[#allocation2 + $0x208] sm:$0xff] %v6864_v0 }
  0x2d   :  { %427 = vst [vmem:[#allocation2 + $0xd0] sm:$0xff] %v6864_v0  ;;  %428 = vst [vmem:[#allocation2 + $0x1b8] sm:$0xff] %v6864_v0 }
  0x2e   :  { %429 = vst [vmem:[#allocation2 + $0x1e0] sm:$0xff] %v6864_v0  ;;  %430 = vst [vmem:[#allocation2 + $0x180] sm:$0xff] %v6864_v0 }
  0x2f   :  { %431 = vst [vmem:[#allocation2 + $0x438] sm:$0xff] %v6864_v0  ;;  %432 = vst [vmem:[#allocation2 + $0x6f8] sm:$0xff] %v6864_v0 }
  0x30   :  { %433 = vst [vmem:[#allocation2 + $0x158] sm:$0xff] %v6864_v0  ;;  %434 = vst [vmem:[#allocation2 + $0x5a0] sm:$0xff] %v6864_v0 }
  0x31   :  { %435 = vst [vmem:[#allocation2 + $0x230] sm:$0xff] %v6864_v0  ;;  %436 = vst [vmem:[#allocation2 + $0x418] sm:$0xff] %v6864_v0 }
  0x32   :  { %437 = vst [vmem:[#allocation2 + $0x250] sm:$0xff] %v6864_v0  ;;  %438 = vst [vmem:[#allocation2 + $0x568] sm:$0xff] %v6864_v0 }
  0x33   :  { %439 = vst [vmem:[#allocation2 + $0x3b8] sm:$0xff] %v6864_v0  ;;  %440 = vst [vmem:[#allocation2 + $0x268] sm:$0xff] %v6864_v0 }
  0x34   :  { %441 = vst [vmem:[#allocation2 + $0x660] sm:$0xff] %v6864_v0  ;;  %442 = vst [vmem:[#allocation2 + $0x28] sm:$0xff] %v6864_v0 }
  0x35   :  { %443 = vst [vmem:[#allocation2 + $0x5f0] sm:$0xff] %v6864_v0  ;;  %444 = vst [vmem:[#allocation2 + $0x4f8] sm:$0xff] %v6864_v0 }
  0x36   :  { %445 = vst [vmem:[#allocation2 + $0x288] sm:$0xff] %v6864_v0  ;;  %446 = vst [vmem:[#allocation2 + $0x1b0] sm:$0xff] %v6864_v0 }
  0x37   :  { %447 = vst [vmem:[#allocation2 + $0x420] sm:$0xff] %v6864_v0  ;;  %448 = vst [vmem:[#allocation2 + $0x178] sm:$0xff] %v6864_v0 }
  0x38   :  { %449 = vst [vmem:[#allocation2 + $0x390] sm:$0xff] %v6864_v0  ;;  %450 = vst [vmem:[#allocation2 + $0x488] sm:$0xff] %v6864_v0 }
  0x39   :  { %451 = vst [vmem:[#allocation2 + $0x678] sm:$0xff] %v6864_v0  ;;  %452 = vst [vmem:[#allocation2 + $0x200] sm:$0xff] %v6864_v0 }
  0x3a   :  { %453 = vst [vmem:[#allocation2 + $0x5a8] sm:$0xff] %v6864_v0  ;;  %454 = vst [vmem:[#allocation2 + $0x478] sm:$0xff] %v6864_v0 }
  0x3b   :  { %455 = vst [vmem:[#allocation2 + $0x388] sm:$0xff] %v6864_v0  ;;  %456 = vst [vmem:[#allocation2 + $0x3f8] sm:$0xff] %v6864_v0 }
  0x3c   :  { %457 = vst [vmem:[#allocation2 + $0x370] sm:$0xff] %v6864_v0  ;;  %458 = vst [vmem:[#allocation2 + $0x308] sm:$0xff] %v6864_v0 }
  0x3d   :  { %459 = vst [vmem:[#allocation2 + $0x310] sm:$0xff] %v6864_v0  ;;  %460 = vst [vmem:[#allocation2 + $0x4c0] sm:$0xff] %v6864_v0 }
  0x3e   :  { %461 = vst [vmem:[#allocation2 + $0x2a0] sm:$0xff] %v6864_v0  ;;  %462 = vst [vmem:[#allocation2 + $0xe8] sm:$0xff] %v6864_v0 }
  0x3f   :  { %463 = vst [vmem:[#allocation2 + $0x100] sm:$0xff] %v6864_v0  ;;  %464 = vst [vmem:[#allocation2 + $0x380] sm:$0xff] %v6864_v0 }
  0x40   :  { %465 = vst [vmem:[#allocation2 + $0x2e8] sm:$0xff] %v6864_v0  ;;  %466 = vst [vmem:[#allocation2 + $0x6b8] sm:$0xff] %v6864_v0 }
  0x41   :  { %467 = vst [vmem:[#allocation2 + $0x120] sm:$0xff] %v6864_v0  ;;  %468 = vst [vmem:[#allocation2 + $0x8] sm:$0xff] %v6864_v0 }
  0x42   :  { %469 = vst [vmem:[#allocation2 + $0x4b8] sm:$0xff] %v6864_v0  ;;  %470 = vst [vmem:[#allocation2 + $0x298] sm:$0xff] %v6864_v0 }
  0x43   :  { %471 = vst [vmem:[#allocation2 + $0x448] sm:$0xff] %v6864_v0  ;;  %472 = vst [vmem:[#allocation2 + $0x560] sm:$0xff] %v6864_v0 }
  0x44   :  { %473 = vst [vmem:[#allocation2 + $0x6c8] sm:$0xff] %v6864_v0  ;;  %474 = vst [vmem:[#allocation2 + $0x50] sm:$0xff] %v6864_v0 }
  0x45   :  { %475 = vst [vmem:[#allocation2 + $0x6a8] sm:$0xff] %v6864_v0  ;;  %476 = vst [vmem:[#allocation2 + $0x4c8] sm:$0xff] %v6864_v0 }
  0x46   :  { %477 = vst [vmem:[#allocation2 + $0x360] sm:$0xff] %v6864_v0  ;;  %478 = vst [vmem:[#allocation2 + $0xa8] sm:$0xff] %v6864_v0 }
  0x47   :  { %479 = vst [vmem:[#allocation2 + $0x690] sm:$0xff] %v6864_v0  ;;  %480 = vst [vmem:[#allocation2 + $0x658] sm:$0xff] %v6864_v0 }
  0x48   :  { %481 = vst [vmem:[#allocation2 + $0x238] sm:$0xff] %v6864_v0  ;;  %482 = vst [vmem:[#allocation2 + $0x620] sm:$0xff] %v6864_v0 }
  0x49   :  { %483 = vst [vmem:[#allocation2 + $0x110] sm:$0xff] %v6864_v0  ;;  %484 = vst [vmem:[#allocation2 + $0x520] sm:$0xff] %v6864_v0 }
  0x4a   :  { %485 = vst [vmem:[#allocation2 + $0x278] sm:$0xff] %v6864_v0  ;;  %486 = vst [vmem:[#allocation2] sm:$0xff] %v6864_v0 }
  0x4b   :  { %487 = vst [vmem:[#allocation2 + $0x2f0] sm:$0xff] %v6864_v0  ;;  %488 = vst [vmem:[#allocation2 + $0x5c8] sm:$0xff] %v6864_v0 }
  0x4c   :  { %489 = vst [vmem:[#allocation2 + $0x498] sm:$0xff] %v6864_v0  ;;  %490 = vst [vmem:[#allocation2 + $0x48] sm:$0xff] %v6864_v0 }
  0x4d   :  { %491 = vst [vmem:[#allocation2 + $0x570] sm:$0xff] %v6864_v0  ;;  %492 = vst [vmem:[#allocation2 + $0x1d8] sm:$0xff] %v6864_v0 }
  0x4e   :  { %493 = vst [vmem:[#allocation2 + $0x5e0] sm:$0xff] %v6864_v0  ;;  %494 = vst [vmem:[#allocation2 + $0x6e0] sm:$0xff] %v6864_v0 }
  0x4f   :  { %495 = vst [vmem:[#allocation2 + $0x78] sm:$0xff] %v6864_v0  ;;  %496 = vst [vmem:[#allocation2 + $0x580] sm:$0xff] %v6864_v0 }
  0x50   :  { %497 = vst [vmem:[#allocation2 + $0x668] sm:$0xff] %v6864_v0  ;;  %498 = vst [vmem:[#allocation2 + $0xf0] sm:$0xff] %v6864_v0 }
  0x51   :  { %499 = vst [vmem:[#allocation2 + $0x150] sm:$0xff] %v6864_v0  ;;  %500 = vst [vmem:[#allocation2 + $0x170] sm:$0xff] %v6864_v0 }
  0x52   :  { %501 = vst [vmem:[#allocation2 + $0x1a8] sm:$0xff] %v6864_v0  ;;  %502 = vst [vmem:[#allocation2 + $0xd8] sm:$0xff] %v6864_v0 }
  0x53   :  { %503 = vst [vmem:[#allocation2 + $0x280] sm:$0xff] %v6864_v0  ;;  %504 = vst [vmem:[#allocation2 + $0x430] sm:$0xff] %v6864_v0 }
  0x54   :  { %505 = vst [vmem:[#allocation2 + $0x398] sm:$0xff] %v6864_v0  ;;  %506 = vst [vmem:[#allocation2 + $0x240] sm:$0xff] %v6864_v0 }
  0x55   :  { %507 = vst [vmem:[#allocation2 + $0x540] sm:$0xff] %v6864_v0  ;;  %508 = vst [vmem:[#allocation2 + $0x698] sm:$0xff] %v6864_v0 }
  0x56   :  { %509 = vst [vmem:[#allocation2 + $0x458] sm:$0xff] %v6864_v0  ;;  %510 = vst [vmem:[#allocation2 + $0x590] sm:$0xff] %v6864_v0 }
  0x57   :  { %511 = vst [vmem:[#allocation2 + $0x30] sm:$0xff] %v6864_v0  ;;  %512 = vst [vmem:[#allocation2 + $0x608] sm:$0xff] %v6864_v0 }
  0x58   :  { %513 = vst [vmem:[#allocation2 + $0x10] sm:$0xff] %v6864_v0  ;;  %514 = vst [vmem:[#allocation2 + $0x4a8] sm:$0xff] %v6864_v0 }
  0x59   :  { %515 = vst [vmem:[#allocation2 + $0x160] sm:$0xff] %v6864_v0  ;;  %516 = vst [vmem:[#allocation2 + $0x300] sm:$0xff] %v6864_v0 }
  0x5a   :  { %517 = vst [vmem:[#allocation2 + $0x290] sm:$0xff] %v6864_v0  ;;  %518 = vst [vmem:[#allocation2 + $0x98] sm:$0xff] %v6864_v0 }
  0x5b   :  { %519 = vst [vmem:[#allocation2 + $0x518] sm:$0xff] %v6864_v0  ;;  %520 = vst [vmem:[#allocation2 + $0x1c0] sm:$0xff] %v6864_v0 }
  0x5c   :  { %521 = vst [vmem:[#allocation2 + $0x468] sm:$0xff] %v6864_v0  ;;  %522 = vst [vmem:[#allocation2 + $0x40] sm:$0xff] %v6864_v0 }
  0x5d   :  { %523 = vst [vmem:[#allocation2 + $0x248] sm:$0xff] %v6864_v0  ;;  %524 = vst [vmem:[#allocation2 + $0x400] sm:$0xff] %v6864_v0 }
  0x5e   :  { %525 = vst [vmem:[#allocation2 + $0x2f8] sm:$0xff] %v6864_v0  ;;  %526 = vst [vmem:[#allocation2 + $0x3e8] sm:$0xff] %v6864_v0 }
  0x5f   :  { %527 = vst [vmem:[#allocation2 + $0x168] sm:$0xff] %v6864_v0  ;;  %528 = vst [vmem:[#allocation2 + $0x530] sm:$0xff] %v6864_v0 }
  0x60   :  { %529 = vst [vmem:[#allocation2 + $0x38] sm:$0xff] %v6864_v0  ;;  %530 = vst [vmem:[#allocation2 + $0x1d0] sm:$0xff] %v6864_v0 }
  0x61   :  { %531 = vst [vmem:[#allocation2 + $0x638] sm:$0xff] %v6864_v0  ;;  %532 = vst [vmem:[#allocation2 + $0x578] sm:$0xff] %v6864_v0 }
  0x62   :  { %533 = vst [vmem:[#allocation2 + $0x140] sm:$0xff] %v6864_v0  ;;  %534 = vst [vmem:[#allocation2 + $0x3a8] sm:$0xff] %v6864_v0 }
  0x63   :  { %535 = vst [vmem:[#allocation2 + $0x508] sm:$0xff] %v6864_v0  ;;  %536 = vst [vmem:[#allocation2 + $0x480] sm:$0xff] %v6864_v0 }
  0x64   :  { %537 = vst [vmem:[#allocation2 + $0x2c8] sm:$0xff] %v6864_v0  ;;  %538 = vst [vmem:[#allocation2 + $0x218] sm:$0xff] %v6864_v0 }
  0x65   :  { %539 = vst [vmem:[#allocation2 + $0xc0] sm:$0xff] %v6864_v0  ;;  %540 = vst [vmem:[#allocation2 + $0x138] sm:$0xff] %v6864_v0 }
  0x66   :  { %541 = vst [vmem:[#allocation2 + $0x70] sm:$0xff] %v6864_v0  ;;  %542 = vst [vmem:[#allocation2 + $0x6c0] sm:$0xff] %v6864_v0 }
  0x67   :  { %543 = vst [vmem:[#allocation2 + $0xc8] sm:$0xff] %v6864_v0  ;;  %544 = vst [vmem:[#allocation2 + $0x1c8] sm:$0xff] %v6864_v0 }
  0x68   :  { %545 = vst [vmem:[#allocation2 + $0x4d0] sm:$0xff] %v6864_v0  ;;  %546 = vst [vmem:[#allocation2 + $0x2a8] sm:$0xff] %v6864_v0 }
  0x69   :  { %547 = vst [vmem:[#allocation2 + $0x470] sm:$0xff] %v6864_v0  ;;  %548 = vst [vmem:[#allocation2 + $0x2d0] sm:$0xff] %v6864_v0 }
  0x6a   :  { %549 = vst [vmem:[#allocation2 + $0x330] sm:$0xff] %v6864_v0  ;;  %550 = vst [vmem:[#allocation2 + $0x5b8] sm:$0xff] %v6864_v0 }
  0x6b   :  { %551 = vst [vmem:[#allocation2 + $0x198] sm:$0xff] %v6864_v0  ;;  %552 = vst [vmem:[#allocation2 + $0x258] sm:$0xff] %v6864_v0 }
  0x6c   :  { %553 = vst [vmem:[#allocation2 + $0x558] sm:$0xff] %v6864_v0  ;;  %554 = vst [vmem:[#allocation2 + $0x600] sm:$0xff] %v6864_v0 }
  0x6d   :  { %555 = vst [vmem:[#allocation2 + $0x618] sm:$0xff] %v6864_v0  ;;  %556 = vst [vmem:[#allocation2 + $0x628] sm:$0xff] %v6864_v0 }
  0x6e   :  { %557 = vst [vmem:[#allocation2 + $0x2e0] sm:$0xff] %v6864_v0  ;;  %558 = vst [vmem:[#allocation2 + $0x210] sm:$0xff] %v6864_v0 }
  0x6f   :  { %559 = vst [vmem:[#allocation2 + $0x3e0] sm:$0xff] %v6864_v0  ;;  %560 = vst [vmem:[#allocation2 + $0x6e8] sm:$0xff] %v6864_v0 }
  0x70   :  { %561 = vst [vmem:[#allocation2 + $0x1f0] sm:$0xff] %v6864_v0  ;;  %562 = vst [vmem:[#allocation2 + $0x460] sm:$0xff] %v6864_v0  ;;  %v7227_v0 = vcvt.s32.f32 %v264_v33  ;;  %v1995_v33 = vld [vmem:[#allocation2 + $0x610] sm:$0x3] }
  0x71   :  { %8884 = vst [vmem:[#allocation3_spill] sm:$0xff] %v7144_v7  ;;  %8885 = vst [vmem:[#allocation4_spill] sm:$0xff] %v7156_v18 }
  0x72   :  { %8886 = vst [vmem:[#allocation5_spill] sm:$0xff] %v7160_v20  ;;  %8887 = vst [vmem:[#allocation6_spill] sm:$0xff] %v7164_v22  ;;  %v7236_v11 = vmul.f32 %v7227_v0, %v7217_v60  ;;  %v2116_v20 = vld [vmem:[#allocation2 + $0x688] sm:$0x3] }
  0x73   :  { %8888 = vst [vmem:[#allocation7_spill] sm:$0xff] %v7166_v23  ;;  %8889 = vst [vmem:[#allocation8_spill] sm:$0xff] %v7168_v24 }
  0x74   :  { %8890 = vst [vmem:[#allocation9_spill] sm:$0xff] %v7170_v25  ;;  %8891 = vst [vmem:[#allocation10_spill] sm:$0xff] %v7196_v39  ;;  %v2057_v29 = vadd.f32 %v1993_v2, %v7236_v11  ;;  %v2020_v32 = vcombine.high %v7236_v11, %v7236_v11  ;;  %v2060_v2 = vadd.f32 %v2021_v52, %v1996_v46  ;;  %v7322_v52 = vcvt.s32.f32 %v271_v41  ;;  %v2008_v41 = vld [vmem:[#allocation2 + $0x68] sm:$0x3] }
  0x75   :  { %8892 = vst [vmem:[#allocation11_spill] sm:$0xff] %v7198_v40  ;;  %2079 = vst [vmem:[#allocation2 + $0x5f8] sm:$0x3] %v2047_v42  ;;  %v1999_v42 = vld [vmem:[#allocation2 + $0x5e8] sm:$0x3] }
  0x76   :  { %2081 = vst [vmem:[#allocation2 + $0x4e8] sm:$0x3] %v2049_v43  ;;  %8893 = vst [vmem:[#allocation12_spill] sm:$0xff] %v7217_v60  ;;  %v268_v43 = vunpack.c.1.s8 %v7222_v61  ;;  %v2058_v45 = vadd.f32 %v2020_v32, %v1994_v14  ;;  %v2003_v14 = vld [vmem:[#allocation2 + $0x2d8] sm:$0x3] }
  0x77   :  { %2080 = vst [vmem:[#allocation2 + $0x4a0] sm:$0x3] %v2048_v49  ;;  %2082 = vst [vmem:[#allocation2 + $0x3d8] sm:$0x3] %v2050_v50  ;;  %v7269_v49 = vcvt.s32.f32 %v232_v36  ;;  %v269_v50 = vunpack.c.2.s8 %v7222_v61  ;;  %v7308_v36 = vcvt.s32.f32 %v234_v9 }
  0x78   :  { %2083 = vst [vmem:[#allocation2 + $0x680] sm:$0x3] %v2051_v51  ;;  %8894 = vst [vmem:[#allocation13_spill] sm:$0xff] %v7227_v0  ;;  %v2059_v51 = vadd.f32 %v1995_v33, %v7257_v37  ;;  %v2002_v33 = vld [vmem:[#allocation2 + $0x4b0] sm:$0x3] }
  0x79   :  { %2084 = vst [vmem:[#allocation2 + $0x3d0] sm:$0x3] %v2052_v56  ;;  %2085 = vst [vmem:[#allocation2 + $0x80] sm:$0x3] %v2053_v57  ;;  %v2000_v56 = vld [vmem:[#allocation2 + $0xb0] sm:$0x3]  ;;  %v7295_v8 = vcvt.s32.f32 %v269_v50 }
  0x7a   :  { %2086 = vst [vmem:[#allocation2 + $0x6a0] sm:$0x3] %v2054_v58  ;;  %2087 = vst [vmem:[#allocation2 + $0x90] sm:$0x3] %v2055_v62  ;;  %v7281_v57 = vld [vmem:[%s8799_s3 + $0x18] sm:$0xff]  ;;  %v2063_v58 = vadd.f32 %v1999_v42, %v7267_v48  ;;  %v7286_v62 = vcvt.s32.f32 %v268_v43 }
  0x7b   :  { %8895 = vst [vmem:[#allocation14_spill] sm:$0xff] %v7236_v11  ;;  %8896 = vst [vmem:[#allocation15_spill] sm:$0xff] %v7238_v12  ;;  %v235_v32 = vunpack.c.0.s8 %v7281_v57  ;;  %v7306_v34 = vmul.f32 %v7295_v8, %v7288_v63  ;;  %v236_v42 = vunpack.c.1.s8 %v7281_v57  ;;  %v2239_v12 = vld [vmem:[#allocation2 + $0x230] sm:$0x3] }
  0x7c   :  { %8897 = vst [vmem:[#allocation16_spill] sm:$0xff] %v7241_v15  ;;  %8898 = vst [vmem:[#allocation17_spill] sm:$0xff] %v7243_v28  ;;  %v7300_v13 = vmul.f32 %v7286_v62, %v7269_v49  ;;  %v2010_v28 = vld [vmem:[#allocation2 + $0x640] sm:$0x3] }
  0x7d   :  { %8899 = vst [vmem:[#allocation18_spill] sm:$0xff] %v7245_v16  ;;  %8900 = vst [vmem:[#allocation19_spill] sm:$0xff] %v7247_v17  ;;  %v7317_v46 = vcvt.s32.f32 %v235_v32  ;;  %v2067_v47 = vadd.f32 %v2003_v14, %v7306_v34  ;;  %v2025_v50 = vcombine.high %v7306_v34, %v7306_v34  ;;  %v238_v14 = vunpack.c.3.s8 %v7281_v57 }
  0x7e   :  { %2088 = vst [vmem:[#allocation2 + $0x5c0] sm:$0x3] %v2056_v10  ;;  %8901 = vst [vmem:[#allocation20_spill] sm:$0xff] %v7252_v35  ;;  %v2064_v10 = vadd.f32 %v2023_v59, %v2000_v56  ;;  %v2065_v43 = vadd.f32 %v2001_v6, %v7300_v13  ;;  %v272_v59 = vunpack.c.1.s8 %v7293_v1  ;;  %v2006_v6 = vld [vmem:[#allocation2 + $0x4e0] sm:$0x3] }
  0x7f   :  { %8902 = vst [vmem:[#allocation21_spill] sm:$0xff] %v7261_v38  ;;  %2089 = vst [vmem:[#allocation2 + $0x5d0] sm:$0x3] %v2057_v29  ;;  %v270_v29 = vunpack.c.3.s8 %v7222_v61  ;;  %v2024_v61 = vcombine.high %v7300_v13, %v7300_v13  ;;  %v7334_v9 = vmul.f32 %v7322_v52, %v7317_v46 }
  0x80   :  { %8903 = vst [vmem:[#allocation22_spill] sm:$0xff] %v7269_v49  ;;  %2090 = vst [vmem:[#allocation2 + $0x4f0] sm:$0x3] %v2058_v45 }
  0x81   :  { %8904 = vst [vmem:[#allocation23_spill] sm:$0xff] %v7286_v62  ;;  %8905 = vst [vmem:[#allocation24_spill] sm:$0xff] %v7288_v63  ;;  %v7315_v45 = vcvt.s32.f32 %v270_v29  ;;  %v2066_v55 = vadd.f32 %v2024_v61, %v2002_v33  ;;  %v2111_v29 = vld [vmem:[#allocation2 + $0x6b0] sm:$0x3] }
  0x82   :  { %2091 = vst [vmem:[#allocation2 + $0x610] sm:$0x3] %v2059_v51  ;;  %2093 = vst [vmem:[#allocation2 + $0x58] sm:$0x3] %v2061_v53  ;;  %v2005_v51 = vld [vmem:[#allocation2 + $0x408] sm:$0x3]  ;;  %v7324_v53 = vcvt.s32.f32 %v236_v42  ;;  %v7341_v42 = vcvt.s32.f32 %v272_v59 }
  0x83   :  { %8906 = vst [vmem:[#allocation25_spill] sm:$0xff] %v7295_v8  ;;  %2095 = vst [vmem:[#allocation2 + $0x5e8] sm:$0x3] %v2063_v58  ;;  %v7328_v56 = vmul.f32 %v7315_v45, %v7308_v36  ;;  %v2007_v58 = vld [vmem:[#allocation2 + $0x358] sm:$0x3] }
  0x84   :  { %8907 = vst [vmem:[#allocation26_spill] sm:$0xff] %v7300_v13  ;;  %2092 = vst [vmem:[#allocation2 + $0x220] sm:$0x3] %v2060_v2  ;;  %v237_v2 = vunpack.c.2.s8 %v7281_v57  ;;  %v2113_v61 = vld [vmem:[#allocation2 + $0x5b0] sm:$0x3]  ;;  %v7354_v59 = vmul.f32 %v7341_v42, %v7324_v53 }
  0x85   :  { %2094 = vst [vmem:[#allocation2 + $0x3f0] sm:$0x3] %v2062_v3  ;;  %8908 = vst [vmem:[#allocation27_spill] sm:$0xff] %v7308_v36  ;;  %v2068_v3 = vadd.f32 %v2025_v50, %v2004_v44  ;;  %v2069_v32 = vadd.f32 %v2005_v51, %v7328_v56  ;;  %v2026_v33 = vcombine.high %v7328_v56, %v7328_v56  ;;  %v2009_v57 = vld [vmem:[#allocation2 + $0x188] sm:$0x3] }
  0x86   :  { %2096 = vst [vmem:[#allocation2 + $0xb0] sm:$0x3] %v2064_v10  ;;  %8909 = vst [vmem:[#allocation28_spill] sm:$0xff] %v7315_v45  ;;  %v273_v10 = vunpack.c.2.s8 %v7293_v1  ;;  %v2071_v44 = vadd.f32 %v2007_v58, %v7334_v9  ;;  %v2112_v58 = vld [vmem:[#allocation2 + $0x2b8] sm:$0x3]  ;;  %v2073_v1 = vadd.f32 %v2009_v57, %v7354_v59 }
  0x87   :  { %8910 = vst [vmem:[#allocation29_spill] sm:$0xff] %v7317_v46  ;;  %8911 = vst [vmem:[#allocation30_spill] sm:$0xff] %v7322_v52  ;;  %v2070_v51 = vadd.f32 %v2026_v33, %v2006_v6  ;;  %v2115_v36 = vld [vmem:[#allocation2 + $0x550] sm:$0x3]  ;;  %v2143_v6 = vcombine.high %v7158_v19, %v7158_v19  ;;  %v2012_v33 = vld [vmem:[#allocation2 + $0x5d8] sm:$0x3] }
  0x88   :  { %8912 = vst [vmem:[#allocation31_spill] sm:$0xff] %v7324_v53  ;;  %2097 = vst [vmem:[#allocation2 + $0x368] sm:$0x3] %v2065_v43  ;;  %v7343_v43 = vcvt.s32.f32 %v237_v2  ;;  %v7348_v50 = vcvt.s32.f32 %v273_v10  ;;  %v2011_v2 = vld [vmem:[#allocation2 + $0x528] sm:$0x3]  ;;  %v2179_v24 = vadd.f32 %v2115_v36, %v7166_v23 }
  0x89   :  { %8913 = vst [vmem:[#allocation32_spill] sm:$0xff] %v7328_v56  ;;  %2099 = vst [vmem:[#allocation2 + $0x2d8] sm:$0x3] %v2067_v47  ;;  %v2027_v47 = vcombine.high %v7334_v9, %v7334_v9  ;;  %v2119_v53 = vld [vmem:[#allocation2 + $0x648] sm:$0x3]  ;;  %v2176_v57 = vadd.f32 %v2143_v6, %v2112_v58 }
  0x8a   :  { %2098 = vst [vmem:[#allocation2 + $0x4b0] sm:$0x3] %v2066_v55  ;;  %8914 = vst [vmem:[#allocation33_spill] sm:$0xff] %v7341_v42  ;;  %v7350_v55 = vcvt.s32.f32 %v238_v14  ;;  %v7360_v10 = vmul.f32 %v7348_v50, %v7343_v43  ;;  %v2177_v14 = vadd.f32 %v2113_v61, %v7162_v21  ;;  %v2121_v46 = vld [vmem:[#allocation2 + $0x88] sm:$0x3]  ;;  %v2183_v6 = vadd.f32 %v2119_v53, %v7198_v40 }
  0x8b   :  { %8915 = vst [vmem:[#allocation34_spill] sm:$0xff] %v7343_v43  ;;  %2100 = vst [vmem:[#allocation2 + $0x410] sm:$0x3] %v2068_v3  ;;  %v2175_v3 = vadd.f32 %v2111_v29, %v7158_v19  ;;  %v2072_v49 = vadd.f32 %v2027_v47, %v2008_v41  ;;  %v2028_v29 = vcombine.high %v7354_v59, %v7354_v59  ;;  %v2117_v47 = vld [vmem:[#allocation2 + $0xb8] sm:$0x3] }
  0x8c   :  { %8916 = vst [vmem:[#allocation35_spill] sm:$0xff] %v7348_v50  ;;  %8917 = vst [vmem:[#allocation36_spill] sm:$0xff] %v7350_v55  ;;  %v2144_v41 = vcombine.high %v7162_v21, %v7162_v21  ;;  %v2075_v60 = vadd.f32 %v2011_v2, %v7360_v10  ;;  %v2029_v61 = vcombine.high %v7360_v10, %v7360_v10  ;;  %v2118_v2 = vld [vmem:[#allocation2 + $0x128] sm:$0x3]  ;;  %v2123_v63 = vld [vmem:[#allocation2 + $0x630] sm:$0x3] }
  0x8d   :  { %2101 = vst [vmem:[#allocation2 + $0x408] sm:$0x3] %v2069_v32  ;;  %8918 = vst [vmem:[#allocation37_spill] sm:$0xff] %v7354_v59  ;;  %v2114_v32 = vld [vmem:[#allocation2 + $0x6f0] sm:$0x3]  ;;  %v2181_v36 = vadd.f32 %v2117_v47, %v7170_v25  ;;  %v2185_v53 = vadd.f32 %v2121_v46, %v7227_v0 }
  0x8e   :  { %2103 = vst [vmem:[#allocation2 + $0x358] sm:$0x3] %v2071_v44  ;;  %2102 = vst [vmem:[#allocation2 + $0x4e0] sm:$0x3] %v2070_v51  ;;  %v7368_v44 = vcvt.s32.f32 %v274_v5  ;;  %v2013_v51 = vld [vmem:[#allocation2 + $0x650] sm:$0x3]  ;;  %v2074_v5 = vadd.f32 %v2028_v29, %v2010_v28  ;;  %v2178_v43 = vadd.f32 %v2144_v41, %v2114_v32  ;;  %v2076_v17 = vadd.f32 %v2029_v61, %v2012_v33 }
  0x8f   :  { %2207 = vst [vmem:[#allocation2 + $0x6b0] sm:$0x3] %v2175_v3  ;;  %2104 = vst [vmem:[#allocation2 + $0x68] sm:$0x3] %v2072_v49  ;;  %v2145_v49 = vcombine.high %v7166_v23, %v7166_v23  ;;  %v2014_v58 = vld [vmem:[#allocation2 + $0x340] sm:$0x3]  ;;  %v2146_v28 = vcombine.high %v7170_v25, %v7170_v25  ;;  %v2148_v61 = vcombine.high %v7227_v0, %v7227_v0 }
  0x90   :  { %8919 = vst [vmem:[#allocation38_spill] sm:$0xff] %v7368_v44  ;;  %2209 = vst [vmem:[#allocation2 + $0x5b0] sm:$0x3] %v2177_v14  ;;  %v7378_v3 = vmul.f32 %v7368_v44, %v7350_v55  ;;  %v2120_v14 = vld [vmem:[#allocation2 + $0x190] sm:$0x3] }
  0x91   :  { %2105 = vst [vmem:[#allocation2 + $0x188] sm:$0x3] %v2073_v1  ;;  %2107 = vst [vmem:[#allocation2 + $0x528] sm:$0x3] %v2075_v60  ;;  %v2125_v32 = vld [vmem:[#allocation2 + $0x1e8] sm:$0x3]  ;;  %v2180_v60 = vadd.f32 %v2145_v49, %v2116_v20  ;;  %v2182_v47 = vadd.f32 %v2146_v28, %v2118_v2 }
  0x92   :  { %8920 = vst [vmem:[#allocation39_spill] sm:$0xff] %v7378_v3  ;;  %2208 = vst [vmem:[#allocation2 + $0x2b8] sm:$0x3] %v2176_v57  ;;  %v2077_v1 = vadd.f32 %v2013_v51, %v7378_v3  ;;  %v2030_v29 = vcombine.high %v7378_v3, %v7378_v3  ;;  %v2122_v33 = vld [vmem:[#allocation2 + $0x148] sm:$0x3]  ;;  %v2187_v51 = vadd.f32 %v2123_v63, %v7241_v15 }
  0x93   :  { %2211 = vst [vmem:[#allocation2 + $0x550] sm:$0x3] %v2179_v24  ;;  %2106 = vst [vmem:[#allocation2 + $0x640] sm:$0x3] %v2074_v5  ;;  %v2147_v24 = vcombine.high %v7198_v40, %v7198_v40  ;;  %v2127_v41 = vld [vmem:[#allocation2 + $0x338] sm:$0x3]  ;;  %v2189_v2 = vadd.f32 %v2125_v32, %v7245_v16  ;;  %v2150_v63 = vcombine.high %v7245_v16, %v7245_v16 }
  0x94   :  { %2210 = vst [vmem:[#allocation2 + $0x6f0] sm:$0x3] %v2178_v43  ;;  %2108 = vst [vmem:[#allocation2 + $0x5d8] sm:$0x3] %v2076_v17  ;;  %v2124_v57 = vld [vmem:[#allocation2 + $0x130] sm:$0x3]  ;;  %v2078_v20 = vadd.f32 %v2030_v29, %v2014_v58  ;;  %v2149_v17 = vcombine.high %v7241_v15, %v7241_v15  ;;  %v2151_v58 = vcombine.high %v7252_v35, %v7252_v35 }
  0x95   :  { %2213 = vst [vmem:[#allocation2 + $0xb8] sm:$0x3] %v2181_v36  ;;  %2215 = vst [vmem:[#allocation2 + $0x648] sm:$0x3] %v2183_v6  ;;  %v2129_v5 = vld [vmem:[#allocation2 + $0x428] sm:$0x3]  ;;  %v2184_v49 = vadd.f32 %v2147_v24, %v2120_v14  ;;  %v2186_v6 = vadd.f32 %v2148_v61, %v2122_v33  ;;  %v2152_v24 = vcombine.high %v7286_v62, %v7286_v62 }
  0x96   :  { %v2131_v43 = vld [vmem:[#allocation2 + $0x350] sm:$0x3]  ;;  %2109 = vst [vmem:[#allocation2 + $0x650] sm:$0x3] %v2077_v1  ;;  %2212 = vst [vmem:[#allocation2 + $0x688] sm:$0x3] %v2180_v60  ;;  %v2191_v1 = vadd.f32 %v2127_v41, %v7252_v35  ;;  %v2188_v32 = vadd.f32 %v2149_v17, %v2124_v57  ;;  %v2193_v60 = vadd.f32 %v2129_v5, %v7286_v62 }
  0x97   :  { %v2126_v36 = vld [vmem:[#allocation2 + $0x1f8] sm:$0x3]  ;;  %v2128_v28 = vld [vmem:[#allocation2 + $0x228] sm:$0x3]  ;;  %v2133_v46 = vld [vmem:[#allocation2 + $0x20] sm:$0x3]  ;;  %v2195_v33 = vadd.f32 %v2131_v43, %v7295_v8  ;;  %v2154_v43 = vcombine.high %v7315_v45, %v7315_v45 }
  0x98   :  { %2214 = vst [vmem:[#allocation2 + $0x128] sm:$0x3] %v2182_v47  ;;  %2217 = vst [vmem:[#allocation2 + $0x88] sm:$0x3] %v2185_v53  ;;  %v2130_v14 = vld [vmem:[#allocation2 + $0x270] sm:$0x3]  ;;  %v2190_v41 = vadd.f32 %v2150_v63, %v2126_v36  ;;  %v2197_v57 = vadd.f32 %v2133_v46, %v7315_v45  ;;  %v2155_v36 = vcombine.high %v7322_v52, %v7322_v52 }
  0x99   :  { %2219 = vst [vmem:[#allocation2 + $0x630] sm:$0x3] %v2187_v51  ;;  %v2135_v29 = vld [vmem:[#allocation2 + $0xd0] sm:$0x3]  ;;  %2110 = vst [vmem:[#allocation2 + $0x340] sm:$0x3] %v2078_v20  ;;  %v2192_v51 = vadd.f32 %v2151_v58, %v2128_v28  ;;  %v2153_v20 = vcombine.high %v7295_v8, %v7295_v8  ;;  %v2156_v58 = vcombine.high %v7341_v42, %v7341_v42 }
  0x9a   :  { %2216 = vst [vmem:[#allocation2 + $0x190] sm:$0x3] %v2184_v49  ;;  %2221 = vst [vmem:[#allocation2 + $0x1e8] sm:$0x3] %v2189_v2  ;;  %v2132_v47 = vld [vmem:[#allocation2 + $0xf8] sm:$0x3]  ;;  %v2194_v2 = vadd.f32 %v2152_v24, %v2130_v14  ;;  %v2157_v24 = vcombine.high %v7348_v50, %v7348_v50 }
  0x9b   :  { %v2137_v53 = vld [vmem:[#allocation2 + $0x1e0] sm:$0x3]  ;;  %v2139_v61 = vld [vmem:[#allocation2 + $0x438] sm:$0x3]  ;;  %2218 = vst [vmem:[#allocation2 + $0x148] sm:$0x3] %v2186_v6  ;;  %v2199_v6 = vadd.f32 %v2135_v29, %v7322_v52  ;;  %v2196_v63 = vadd.f32 %v2153_v20, %v2132_v47 }
  0x9c   :  { %2223 = vst [vmem:[#allocation2 + $0x338] sm:$0x3] %v2191_v1  ;;  %v2134_v49 = vld [vmem:[#allocation2 + $0x208] sm:$0x3]  ;;  %v2136_v17 = vld [vmem:[#allocation2 + $0x1b8] sm:$0x3]  ;;  %v2201_v1 = vadd.f32 %v2137_v53, %v7341_v42  ;;  %v2203_v14 = vadd.f32 %v2139_v61, %v7348_v50 }
  0x9d   :  { %v2141_v5 = vld [vmem:[#allocation2 + $0x158] sm:$0x3]  ;;  %2220 = vst [vmem:[#allocation2 + $0x130] sm:$0x3] %v2188_v32  ;;  %2225 = vst [vmem:[#allocation2 + $0x428] sm:$0x3] %v2193_v60  ;;  %v2198_v32 = vadd.f32 %v2154_v43, %v2134_v49  ;;  %v2200_v60 = vadd.f32 %v2155_v36, %v2136_v17  ;;  %v630_v17 = vunpack.c.0.s8 %v7142_v4 }
  0x9e   :  { %2227 = vst [vmem:[#allocation2 + $0x350] sm:$0x3] %v2195_v33  ;;  %v2138_v28 = vld [vmem:[#allocation2 + $0x180] sm:$0x3]  ;;  %2222 = vst [vmem:[#allocation2 + $0x1f8] sm:$0x3] %v2190_v41  ;;  %v2205_v33 = vadd.f32 %v2141_v5, %v7368_v44  ;;  %v8921_v5 = vlaneseq }
  0x9f   :  { %v299_v46 = vld [vmem:[%s8801_s6] sm:$0xff]  ;;  %2224 = vst [vmem:[#allocation2 + $0x228] sm:$0x3] %v2192_v51  ;;  %2229 = vst [vmem:[#allocation2 + $0x20] sm:$0x3] %v2197_v57  ;;  %v2202_v61 = vadd.f32 %v2156_v58, %v2138_v28  ;;  %v2158_v51 = vcombine.high %v7368_v44, %v7368_v44  ;;  %v6744_v43 = vld [vmem:[%s8802_s1 + $0x48] sm:$0xff] }
  0xa0   :  { %v2140_v29 = vld [vmem:[#allocation2 + $0x6f8] sm:$0x3]  ;;  %2226 = vst [vmem:[#allocation2 + $0x270] sm:$0x3] %v2194_v2  ;;  %2231 = vst [vmem:[#allocation2 + $0xd0] sm:$0x3] %v2199_v6  ;;  %v303_v20 = vunpack.c.0.s8 %v299_v46  ;;  %v304_v57 = vunpack.c.1.s8 %v299_v46 }
  0xa1   :  { %v2142_v41 = vld [vmem:[#allocation2 + $0x5a0] sm:$0x3]  ;;  %2228 = vst [vmem:[#allocation2 + $0xf8] sm:$0x3] %v2196_v63  ;;  %2233 = vst [vmem:[#allocation2 + $0x1e0] sm:$0x3] %v2201_v1  ;;  %v2204_v49 = vadd.f32 %v2157_v24, %v2140_v29  ;;  %v305_v29 = vunpack.c.2.s8 %v299_v46 }
  0xa2   :  { %v6743_v47 = vld [vmem:[%s8802_s1 + $0x40] sm:$0xff]  ;;  %2235 = vst [vmem:[#allocation2 + $0x438] sm:$0x3] %v2203_v14  ;;  %2230 = vst [vmem:[#allocation2 + $0x208] sm:$0x3] %v2198_v32  ;;  %v7435_v2 = vshrl.u32 %v8921_v5, 7  ;;  %v2206_v28 = vadd.f32 %v2158_v51, %v2142_v41  ;;  %v7446_v63 = vcvt.s32.f32 %v303_v20  ;;  %v7448_v4 = vcvt.s32.f32 %v304_v57 }
  0xa3   :  { %v291_v53 = vld [vmem:[%s8803_s5] sm:$0xff]  ;;  %2232 = vst [vmem:[#allocation2 + $0x1b8] sm:$0x3] %v2200_v60  ;;  %2237 = vst [vmem:[#allocation2 + $0x158] sm:$0x3] %v2205_v33  ;;  %v292_v6 = vld [vmem:[%s8803_s5 + $0x8] sm:$0xff]  ;;  %v306_v32 = vunpack.c.3.s8 %v299_v46  ;;  %v7464_v46 = vcvt.s32.f32 %v305_v29 }
  0xa4   :  { %8922 = vst [vmem:[#allocation40_spill] sm:$0xff] %v7435_v2  ;;  %v300_v36 = vld [vmem:[%s8801_s6 + $0x8] sm:$0xff]  ;;  %2234 = vst [vmem:[#allocation2 + $0x180] sm:$0x3] %v2202_v61  ;;  %v1367_v1 = vsub.f32 %v6743_v47, %v291_v53  ;;  %v7451_v58 = vsub.s32 %v630_v17, %v7435_v2  ;;  %v6745_v60 = vld [vmem:[%s8802_s1 + $0x50] sm:$0xff]  ;;  %v1368_v41 = vsub.f32 %v6744_v43, %v292_v6 }
  0xa5   :  { %2236 = vst [vmem:[#allocation2 + $0x6f8] sm:$0x3] %v2204_v49  ;;  %v293_v24 = vld [vmem:[%s8803_s5 + $0x10] sm:$0xff]  ;;  %2238 = vst [vmem:[#allocation2 + $0x5a0] sm:$0x3] %v2206_v28  ;;  %v307_v47 = vunpack.c.0.s8 %v300_v36  ;;  %v308_v53 = vunpack.c.1.s8 %v300_v36  ;;  %v7466_v20 = vcvt.s32.f32 %v306_v32  ;;  %v6746_v43 = vld [vmem:[%s8802_s1 + $0x58] sm:$0xff]  ;;  %v309_v32 = vunpack.c.2.s8 %v300_v36 }
  0xa6   :  { %v1375_v33 = vand.u32 2147483647, %v1367_v1  ;;  %v1405_v61 = vrot.slane %v7446_v63, %v7451_v58  ;;  %v1412_v51 = vrot.slane %v7448_v4, %v7451_v58  ;;  %v1376_v57 = vand.u32 2147483647, %v1368_v41  ;;  %v294_v6 = vld [vmem:[%s8803_s5 + $0x18] sm:$0xff] }
  0xa7   :  { %v7468_v49 = vcvt.s32.f32 %v307_v47  ;;  %v7470_v17 = vcvt.s32.f32 %v308_v53  ;;  %v1369_v5 = vsub.f32 %v6745_v60, %v293_v24  ;;  %v1420_v1 = vrot.slane %v7464_v46, %v7451_v58  ;;  %v7485_v60 = vld [vmem:[%s8801_s6 + $0x10] sm:$0xff]  ;;  %v2240_v42 = vld [vmem:[#allocation2 + $0x418] sm:$0x3]  ;;  %v2245_v62 = vld [vmem:[#allocation2 + $0x660] sm:$0x3] }
  0xa8   :  { %v1413_v28 = vcombine.low %v1405_v61, %v1412_v51  ;;  %v1427_v29 = vrot.slane %v7466_v20, %v7451_v58  ;;  %v310_v53 = vunpack.c.3.s8 %v300_v36  ;;  %v7491_v14 = vcvt.s32.f32 %v309_v32  ;;  %v2241_v36 = vld [vmem:[#allocation2 + $0x250] sm:$0x3]  ;;  %v2249_v15 = vld [vmem:[#allocation2 + $0x288] sm:$0x3]  ;;  %v2513_v0 = vld [vmem:[#allocation2 + $0x4b8] sm:$0x3] }
  0xa9   :  { %v1377_v24 = vand.u32 2147483647, %v1369_v5  ;;  %v1435_v41 = vrot.slane %v7468_v49, %v7451_v58  ;;  %v1442_v47 = vrot.slane %v7470_v17, %v7451_v58  ;;  %v1370_v55 = vsub.f32 %v6746_v43, %v294_v6 }
  0xaa   :  { %v1527_v61 = vmul.f32 %v1413_v28, %v1375_v33  ;;  %v1428_v51 = vcombine.low %v1420_v1, %v1427_v29  ;;  %v7493_v22 = vcvt.s32.f32 %v310_v53  ;;  %v311_v18 = vunpack.c.0.s8 %v7485_v60  ;;  %v2243_v33 = vld [vmem:[#allocation2 + $0x3b8] sm:$0x3] }
  0xab   :  { %v1443_v39 = vcombine.low %v1435_v41, %v1442_v47  ;;  %v312_v5 = vunpack.c.1.s8 %v7485_v60  ;;  %v1378_v50 = vand.u32 2147483647, %v1370_v55  ;;  %v1450_v43 = vrot.slane %v7491_v14, %v7451_v58  ;;  %v2242_v55 = vld [vmem:[#allocation2 + $0x568] sm:$0x3] }
  0xac   :  { %v2286_v7 = vrot.slane %v1527_v61, %v7451_v58  ;;  %v2279_v2 = vcombine.high %v1527_v61, %v1527_v61  ;;  %v1528_v44 = vmul.f32 %v1428_v51, %v1376_v57  ;;  %v1457_v6 = vrot.slane %v7493_v22, %v7451_v58  ;;  %v2247_v57 = vld [vmem:[#allocation2 + $0x5f0] sm:$0x3] }
  0xad   :  { %v1529_v28 = vmul.f32 %v1443_v39, %v1377_v24  ;;  %v7502_v1 = vcvt.s32.f32 %v311_v18  ;;  %v2244_v18 = vld [vmem:[#allocation2 + $0x268] sm:$0x3] }
  0xae   :  { %v2447_v29 = vadd.f32 %v2286_v7, %v2239_v12  ;;  %v2294_v32 = vcombine.high %v2286_v7, %v2286_v7  ;;  %v2293_v41 = vrot.slane %v2279_v2, %v7451_v58  ;;  %v2303_v47 = vrot.slane %v1528_v44, %v7451_v58  ;;  %v2248_v12 = vld [vmem:[#allocation2 + $0x4f8] sm:$0x3] }
  0xaf   :  { %v2296_v53 = vcombine.high %v1528_v44, %v1528_v44  ;;  %v2320_v61 = vrot.slane %v1529_v28, %v7451_v58  ;;  %v2313_v39 = vcombine.high %v1529_v28, %v1529_v28  ;;  %v1458_v24 = vcombine.low %v1450_v43, %v1457_v6  ;;  %v2246_v28 = vld [vmem:[#allocation2 + $0x28] sm:$0x3] }
  0xb0   :  { %2479 = vst [vmem:[#allocation2 + $0x230] sm:$0x3] %v2447_v29  ;;  %v2448_v51 = vadd.f32 %v2294_v32, %v2240_v42  ;;  %v2449_v52 = vadd.f32 %v2293_v41, %v2241_v36  ;;  %v2295_v45 = vcombine.high %v2293_v41, %v2293_v41  ;;  %v2451_v8 = vadd.f32 %v2303_v47, %v2243_v33  ;;  %v6747_v36 = vld [vmem:[%s8802_s1 + $0x60] sm:$0xff] }
  0xb1   :  { %v2311_v7 = vcombine.high %v2303_v47, %v2303_v47  ;;  %v2310_v2 = vrot.slane %v2296_v53, %v7451_v58  ;;  %v2455_v35 = vadd.f32 %v2320_v61, %v2247_v57  ;;  %v2328_v16 = vcombine.high %v2320_v61, %v2320_v61  ;;  %v295_v33 = vld [vmem:[%s8803_s5 + $0x20] sm:$0xff] }
  0xb2   :  { %2480 = vst [vmem:[#allocation2 + $0x418] sm:$0x3] %v2448_v51  ;;  %2481 = vst [vmem:[#allocation2 + $0x250] sm:$0x3] %v2449_v52  ;;  %v2450_v44 = vadd.f32 %v2295_v45, %v2242_v55  ;;  %v2327_v43 = vrot.slane %v2313_v39, %v7451_v58  ;;  %v1530_v42 = vmul.f32 %v1458_v24, %v1378_v50  ;;  %v7515_v6 = vcvt.s32.f32 %v312_v5  ;;  %v2251_v52 = vld [vmem:[#allocation2 + $0x420] sm:$0x3] }
  0xb3   :  { %2483 = vst [vmem:[#allocation2 + $0x3b8] sm:$0x3] %v2451_v8  ;;  %v2452_v29 = vadd.f32 %v2311_v7, %v2244_v18  ;;  %v2453_v32 = vadd.f32 %v2310_v2, %v2245_v62  ;;  %v2312_v41 = vcombine.high %v2310_v2, %v2310_v2  ;;  %2487 = vst [vmem:[#allocation2 + $0x5f0] sm:$0x3] %v2455_v35  ;;  %v2250_v8 = vld [vmem:[#allocation2 + $0x1b0] sm:$0x3] }
  0xb4   :  { %v2456_v45 = vadd.f32 %v2328_v16, %v2248_v12  ;;  %2482 = vst [vmem:[#allocation2 + $0x568] sm:$0x3] %v2450_v44  ;;  %v2457_v47 = vadd.f32 %v2327_v43, %v2249_v15  ;;  %v2329_v50 = vcombine.high %v2327_v43, %v2327_v43  ;;  %v2337_v57 = vrot.slane %v1530_v42, %v7451_v58  ;;  %v2252_v55 = vld [vmem:[#allocation2 + $0x178] sm:$0x3]  ;;  %v2253_v5 = vld [vmem:[#allocation2 + $0x390] sm:$0x3] }
  0xb5   :  { %v2330_v53 = vcombine.high %v1530_v42, %v1530_v42  ;;  %2484 = vst [vmem:[#allocation2 + $0x268] sm:$0x3] %v2452_v29  ;;  %2485 = vst [vmem:[#allocation2 + $0x660] sm:$0x3] %v2453_v32  ;;  %v2454_v61 = vadd.f32 %v2312_v41, %v2246_v28  ;;  %v1371_v39 = vsub.f32 %v6747_v36, %v295_v33  ;;  %v6748_v15 = vld [vmem:[%s8802_s1 + $0x68] sm:$0xff]  ;;  %v302_v7 = vld [vmem:[%s8801_s6 + $0x18] sm:$0xff]  ;;  %v313_v43 = vunpack.c.2.s8 %v7485_v60 }
  0xb6   :  { %2488 = vst [vmem:[#allocation2 + $0x4f8] sm:$0x3] %v2456_v45  ;;  %v1465_v62 = vrot.slane %v7502_v1, %v7451_v58  ;;  %v1472_v16 = vrot.slane %v7515_v6, %v7451_v58  ;;  %v296_v35 = vld [vmem:[%s8803_s5 + $0x28] sm:$0xff]  ;;  %2489 = vst [vmem:[#allocation2 + $0x288] sm:$0x3] %v2457_v47  ;;  %v2458_v24 = vadd.f32 %v2329_v50, %v2250_v8  ;;  %v314_v42 = vunpack.c.3.s8 %v7485_v60  ;;  %v6749_v36 = vld [vmem:[%s8802_s1 + $0x70] sm:$0xff] }
  0xb7   :  { %v2459_v51 = vadd.f32 %v2337_v57, %v2251_v52  ;;  %v2345_v18 = vcombine.high %v2337_v57, %v2337_v57  ;;  %v2344_v12 = vrot.slane %v2330_v53, %v7451_v58  ;;  %2486 = vst [vmem:[#allocation2 + $0x28] sm:$0x3] %v2454_v61  ;;  %v2254_v2 = vld [vmem:[#allocation2 + $0x488] sm:$0x3]  ;;  %v1379_v44 = vand.u32 2147483647, %v1371_v39 }
  0xb8   :  { %v1473_v28 = vcombine.low %v1465_v62, %v1472_v16  ;;  %v297_v33 = vld [vmem:[%s8803_s5 + $0x30] sm:$0xff]  ;;  %2490 = vst [vmem:[#allocation2 + $0x1b0] sm:$0x3] %v2458_v24  ;;  %v1372_v45 = vsub.f32 %v6748_v15, %v296_v35  ;;  %v7540_v52 = vcvt.s32.f32 %v313_v43  ;;  %v7542_v47 = vcvt.s32.f32 %v314_v42  ;;  %v2255_v57 = vld [vmem:[#allocation2 + $0x678] sm:$0x3] }
  0xb9   :  { %2491 = vst [vmem:[#allocation2 + $0x420] sm:$0x3] %v2459_v51  ;;  %v2460_v29 = vadd.f32 %v2345_v18, %v2252_v55  ;;  %v2461_v32 = vadd.f32 %v2344_v12, %v2253_v5  ;;  %v2346_v41 = vcombine.high %v2344_v12, %v2344_v12  ;;  %v315_v60 = vunpack.c.0.s8 %v302_v7  ;;  %v2256_v15 = vld [vmem:[#allocation2 + $0x200] sm:$0x3]  ;;  %v2257_v35 = vld [vmem:[#allocation2 + $0x5a8] sm:$0x3] }
  0xba   :  { %v1531_v8 = vmul.f32 %v1473_v28, %v1379_v44  ;;  %v1380_v53 = vand.u32 2147483647, %v1372_v45  ;;  %v316_v61 = vunpack.c.1.s8 %v302_v7  ;;  %v1373_v39 = vsub.f32 %v6749_v36, %v297_v33  ;;  %v6750_v42 = vld [vmem:[%s8802_s1 + $0x78] sm:$0xff] }
  0xbb   :  { %2492 = vst [vmem:[#allocation2 + $0x178] sm:$0x3] %v2460_v29  ;;  %2493 = vst [vmem:[#allocation2 + $0x390] sm:$0x3] %v2461_v32  ;;  %v2462_v50 = vadd.f32 %v2346_v41, %v2254_v2  ;;  %v1480_v55 = vrot.slane %v7540_v52, %v7451_v58  ;;  %v1487_v5 = vrot.slane %v7542_v47, %v7451_v58  ;;  %v7549_v24 = vcvt.s32.f32 %v315_v60  ;;  %v298_v36 = vld [vmem:[%s8803_s5 + $0x38] sm:$0xff] }
  0xbc   :  { %v2354_v62 = vrot.slane %v1531_v8, %v7451_v58  ;;  %v2347_v16 = vcombine.high %v1531_v8, %v1531_v8  ;;  %v7551_v51 = vcvt.s32.f32 %v316_v61  ;;  %v1381_v18 = vand.u32 2147483647, %v1373_v39  ;;  %v2258_v33 = vld [vmem:[#allocation2 + $0x478] sm:$0x3]  ;;  %v2511_v8 = vld [vmem:[#allocation2 + $0x120] sm:$0x3] }
  0xbd   :  { %2494 = vst [vmem:[#allocation2 + $0x488] sm:$0x3] %v2462_v50  ;;  %v317_v12 = vunpack.c.2.s8 %v302_v7  ;;  %v1488_v43 = vcombine.low %v1480_v55, %v1487_v5  ;;  %v1495_v29 = vrot.slane %v7549_v24, %v7451_v58  ;;  %v318_v41 = vunpack.c.3.s8 %v302_v7  ;;  %v2259_v39 = vld [vmem:[#allocation2 + $0x388] sm:$0x3] }
  0xbe   :  { %v2463_v2 = vadd.f32 %v2354_v62, %v2255_v57  ;;  %v2362_v44 = vcombine.high %v2354_v62, %v2354_v62  ;;  %v2361_v28 = vrot.slane %v2347_v16, %v7451_v58  ;;  %v1502_v32 = vrot.slane %v7551_v51, %v7451_v58 }
  0xbf   :  { %v7564_v45 = vcvt.s32.f32 %v317_v12  ;;  %v1532_v61 = vmul.f32 %v1488_v43, %v1380_v53  ;;  %v7566_v16 = vcvt.s32.f32 %v318_v41  ;;  %v1374_v55 = vsub.f32 %v6750_v42, %v298_v36  ;;  %v2261_v53 = vld [vmem:[#allocation2 + $0x370] sm:$0x3] }
  0xc0   :  { %2495 = vst [vmem:[#allocation2 + $0x678] sm:$0x3] %v2463_v2  ;;  %v2464_v60 = vadd.f32 %v2362_v44, %v2256_v15  ;;  %v2465_v50 = vadd.f32 %v2361_v28, %v2257_v35  ;;  %v2363_v57 = vcombine.high %v2361_v28, %v2361_v28  ;;  %v1503_v62 = vcombine.low %v1495_v29, %v1502_v32  ;;  %v2512_v35 = vld [vmem:[#allocation2 + $0x8] sm:$0x3]  ;;  %v2260_v2 = vld [vmem:[#allocation2 + $0x3f8] sm:$0x3] }
  0xc1   :  { %v1510_v5 = vrot.slane %v7564_v45, %v7451_v58  ;;  %v2371_v12 = vrot.slane %v1532_v61, %v7451_v58  ;;  %v2364_v40 = vcombine.high %v1532_v61, %v1532_v61  ;;  %v2575_v15 = vadd.f32 %v2511_v8, %v7446_v63  ;;  %v2263_v32 = vld [vmem:[#allocation2 + $0x310] sm:$0x3]  ;;  %v2262_v8 = vld [vmem:[#allocation2 + $0x308] sm:$0x3]  ;;  %v2514_v61 = vld [vmem:[#allocation2 + $0x298] sm:$0x3] }
  0xc2   :  { %2496 = vst [vmem:[#allocation2 + $0x200] sm:$0x3] %v2464_v60  ;;  %2497 = vst [vmem:[#allocation2 + $0x5a8] sm:$0x3] %v2465_v50  ;;  %v2466_v7 = vadd.f32 %v2363_v57, %v2258_v33  ;;  %v1533_v44 = vmul.f32 %v1503_v62, %v1381_v18  ;;  %v1382_v28 = vand.u32 2147483647, %v1374_v55  ;;  %v1517_v43 = vrot.slane %v7566_v16, %v7451_v58 }
  0xc3   :  { %v2543_v42 = vcombine.high %v7446_v63, %v7446_v63  ;;  %v2467_v36 = vadd.f32 %v2371_v12, %v2259_v39  ;;  %v2379_v29 = vcombine.high %v2371_v12, %v2371_v12  ;;  %v2378_v33 = vrot.slane %v2364_v40, %v7451_v58  ;;  %2607 = vst [vmem:[#allocation2 + $0x120] sm:$0x3] %v2575_v15  ;;  %v2515_v62 = vld [vmem:[#allocation2 + $0x448] sm:$0x3]  ;;  %v2264_v39 = vld [vmem:[#allocation2 + $0x4c0] sm:$0x3] }
  0xc4   :  { %2498 = vst [vmem:[#allocation2 + $0x478] sm:$0x3] %v2466_v7  ;;  %v2577_v41 = vadd.f32 %v2513_v0, %v7448_v4  ;;  %v2388_v60 = vrot.slane %v1533_v44, %v7451_v58  ;;  %v2381_v18 = vcombine.high %v1533_v44, %v1533_v44  ;;  %v1518_v50 = vcombine.low %v1510_v5, %v1517_v43  ;;  %v2265_v12 = vld [vmem:[#allocation2 + $0x2a0] sm:$0x3] }
  0xc5   :  { %v2576_v57 = vadd.f32 %v2543_v42, %v2512_v35  ;;  %2499 = vst [vmem:[#allocation2 + $0x388] sm:$0x3] %v2467_v36  ;;  %v2468_v55 = vadd.f32 %v2379_v29, %v2260_v2  ;;  %v2469_v63 = vadd.f32 %v2378_v33, %v2261_v53  ;;  %v2380_v7 = vcombine.high %v2378_v33, %v2378_v33  ;;  %v2516_v5 = vld [vmem:[#allocation2 + $0x560] sm:$0x3]  ;;  %v2517_v35 = vld [vmem:[#allocation2 + $0x6c8] sm:$0x3] }
  0xc6   :  { %2609 = vst [vmem:[#allocation2 + $0x4b8] sm:$0x3] %v2577_v41  ;;  %v2544_v40 = vcombine.high %v7448_v4, %v7448_v4  ;;  %v2471_v15 = vadd.f32 %v2388_v60, %v2263_v32  ;;  %v2396_v0 = vcombine.high %v2388_v60, %v2388_v60  ;;  %v2395_v25 = vrot.slane %v2381_v18, %v7451_v58  ;;  %v2266_v2 = vld [vmem:[#allocation2 + $0xe8] sm:$0x3]  ;;  %v2267_v53 = vld [vmem:[#allocation2 + $0x100] sm:$0x3] }
  0xc7   :  { %v1534_v23 = vmul.f32 %v1518_v50, %v1382_v28  ;;  %2608 = vst [vmem:[#allocation2 + $0x8] sm:$0x3] %v2576_v57  ;;  %2500 = vst [vmem:[#allocation2 + $0x3f8] sm:$0x3] %v2468_v55  ;;  %v2470_v44 = vadd.f32 %v2380_v7, %v2262_v8  ;;  %v2579_v42 = vadd.f32 %v2515_v62, %v7464_v46  ;;  %v2519_v4 = vld [vmem:[#allocation2 + $0x6a8] sm:$0x3] }
  0xc8   :  { %2501 = vst [vmem:[#allocation2 + $0x370] sm:$0x3] %v2469_v63  ;;  %v2578_v43 = vadd.f32 %v2544_v40, %v2514_v61  ;;  %v2545_v36 = vcombine.high %v7464_v46, %v7464_v46  ;;  %2503 = vst [vmem:[#allocation2 + $0x310] sm:$0x3] %v2471_v15  ;;  %v2472_v29 = vadd.f32 %v2396_v0, %v2264_v39  ;;  %v2518_v41 = vld [vmem:[#allocation2 + $0x50] sm:$0x3] }
  0xc9   :  { %v2473_v33 = vadd.f32 %v2395_v25, %v2265_v12  ;;  %v2397_v32 = vcombine.high %v2395_v25, %v2395_v25  ;;  %v2405_v28 = vrot.slane %v1534_v23, %v7451_v58  ;;  %v2521_v60 = vld [vmem:[#allocation2 + $0x360] sm:$0x3]  ;;  %2502 = vst [vmem:[#allocation2 + $0x308] sm:$0x3] %v2470_v44  ;;  %v2398_v8 = vcombine.high %v1534_v23, %v1534_v23  ;;  %v2523_v61 = vld [vmem:[#allocation2 + $0x690] sm:$0x3] }
  0xca   :  { %v2268_v18 = vld [vmem:[#allocation2 + $0x380] sm:$0x3]  ;;  %2610 = vst [vmem:[#allocation2 + $0x298] sm:$0x3] %v2578_v43  ;;  %2611 = vst [vmem:[#allocation2 + $0x448] sm:$0x3] %v2579_v42  ;;  %v2580_v50 = vadd.f32 %v2545_v36, %v2516_v5  ;;  %v2581_v57 = vadd.f32 %v2517_v35, %v7466_v20  ;;  %v2546_v46 = vcombine.high %v7466_v20, %v7466_v20 }
  0xcb   :  { %2504 = vst [vmem:[#allocation2 + $0x4c0] sm:$0x3] %v2472_v29  ;;  %2505 = vst [vmem:[#allocation2 + $0x2a0] sm:$0x3] %v2473_v33  ;;  %v2474_v62 = vadd.f32 %v2397_v32, %v2266_v2  ;;  %v2475_v25 = vadd.f32 %v2405_v28, %v2267_v53  ;;  %v2413_v55 = vcombine.high %v2405_v28, %v2405_v28  ;;  %v2269_v63 = vld [vmem:[#allocation2 + $0x2e8] sm:$0x3] }
  0xcc   :  { %v2583_v7 = vadd.f32 %v2519_v4, %v7468_v49  ;;  %v2520_v39 = vld [vmem:[#allocation2 + $0x4c8] sm:$0x3]  ;;  %v2525_v12 = vld [vmem:[#allocation2 + $0x238] sm:$0x3]  ;;  %v2412_v23 = vrot.slane %v2398_v8, %v7451_v58  ;;  %2612 = vst [vmem:[#allocation2 + $0x560] sm:$0x3] %v2580_v50  ;;  %v2582_v40 = vadd.f32 %v2546_v46, %v2518_v41  ;;  %v2547_v15 = vcombine.high %v7468_v49, %v7468_v49 }
  0xcd   :  { %2613 = vst [vmem:[#allocation2 + $0x6c8] sm:$0x3] %v2581_v57  ;;  %v2585_v20 = vadd.f32 %v2521_v60, %v7470_v17  ;;  %v2522_v0 = vld [vmem:[#allocation2 + $0xa8] sm:$0x3]  ;;  %v2524_v5 = vld [vmem:[#allocation2 + $0x658] sm:$0x3]  ;;  %v2476_v44 = vadd.f32 %v2413_v55, %v2268_v18  ;;  %v2548_v53 = vcombine.high %v7470_v17, %v7470_v17  ;;  %v2587_v43 = vadd.f32 %v2523_v61, %v7491_v14 }
  0xce   :  { %v2527_v35 = vld [vmem:[#allocation2 + $0x110] sm:$0x3]  ;;  %2506 = vst [vmem:[#allocation2 + $0xe8] sm:$0x3] %v2474_v62  ;;  %2507 = vst [vmem:[#allocation2 + $0x100] sm:$0x3] %v2475_v25  ;;  %v2549_v42 = vcombine.high %v7491_v14, %v7491_v14  ;;  %v2477_v49 = vadd.f32 %v2412_v23, %v2269_v63  ;;  %v2414_v4 = vcombine.high %v2412_v23, %v2412_v23 }
  0xcf   :  { %v2270_v2 = vld [vmem:[#allocation2 + $0x6b8] sm:$0x3]  ;;  %2615 = vst [vmem:[#allocation2 + $0x6a8] sm:$0x3] %v2583_v7  ;;  %2614 = vst [vmem:[#allocation2 + $0x50] sm:$0x3] %v2582_v40  ;;  %v2584_v29 = vadd.f32 %v2547_v15, %v2520_v39  ;;  %v2589_v33 = vadd.f32 %v2525_v12, %v7493_v22  ;;  %v2586_v60 = vadd.f32 %v2548_v53, %v2522_v0 }
  0xd0   :  { %v2529_v36 = vld [vmem:[#allocation2 + $0x278] sm:$0x3]  ;;  %2617 = vst [vmem:[#allocation2 + $0x360] sm:$0x3] %v2585_v20  ;;  %v2526_v32 = vld [vmem:[#allocation2 + $0x620] sm:$0x3]  ;;  %v2588_v17 = vadd.f32 %v2549_v42, %v2524_v5  ;;  %v2550_v18 = vcombine.high %v7493_v22, %v7493_v22  ;;  %v2591_v14 = vadd.f32 %v2527_v35, %v7502_v1  ;;  %v2478_v46 = vadd.f32 %v2414_v4, %v2270_v2 }
  0xd1   :  { %v2531_v28 = vld [vmem:[#allocation2 + $0x2f0] sm:$0x3]  ;;  %v2533_v41 = vld [vmem:[#allocation2 + $0x498] sm:$0x3]  ;;  %2508 = vst [vmem:[#allocation2 + $0x380] sm:$0x3] %v2476_v44  ;;  %v2551_v61 = vcombine.high %v7502_v1, %v7502_v1  ;;  %v2593_v62 = vadd.f32 %v2529_v36, %v7515_v6  ;;  %v2552_v25 = vcombine.high %v7515_v6, %v7515_v6  ;;  %v2553_v39 = vcombine.high %v7540_v52, %v7540_v52 }
  0xd2   :  { %2619 = vst [vmem:[#allocation2 + $0x690] sm:$0x3] %v2587_v43  ;;  %v2528_v8 = vld [vmem:[#allocation2 + $0x520] sm:$0x3]  ;;  %v2535_v57 = vld [vmem:[#allocation2 + $0x570] sm:$0x3]  ;;  %v2590_v22 = vadd.f32 %v2550_v18, %v2526_v32  ;;  %v2595_v7 = vadd.f32 %v2531_v28, %v7540_v52  ;;  %v2597_v12 = vadd.f32 %v2533_v41, %v7542_v47  ;;  %v2554_v20 = vcombine.high %v7542_v47, %v7542_v47 }
  0xd3   :  { %v2530_v50 = vld [vmem:[#allocation2] sm:$0x3]  ;;  %2509 = vst [vmem:[#allocation2 + $0x2e8] sm:$0x3] %v2477_v49  ;;  %2616 = vst [vmem:[#allocation2 + $0x4c8] sm:$0x3] %v2584_v29  ;;  %v2592_v15 = vadd.f32 %v2551_v61, %v2528_v8  ;;  %v2599_v0 = vadd.f32 %v2535_v57, %v7549_v24  ;;  %v2555_v52 = vcombine.high %v7549_v24, %v7549_v24 }
  0xd4   :  { %2621 = vst [vmem:[#allocation2 + $0x238] sm:$0x3] %v2589_v33  ;;  %v2532_v55 = vld [vmem:[#allocation2 + $0x5c8] sm:$0x3]  ;;  %v2537_v63 = vld [vmem:[#allocation2 + $0x5e0] sm:$0x3]  ;;  %v2594_v6 = vadd.f32 %v2552_v25, %v2530_v50  ;;  %v2556_v53 = vcombine.high %v7551_v51, %v7551_v51  ;;  %v2557_v36 = vcombine.high %v7564_v45, %v7564_v45  ;;  %v1557_v33 = vrot.slane %v7174_v26, %v7451_v58 }
  0xd5   :  { %2618 = vst [vmem:[#allocation2 + $0xa8] sm:$0x3] %v2586_v60  ;;  %2620 = vst [vmem:[#allocation2 + $0x658] sm:$0x3] %v2588_v17  ;;  %v2534_v23 = vld [vmem:[#allocation2 + $0x48] sm:$0x3]  ;;  %v2596_v44 = vadd.f32 %v2553_v39, %v2532_v55  ;;  %v2601_v2 = vadd.f32 %v2537_v63, %v7551_v51  ;;  %v2558_v51 = vcombine.high %v7566_v16, %v7566_v16 }
  0xd6   :  { %2623 = vst [vmem:[#allocation2 + $0x110] sm:$0x3] %v2591_v14  ;;  %v2539_v1 = vld [vmem:[#allocation2 + $0x78] sm:$0x3]  ;;  %v2541_v40 = vld [vmem:[#allocation2 + $0x668] sm:$0x3]  ;;  %v2598_v47 = vadd.f32 %v2554_v20, %v2534_v23  ;;  %v1572_v28 = vrot.slane %v7184_v30, %v7451_v58  ;;  %v1579_v41 = vrot.slane %v7188_v31, %v7451_v58  ;;  %v1587_v18 = vrot.slane %v7214_v54, %v7451_v58 }
  0xd7   :  { %2510 = vst [vmem:[#allocation2 + $0x6b8] sm:$0x3] %v2478_v46  ;;  %2625 = vst [vmem:[#allocation2 + $0x278] sm:$0x3] %v2593_v62  ;;  %v2536_v5 = vld [vmem:[#allocation2 + $0x1d8] sm:$0x3]  ;;  %v2603_v42 = vadd.f32 %v2539_v1, %v7564_v45  ;;  %v2605_v49 = vadd.f32 %v2541_v40, %v7566_v16  ;;  %v1564_v45 = vrot.slane %v7178_v27, %v7451_v58 }
  0xd8   :  { %v2538_v35 = vld [vmem:[#allocation2 + $0x6e0] sm:$0x3]  ;;  %2622 = vst [vmem:[#allocation2 + $0x620] sm:$0x3] %v2590_v22  ;;  %2627 = vst [vmem:[#allocation2 + $0x2f0] sm:$0x3] %v2595_v7  ;;  %v2600_v24 = vadd.f32 %v2555_v52, %v2536_v5  ;;  %v1594_v14 = vrot.slane %v7236_v11, %v7451_v58  ;;  %v1602_v8 = vrot.slane %v7257_v37, %v7451_v58 }
  0xd9   :  { %2629 = vst [vmem:[#allocation2 + $0x498] sm:$0x3] %v2597_v12  ;;  %v2540_v43 = vld [vmem:[#allocation2 + $0x580] sm:$0x3]  ;;  %2624 = vst [vmem:[#allocation2 + $0x520] sm:$0x3] %v2592_v15  ;;  %v2602_v29 = vadd.f32 %v2556_v53, %v2538_v35  ;;  %v1565_v50 = vcombine.low %v1557_v33, %v1564_v45  ;;  %v1580_v57 = vcombine.low %v1572_v28, %v1579_v41 }
  0xda   :  { %2626 = vst [vmem:[#allocation2] sm:$0x3] %v2594_v6  ;;  %2631 = vst [vmem:[#allocation2 + $0x570] sm:$0x3] %v2599_v0  ;;  %v2542_v4 = vld [vmem:[#allocation2 + $0xf0] sm:$0x3]  ;;  %v2604_v32 = vadd.f32 %v2557_v36, %v2540_v43  ;;  %v1609_v61 = vrot.slane %v7261_v38, %v7451_v58  ;;  %v1617_v62 = vrot.slane %v7267_v48, %v7451_v58 }
  0xdb   :  { %2628 = vst [vmem:[#allocation2 + $0x5c8] sm:$0x3] %v2596_v44  ;;  %2633 = vst [vmem:[#allocation2 + $0x5e0] sm:$0x3] %v2601_v2  ;;  %v2606_v60 = vadd.f32 %v2558_v51, %v2542_v4  ;;  %v7637_v16 = vld [vmem:[%s8804_s2 + $0x80] sm:$0xff]  ;;  %v7642_v17 = vld [vmem:[%s8804_s2 + $0x88] sm:$0xff]  ;;  %v1595_v25 = vcombine.low %v1587_v18, %v1594_v14  ;;  %v1624_v55 = vrot.slane %v7300_v13, %v7451_v58 }
  0xdc   :  { %2630 = vst [vmem:[#allocation2 + $0x48] sm:$0x3] %v2598_v47  ;;  %2635 = vst [vmem:[#allocation2 + $0x78] sm:$0x3] %v2603_v42  ;;  %v7653_v46 = vld [vmem:[%s8804_s2 + $0x90] sm:$0xff]  ;;  %v1632_v63 = vrot.slane %v7306_v34, %v7451_v58  ;;  %v1639_v22 = vrot.slane %v7328_v56, %v7451_v58  ;;  %v1679_v7 = vmul.f32 %v7637_v16, %v1565_v50  ;;  %v7670_v12 = vld [vmem:[%s8804_s2 + $0x98] sm:$0xff] }
  0xdd   :  { %2637 = vst [vmem:[#allocation2 + $0x668] sm:$0x3] %v2605_v49  ;;  %2632 = vst [vmem:[#allocation2 + $0x1d8] sm:$0x3] %v2600_v24  ;;  %v1680_v39 = vmul.f32 %v7642_v17, %v1580_v57  ;;  %v1610_v23 = vcombine.low %v1602_v8, %v1609_v61  ;;  %v7675_v1 = vld [vmem:[%s8804_s2 + $0xa0] sm:$0xff]  ;;  %v1647_v40 = vrot.slane %v7334_v9, %v7451_v58 }
  0xde   :  { %2634 = vst [vmem:[#allocation2 + $0x6e0] sm:$0x3] %v2602_v29  ;;  %2636 = vst [vmem:[#allocation2 + $0x580] sm:$0x3] %v2604_v32  ;;  %v2639_v15 = vld [vmem:[#allocation2 + $0x150] sm:$0x3]  ;;  %v1681_v20 = vmul.f32 %v7653_v46, %v1595_v25  ;;  %v1625_v0 = vcombine.low %v1617_v62, %v1624_v55  ;;  %v7680_v5 = vcombine.low %v1632_v63, %v1639_v22 }
  0xdf   :  { %2638 = vst [vmem:[#allocation2 + $0xf0] sm:$0x3] %v2606_v60  ;;  %v2643_v6 = vld [vmem:[#allocation2 + $0x280] sm:$0x3]  ;;  %v1654_v35 = vrot.slane %v7354_v59, %v7451_v58  ;;  %v2686_v44 = vrot.slane %v1679_v7, %v7451_v58  ;;  %v2679_v52 = vcombine.high %v1679_v7, %v1679_v7  ;;  %v2703_v2 = vrot.slane %v1680_v39, %v7451_v58  ;;  %v2640_v47 = vld [vmem:[#allocation2 + $0x170] sm:$0x3] }
  0xe0   :  { %v2696_v53 = vcombine.high %v1680_v39, %v1680_v39  ;;  %v2647_v43 = vld [vmem:[#allocation2 + $0x540] sm:$0x3]  ;;  %v2641_v42 = vld [vmem:[#allocation2 + $0x1a8] sm:$0x3]  ;;  %v2720_v36 = vrot.slane %v1681_v20, %v7451_v58  ;;  %v2713_v49 = vcombine.high %v1681_v20, %v1681_v20  ;;  %v1682_v4 = vmul.f32 %v7670_v12, %v1610_v23  ;;  %v2644_v45 = vld [vmem:[#allocation2 + $0x430] sm:$0x3] }
  0xe1   :  { %v1683_v24 = vmul.f32 %v7675_v1, %v1625_v0  ;;  %v2847_v29 = vadd.f32 %v2686_v44, %v2639_v15  ;;  %v2694_v51 = vcombine.high %v2686_v44, %v2686_v44  ;;  %v2693_v33 = vrot.slane %v2679_v52, %v7451_v58  ;;  %v2645_v28 = vld [vmem:[#allocation2 + $0x398] sm:$0x3]  ;;  %v2646_v55 = vld [vmem:[#allocation2 + $0x240] sm:$0x3]  ;;  %v2650_v15 = vld [vmem:[#allocation2 + $0x590] sm:$0x3] }
  0xe2   :  { %v2851_v32 = vadd.f32 %v2703_v2, %v2643_v6  ;;  %v2648_v41 = vld [vmem:[#allocation2 + $0x698] sm:$0x3]  ;;  %v2711_v18 = vcombine.high %v2703_v2, %v2703_v2  ;;  %v2710_v14 = vrot.slane %v2696_v53, %v7451_v58  ;;  %v2855_v8 = vadd.f32 %v2720_v36, %v2647_v43  ;;  %v2651_v6 = vld [vmem:[#allocation2 + $0x30] sm:$0x3]  ;;  %v7695_v20 = vld [vmem:[%s8804_s2 + $0xa8] sm:$0xff] }
  0xe3   :  { %v2642_v60 = vld [vmem:[#allocation2 + $0xd8] sm:$0x3]  ;;  %v2728_v50 = vcombine.high %v2720_v36, %v2720_v36  ;;  %2879 = vst [vmem:[#allocation2 + $0x150] sm:$0x3] %v2847_v29  ;;  %v2848_v61 = vadd.f32 %v2694_v51, %v2640_v47  ;;  %v2849_v62 = vadd.f32 %v2693_v33, %v2641_v42  ;;  %v2695_v25 = vcombine.high %v2693_v33, %v2693_v33  ;;  %v2655_v53 = vld [vmem:[#allocation2 + $0x160] sm:$0x3] }
  0xe4   :  { %v2649_v57 = vld [vmem:[#allocation2 + $0x458] sm:$0x3]  ;;  %2883 = vst [vmem:[#allocation2 + $0x280] sm:$0x3] %v2851_v32  ;;  %v2727_v63 = vrot.slane %v2713_v49, %v7451_v58  ;;  %v2852_v22 = vadd.f32 %v2711_v18, %v2644_v45  ;;  %v2853_v7 = vadd.f32 %v2710_v14, %v2645_v28  ;;  %v2712_v39 = vcombine.high %v2710_v14, %v2710_v14  ;;  %v2652_v47 = vld [vmem:[#allocation2 + $0x608] sm:$0x3] }
  0xe5   :  { %2887 = vst [vmem:[#allocation2 + $0x540] sm:$0x3] %v2855_v8  ;;  %v2856_v23 = vadd.f32 %v2728_v50, %v2648_v41  ;;  %2880 = vst [vmem:[#allocation2 + $0x170] sm:$0x3] %v2848_v61  ;;  %v2850_v0 = vadd.f32 %v2695_v25, %v2642_v60  ;;  %v2737_v2 = vrot.slane %v1682_v4, %v7451_v58  ;;  %v2653_v32 = vld [vmem:[#allocation2 + $0x10] sm:$0x3] }
  0xe6   :  { %2881 = vst [vmem:[#allocation2 + $0x1a8] sm:$0x3] %v2849_v62  ;;  %v2857_v44 = vadd.f32 %v2727_v63, %v2649_v57  ;;  %v2729_v52 = vcombine.high %v2727_v63, %v2727_v63  ;;  %2884 = vst [vmem:[#allocation2 + $0x430] sm:$0x3] %v2852_v22  ;;  %v2854_v43 = vadd.f32 %v2712_v39, %v2646_v55  ;;  %v2656_v45 = vld [vmem:[#allocation2 + $0x300] sm:$0x3] }
  0xe7   :  { %2885 = vst [vmem:[#allocation2 + $0x398] sm:$0x3] %v2853_v7  ;;  %2888 = vst [vmem:[#allocation2 + $0x698] sm:$0x3] %v2856_v23  ;;  %v2730_v42 = vcombine.high %v1682_v4, %v1682_v4  ;;  %v2754_v36 = vrot.slane %v1683_v24, %v7451_v58  ;;  %v2747_v49 = vcombine.high %v1683_v24, %v1683_v24  ;;  %v2657_v28 = vld [vmem:[#allocation2 + $0x290] sm:$0x3] }
  0xe8   :  { %2882 = vst [vmem:[#allocation2 + $0xd8] sm:$0x3] %v2850_v0  ;;  %2889 = vst [vmem:[#allocation2 + $0x458] sm:$0x3] %v2857_v44  ;;  %v2858_v29 = vadd.f32 %v2729_v52, %v2650_v15  ;;  %v2859_v51 = vadd.f32 %v2737_v2, %v2651_v6  ;;  %v2745_v33 = vcombine.high %v2737_v2, %v2737_v2  ;;  %v2659_v8 = vld [vmem:[#allocation2 + $0x518] sm:$0x3] }
  0xe9   :  { %v1684_v41 = vmul.f32 %v7695_v20, %v7680_v5  ;;  %2886 = vst [vmem:[#allocation2 + $0x240] sm:$0x3] %v2854_v43  ;;  %v2744_v60 = vrot.slane %v2730_v42, %v7451_v58  ;;  %v2863_v18 = vadd.f32 %v2754_v36, %v2655_v53  ;;  %v2762_v14 = vcombine.high %v2754_v36, %v2754_v36  ;;  %v2654_v50 = vld [vmem:[#allocation2 + $0x4a8] sm:$0x3]  ;;  %v7707_v62 = vld [vmem:[%s8804_s2 + $0xb0] sm:$0xff] }
  0xea   :  { %v2761_v4 = vrot.slane %v2747_v49, %v7451_v58  ;;  %2890 = vst [vmem:[#allocation2 + $0x590] sm:$0x3] %v2858_v29  ;;  %2891 = vst [vmem:[#allocation2 + $0x30] sm:$0x3] %v2859_v51  ;;  %v2860_v24 = vadd.f32 %v2745_v33, %v2652_v47  ;;  %v1655_v5 = vcombine.low %v1647_v40, %v1654_v35  ;;  %v2658_v7 = vld [vmem:[#allocation2 + $0x98] sm:$0x3] }
  0xeb   :  { %v2771_v57 = vrot.slane %v1684_v41, %v7451_v58  ;;  %v2764_v61 = vcombine.high %v1684_v41, %v1684_v41  ;;  %v2861_v25 = vadd.f32 %v2744_v60, %v2653_v32  ;;  %v2746_v55 = vcombine.high %v2744_v60, %v2744_v60  ;;  %2895 = vst [vmem:[#allocation2 + $0x160] sm:$0x3] %v2863_v18  ;;  %v2660_v39 = vld [vmem:[#allocation2 + $0x1c0] sm:$0x3]  ;;  %v2661_v23 = vld [vmem:[#allocation2 + $0x468] sm:$0x3] }
  0xec   :  { %v2864_v63 = vadd.f32 %v2762_v14, %v2656_v45  ;;  %v2865_v22 = vadd.f32 %v2761_v4, %v2657_v28  ;;  %2892 = vst [vmem:[#allocation2 + $0x608] sm:$0x3] %v2860_v24  ;;  %v2763_v15 = vcombine.high %v2761_v4, %v2761_v4  ;;  %v2662_v2 = vld [vmem:[#allocation2 + $0x40] sm:$0x3]  ;;  %v1685_v40 = vmul.f32 %v7707_v62, %v1655_v5  ;;  %v2663_v49 = vld [vmem:[#allocation2 + $0x248] sm:$0x3] }
  0xed   :  { %v2867_v6 = vadd.f32 %v2771_v57, %v2659_v8  ;;  %v2779_v0 = vcombine.high %v2771_v57, %v2771_v57  ;;  %v2778_v44 = vrot.slane %v2764_v61, %v7451_v58  ;;  %2893 = vst [vmem:[#allocation2 + $0x10] sm:$0x3] %v2861_v25  ;;  %v2862_v52 = vadd.f32 %v2746_v55, %v2654_v50  ;;  %v7724_v29 = vld [vmem:[%s8804_s2 + $0xb8] sm:$0xff]  ;;  %v2664_v41 = vld [vmem:[#allocation2 + $0x400] sm:$0x3]  ;;  %v8924_v8 = vld [vmem:[#allocation9_spill] sm:$0xff] }
  0xee   :  { %2896 = vst [vmem:[#allocation2 + $0x300] sm:$0x3] %v2864_v63  ;;  %2897 = vst [vmem:[#allocation2 + $0x290] sm:$0x3] %v2865_v22  ;;  %v1662_v35 = vrot.slane %v7360_v10, %v7451_v58  ;;  %v1669_v53 = vrot.slane %v7378_v3, %v7451_v58  ;;  %v2866_v43 = vadd.f32 %v2763_v15, %v2658_v7  ;;  %v2665_v60 = vld [vmem:[#allocation2 + $0x2f8] sm:$0x3] }
  0xef   :  { %2899 = vst [vmem:[#allocation2 + $0x518] sm:$0x3] %v2867_v6  ;;  %v2868_v47 = vadd.f32 %v2779_v0, %v2660_v39  ;;  %v2869_v42 = vadd.f32 %v2778_v44, %v2661_v23  ;;  %v2780_v36 = vcombine.high %v2778_v44, %v2778_v44  ;;  %2894 = vst [vmem:[#allocation2 + $0x4a8] sm:$0x3] %v2862_v52  ;;  %v8923_v14 = vld [vmem:[#allocation7_spill] sm:$0xff]  ;;  %v8926_v23 = vld [vmem:[#allocation13_spill] sm:$0xff] }
  0xf0   :  { %v2788_v51 = vrot.slane %v1685_v40, %v7451_v58  ;;  %v2781_v33 = vcombine.high %v1685_v40, %v1685_v40  ;;  %v1670_v32 = vcombine.low %v1662_v35, %v1669_v53  ;;  %v1709_v45 = vrot.slane %v7158_v19, %v7451_v58  ;;  %2898 = vst [vmem:[#allocation2 + $0x98] sm:$0x3] %v2866_v43  ;;  %v2666_v25 = vld [vmem:[#allocation2 + $0x3e8] sm:$0x3]  ;;  %v8925_v7 = vld [vmem:[#allocation11_spill] sm:$0xff] }
  0xf1   :  { %2900 = vst [vmem:[#allocation2 + $0x1c0] sm:$0x3] %v2868_v47  ;;  %2901 = vst [vmem:[#allocation2 + $0x468] sm:$0x3] %v2869_v42  ;;  %v2870_v28 = vadd.f32 %v2780_v36, %v2662_v2  ;;  %v1716_v18 = vrot.slane %v7162_v21, %v7451_v58  ;;  %v1724_v4 = vrot.slane %v8923_v14, %v7451_v58  ;;  %v2667_v55 = vld [vmem:[#allocation2 + $0x168] sm:$0x3] }
  0xf2   :  { %v1731_v24 = vrot.slane %v8924_v8, %v7451_v58  ;;  %v2871_v50 = vadd.f32 %v2788_v51, %v2663_v49  ;;  %v2796_v57 = vcombine.high %v2788_v51, %v2788_v51  ;;  %v2795_v61 = vrot.slane %v2781_v33, %v7451_v58  ;;  %v2668_v2 = vld [vmem:[#allocation2 + $0x530] sm:$0x3]  ;;  %v2669_v49 = vld [vmem:[#allocation2 + $0x38] sm:$0x3]  ;;  %v8927_v33 = vld [vmem:[#allocation16_spill] sm:$0xff] }
  0xf3   :  { %v1686_v5 = vmul.f32 %v7724_v29, %v1670_v32  ;;  %2902 = vst [vmem:[#allocation2 + $0x40] sm:$0x3] %v2870_v28  ;;  %v1717_v63 = vcombine.low %v1709_v45, %v1716_v18  ;;  %v1739_v39 = vrot.slane %v8925_v7, %v7451_v58  ;;  %v1746_v15 = vrot.slane %v8926_v23, %v7451_v58  ;;  %v2911_v51 = vld [vmem:[#allocation2 + $0x638] sm:$0x3]  ;;  %v2670_v18 = vld [vmem:[#allocation2 + $0x1d0] sm:$0x3] }
  0xf4   :  { %v1732_v22 = vcombine.low %v1724_v4, %v1731_v24  ;;  %2903 = vst [vmem:[#allocation2 + $0x248] sm:$0x3] %v2871_v50  ;;  %v2872_v6 = vadd.f32 %v2796_v57, %v2664_v41  ;;  %v2873_v0 = vadd.f32 %v2795_v61, %v2665_v60  ;;  %v2797_v44 = vcombine.high %v2795_v61, %v2795_v61  ;;  %v2915_v60 = vld [vmem:[#allocation2 + $0x508] sm:$0x3]  ;;  %v2912_v4 = vld [vmem:[#allocation2 + $0x578] sm:$0x3] }
  0xf5   :  { %v2805_v52 = vrot.slane %v1686_v5, %v7451_v58  ;;  %v2798_v40 = vcombine.high %v1686_v5, %v1686_v5  ;;  %v1831_v35 = vmul.f32 %v7637_v16, %v1717_v63  ;;  %v1747_v43 = vcombine.low %v1739_v39, %v1746_v15  ;;  %v8928_v57 = vld [vmem:[#allocation18_spill] sm:$0xff]  ;;  %v2916_v39 = vld [vmem:[#allocation2 + $0x480] sm:$0x3]  ;;  %v2917_v15 = vld [vmem:[#allocation2 + $0x2c8] sm:$0x3] }
  0xf6   :  { %v1832_v53 = vmul.f32 %v7642_v17, %v1732_v22  ;;  %2904 = vst [vmem:[#allocation2 + $0x400] sm:$0x3] %v2872_v6  ;;  %2905 = vst [vmem:[#allocation2 + $0x2f8] sm:$0x3] %v2873_v0  ;;  %v2874_v47 = vadd.f32 %v2797_v44, %v2666_v25  ;;  %v1754_v32 = vrot.slane %v8927_v33, %v7451_v58  ;;  %v2913_v22 = vld [vmem:[#allocation2 + $0x140] sm:$0x3] }
  0xf7   :  { %v2875_v42 = vadd.f32 %v2805_v52, %v2667_v55  ;;  %v2813_v36 = vcombine.high %v2805_v52, %v2805_v52  ;;  %v2812_v45 = vrot.slane %v2798_v40, %v7451_v58  ;;  %v2958_v28 = vrot.slane %v1831_v35, %v7451_v58  ;;  %v1839_v38 = vld [vmem:[#allocation2 + $0x2b0] sm:$0x3] }
  0xf8   :  { %v2951_v41 = vcombine.high %v1831_v35, %v1831_v35  ;;  %v2975_v16 = vrot.slane %v1832_v53, %v7451_v58  ;;  %2906 = vst [vmem:[#allocation2 + $0x3e8] sm:$0x3] %v2874_v47  ;;  %v2968_v24 = vcombine.high %v1832_v53, %v1832_v53  ;;  %v1833_v50 = vmul.f32 %v7653_v46, %v1747_v43  ;;  %v2914_v35 = vld [vmem:[#allocation2 + $0x3a8] sm:$0x3] }
  0xf9   :  { %2907 = vst [vmem:[#allocation2 + $0x168] sm:$0x3] %v2875_v42  ;;  %v2876_v17 = vadd.f32 %v2813_v36, %v2668_v2  ;;  %v1761_v61 = vrot.slane %v8928_v57, %v7451_v58  ;;  %v2877_v5 = vadd.f32 %v2812_v45, %v2669_v49  ;;  %v2814_v25 = vcombine.high %v2812_v45, %v2812_v45  ;;  %v2919_v2 = vld [vmem:[#allocation2 + $0xc0] sm:$0x3]  ;;  %v2920_v45 = vld [vmem:[#allocation2 + $0x138] sm:$0x3] }
  0xfa   :  { %v3119_v55 = vadd.f32 %v2958_v28, %v2911_v51  ;;  %v2966_v63 = vcombine.high %v2958_v28, %v2958_v28  ;;  %v2965_v6 = vrot.slane %v2951_v41, %v7451_v58  ;;  %v3123_v0 = vadd.f32 %v2975_v16, %v2915_v60  ;;  %v2918_v51 = vld [vmem:[#allocation2 + $0x218] sm:$0x3]  ;;  %v2921_v28 = vld [vmem:[#allocation2 + $0x70] sm:$0x3] }
  0xfb   :  { %2908 = vst [vmem:[#allocation2 + $0x530] sm:$0x3] %v2876_v17  ;;  %v2983_v44 = vcombine.high %v2975_v16, %v2975_v16  ;;  %v2982_v52 = vrot.slane %v2968_v24, %v7451_v58  ;;  %2909 = vst [vmem:[#allocation2 + $0x38] sm:$0x3] %v2877_v5  ;;  %v2878_v46 = vadd.f32 %v2814_v25, %v2670_v18  ;;  %v8930_v25 = vld [vmem:[#allocation23_spill] sm:$0xff] }
  0xfc   :  { %3151 = vst [vmem:[#allocation2 + $0x638] sm:$0x3] %v3119_v55  ;;  %v3120_v40 = vadd.f32 %v2966_v63, %v2912_v4  ;;  %v2992_v53 = vrot.slane %v1833_v50, %v7451_v58  ;;  %v2985_v43 = vcombine.high %v1833_v50, %v1833_v50  ;;  %v3121_v47 = vadd.f32 %v2965_v6, %v2913_v22  ;;  %v2922_v4 = vld [vmem:[#allocation2 + $0x6c0] sm:$0x3]  ;;  %v8929_v50 = vld [vmem:[#allocation20_spill] sm:$0xff] }
  0xfd   :  { %v2967_v42 = vcombine.high %v2965_v6, %v2965_v6  ;;  %3155 = vst [vmem:[#allocation2 + $0x508] sm:$0x3] %v3123_v0  ;;  %v3124_v36 = vadd.f32 %v2983_v44, %v2916_v39  ;;  %v3125_v49 = vadd.f32 %v2982_v52, %v2917_v15  ;;  %2910 = vst [vmem:[#allocation2 + $0x1d0] sm:$0x3] %v2878_v46  ;;  %v8931_v44 = vld [vmem:[#allocation25_spill] sm:$0xff] }
  0xfe   :  { %3152 = vst [vmem:[#allocation2 + $0x578] sm:$0x3] %v3120_v40  ;;  %v2984_v41 = vcombine.high %v2982_v52, %v2982_v52  ;;  %v3127_v60 = vadd.f32 %v2992_v53, %v2919_v2  ;;  %v3000_v16 = vcombine.high %v2992_v53, %v2992_v53  ;;  %v2999_v17 = vrot.slane %v2985_v43, %v7451_v58  ;;  %v7768_v2 = vld [vmem:[%s8805_s0] sm:$0xff]  ;;  %v2923_v40 = vld [vmem:[#allocation2 + $0xc8] sm:$0x3]  ;;  %v8934_v53 = vld [vmem:[#allocation33_spill] sm:$0xff] }
  0xff   :  { %3153 = vst [vmem:[#allocation2 + $0x140] sm:$0x3] %v3121_v47  ;;  %v3122_v18 = vadd.f32 %v2967_v42, %v2914_v35  ;;  %3156 = vst [vmem:[#allocation2 + $0x480] sm:$0x3] %v3124_v36  ;;  %v1762_v24 = vcombine.low %v1754_v32, %v1761_v61  ;;  %v1769_v5 = vrot.slane %v8929_v50, %v7451_v58  ;;  %v8932_v32 = vld [vmem:[#allocation28_spill] sm:$0xff]  ;;  %v8933_v35 = vld [vmem:[#allocation30_spill] sm:$0xff]  ;;  %6832 = vlog2.f32 %v7768_v2 }
 0x100   :  { %3157 = vst [vmem:[#allocation2 + $0x2c8] sm:$0x3] %v3125_v49  ;;  %v1776_v55 = vrot.slane %v8930_v25, %v7451_v58  ;;  %v3126_v63 = vadd.f32 %v2984_v41, %v2918_v51  ;;  %3159 = vst [vmem:[#allocation2 + $0xc0] sm:$0x3] %v3127_v60  ;;  %v3128_v22 = vadd.f32 %v3000_v16, %v2920_v45  ;;  %v8935_v47 = vld [vmem:[#allocation35_spill] sm:$0xff] }
 0x101   :  { %v3129_v39 = vadd.f32 %v2999_v17, %v2921_v28  ;;  %v3001_v15 = vcombine.high %v2999_v17, %v2999_v17  ;;  %3154 = vst [vmem:[#allocation2 + $0x3a8] sm:$0x3] %v3122_v18  ;;  %v1834_v6 = vmul.f32 %v7670_v12, %v1762_v24  ;;  %v1784_v52 = vrot.slane %v8931_v44, %v7451_v58  ;;  %v2924_v49 = vld [vmem:[#allocation2 + $0x1c8] sm:$0x3]  ;;  %v2925_v41 = vld [vmem:[#allocation2 + $0x4d0] sm:$0x3] }
 0x102   :  { %v1777_v0 = vcombine.low %v1769_v5, %v1776_v55  ;;  %v1791_v61 = vrot.slane %v8932_v32, %v7451_v58  ;;  %3158 = vst [vmem:[#allocation2 + $0x218] sm:$0x3] %v3126_v63  ;;  %3160 = vst [vmem:[#allocation2 + $0x138] sm:$0x3] %v3128_v22  ;;  %v1799_v12 = vrot.slane %v8933_v35, %v7451_v58  ;;  %v2927_v60 = vld [vmem:[#allocation2 + $0x470] sm:$0x3] }
 0x103   :  { %3161 = vst [vmem:[#allocation2 + $0x70] sm:$0x3] %v3129_v39  ;;  %v3130_v46 = vadd.f32 %v3001_v15, %v2922_v4  ;;  %v1806_v43 = vrot.slane %v8934_v53, %v7451_v58  ;;  %v1814_v42 = vrot.slane %v8935_v47, %v7451_v58  ;;  %v3009_v36 = vrot.slane %v1834_v6, %v7451_v58  ;;  %v8936_v17 = vld [vmem:[#allocation38_spill] sm:$0xff]  ;;  %v2926_v22 = vld [vmem:[#allocation2 + $0x2a8] sm:$0x3] }
 0x104   :  { %v3002_v51 = vcombine.high %v1834_v6, %v1834_v6  ;;  %v1835_v45 = vmul.f32 %v7675_v1, %v1777_v0  ;;  %v1792_v28 = vcombine.low %v1784_v52, %v1791_v61  ;;  %v1821_v18 = vrot.slane %v8936_v17, %v7451_v58 }
 0x105   :  { %3162 = vst [vmem:[#allocation2 + $0x6c0] sm:$0x3] %v3130_v46  ;;  %v1807_v16 = vcombine.low %v1799_v12, %v1806_v43  ;;  %v3131_v24 = vadd.f32 %v3009_v36, %v2923_v40  ;;  %v3017_v5 = vcombine.high %v3009_v36, %v3009_v36  ;;  %v2928_v12 = vld [vmem:[#allocation2 + $0x2d0] sm:$0x3]  ;;  %v2931_v40 = vld [vmem:[#allocation2 + $0x198] sm:$0x3] }
 0x106   :  { %v3016_v55 = vrot.slane %v3002_v51, %v7451_v58  ;;  %v3026_v63 = vrot.slane %v1835_v45, %v7451_v58  ;;  %v3019_v1 = vcombine.high %v1835_v45, %v1835_v45  ;;  %v1836_v39 = vmul.f32 %v7695_v20, %v1792_v28  ;;  %v2929_v43 = vld [vmem:[#allocation2 + $0x330] sm:$0x3]  ;;  %v2935_v45 = vld [vmem:[#allocation2 + $0x618] sm:$0x3] }
 0x107   :  { %v1837_v15 = vmul.f32 %v7707_v62, %v1807_v16  ;;  %v1822_v6 = vcombine.low %v1814_v42, %v1821_v18  ;;  %3163 = vst [vmem:[#allocation2 + $0xc8] sm:$0x3] %v3131_v24  ;;  %v3132_v0 = vadd.f32 %v3017_v5, %v2924_v49  ;;  %v2930_v62 = vld [vmem:[#allocation2 + $0x5b8] sm:$0x3] }
 0x108   :  { %v3133_v52 = vadd.f32 %v3016_v55, %v2925_v41  ;;  %v3018_v61 = vcombine.high %v3016_v55, %v3016_v55  ;;  %v3135_v46 = vadd.f32 %v3026_v63, %v2927_v60  ;;  %v3034_v36 = vcombine.high %v3026_v63, %v3026_v63  ;;  %v2932_v24 = vld [vmem:[#allocation2 + $0x258] sm:$0x3]  ;;  %v2936_v55 = vld [vmem:[#allocation2 + $0x628] sm:$0x3] }
 0x109   :  { %v3033_v51 = vrot.slane %v3019_v1, %v7451_v58  ;;  %v3043_v4 = vrot.slane %v1836_v39, %v7451_v58  ;;  %v3036_v17 = vcombine.high %v1836_v39, %v1836_v39  ;;  %3164 = vst [vmem:[#allocation2 + $0x1c8] sm:$0x3] %v3132_v0  ;;  %v3060_v42 = vrot.slane %v1837_v15, %v7451_v58  ;;  %v2933_v5 = vld [vmem:[#allocation2 + $0x558] sm:$0x3]  ;;  %v2937_v0 = vld [vmem:[#allocation2 + $0x2e0] sm:$0x3] }
 0x10a   :  { %3165 = vst [vmem:[#allocation2 + $0x4d0] sm:$0x3] %v3133_v52  ;;  %v3134_v20 = vadd.f32 %v3018_v61, %v2926_v22  ;;  %3167 = vst [vmem:[#allocation2 + $0x470] sm:$0x3] %v3135_v46  ;;  %v3053_v49 = vcombine.high %v1837_v15, %v1837_v15  ;;  %v1838_v28 = vmul.f32 %v7724_v29, %v1822_v6  ;;  %v2939_v52 = vld [vmem:[#allocation2 + $0x3e0] sm:$0x3] }
 0x10b   :  { %v3136_v41 = vadd.f32 %v3034_v36, %v2928_v12  ;;  %v3137_v60 = vadd.f32 %v3033_v51, %v2929_v43  ;;  %v3035_v16 = vcombine.high %v3033_v51, %v3033_v51  ;;  %v3139_v18 = vadd.f32 %v3043_v4, %v2931_v40  ;;  %v2934_v29 = vld [vmem:[#allocation2 + $0x600] sm:$0x3]  ;;  %v2940_v36 = vld [vmem:[#allocation2 + $0x6e8] sm:$0x3] }
 0x10c   :  { %3166 = vst [vmem:[#allocation2 + $0x2a8] sm:$0x3] %v3134_v20  ;;  %v3051_v63 = vcombine.high %v3043_v4, %v3043_v4  ;;  %v3050_v1 = vrot.slane %v3036_v17, %v7451_v58  ;;  %v3143_v39 = vadd.f32 %v3060_v42, %v2935_v45  ;;  %v3068_v22 = vcombine.high %v3060_v42, %v3060_v42  ;;  %v2938_v17 = vld [vmem:[#allocation2 + $0x210] sm:$0x3]  ;;  %v196_v51 = vld [vmem:[%s8805_s0 + $0x8] sm:$0xff] }
 0x10d   :  { %3168 = vst [vmem:[#allocation2 + $0x2d0] sm:$0x3] %v3136_v41  ;;  %3169 = vst [vmem:[#allocation2 + $0x330] sm:$0x3] %v3137_v60  ;;  %v3138_v15 = vadd.f32 %v3035_v16, %v2930_v62  ;;  %v3067_v6 = vrot.slane %v3053_v49, %v7451_v58  ;;  %v3077_v61 = vrot.slane %v1838_v28, %v7451_v58  ;;  %v2941_v49 = vld [vmem:[#allocation2 + $0x1f0] sm:$0x3] }
 0x10e   :  { %3171 = vst [vmem:[#allocation2 + $0x198] sm:$0x3] %v3139_v18  ;;  %v3070_v46 = vcombine.high %v1838_v28, %v1838_v28  ;;  %v3140_v12 = vadd.f32 %v3051_v63, %v2932_v24  ;;  %v3141_v43 = vadd.f32 %v3050_v1, %v2933_v5  ;;  %v3052_v40 = vcombine.high %v3050_v1, %v3050_v1  ;;  %v8937_v41 = vld [vmem:[#allocation40_spill] sm:$0xff]  ;;  %v8938_v60 = vld [vmem:[#allocation3_spill] sm:$0xff] }
 0x10f   :  { %3175 = vst [vmem:[#allocation2 + $0x618] sm:$0x3] %v3143_v39  ;;  %v3144_v4 = vadd.f32 %v3068_v22, %v2936_v55  ;;  %3170 = vst [vmem:[#allocation2 + $0x5b8] sm:$0x3] %v3138_v15  ;;  %v3145_v45 = vadd.f32 %v3067_v6, %v2937_v0  ;;  %v3069_v20 = vcombine.high %v3067_v6, %v3067_v6  ;;  %v8939_v28 = vunpack.c.0.s8 %v8938_v60  ;;  %v197_v55 = vld [vmem:[%s8805_s0 + $0x10] sm:$0xff]  ;;  %v198_v0 = vld [vmem:[%s8805_s0 + $0x18] sm:$0xff] }
 0x110   :  { %v3147_v62 = vadd.f32 %v3077_v61, %v2939_v52  ;;  %v3085_v42 = vcombine.high %v3077_v61, %v3077_v61  ;;  %3172 = vst [vmem:[#allocation2 + $0x258] sm:$0x3] %v3140_v12  ;;  %3173 = vst [vmem:[#allocation2 + $0x558] sm:$0x3] %v3141_v43  ;;  %v3142_v18 = vadd.f32 %v3052_v40, %v2934_v29  ;;  %v8941_v5 = vsub.f32 1.0, %v7768_v2  ;;  %v6833_v52 = vpop.eup %6832  ;;  %v8942_v29 = vld [vmem:[#allocation4_spill] sm:$0xff] }
 0x111   :  { %v7799_v16 = vsub.s32 %v8939_v28, %v8937_v41  ;;  %3176 = vst [vmem:[#allocation2 + $0x628] sm:$0x3] %v3144_v4  ;;  %v3084_v24 = vrot.slane %v3070_v46, %v7451_v58  ;;  %3177 = vst [vmem:[#allocation2 + $0x2e0] sm:$0x3] %v3145_v45  ;;  %v3146_v63 = vadd.f32 %v3069_v20, %v2938_v17  ;;  %v2942_v39 = vld [vmem:[#allocation2 + $0x460] sm:$0x3] }
 0x112   :  { %6834 = vlog2.f32 %v8941_v5  ;;  %3179 = vst [vmem:[#allocation2 + $0x3e0] sm:$0x3] %v3147_v62  ;;  %v3148_v1 = vadd.f32 %v3085_v42, %v2940_v36  ;;  %v588_v22 = vsub.f32 1.0, %v196_v51  ;;  %3174 = vst [vmem:[#allocation2 + $0x600] sm:$0x3] %v3142_v18  ;;  %v199_v61 = vld [vmem:[%s8805_s0 + $0x20] sm:$0xff] }
 0x113   :  { %8940 = vst [vmem:[#allocation7_spill] sm:$0xff] %v7799_v16  ;;  %6836 = vlog2.f32 %v196_v51  ;;  %v3149_v15 = vadd.f32 %v3084_v24, %v2941_v49  ;;  %v3086_v2 = vcombine.high %v3084_v24, %v3084_v24  ;;  %3178 = vst [vmem:[#allocation2 + $0x210] sm:$0x3] %v3146_v63  ;;  %v564_v46 = vmul.f32 0.6931472, %v6833_v52  ;;  %v8943_v12 = vld [vmem:[#allocation6_spill] sm:$0xff] }
 0x114   :  { %6838 = vlog2.f32 %v197_v55  ;;  %3180 = vst [vmem:[#allocation2 + $0x6e8] sm:$0x3] %v3148_v1  ;;  %v589_v40 = vsub.f32 1.0, %v197_v55  ;;  %v200_v4 = vld [vmem:[%s8805_s0 + $0x28] sm:$0xff]  ;;  %v8944_v36 = vld [vmem:[#allocation10_spill] sm:$0xff]  ;;  %v590_v45 = vsub.f32 1.0, %v198_v0 }
 0x115   :  { %6840 = vlog2.f32 %v588_v22  ;;  %3181 = vst [vmem:[#allocation2 + $0x1f0] sm:$0x3] %v3149_v15  ;;  %v3150_v17 = vadd.f32 %v3086_v2, %v2942_v39  ;;  %v201_v20 = vld [vmem:[%s8805_s0 + $0x30] sm:$0xff]  ;;  %v579_v62 = vmax.f32 %v564_v46, -100.0  ;;  %v8945_v42 = vld [vmem:[#allocation15_spill] sm:$0xff]  ;;  %v591_v41 = vsub.f32 1.0, %v199_v61 }
 0x116   :  { %6842 = vlog2.f32 %v198_v0  ;;  %v202_v60 = vld [vmem:[%s8805_s0 + $0x38] sm:$0xff]  ;;  %v8946_v28 = vld [vmem:[#allocation19_spill] sm:$0xff]  ;;  %v592_v24 = vsub.f32 1.0, %v200_v4  ;;  %v8947_v5 = vld [vmem:[#allocation24_spill] sm:$0xff]  ;;  %v593_v1 = vsub.f32 1.0, %v201_v20 }
 0x117   :  { %6844 = vlog2.f32 %v589_v40  ;;  %3182 = vst [vmem:[#allocation2 + $0x460] sm:$0x3] %v3150_v17  ;;  %v634_v63 = vrot.slane %v579_v62, %v7451_v58  ;;  %v8948_v39 = vld [vmem:[#allocation29_spill] sm:$0xff]  ;;  %v594_v0 = vsub.f32 1.0, %v202_v60  ;;  %v8949_v52 = vld [vmem:[#allocation34_spill] sm:$0xff]  ;;  %v627_v2 = vcombine.high %v579_v62, %v579_v62  ;;  %v8952_v49 = vld [vmem:[#allocation12_spill] sm:$0xff] }
 0x118   :  { %6846 = vlog2.f32 %v590_v45  ;;  %v8950_v40 = vld [vmem:[#allocation5_spill] sm:$0xff]  ;;  %v8951_v45 = vld [vmem:[#allocation8_spill] sm:$0xff]  ;;  %v3686_v55 = vld [vmem:[#allocation2 + $0x5f8] sm:$0x3] }
 0x119   :  { %6848 = vlog2.f32 %v199_v61  ;;  %v7832_v46 = vmul.f32 %v634_v63, %v8942_v29  ;;  %v641_v61 = vrot.slane %v627_v2, %v7451_v58  ;;  %v3687_v43 = vld [vmem:[#allocation2 + $0x4a0] sm:$0x3]  ;;  %v3688_v6 = vld [vmem:[#allocation2 + $0x4e8] sm:$0x3]  ;;  %v3689_v2 = vld [vmem:[#allocation2 + $0x3d8] sm:$0x3] }
 0x11a   :  { %6850 = vlog2.f32 %v591_v41  ;;  %v3690_v51 = vld [vmem:[#allocation2 + $0x680] sm:$0x3]  ;;  %v3718_v41 = vsel %vm3218_vm0, %v3686_v55, 0.0  ;;  %v3732_v15 = vsel %vm3218_vm0, %v3688_v6, 0.0  ;;  %v7850_v17 = vsel %vm3218_vm0, %v3689_v2, 0.0 }
 0x11b   :  { %6852 = vlog2.f32 %v200_v4  ;;  %v7843_v18 = vmul.f32 %v641_v61, %v8950_v40  ;;  %v3733_v56 = vrot.slane %v3732_v15, 4  ;;  %8958 = vst [vmem:[#allocation11_spill] sm:$0xff] %v7850_v17 }
 0x11c   :  { %6854 = vlog2.f32 %v592_v24  ;;  %v7853_v24 = vsel %vm3218_vm0, %v3690_v51, 0.0 }
 0x11d   :  { %6856 = vlog2.f32 %v201_v20  ;;  %v3725_v20 = vsel %vm3218_vm0, %v3687_v43, 0.0  ;;  %8959 = vst [vmem:[#allocation16_spill] sm:$0xff] %v7853_v24 }
 0x11e   :  { %6858 = vlog2.f32 %v593_v1  ;;  %v3719_v1 = vrot.slane %v3718_v41, 4  ;;  %v3726_v3 = vrot.slane %v3725_v20, 4 }
 0x11f   :  { %v6835_v53 = vpop.eup %6834  ;;  %6860 = vlog2.f32 %v202_v60 }
 0x120   :  { %v6837_v16 = vpop.eup %6836  ;;  %v596_v59 = vmul.f32 0.6931472, %v6835_v53  ;;  %6862 = vlog2.f32 %v594_v0  ;;  %v7857_v4 = vadd.f32 %v3719_v1, %v3718_v41  ;;  %v7859_v6 = vadd.f32 %v3726_v3, %v3725_v20 }
 0x121   :  { %v6839_v61 = vpop.eup %6838  ;;  %v566_v32 = vmul.f32 0.6931472, %v6837_v16  ;;  %v7863_v16 = vadd.f32 %v3733_v56, %v3732_v15 }
 0x122   :  { %v6841_v60 = vpop.eup %6840  ;;  %v7855_v55 = vmax.f32 %v596_v59, -100.0  ;;  %v568_v43 = vmul.f32 0.6931472, %v6839_v61  ;;  %8960 = vst [vmem:[#allocation20_spill] sm:$0xff] %v7857_v4  ;;  %8961 = vst [vmem:[#allocation25_spill] sm:$0xff] %v7859_v6  ;;  %v8963_v61 = vsub.f32 1.0, %v8942_v29 }
 0x123   :  { %v6843_v53 = vpop.eup %6842  ;;  %v7861_v0 = vmax.f32 %v566_v32, -100.0  ;;  %v598_v25 = vmul.f32 0.6931472, %v6841_v60  ;;  %8962 = vst [vmem:[#allocation30_spill] sm:$0xff] %v7863_v16 }
 0x124   :  { %v6845_v13 = vpop.eup %6844  ;;  %v810_v51 = vrot.slane %v7855_v55, %v7451_v58  ;;  %v7868_v24 = vmax.f32 %v568_v43, -100.0  ;;  %v570_v59 = vmul.f32 0.6931472, %v6843_v53 }
 0x125   :  { %v6847_v3 = vpop.eup %6846  ;;  %v7872_v20 = vmax.f32 %v598_v25, -100.0  ;;  %v649_v32 = vrot.slane %v7861_v0, %v7451_v58  ;;  %v600_v56 = vmul.f32 0.6931472, %v6845_v13 }
 0x126   :  { %v6849_v1 = vpop.eup %6848  ;;  %v939_v60 = vmul.f32 %v810_v51, %v8963_v61  ;;  %v664_v43 = vrot.slane %v7868_v24, %v7451_v58  ;;  %v7882_v53 = vmax.f32 %v570_v59, -100.0  ;;  %v602_v2 = vmul.f32 0.6931472, %v6847_v3 }
 0x127   :  { %v6851_v41 = vpop.eup %6850  ;;  %v765_v25 = vmul.f32 %v649_v32, %v8943_v12  ;;  %v825_v17 = vrot.slane %v7872_v20, %v7451_v58  ;;  %v7887_v13 = vmax.f32 %v600_v56, -100.0  ;;  %v572_v16 = vmul.f32 0.6931472, %v6849_v1 }
 0x128   :  { %v6853_v15 = vpop.eup %6852  ;;  %v955_v6 = vadd.f32 %v939_v60, %v7832_v46  ;;  %v767_v29 = vmul.f32 %v664_v43, %v8944_v36  ;;  %v7891_v51 = vmax.f32 %v602_v2, -100.0  ;;  %v679_v59 = vrot.slane %v7882_v53, %v7451_v58 }
 0x129   :  { %v6855_v3 = vpop.eup %6854  ;;  %v8964_v61 = vsub.f32 1.0, %v8943_v12  ;;  %v840_v4 = vrot.slane %v7887_v13, %v7451_v58  ;;  %v7899_v56 = vmax.f32 %v572_v16, -100.0  ;;  %v604_v1 = vmul.f32 0.6931472, %v6851_v41 }
 0x12a   :  { %v6857_v63 = vpop.eup %6856  ;;  %v971_v57 = vsub.f32 0.0, %v955_v6  ;;  %v769_v46 = vmul.f32 %v679_v59, %v8945_v42  ;;  %v855_v2 = vrot.slane %v7891_v51, %v7451_v58  ;;  %v574_v60 = vmul.f32 0.6931472, %v6853_v15 }
 0x12b   :  { %v941_v32 = vmul.f32 %v825_v17, %v8964_v61  ;;  %v6859_v43 = vpop.eup %6858  ;;  %v8965_v12 = vsub.f32 1.0, %v8944_v36  ;;  %v7906_v61 = vmax.f32 %v604_v1, -100.0  ;;  %v694_v16 = vrot.slane %v7899_v56, %v7451_v58 }
 0x12c   :  { %v6861_v41 = vpop.eup %6860  ;;  %v7911_v6 = vmul.f32 %v7174_v26, %v971_v57  ;;  %v7914_v59 = vmul.f32 %v971_v57, %v7158_v19  ;;  %v8966_v15 = vsub.f32 1.0, %v8945_v42  ;;  %v7918_v62 = vmax.f32 %v574_v60, -100.0  ;;  %v1843_v26 = vld [vmem:[#allocation2 + $0x450] sm:$0x3]  ;;  %v1847_v60 = vld [vmem:[#allocation2 + $0x108] sm:$0x3] }
 0x12d   :  { %v957_v23 = vadd.f32 %v941_v32, %v765_v25  ;;  %v943_v17 = vmul.f32 %v840_v4, %v8965_v12  ;;  %v6863_v25 = vpop.eup %6862  ;;  %v771_v32 = vmul.f32 %v694_v16, %v8946_v28  ;;  %v870_v1 = vrot.slane %v7906_v61, %v7451_v58  ;;  %v1851_v16 = vld [vmem:[#allocation2 + $0x548] sm:$0x3] }
 0x12e   :  { %v945_v11 = vmul.f32 %v855_v2, %v8966_v15  ;;  %v1919_v12 = vadd.f32 %v1839_v38, %v7911_v6  ;;  %v606_v8 = vmul.f32 0.6931472, %v6855_v3  ;;  %v709_v19 = vrot.slane %v7918_v62, %v7451_v58 }
 0x12f   :  { %v973_v36 = vsub.f32 0.0, %v957_v23  ;;  %v959_v4 = vadd.f32 %v943_v17, %v767_v29  ;;  %v8967_v29 = vsub.f32 1.0, %v8946_v28  ;;  %v576_v3 = vmul.f32 0.6931472, %v6857_v63 }
 0x130   :  { %v961_v22 = vadd.f32 %v945_v11, %v769_v46  ;;  %1951 = vst [vmem:[#allocation2 + $0x2b0] sm:$0x3] %v1919_v12  ;;  %v7934_v38 = vmax.f32 %v606_v8, -100.0  ;;  %v773_v11 = vmul.f32 %v709_v19, %v8947_v5 }
 0x131   :  { %v7927_v57 = vmul.f32 %v7184_v30, %v973_v36  ;;  %v7930_v42 = vmul.f32 %v973_v36, %v8923_v14  ;;  %v975_v23 = vsub.f32 0.0, %v959_v4  ;;  %v947_v2 = vmul.f32 %v870_v1, %v8967_v29 }
 0x132   :  { %v977_v17 = vsub.f32 0.0, %v961_v22  ;;  %v885_v8 = vrot.slane %v7934_v38, %v7451_v58  ;;  %v7952_v63 = vmax.f32 %v576_v3, -100.0  ;;  %v608_v4 = vmul.f32 0.6931472, %v6859_v43 }
 0x133   :  { %v1923_v46 = vadd.f32 %v1843_v26, %v7927_v57  ;;  %v7939_v30 = vmul.f32 %v7214_v54, %v975_v23  ;;  %v7942_v14 = vmul.f32 %v975_v23, %v8925_v7  ;;  %v963_v15 = vadd.f32 %v947_v2, %v771_v32  ;;  %v1855_v32 = vld [vmem:[#allocation2 + $0x2c0] sm:$0x3] }
 0x134   :  { %v7945_v28 = vmul.f32 %v7257_v37, %v977_v17  ;;  %v7948_v22 = vmul.f32 %v977_v17, %v8927_v33  ;;  %v578_v7 = vmul.f32 0.6931472, %v6861_v41  ;;  %v8968_v37 = vsub.f32 1.0, %v8947_v5  ;;  %v1840_v41 = vld [vmem:[#allocation2 + $0x3b0] sm:$0x3] }
 0x135   :  { %1955 = vst [vmem:[#allocation2 + $0x450] sm:$0x3] %v1923_v46  ;;  %v1927_v54 = vadd.f32 %v1847_v60, %v7939_v30  ;;  %v979_v36 = vsub.f32 0.0, %v963_v15  ;;  %v724_v33 = vrot.slane %v7952_v63, %v7451_v58  ;;  %v610_v26 = vmul.f32 0.6931472, %v6863_v25 }
 0x136   :  { %v1931_v1 = vadd.f32 %v1851_v16, %v7945_v28  ;;  %v949_v12 = vmul.f32 %v885_v8, %v8968_v37  ;;  %v7966_v29 = vmax.f32 %v608_v4, -100.0  ;;  %v7968_v43 = vmax.f32 %v578_v7, -100.0  ;;  %v1844_v46 = vld [vmem:[#allocation2 + $0x328] sm:$0x3] }
 0x137   :  { %1959 = vst [vmem:[#allocation2 + $0x108] sm:$0x3] %v1927_v54  ;;  %v7961_v19 = vmul.f32 %v7267_v48, %v979_v36  ;;  %v7964_v23 = vmul.f32 %v979_v36, %v8929_v50  ;;  %v775_v5 = vmul.f32 %v724_v33, %v8948_v39  ;;  %v7971_v60 = vmax.f32 %v610_v26, -100.0  ;;  %v1859_v36 = vld [vmem:[#allocation2 + $0x3c8] sm:$0x3] }
 0x138   :  { %1963 = vst [vmem:[#allocation2 + $0x548] sm:$0x3] %v1931_v1  ;;  %v965_v2 = vadd.f32 %v949_v12, %v773_v11  ;;  %v1887_v25 = vcombine.high %v7911_v6, %v7911_v6  ;;  %v900_v50 = vrot.slane %v7966_v29, %v7451_v58  ;;  %v739_v17 = vrot.slane %v7968_v43, %v7451_v58 }
 0x139   :  { %v1935_v48 = vadd.f32 %v1855_v32, %v7961_v19  ;;  %v8969_v3 = vcombine.high %v7855_v55, %v7855_v55  ;;  %v915_v15 = vrot.slane %v7971_v60, %v7451_v58  ;;  %v1889_v54 = vcombine.high %v7927_v57, %v7927_v57 }
 0x13a   :  { %v981_v16 = vsub.f32 0.0, %v965_v2  ;;  %v1920_v8 = vadd.f32 %v1887_v25, %v1840_v41  ;;  %v8970_v4 = vsub.f32 1.0, %v8948_v39  ;;  %v777_v1 = vmul.f32 %v739_v17, %v8949_v52 }
 0x13b   :  { %v817_v11 = vrot.slane %v8969_v3, %v7451_v58  ;;  %1967 = vst [vmem:[#allocation2 + $0x2c0] sm:$0x3] %v1935_v48  ;;  %v8971_v32 = vsub.f32 1.0, %v8950_v40  ;;  %v8972_v37 = vcombine.high %v7861_v0, %v7861_v0  ;;  %v8973_v41 = vsub.f32 1.0, %v8949_v52 }
 0x13c   :  { %v951_v7 = vmul.f32 %v900_v50, %v8970_v4  ;;  %v7998_v33 = vmul.f32 %v7306_v34, %v981_v16  ;;  %v8001_v26 = vmul.f32 %v981_v16, %v8931_v44  ;;  %1952 = vst [vmem:[#allocation2 + $0x3b0] sm:$0x3] %v1920_v8  ;;  %v1924_v2 = vadd.f32 %v1889_v54, %v1844_v46  ;;  %v1848_v50 = vld [vmem:[#allocation2 + $0x510] sm:$0x3]  ;;  %v1841_v16 = vld [vmem:[#allocation2 + $0x4d8] sm:$0x3] }
 0x13d   :  { %v940_v55 = vmul.f32 %v817_v11, %v8971_v32  ;;  %v656_v12 = vrot.slane %v8972_v37, %v7451_v58  ;;  %v953_v39 = vmul.f32 %v915_v15, %v8973_v41  ;;  %v818_v0 = vcombine.high %v7872_v20, %v7872_v20  ;;  %v1852_v54 = vld [vmem:[#allocation2 + $0x500] sm:$0x3] }
 0x13e   :  { %v967_v25 = vadd.f32 %v951_v7, %v775_v5  ;;  %v1939_v34 = vadd.f32 %v1859_v36, %v7998_v33  ;;  %1956 = vst [vmem:[#allocation2 + $0x328] sm:$0x3] %v1924_v2  ;;  %v1891_v44 = vcombine.high %v7939_v30, %v7939_v30  ;;  %v657_v52 = vcombine.high %v7868_v24, %v7868_v24  ;;  %v1863_v5 = vld [vmem:[#allocation2 + $0x118] sm:$0x3]  ;;  %v1867_v7 = vld [vmem:[#allocation2 + $0xe0] sm:$0x3] }
 0x13f   :  { %v956_v40 = vadd.f32 %v940_v55, %v7843_v18  ;;  %v766_v48 = vmul.f32 %v656_v12, %v8951_v45  ;;  %v969_v17 = vadd.f32 %v953_v39, %v777_v1  ;;  %v832_v18 = vrot.slane %v818_v0, %v7451_v58  ;;  %v1856_v2 = vld [vmem:[#allocation2 + $0x588] sm:$0x3] }
 0x140   :  { %v983_v3 = vsub.f32 0.0, %v967_v25  ;;  %v833_v46 = vcombine.high %v7887_v13, %v7887_v13  ;;  %1971 = vst [vmem:[#allocation2 + $0x3c8] sm:$0x3] %v1939_v34  ;;  %v1928_v15 = vadd.f32 %v1891_v44, %v1848_v50  ;;  %v671_v8 = vrot.slane %v657_v52, %v7451_v58  ;;  %v1845_v44 = vld [vmem:[#allocation2 + $0x440] sm:$0x3] }
 0x141   :  { %v972_v11 = vsub.f32 0.0, %v956_v40  ;;  %v985_v20 = vsub.f32 0.0, %v969_v17  ;;  %v1893_v36 = vcombine.high %v7945_v28, %v7945_v28  ;;  %v8975_v37 = vsub.f32 1.0, %v8951_v45  ;;  %v1860_v17 = vld [vmem:[#allocation2 + $0x6d8] sm:$0x3] }
 0x142   :  { %v8021_v24 = vmul.f32 %v7334_v9, %v983_v3  ;;  %v8024_v4 = vmul.f32 %v983_v3, %v8933_v35  ;;  %1960 = vst [vmem:[#allocation2 + $0x510] sm:$0x3] %v1928_v15  ;;  %v768_v35 = vmul.f32 %v671_v8, %v8952_v49  ;;  %v847_v41 = vrot.slane %v833_v46, %v7451_v58  ;;  %v8978_v46 = vld [vmem:[#allocation17_spill] sm:$0xff] }
 0x143   :  { %v8027_v1 = vmul.f32 %v7178_v27, %v972_v11  ;;  %v8030_v13 = vmul.f32 %v972_v11, %v7162_v21  ;;  %v8033_v32 = vmul.f32 %v7360_v10, %v985_v20  ;;  %v8036_v55 = vmul.f32 %v985_v20, %v8935_v47 }
 0x144   :  { %v942_v9 = vmul.f32 %v832_v18, %v8975_v37  ;;  %v1943_v12 = vadd.f32 %v1863_v5, %v8021_v24  ;;  %v1932_v21 = vadd.f32 %v1893_v36, %v1852_v54  ;;  %v672_v47 = vcombine.high %v7882_v53, %v7882_v53  ;;  %v8980_v54 = vld [vmem:[#allocation22_spill] sm:$0xff] }
 0x145   :  { %8974 = vst [vmem:[#allocation35_spill] sm:$0xff] %v8036_v55  ;;  %v1921_v27 = vadd.f32 %v1841_v16, %v8027_v1  ;;  %v1947_v39 = vadd.f32 %v1867_v7, %v8033_v32  ;;  %v848_v45 = vcombine.high %v7891_v51, %v7891_v51  ;;  %v8976_v25 = vsub.f32 1.0, %v8952_v49  ;;  %v3711_v55 = vld [vmem:[#allocation2 + $0x68] sm:$0x3] }
 0x146   :  { %v958_v10 = vadd.f32 %v942_v9, %v766_v48  ;;  %1975 = vst [vmem:[#allocation2 + $0x118] sm:$0x3] %v1943_v12  ;;  %1964 = vst [vmem:[#allocation2 + $0x500] sm:$0x3] %v1932_v21  ;;  %v1895_v0 = vcombine.high %v7961_v19, %v7961_v19  ;;  %v687_v50 = vcombine.high %v7899_v56, %v7899_v56  ;;  %v8979_v16 = vsub.f32 1.0, %v8978_v46 }
 0x147   :  { %1953 = vst [vmem:[#allocation2 + $0x4d8] sm:$0x3] %v1921_v27  ;;  %v944_v40 = vmul.f32 %v847_v41, %v8976_v25  ;;  %v863_v48 = vcombine.high %v7906_v61, %v7906_v61  ;;  %1979 = vst [vmem:[#allocation2 + $0xe0] sm:$0x3] %v1947_v39  ;;  %v686_v51 = vrot.slane %v672_v47, %v7451_v58  ;;  %v8977_v61 = vld [vmem:[#allocation9_spill] sm:$0xff]  ;;  %v8981_v7 = vsub.f32 1.0, %v8980_v54 }
 0x148   :  { %v974_v53 = vsub.f32 0.0, %v958_v10  ;;  %v862_v34 = vrot.slane %v848_v45, %v7451_v58  ;;  %v1897_v49 = vcombine.high %v7998_v33, %v7998_v33  ;;  %v1936_v3 = vadd.f32 %v1895_v0, %v1856_v2  ;;  %v1864_v21 = vld [vmem:[#allocation2 + $0xa0] sm:$0x3]  ;;  %v8982_v39 = vld [vmem:[#allocation14_spill] sm:$0xff]  ;;  %v8983_v47 = vld [vmem:[#allocation13_spill] sm:$0xff] }
 0x149   :  { %v960_v52 = vadd.f32 %v944_v40, %v768_v35  ;;  %v701_v5 = vrot.slane %v687_v50, %v7451_v58  ;;  %v877_v56 = vrot.slane %v863_v48, %v7451_v58  ;;  %v770_v20 = vmul.f32 %v686_v51, %v8978_v46  ;;  %v1853_v48 = vld [vmem:[#allocation2 + $0x6d0] sm:$0x3]  ;;  %v8988_v46 = vld [vmem:[#allocation26_spill] sm:$0xff] }
 0x14a   :  { %v8064_v11 = vmul.f32 %v7188_v31, %v974_v53  ;;  %v8067_v18 = vmul.f32 %v974_v53, %v8977_v61  ;;  %v946_v15 = vmul.f32 %v862_v34, %v8979_v16  ;;  %1968 = vst [vmem:[#allocation2 + $0x588] sm:$0x3] %v1936_v3  ;;  %v1940_v9 = vadd.f32 %v1897_v49, %v1860_v17  ;;  %v1849_v31 = vld [vmem:[#allocation2 + $0x490] sm:$0x3]  ;;  %v1857_v3 = vld [vmem:[#allocation2 + $0x598] sm:$0x3] }
 0x14b   :  { %v976_v8 = vsub.f32 0.0, %v960_v52  ;;  %v772_v36 = vmul.f32 %v701_v5, %v8980_v54  ;;  %v948_v37 = vmul.f32 %v877_v56, %v8981_v7  ;;  %v702_v27 = vcombine.high %v7918_v62, %v7918_v62  ;;  %v8984_v17 = vld [vmem:[#allocation21_spill] sm:$0xff]  ;;  %v8986_v5 = vld [vmem:[#allocation27_spill] sm:$0xff] }
 0x14c   :  { %v1925_v35 = vadd.f32 %v1845_v44, %v8064_v11  ;;  %v962_v12 = vadd.f32 %v946_v15, %v770_v20  ;;  %v878_v41 = vcombine.high %v7934_v38, %v7934_v38  ;;  %1972 = vst [vmem:[#allocation2 + $0x6d8] sm:$0x3] %v1940_v9  ;;  %v1899_v25 = vcombine.high %v8021_v24, %v8021_v24  ;;  %v8985_v44 = vld [vmem:[#allocation18_spill] sm:$0xff]  ;;  %v8989_v16 = vld [vmem:[#allocation23_spill] sm:$0xff] }
 0x14d   :  { %v8081_v10 = vmul.f32 %v8982_v39, %v976_v8  ;;  %v8084_v45 = vmul.f32 %v976_v8, %v8983_v47  ;;  %v964_v2 = vadd.f32 %v948_v37, %v772_v36  ;;  %v716_v0 = vrot.slane %v702_v27, %v7451_v58  ;;  %v1868_v54 = vld [vmem:[#allocation2 + $0x3a0] sm:$0x3]  ;;  %v1842_v39 = vld [vmem:[#allocation2 + $0x18] sm:$0x3] }
 0x14e   :  { %1957 = vst [vmem:[#allocation2 + $0x440] sm:$0x3] %v1925_v35  ;;  %v978_v40 = vsub.f32 0.0, %v962_v12  ;;  %v892_v62 = vrot.slane %v878_v41, %v7451_v58  ;;  %v717_v38 = vcombine.high %v7952_v63, %v7952_v63  ;;  %v1944_v51 = vadd.f32 %v1899_v25, %v1864_v21 }
 0x14f   :  { %v1929_v50 = vadd.f32 %v1849_v31, %v8081_v10  ;;  %v980_v53 = vsub.f32 0.0, %v964_v2  ;;  %v893_v34 = vcombine.high %v7966_v29, %v7966_v29  ;;  %v774_v56 = vmul.f32 %v716_v0, %v8986_v5  ;;  %v8990_v31 = vld [vmem:[#allocation31_spill] sm:$0xff]  ;;  %v1850_v0 = vld [vmem:[#allocation2 + $0x318] sm:$0x3] }
 0x150   :  { %v8096_v49 = vmul.f32 %v8984_v17, %v978_v40  ;;  %v8099_v52 = vmul.f32 %v978_v40, %v8985_v44  ;;  %v8987_v61 = vsub.f32 1.0, %v8986_v5  ;;  %1976 = vst [vmem:[#allocation2 + $0xa0] sm:$0x3] %v1944_v51  ;;  %v731_v29 = vrot.slane %v717_v38, %v7451_v58  ;;  %v8994_v44 = vld [vmem:[#allocation36_spill] sm:$0xff] }
 0x151   :  { %1961 = vst [vmem:[#allocation2 + $0x490] sm:$0x3] %v1929_v50  ;;  %v8105_v20 = vmul.f32 %v8988_v46, %v980_v53  ;;  %v8108_v15 = vmul.f32 %v980_v53, %v8989_v16  ;;  %v907_v8 = vrot.slane %v893_v34, %v7451_v58  ;;  %v1901_v37 = vcombine.high %v8033_v32, %v8033_v32  ;;  %v8992_v53 = vld [vmem:[#allocation32_spill] sm:$0xff] }
 0x152   :  { %v950_v63 = vmul.f32 %v892_v62, %v8987_v61  ;;  %v1933_v36 = vadd.f32 %v1853_v48, %v8096_v49  ;;  %v732_v9 = vcombine.high %v7968_v43, %v7968_v43  ;;  %v776_v12 = vmul.f32 %v731_v29, %v8990_v31  ;;  %v1846_v43 = vld [vmem:[#allocation2 + $0x378] sm:$0x3]  ;;  %v1861_v62 = vld [vmem:[#allocation2 + $0x670] sm:$0x3]  ;;  %v8993_v34 = vld [vmem:[#allocation28_spill] sm:$0xff] }
 0x153   :  { %v1937_v35 = vadd.f32 %v1857_v3, %v8105_v20  ;;  %v8991_v27 = vsub.f32 1.0, %v8990_v31  ;;  %v908_v21 = vcombine.high %v7971_v60, %v7971_v60  ;;  %v1948_v2 = vadd.f32 %v1901_v37, %v1868_v54  ;;  %v1858_v29 = vld [vmem:[#allocation2 + $0x60] sm:$0x3] }
 0x154   :  { %v966_v7 = vadd.f32 %v950_v63, %v774_v56  ;;  %1965 = vst [vmem:[#allocation2 + $0x6d0] sm:$0x3] %v1933_v36  ;;  %v746_v25 = vrot.slane %v732_v9, %v7451_v58  ;;  %v1888_v40 = vcombine.high %v8027_v1, %v8027_v1  ;;  %v1890_v48 = vcombine.high %v8064_v11, %v8064_v11  ;;  %v1854_v56 = vld [vmem:[#allocation2 + $0x320] sm:$0x3] }
 0x155   :  { %v952_v41 = vmul.f32 %v907_v8, %v8991_v27  ;;  %1969 = vst [vmem:[#allocation2 + $0x598] sm:$0x3] %v1937_v35  ;;  %v922_v50 = vrot.slane %v908_v21, %v7451_v58  ;;  %v1892_v60 = vcombine.high %v8081_v10, %v8081_v10  ;;  %1980 = vst [vmem:[#allocation2 + $0x3a0] sm:$0x3] %v1948_v2  ;;  %v8995_v58 = vsub.f32 1.0, %v8994_v44  ;;  %v8996_v35 = vld [vmem:[#allocation37_spill] sm:$0xff] }
 0x156   :  { %v982_v47 = vsub.f32 0.0, %v966_v7  ;;  %v778_v3 = vmul.f32 %v746_v25, %v8994_v44  ;;  %v1922_v5 = vadd.f32 %v1888_v40, %v1842_v39  ;;  %v1926_v46 = vadd.f32 %v1890_v48, %v1846_v43  ;;  %v1862_v8 = vld [vmem:[#allocation2 + $0x348] sm:$0x3]  ;;  %v1865_v36 = vld [vmem:[#allocation2 + $0x1a0] sm:$0x3]  ;;  %v8999_v43 = vld [vmem:[#allocation25_spill] sm:$0xff] }
 0x157   :  { %v968_v38 = vadd.f32 %v952_v41, %v776_v12  ;;  %v954_v63 = vmul.f32 %v922_v50, %v8995_v58  ;;  %v1930_v16 = vadd.f32 %v1892_v60, %v1850_v0  ;;  %v1894_v7 = vcombine.high %v8096_v49, %v8096_v49  ;;  %v8997_v12 = vld [vmem:[#allocation33_spill] sm:$0xff]  ;;  %v8998_v21 = vld [vmem:[#allocation20_spill] sm:$0xff]  ;;  %v1866_v40 = vld [vmem:[#allocation2 + $0x260] sm:$0x3] }
 0x158   :  { %v8132_v51 = vmul.f32 %v8992_v53, %v982_v47  ;;  %v8135_v17 = vmul.f32 %v982_v47, %v8993_v34  ;;  %1954 = vst [vmem:[#allocation2 + $0x18] sm:$0x3] %v1922_v5  ;;  %v1896_v37 = vcombine.high %v8105_v20, %v8105_v20  ;;  %1958 = vst [vmem:[#allocation2 + $0x378] sm:$0x3] %v1926_v46  ;;  %v3721_v39 = vrot.slane %v8998_v21, 2  ;;  %v9000_v44 = vld [vmem:[#allocation30_spill] sm:$0xff] }
 0x159   :  { %v984_v61 = vsub.f32 0.0, %v968_v38  ;;  %v970_v41 = vadd.f32 %v954_v63, %v778_v3  ;;  %1962 = vst [vmem:[#allocation2 + $0x318] sm:$0x3] %v1930_v16  ;;  %v1934_v47 = vadd.f32 %v1894_v7, %v1854_v56  ;;  %v3728_v0 = vrot.slane %v8999_v43, 2  ;;  %v1869_v60 = vld [vmem:[#allocation2 + $0x538] sm:$0x3] }
 0x15a   :  { %v1941_v54 = vadd.f32 %v1861_v62, %v8132_v51  ;;  %v1898_v9 = vcombine.high %v8132_v51, %v8132_v51  ;;  %v1938_v2 = vadd.f32 %v1896_v37, %v1858_v29  ;;  %v3722_v48 = vadd.f32 %v3721_v39, %v8998_v21  ;;  %v3691_v53 = vld [vmem:[#allocation2 + $0x3d0] sm:$0x3]  ;;  %v9001_v5 = vld [vmem:[#allocation11_spill] sm:$0xff]  ;;  %v9003_v58 = vld [vmem:[#allocation16_spill] sm:$0xff] }
 0x15b   :  { %v8148_v31 = vmul.f32 %v8996_v35, %v984_v61  ;;  %v8151_v27 = vmul.f32 %v984_v61, %v8997_v12  ;;  %v986_v38 = vsub.f32 0.0, %v970_v41  ;;  %1966 = vst [vmem:[#allocation2 + $0x320] sm:$0x3] %v1934_v47  ;;  %v3729_v34 = vadd.f32 %v3728_v0, %v8999_v43  ;;  %v9004_v46 = vld [vmem:[#allocation39_spill] sm:$0xff]  ;;  %v9006_v29 = vld [vmem:[#allocation38_spill] sm:$0xff] }
 0x15c   :  { %1973 = vst [vmem:[#allocation2 + $0x670] sm:$0x3] %v1941_v54  ;;  %v1942_v25 = vadd.f32 %v1898_v9, %v1862_v8  ;;  %1970 = vst [vmem:[#allocation2 + $0x60] sm:$0x3] %v1938_v2  ;;  %v3735_v3 = vrot.slane %v9000_v44, 2  ;;  %v9002_v56 = vrot.slane %v9001_v5, 4 }
 0x15d   :  { %v1945_v62 = vadd.f32 %v1865_v36, %v8148_v31  ;;  %v1900_v50 = vcombine.high %v8148_v31, %v8148_v31  ;;  %v3747_v63 = vrot.slane %v9003_v58, 4  ;;  %v8166_v16 = vmul.f32 %v9004_v46, %v986_v38  ;;  %v1870_v36 = vld [vmem:[#allocation2 + $0x3c0] sm:$0x3] }
 0x15e   :  { %1974 = vst [vmem:[#allocation2 + $0x348] sm:$0x3] %v1942_v25  ;;  %v3741_v61 = vadd.f32 %v9002_v56, %v9001_v5  ;;  %v8169_v8 = vmul.f32 %v986_v38, %v9006_v29  ;;  %v3723_v7 = vrot.slane %v3722_v48, 1  ;;  %v3692_v37 = vld [vmem:[#allocation2 + $0x80] sm:$0x3]  ;;  %v3730_v35 = vrot.slane %v3729_v34, 1 }
 0x15f   :  { %1977 = vst [vmem:[#allocation2 + $0x1a0] sm:$0x3] %v1945_v62  ;;  %9005 = vst [vmem:[#allocation40_spill] sm:$0xff] %v8166_v16  ;;  %v1946_v54 = vadd.f32 %v1900_v50, %v1866_v40  ;;  %v3693_v9 = vld [vmem:[#allocation2 + $0x6a0] sm:$0x3]  ;;  %v3736_v12 = vadd.f32 %v3735_v3, %v9000_v44  ;;  %v3748_v21 = vadd.f32 %v3747_v63, %v9003_v58  ;;  %v3753_v25 = vsel %vm3218_vm0, %v3691_v53, 0.0 }
 0x160   :  { %9007 = vst [vmem:[#allocation3_spill] sm:$0xff] %v8169_v8  ;;  %v3742_v41 = vrot.slane %v3741_v61, 2  ;;  %v1949_v39 = vadd.f32 %v1869_v60, %v8166_v16  ;;  %v1902_v47 = vcombine.high %v8166_v16, %v8166_v16  ;;  %v3724_v2 = vadd.f32 %v3723_v7, %v3722_v48  ;;  %v3694_v38 = vld [vmem:[#allocation2 + $0x90] sm:$0x3]  ;;  %v3695_v46 = vld [vmem:[#allocation2 + $0x5c0] sm:$0x3] }
 0x161   :  { %1978 = vst [vmem:[#allocation2 + $0x260] sm:$0x3] %v1946_v54  ;;  %v3731_v40 = vadd.f32 %v3730_v35, %v3729_v34  ;;  %v3737_v43 = vrot.slane %v3736_v12, 1  ;;  %v3749_v62 = vrot.slane %v3748_v21, 2  ;;  %v3754_v44 = vrot.slane %v3753_v25, 4 }
 0x162   :  { %v3743_v0 = vadd.f32 %v3742_v41, %v3741_v61  ;;  %1981 = vst [vmem:[#allocation2 + $0x538] sm:$0x3] %v1949_v39  ;;  %v1950_v50 = vadd.f32 %v1902_v47, %v1870_v36  ;;  %v3760_v3 = vsel %vm3218_vm0, %v3692_v37, 0.0  ;;  %v3767_v5 = vsel %vm3218_vm0, %v3693_v9, 0.0  ;;  %v3696_v36 = vld [vmem:[#allocation2 + $0x5d0] sm:$0x3] }
 0x163   :  { %v3738_v60 = vadd.f32 %v3737_v43, %v3736_v12  ;;  %v3750_v58 = vadd.f32 %v3749_v62, %v3748_v21  ;;  %v3761_v63 = vrot.slane %v3760_v3, 4  ;;  %v3755_v48 = vadd.f32 %v3754_v44, %v3753_v25  ;;  %v9008_v39 = vld [vmem:[#allocation7_spill] sm:$0xff]  ;;  %v3697_v62 = vld [vmem:[#allocation2 + $0x4f0] sm:$0x3] }
 0x164   :  { %v3744_v56 = vrot.slane %v3743_v0, 1  ;;  %1982 = vst [vmem:[#allocation2 + $0x3c0] sm:$0x3] %v1950_v50  ;;  %v3768_v53 = vrot.slane %v3767_v5, 4  ;;  %v3974_v34 = vcombine.low %v3724_v2, %v3731_v40  ;;  %v3774_v61 = vsel %vm3218_vm0, %v3694_v38, 0.0 }
 0x165   :  { %v3751_v54 = vrot.slane %v3750_v58, 1  ;;  %v3762_v7 = vadd.f32 %v3761_v63, %v3760_v3  ;;  %v3775_v35 = vrot.slane %v3774_v61, 4  ;;  %v3756_v41 = vrot.slane %v3755_v48, 2 }
 0x166   :  { %v3745_v29 = vadd.f32 %v3744_v56, %v3743_v0  ;;  %v3769_v37 = vadd.f32 %v3768_v53, %v3767_v5  ;;  %v3984_v9 = vrot.slane %v3974_v34, %v9008_v39  ;;  %v3781_v12 = vsel %vm3218_vm0, %v3695_v46, 0.0 }
 0x167   :  { %v3752_v21 = vadd.f32 %v3751_v54, %v3750_v58  ;;  %v3763_v47 = vrot.slane %v3762_v7, 2  ;;  %v3776_v25 = vadd.f32 %v3775_v35, %v3774_v61  ;;  %v3757_v50 = vadd.f32 %v3756_v41, %v3755_v48  ;;  %v3699_v35 = vld [vmem:[#allocation2 + $0x220] sm:$0x3] }
 0x168   :  { %v3975_v43 = vcombine.low %v3738_v60, %v3745_v29  ;;  %v3770_v2 = vrot.slane %v3769_v37, 2  ;;  %v3782_v40 = vrot.slane %v3781_v12, 4  ;;  %v3788_v0 = vsel %vm3218_vm0, %v3696_v36, 0.0  ;;  %v3698_v60 = vld [vmem:[#allocation2 + $0x610] sm:$0x3] }
 0x169   :  { %v3764_v38 = vadd.f32 %v3763_v47, %v3762_v7  ;;  %v3777_v3 = vrot.slane %v3776_v25, 2  ;;  %v3789_v56 = vrot.slane %v3788_v0, 4  ;;  %v3758_v5 = vrot.slane %v3757_v50, 1 }
 0x16a   :  { %v3991_v44 = vrot.slane %v3975_v43, %v9008_v39  ;;  %v3771_v63 = vadd.f32 %v3770_v2, %v3769_v37  ;;  %v3783_v53 = vadd.f32 %v3782_v40, %v3781_v12  ;;  %v3795_v46 = vsel %vm3218_vm0, %v3697_v62, 0.0  ;;  %v3700_v12 = vld [vmem:[#allocation2 + $0x58] sm:$0x3] }
 0x16b   :  { %v3765_v58 = vrot.slane %v3764_v38, 1  ;;  %v3778_v29 = vadd.f32 %v3777_v3, %v3776_v25  ;;  %v3790_v61 = vadd.f32 %v3789_v56, %v3788_v0  ;;  %v3759_v48 = vadd.f32 %v3758_v5, %v3757_v50  ;;  %v3701_v3 = vld [vmem:[#allocation2 + $0x3f0] sm:$0x3] }
 0x16c   :  { %v4006_v34 = vcombine.low %v3984_v9, %v3991_v44  ;;  %v3772_v54 = vrot.slane %v3771_v63, 1  ;;  %v3784_v41 = vrot.slane %v3783_v53, 2  ;;  %v3796_v36 = vrot.slane %v3795_v46, 4 }
 0x16d   :  { %v3766_v7 = vadd.f32 %v3765_v58, %v3764_v38  ;;  %v3779_v43 = vrot.slane %v3778_v29, 1  ;;  %v3791_v8 = vrot.slane %v3790_v61, 2  ;;  %v3976_v37 = vcombine.low %v3752_v21, %v3759_v48 }
 0x16e   :  { %v4014_v47 = vrot.slane %v4006_v34, %v9008_v39  ;;  %v3773_v16 = vadd.f32 %v3772_v54, %v3771_v63  ;;  %v3785_v2 = vadd.f32 %v3784_v41, %v3783_v53  ;;  %v3797_v62 = vadd.f32 %v3796_v36, %v3795_v46 }
 0x16f   :  { %v3780_v40 = vadd.f32 %v3779_v43, %v3778_v29  ;;  %v3792_v9 = vadd.f32 %v3791_v8, %v3790_v61  ;;  %v3802_v25 = vsel %vm3218_vm0, %v3698_v60, 0.0  ;;  %v3809_v50 = vsel %vm3218_vm0, %v3699_v35, 0.0  ;;  %v3702_v29 = vld [vmem:[#allocation2 + $0x5e8] sm:$0x3] }
 0x170   :  { %v3977_v0 = vcombine.low %v3766_v7, %v3773_v16  ;;  %v3998_v44 = vrot.slane %v3976_v37, %v9008_v39  ;;  %v3786_v38 = vrot.slane %v3785_v2, 1  ;;  %v3798_v56 = vrot.slane %v3797_v62, 2 }
 0x171   :  { %v3793_v5 = vrot.slane %v3792_v9, 1  ;;  %v3803_v58 = vrot.slane %v3802_v25, 4  ;;  %v3810_v34 = vrot.slane %v3809_v50, 4  ;;  %v3816_v21 = vsel %vm3218_vm0, %v3700_v12, 0.0 }
 0x172   :  { %v4005_v63 = vrot.slane %v3977_v0, %v9008_v39  ;;  %v3787_v53 = vadd.f32 %v3786_v38, %v3785_v2  ;;  %v3799_v46 = vadd.f32 %v3798_v56, %v3797_v62  ;;  %v3817_v8 = vrot.slane %v3816_v21, 4  ;;  %v3703_v56 = vld [vmem:[#allocation2 + $0xb0] sm:$0x3] }
 0x173   :  { %v3794_v60 = vadd.f32 %v3793_v5, %v3792_v9  ;;  %v3804_v61 = vadd.f32 %v3803_v58, %v3802_v25  ;;  %v3811_v48 = vadd.f32 %v3810_v34, %v3809_v50  ;;  %v3823_v16 = vsel %vm3218_vm0, %v3701_v3, 0.0 }
 0x174   :  { %v4007_v54 = vcombine.low %v3998_v44, %v4005_v63  ;;  %v3800_v35 = vrot.slane %v3799_v46, 1  ;;  %v3818_v41 = vadd.f32 %v3817_v8, %v3816_v21  ;;  %v3824_v36 = vrot.slane %v3823_v16, 4  ;;  %v3704_v21 = vld [vmem:[#allocation2 + $0x368] sm:$0x3] }
 0x175   :  { %v3805_v7 = vrot.slane %v3804_v61, 2  ;;  %v3812_v43 = vrot.slane %v3811_v48, 2  ;;  %v4023_v37 = vcombine.low %v3780_v40, %v3787_v53  ;;  %v3830_v12 = vsel %vm3218_vm0, %v3702_v29, 0.0 }
 0x176   :  { %v4021_v0 = vrot.slane %v4007_v54, %v9008_v39  ;;  %v3801_v2 = vadd.f32 %v3800_v35, %v3799_v46  ;;  %v3819_v62 = vrot.slane %v3818_v41, 2  ;;  %v3825_v38 = vadd.f32 %v3824_v36, %v3823_v16 }
 0x177   :  { %v3806_v9 = vadd.f32 %v3805_v7, %v3804_v61  ;;  %v3813_v25 = vadd.f32 %v3812_v43, %v3811_v48  ;;  %v4033_v50 = vrot.slane %v4023_v37, %v9008_v39  ;;  %v3831_v3 = vrot.slane %v3830_v12, 4  ;;  %v3705_v61 = vld [vmem:[#allocation2 + $0x4b0] sm:$0x3]  ;;  %v3706_v43 = vld [vmem:[#allocation2 + $0x2d8] sm:$0x3] }
 0x178   :  { %v4022_v44 = vcombine.low %v4014_v47, %v4021_v0  ;;  %v3820_v5 = vadd.f32 %v3819_v62, %v3818_v41  ;;  %v3826_v58 = vrot.slane %v3825_v38, 2  ;;  %v4024_v34 = vcombine.low %v3794_v60, %v3801_v2 }
 0x179   :  { %v3807_v63 = vrot.slane %v3806_v9, 1  ;;  %v3814_v40 = vrot.slane %v3813_v25, 1  ;;  %v3832_v53 = vadd.f32 %v3831_v3, %v3830_v12  ;;  %v3837_v8 = vsel %vm3218_vm0, %v3703_v56, 0.0  ;;  %v3707_v3 = vld [vmem:[#allocation2 + $0x410] sm:$0x3] }
 0x17a   :  { %6781 = vst [vmem:[%s8806_s8 + $0x1] ss:$8 sm:$0xf] %v4022_v44  ;;  %6782 = vst [vmem:[%s8806_s8 + $0x1] ss:$8 sm:$0xf0] %v4022_v44  ;;  %v3827_v29 = vadd.f32 %v3826_v58, %v3825_v38  ;;  %v4040_v47 = vrot.slane %v4024_v34, %v9008_v39 }
 0x17b   :  { %v3821_v46 = vrot.slane %v3820_v5, 1  ;;  %v3838_v60 = vrot.slane %v3837_v8, 4  ;;  %v3808_v48 = vadd.f32 %v3807_v63, %v3806_v9  ;;  %v3815_v16 = vadd.f32 %v3814_v40, %v3813_v25  ;;  %v3708_v44 = vld [vmem:[#allocation2 + $0x408] sm:$0x3]  ;;  %v3709_v63 = vld [vmem:[#allocation2 + $0x4e0] sm:$0x3] }
 0x17c   :  { %v3833_v54 = vrot.slane %v3832_v53, 2  ;;  %v3844_v35 = vsel %vm3218_vm0, %v3704_v21, 0.0  ;;  %v3828_v36 = vrot.slane %v3827_v29, 1  ;;  %v4055_v7 = vcombine.low %v4033_v50, %v4040_v47 }
 0x17d   :  { %v3822_v41 = vadd.f32 %v3821_v46, %v3820_v5  ;;  %v3839_v37 = vadd.f32 %v3838_v60, %v3837_v8  ;;  %v4025_v12 = vcombine.low %v3808_v48, %v3815_v16  ;;  %v3845_v2 = vrot.slane %v3844_v35, 4 }
 0x17e   :  { %v3834_v0 = vadd.f32 %v3833_v54, %v3832_v53  ;;  %v3851_v62 = vsel %vm3218_vm0, %v3705_v61, 0.0  ;;  %v3829_v38 = vadd.f32 %v3828_v36, %v3827_v29  ;;  %v4063_v56 = vrot.slane %v4055_v7, %v9008_v39 }
 0x17f   :  { %v3840_v9 = vrot.slane %v3839_v37, 2  ;;  %v3852_v25 = vrot.slane %v3851_v62, 4  ;;  %v4047_v58 = vrot.slane %v4025_v12, %v9008_v39  ;;  %v3846_v5 = vadd.f32 %v3845_v2, %v3844_v35 }
 0x180   :  { %v3835_v34 = vrot.slane %v3834_v0, 1  ;;  %v3858_v50 = vsel %vm3218_vm0, %v3706_v43, 0.0  ;;  %v4026_v21 = vcombine.low %v3822_v41, %v3829_v38  ;;  %v3865_v29 = vsel %vm3218_vm0, %v3707_v3, 0.0 }
 0x181   :  { %v3841_v40 = vadd.f32 %v3840_v9, %v3839_v37  ;;  %v3853_v53 = vadd.f32 %v3852_v25, %v3851_v62  ;;  %v3859_v8 = vrot.slane %v3858_v50, 4  ;;  %v3847_v47 = vrot.slane %v3846_v5, 2 }
 0x182   :  { %v3836_v46 = vadd.f32 %v3835_v34, %v3834_v0  ;;  %v3872_v61 = vsel %vm3218_vm0, %v3708_v44, 0.0  ;;  %v4054_v60 = vrot.slane %v4026_v21, %v9008_v39  ;;  %v3866_v35 = vrot.slane %v3865_v29, 4  ;;  %v3710_v21 = vld [vmem:[#allocation2 + $0x358] sm:$0x3] }
 0x183   :  { %v3842_v48 = vrot.slane %v3841_v40, 1  ;;  %v3854_v16 = vrot.slane %v3853_v53, 2  ;;  %v3860_v54 = vadd.f32 %v3859_v8, %v3858_v50  ;;  %v3848_v36 = vadd.f32 %v3847_v47, %v3846_v5 }
 0x184   :  { %v3873_v7 = vrot.slane %v3872_v61, 4  ;;  %v3879_v41 = vsel %vm3218_vm0, %v3709_v63, 0.0  ;;  %v4056_v43 = vcombine.low %v4047_v58, %v4054_v60  ;;  %v3867_v62 = vadd.f32 %v3866_v35, %v3865_v29 }
 0x185   :  { %v3843_v37 = vadd.f32 %v3842_v48, %v3841_v40  ;;  %v3855_v12 = vadd.f32 %v3854_v16, %v3853_v53  ;;  %v3861_v2 = vrot.slane %v3860_v54, 2  ;;  %v3849_v0 = vrot.slane %v3848_v36, 1  ;;  %v3712_v48 = vld [vmem:[#allocation2 + $0x188] sm:$0x3]  ;;  %v3713_v16 = vld [vmem:[#allocation2 + $0x640] sm:$0x3] }
 0x186   :  { %v3874_v38 = vadd.f32 %v3873_v7, %v3872_v61  ;;  %v3880_v3 = vrot.slane %v3879_v41, 4  ;;  %v4070_v44 = vrot.slane %v4056_v43, %v9008_v39  ;;  %v3868_v5 = vrot.slane %v3867_v62, 2 }
 0x187   :  { %v3856_v9 = vrot.slane %v3855_v12, 1  ;;  %v3862_v25 = vadd.f32 %v3861_v2, %v3860_v54  ;;  %v4072_v34 = vcombine.low %v3836_v46, %v3843_v37  ;;  %v3850_v50 = vadd.f32 %v3849_v0, %v3848_v36  ;;  %v3714_v2 = vld [vmem:[#allocation2 + $0x528] sm:$0x3] }
 0x188   :  { %v3875_v8 = vrot.slane %v3874_v38, 2  ;;  %v3881_v47 = vadd.f32 %v3880_v3, %v3879_v41  ;;  %v4071_v63 = vcombine.low %v4063_v56, %v4070_v44  ;;  %v3869_v60 = vadd.f32 %v3868_v5, %v3867_v62 }
 0x189   :  { %v3857_v58 = vadd.f32 %v3856_v9, %v3855_v12  ;;  %v3863_v40 = vrot.slane %v3862_v25, 1  ;;  %v4082_v53 = vrot.slane %v4072_v34, %v9008_v39  ;;  %v3886_v35 = vsel %vm3218_vm0, %v3710_v21, 0.0 }
 0x18a   :  { %v3876_v29 = vadd.f32 %v3875_v8, %v3874_v38  ;;  %v3882_v61 = vrot.slane %v3881_v47, 2  ;;  %6783 = vst [vmem:[%s8806_s8 + $0x41] ss:$8 sm:$0xf] %v4071_v63  ;;  %v3887_v54 = vrot.slane %v3886_v35, 4  ;;  %v3893_v36 = vsel %vm3218_vm0, %v3711_v55, 0.0 }
 0x18b   :  { %6784 = vst [vmem:[%s8806_s8 + $0x41] ss:$8 sm:$0xf0] %v4071_v63  ;;  %v3864_v56 = vadd.f32 %v3863_v40, %v3862_v25  ;;  %v4073_v46 = vcombine.low %v3850_v50, %v3857_v58  ;;  %v3870_v7 = vrot.slane %v3869_v60, 1  ;;  %v3894_v37 = vrot.slane %v3893_v36, 4 }
 0x18c   :  { %v3877_v41 = vrot.slane %v3876_v29, 1  ;;  %v3883_v43 = vadd.f32 %v3882_v61, %v3881_v47  ;;  %v3888_v0 = vadd.f32 %v3887_v54, %v3886_v35  ;;  %v3900_v62 = vsel %vm3218_vm0, %v3712_v48, 0.0  ;;  %v3715_v47 = vld [vmem:[#allocation2 + $0x5d8] sm:$0x3] }
 0x18d   :  { %v4089_v12 = vrot.slane %v4073_v46, %v9008_v39  ;;  %v3907_v38 = vsel %vm3218_vm0, %v3713_v16, 0.0  ;;  %v3871_v3 = vadd.f32 %v3870_v7, %v3869_v60  ;;  %v3895_v25 = vadd.f32 %v3894_v37, %v3893_v36 }
 0x18e   :  { %v3878_v44 = vadd.f32 %v3877_v41, %v3876_v29  ;;  %v3884_v9 = vrot.slane %v3883_v43, 1  ;;  %v3889_v21 = vrot.slane %v3888_v0, 2  ;;  %v3901_v50 = vrot.slane %v3900_v62, 4  ;;  %v3716_v29 = vld [vmem:[#allocation2 + $0x650] sm:$0x3] }
 0x18f   :  { %v4104_v34 = vcombine.low %v4082_v53, %v4089_v12  ;;  %v3908_v55 = vrot.slane %v3907_v38, 4  ;;  %v4074_v8 = vcombine.low %v3864_v56, %v3871_v3  ;;  %v3896_v63 = vrot.slane %v3895_v25, 2 }
 0x190   :  { %v3885_v5 = vadd.f32 %v3884_v9, %v3883_v43  ;;  %v3914_v58 = vsel %vm3218_vm0, %v3714_v2, 0.0  ;;  %v3890_v61 = vadd.f32 %v3889_v21, %v3888_v0  ;;  %v3902_v48 = vadd.f32 %v3901_v50, %v3900_v62  ;;  %v3717_v43 = vld [vmem:[#allocation2 + $0x340] sm:$0x3] }
 0x191   :  { %v4112_v40 = vrot.slane %v4104_v34, %v9008_v39  ;;  %v3909_v35 = vadd.f32 %v3908_v55, %v3907_v38  ;;  %v4096_v60 = vrot.slane %v4074_v8, %v9008_v39  ;;  %v3897_v46 = vadd.f32 %v3896_v63, %v3895_v25 }
 0x192   :  { %v4075_v16 = vcombine.low %v3878_v44, %v3885_v5  ;;  %v3915_v53 = vrot.slane %v3914_v58, 4  ;;  %v3891_v54 = vrot.slane %v3890_v61, 1  ;;  %v3903_v36 = vrot.slane %v3902_v48, 2 }
 0x193   :  { %v3910_v7 = vrot.slane %v3909_v35, 2  ;;  %v3921_v56 = vsel %vm3218_vm0, %v3715_v47, 0.0  ;;  %v3898_v37 = vrot.slane %v3897_v46, 1  ;;  %v3928_v3 = vsel %vm3218_vm0, %v3716_v29, 0.0 }
 0x194   :  { %v4103_v41 = vrot.slane %v4075_v16, %v9008_v39  ;;  %v3916_v12 = vadd.f32 %v3915_v53, %v3914_v58  ;;  %v3922_v2 = vrot.slane %v3921_v56, 4  ;;  %v3892_v0 = vadd.f32 %v3891_v54, %v3890_v61  ;;  %v4186_v16 = vld [vmem:[#allocation2 + $0x6b0] sm:$0x3] }
 0x195   :  { %v3904_v62 = vadd.f32 %v3903_v36, %v3902_v48  ;;  %v3911_v38 = vadd.f32 %v3910_v7, %v3909_v35  ;;  %v3899_v9 = vadd.f32 %v3898_v37, %v3897_v46  ;;  %v3929_v55 = vrot.slane %v3928_v3, 4  ;;  %v4187_v36 = vld [vmem:[#allocation2 + $0x2b8] sm:$0x3]  ;;  %v4188_v7 = vld [vmem:[#allocation2 + $0x5b0] sm:$0x3] }
 0x196   :  { %v4105_v44 = vcombine.low %v4096_v60, %v4103_v41  ;;  %v3917_v25 = vrot.slane %v3916_v12, 2  ;;  %v3923_v34 = vadd.f32 %v3922_v2, %v3921_v56  ;;  %v3935_v5 = vsel %vm3218_vm0, %v3717_v43, 0.0 }
 0x197   :  { %v3905_v21 = vrot.slane %v3904_v62, 1  ;;  %v3912_v50 = vrot.slane %v3911_v38, 1  ;;  %v3936_v58 = vrot.slane %v3935_v5, 4  ;;  %v3930_v35 = vadd.f32 %v3929_v55, %v3928_v3 }
 0x198   :  { %v4119_v8 = vrot.slane %v4105_v44, %v9008_v39  ;;  %v3918_v47 = vadd.f32 %v3917_v25, %v3916_v12  ;;  %v3924_v63 = vrot.slane %v3923_v34, 2  ;;  %v4121_v53 = vcombine.low %v3892_v0, %v3899_v9  ;;  %v4189_v0 = vld [vmem:[#allocation2 + $0x6f0] sm:$0x3] }
 0x199   :  { %v3906_v61 = vadd.f32 %v3905_v21, %v3904_v62  ;;  %v3913_v48 = vadd.f32 %v3912_v50, %v3911_v38  ;;  %v3937_v54 = vadd.f32 %v3936_v58, %v3935_v5  ;;  %v3931_v56 = vrot.slane %v3930_v35, 2 }
 0x19a   :  { %v4120_v29 = vcombine.low %v4112_v40, %v4119_v8  ;;  %v3919_v60 = vrot.slane %v3918_v47, 1  ;;  %v3925_v46 = vadd.f32 %v3924_v63, %v3923_v34  ;;  %v4131_v43 = vrot.slane %v4121_v53, %v9008_v39 }
 0x19b   :  { %v4122_v41 = vcombine.low %v3906_v61, %v3913_v48  ;;  %v4218_v37 = vsel %vm3218_vm0, %v4186_v16, 0.0  ;;  %v3938_v2 = vrot.slane %v3937_v54, 2  ;;  %v3932_v38 = vadd.f32 %v3931_v56, %v3930_v35  ;;  %v4190_v16 = vld [vmem:[#allocation2 + $0x550] sm:$0x3]  ;;  %v4191_v61 = vld [vmem:[#allocation2 + $0x688] sm:$0x3] }
 0x19c   :  { %6785 = vst [vmem:[%s8806_s8 + $0x81] ss:$8 sm:$0xf] %v4120_v29  ;;  %6786 = vst [vmem:[%s8806_s8 + $0x81] ss:$8 sm:$0xf0] %v4120_v29  ;;  %v3920_v40 = vadd.f32 %v3919_v60, %v3918_v47 }
 0x19d   :  { %v3926_v12 = vrot.slane %v3925_v46, 1  ;;  %v4219_v62 = vrot.slane %v4218_v37, 4  ;;  %v4138_v3 = vrot.slane %v4122_v41, %v9008_v39  ;;  %v4225_v44 = vsel %vm3218_vm0, %v4187_v36, 0.0 }
 0x19e   :  { %v4232_v9 = vsel %vm3218_vm0, %v4188_v7, 0.0  ;;  %v3939_v34 = vadd.f32 %v3938_v2, %v3937_v54  ;;  %v4226_v50 = vrot.slane %v4225_v44, 4  ;;  %v3933_v55 = vrot.slane %v3932_v38, 1  ;;  %v4192_v7 = vld [vmem:[#allocation2 + $0xb8] sm:$0x3] }
 0x19f   :  { %v3927_v25 = vadd.f32 %v3926_v12, %v3925_v46  ;;  %v4220_v21 = vadd.f32 %v4219_v62, %v4218_v37  ;;  %v4153_v5 = vcombine.low %v4131_v43, %v4138_v3  ;;  %v4233_v8 = vrot.slane %v4232_v9, 4  ;;  %v4193_v3 = vld [vmem:[#allocation2 + $0x128] sm:$0x3] }
 0x1a0   :  { %v4239_v47 = vsel %vm3218_vm0, %v4189_v0, 0.0  ;;  %v3940_v63 = vrot.slane %v3939_v34, 1  ;;  %v4227_v35 = vadd.f32 %v4226_v50, %v4225_v44  ;;  %v3934_v53 = vadd.f32 %v3933_v55, %v3932_v38 }
 0x1a1   :  { %v4123_v58 = vcombine.low %v3920_v40, %v3927_v25  ;;  %v4221_v48 = vrot.slane %v4220_v21, 2  ;;  %v4161_v29 = vrot.slane %v4153_v5, %v9008_v39  ;;  %v4234_v60 = vadd.f32 %v4233_v8, %v4232_v9 }
 0x1a2   :  { %v4240_v36 = vrot.slane %v4239_v47, 4  ;;  %v3941_v46 = vadd.f32 %v3940_v63, %v3939_v34  ;;  %v4228_v41 = vrot.slane %v4227_v35, 2  ;;  %v4246_v12 = vsel %vm3218_vm0, %v4190_v16, 0.0 }
 0x1a3   :  { %v4145_v54 = vrot.slane %v4123_v58, %v9008_v39  ;;  %v4222_v56 = vadd.f32 %v4221_v48, %v4220_v21  ;;  %v4235_v43 = vrot.slane %v4234_v60, 2  ;;  %v4253_v40 = vsel %vm3218_vm0, %v4191_v61, 0.0 }
 0x1a4   :  { %v4241_v37 = vadd.f32 %v4240_v36, %v4239_v47  ;;  %v4124_v2 = vcombine.low %v3934_v53, %v3941_v46  ;;  %v4229_v62 = vadd.f32 %v4228_v41, %v4227_v35  ;;  %v4247_v38 = vrot.slane %v4246_v12, 4  ;;  %v4194_v53 = vld [vmem:[#allocation2 + $0x648] sm:$0x3] }
 0x1a5   :  { %v4223_v0 = vrot.slane %v4222_v56, 1  ;;  %v4236_v44 = vadd.f32 %v4235_v43, %v4234_v60  ;;  %v4254_v25 = vrot.slane %v4253_v40, 4  ;;  %v4260_v34 = vsel %vm3218_vm0, %v4192_v7, 0.0 }
 0x1a6   :  { %v4242_v9 = vrot.slane %v4241_v37, 2  ;;  %v4152_v50 = vrot.slane %v4124_v2, %v9008_v39  ;;  %v4230_v55 = vrot.slane %v4229_v62, 1  ;;  %v4248_v5 = vadd.f32 %v4247_v38, %v4246_v12  ;;  %v4196_v38 = vld [vmem:[#allocation2 + $0x88] sm:$0x3] }
 0x1a7   :  { %v4224_v21 = vadd.f32 %v4223_v0, %v4222_v56  ;;  %v4237_v8 = vrot.slane %v4236_v44, 1  ;;  %v4255_v63 = vadd.f32 %v4254_v25, %v4253_v40  ;;  %v4261_v58 = vrot.slane %v4260_v34, 4  ;;  %v4195_v40 = vld [vmem:[#allocation2 + $0x190] sm:$0x3] }
 0x1a8   :  { %v4243_v47 = vadd.f32 %v4242_v9, %v4241_v37  ;;  %v4154_v16 = vcombine.low %v4145_v54, %v4152_v50  ;;  %v4231_v61 = vadd.f32 %v4230_v55, %v4229_v62  ;;  %v4249_v48 = vrot.slane %v4248_v5, 2  ;;  %v4197_v55 = vld [vmem:[#allocation2 + $0x148] sm:$0x3] }
 0x1a9   :  { %v4267_v35 = vsel %vm3218_vm0, %v4193_v3, 0.0  ;;  %v4238_v60 = vadd.f32 %v4237_v8, %v4236_v44  ;;  %v4256_v46 = vrot.slane %v4255_v63, 2  ;;  %v4262_v41 = vadd.f32 %v4261_v58, %v4260_v34 }
 0x1aa   :  { %v4244_v36 = vrot.slane %v4243_v47, 1  ;;  %v4168_v7 = vrot.slane %v4154_v16, %v9008_v39  ;;  %v4250_v43 = vadd.f32 %v4249_v48, %v4248_v5  ;;  %v4268_v56 = vrot.slane %v4267_v35, 4 }
 0x1ab   :  { %v4474_v2 = vcombine.low %v4224_v21, %v4231_v61  ;;  %v4257_v0 = vadd.f32 %v4256_v46, %v4255_v63  ;;  %v4263_v37 = vrot.slane %v4262_v41, 2  ;;  %v4274_v54 = vsel %vm3218_vm0, %v4194_v53, 0.0 }
 0x1ac   :  { %v4245_v12 = vadd.f32 %v4244_v36, %v4243_v47  ;;  %v4169_v62 = vcombine.low %v4161_v29, %v4168_v7  ;;  %v4251_v9 = vrot.slane %v4250_v43, 1  ;;  %v4269_v3 = vadd.f32 %v4268_v56, %v4267_v35  ;;  %v4198_v35 = vld [vmem:[#allocation2 + $0x630] sm:$0x3] }
 0x1ad   :  { %v4484_v44 = vrot.slane %v4474_v2, %v9008_v39  ;;  %v4258_v25 = vrot.slane %v4257_v0, 1  ;;  %v4264_v50 = vadd.f32 %v4263_v37, %v4262_v41  ;;  %v4275_v8 = vrot.slane %v4274_v54, 4  ;;  %v4199_v2 = vld [vmem:[#allocation2 + $0x130] sm:$0x3] }
 0x1ae   :  { %v4475_v34 = vcombine.low %v4238_v60, %v4245_v12  ;;  %6787 = vst [vmem:[%s8806_s8 + $0xc1] ss:$8 sm:$0xf] %v4169_v62  ;;  %6788 = vst [vmem:[%s8806_s8 + $0xc1] ss:$8 sm:$0xf0] %v4169_v62  ;;  %v4252_v21 = vadd.f32 %v4251_v9, %v4250_v43 }
 0x1af   :  { %v4270_v5 = vrot.slane %v4269_v3, 2  ;;  %v4281_v29 = vsel %vm3218_vm0, %v4195_v40, 0.0  ;;  %v4288_v47 = vsel %vm3218_vm0, %v4196_v38, 0.0  ;;  %v4259_v63 = vadd.f32 %v4258_v25, %v4257_v0  ;;  %v4200_v12 = vld [vmem:[#allocation2 + $0x1e8] sm:$0x3] }
 0x1b0   :  { %v4265_v58 = vrot.slane %v4264_v50, 1  ;;  %v4491_v16 = vrot.slane %v4475_v34, %v9008_v39  ;;  %v4276_v61 = vadd.f32 %v4275_v8, %v4274_v54  ;;  %v4282_v53 = vrot.slane %v4281_v29, 4 }
 0x1b1   :  { %v4271_v48 = vadd.f32 %v4270_v5, %v4269_v3  ;;  %v4289_v60 = vrot.slane %v4288_v47, 4  ;;  %v4295_v36 = vsel %vm3218_vm0, %v4197_v55, 0.0  ;;  %v4476_v41 = vcombine.low %v4252_v21, %v4259_v63 }
 0x1b2   :  { %v4266_v46 = vadd.f32 %v4265_v58, %v4264_v50  ;;  %v4506_v7 = vcombine.low %v4484_v44, %v4491_v16  ;;  %v4277_v43 = vrot.slane %v4276_v61, 2  ;;  %v4283_v37 = vadd.f32 %v4282_v53, %v4281_v29  ;;  %v4201_v29 = vld [vmem:[#allocation2 + $0x1f8] sm:$0x3] }
 0x1b3   :  { %v4272_v56 = vrot.slane %v4271_v48, 1  ;;  %v4290_v40 = vadd.f32 %v4289_v60, %v4288_v47  ;;  %v4296_v0 = vrot.slane %v4295_v36, 4  ;;  %v4498_v38 = vrot.slane %v4476_v41, %v9008_v39 }
 0x1b4   :  { %v4514_v54 = vrot.slane %v4506_v7, %v9008_v39  ;;  %v4278_v62 = vadd.f32 %v4277_v43, %v4276_v61  ;;  %v4302_v9 = vsel %vm3218_vm0, %v4198_v35, 0.0  ;;  %v4284_v25 = vrot.slane %v4283_v37, 2 }
 0x1b5   :  { %v4273_v3 = vadd.f32 %v4272_v56, %v4271_v48  ;;  %v4291_v34 = vrot.slane %v4290_v40, 2  ;;  %v4297_v50 = vadd.f32 %v4296_v0, %v4295_v36  ;;  %v4303_v44 = vrot.slane %v4302_v9, 4 }
 0x1b6   :  { %v4279_v55 = vrot.slane %v4278_v62, 1  ;;  %v4309_v8 = vsel %vm3218_vm0, %v4199_v2, 0.0  ;;  %v4316_v21 = vsel %vm3218_vm0, %v4200_v12, 0.0  ;;  %v4285_v47 = vadd.f32 %v4284_v25, %v4283_v37  ;;  %v4202_v12 = vld [vmem:[#allocation2 + $0x338] sm:$0x3] }
 0x1b7   :  { %v4477_v5 = vcombine.low %v4266_v46, %v4273_v3  ;;  %v4292_v63 = vadd.f32 %v4291_v34, %v4290_v40  ;;  %v4298_v58 = vrot.slane %v4297_v50, 2  ;;  %v4304_v53 = vadd.f32 %v4303_v44, %v4302_v9 }
 0x1b8   :  { %v4280_v16 = vadd.f32 %v4279_v55, %v4278_v62  ;;  %v4310_v61 = vrot.slane %v4309_v8, 4  ;;  %v4317_v60 = vrot.slane %v4316_v21, 4  ;;  %v4286_v35 = vrot.slane %v4285_v47, 1 }
 0x1b9   :  { %v4505_v48 = vrot.slane %v4477_v5, %v9008_v39  ;;  %v4293_v41 = vrot.slane %v4292_v63, 1  ;;  %v4299_v36 = vadd.f32 %v4298_v58, %v4297_v50  ;;  %v4305_v7 = vrot.slane %v4304_v53, 2 }
 0x1ba   :  { %v4311_v43 = vadd.f32 %v4310_v61, %v4309_v8  ;;  %v4318_v56 = vadd.f32 %v4317_v60, %v4316_v21  ;;  %v4323_v2 = vsel %vm3218_vm0, %v4201_v29, 0.0  ;;  %v4287_v0 = vadd.f32 %v4286_v35, %v4285_v47  ;;  %v4203_v29 = vld [vmem:[#allocation2 + $0x228] sm:$0x3] }
 0x1bb   :  { %v4507_v46 = vcombine.low %v4498_v38, %v4505_v48  ;;  %v4294_v37 = vadd.f32 %v4293_v41, %v4292_v63  ;;  %v4300_v40 = vrot.slane %v4299_v36, 1  ;;  %v4306_v3 = vadd.f32 %v4305_v7, %v4304_v53  ;;  %v4204_v61 = vld [vmem:[#allocation2 + $0x428] sm:$0x3]  ;;  %v4205_v7 = vld [vmem:[#allocation2 + $0x270] sm:$0x3] }
 0x1bc   :  { %v4312_v62 = vrot.slane %v4311_v43, 2  ;;  %v4319_v9 = vrot.slane %v4318_v56, 2  ;;  %v4324_v25 = vrot.slane %v4323_v2, 4  ;;  %v4523_v44 = vcombine.low %v4280_v16, %v4287_v0 }
 0x1bd   :  { %v4521_v34 = vrot.slane %v4507_v46, %v9008_v39  ;;  %v4301_v55 = vadd.f32 %v4300_v40, %v4299_v36  ;;  %v4330_v50 = vsel %vm3218_vm0, %v4202_v12, 0.0  ;;  %v4307_v5 = vrot.slane %v4306_v3, 1  ;;  %v4206_v46 = vld [vmem:[#allocation2 + $0x350] sm:$0x3] }
 0x1be   :  { %v4313_v8 = vadd.f32 %v4312_v62, %v4311_v43  ;;  %v4320_v21 = vadd.f32 %v4319_v9, %v4318_v56  ;;  %v4325_v58 = vadd.f32 %v4324_v25, %v4323_v2  ;;  %v4533_v63 = vrot.slane %v4523_v44, %v9008_v39 }
 0x1bf   :  { %v4522_v38 = vcombine.low %v4514_v54, %v4521_v34  ;;  %v4524_v47 = vcombine.low %v4294_v37, %v4301_v55  ;;  %v4331_v53 = vrot.slane %v4330_v50, 4  ;;  %v4308_v60 = vadd.f32 %v4307_v5, %v4306_v3  ;;  %v4207_v34 = vld [vmem:[#allocation2 + $0xf8] sm:$0x3] }
 0x1c0   :  { %v4314_v48 = vrot.slane %v4313_v8, 1  ;;  %v4321_v35 = vrot.slane %v4320_v21, 1  ;;  %v4326_v41 = vrot.slane %v4325_v58, 2  ;;  %v4337_v36 = vsel %vm3218_vm0, %v4203_v29, 0.0 }
 0x1c1   :  { %6789 = vst [vmem:[%s8806_s8 + $0x2] ss:$8 sm:$0xf] %v4522_v38  ;;  %6790 = vst [vmem:[%s8806_s8 + $0x2] ss:$8 sm:$0xf0] %v4522_v38  ;;  %v4540_v16 = vrot.slane %v4524_v47, %v9008_v39  ;;  %v4332_v54 = vadd.f32 %v4331_v53, %v4330_v50 }
 0x1c2   :  { %v4344_v43 = vsel %vm3218_vm0, %v4204_v61, 0.0  ;;  %v4315_v56 = vadd.f32 %v4314_v48, %v4313_v8  ;;  %v4322_v2 = vadd.f32 %v4321_v35, %v4320_v21  ;;  %v4327_v12 = vadd.f32 %v4326_v41, %v4325_v58  ;;  %v4208_v61 = vld [vmem:[#allocation2 + $0x20] sm:$0x3]  ;;  %v4209_v41 = vld [vmem:[#allocation2 + $0x208] sm:$0x3] }
 0x1c3   :  { %v4338_v0 = vrot.slane %v4337_v36, 4  ;;  %v4555_v37 = vcombine.low %v4533_v63, %v4540_v16  ;;  %v4333_v40 = vrot.slane %v4332_v54, 2  ;;  %v4345_v3 = vrot.slane %v4344_v43, 4 }
 0x1c4   :  { %v4351_v62 = vsel %vm3218_vm0, %v4205_v7, 0.0  ;;  %v4328_v9 = vrot.slane %v4327_v12, 1  ;;  %v4525_v25 = vcombine.low %v4308_v60, %v4315_v56  ;;  %v4358_v8 = vsel %vm3218_vm0, %v4206_v46, 0.0 }
 0x1c5   :  { %v4339_v55 = vadd.f32 %v4338_v0, %v4337_v36  ;;  %v4352_v44 = vrot.slane %v4351_v62, 4  ;;  %v4563_v50 = vrot.slane %v4555_v37, %v9008_v39  ;;  %v4334_v5 = vadd.f32 %v4333_v40, %v4332_v54 }
 0x1c6   :  { %v4346_v29 = vadd.f32 %v4345_v3, %v4344_v43  ;;  %v4329_v21 = vadd.f32 %v4328_v9, %v4327_v12  ;;  %v4547_v58 = vrot.slane %v4525_v25, %v9008_v39  ;;  %v4359_v48 = vrot.slane %v4358_v8, 4 }
 0x1c7   :  { %v4340_v38 = vrot.slane %v4339_v55, 2  ;;  %v4353_v47 = vadd.f32 %v4352_v44, %v4351_v62  ;;  %v4335_v63 = vrot.slane %v4334_v5, 1  ;;  %v4365_v60 = vsel %vm3218_vm0, %v4207_v34, 0.0 }
 0x1c8   :  { %v4347_v53 = vrot.slane %v4346_v29, 2  ;;  %v4526_v35 = vcombine.low %v4322_v2, %v4329_v21  ;;  %v4366_v36 = vrot.slane %v4365_v60, 4  ;;  %v4360_v56 = vadd.f32 %v4359_v48, %v4358_v8  ;;  %v4210_v21 = vld [vmem:[#allocation2 + $0xd0] sm:$0x3]  ;;  %v4211_v48 = vld [vmem:[#allocation2 + $0x1b8] sm:$0x3] }
 0x1c9   :  { %v4341_v7 = vadd.f32 %v4340_v38, %v4339_v55  ;;  %v4354_v16 = vrot.slane %v4353_v47, 2  ;;  %v4336_v54 = vadd.f32 %v4335_v63, %v4334_v5  ;;  %v4372_v12 = vsel %vm3218_vm0, %v4208_v61, 0.0 }
 0x1ca   :  { %v4348_v43 = vadd.f32 %v4347_v53, %v4346_v29  ;;  %v4554_v46 = vrot.slane %v4526_v35, %v9008_v39  ;;  %v4367_v40 = vadd.f32 %v4366_v36, %v4365_v60  ;;  %v4361_v62 = vrot.slane %v4360_v56, 2  ;;  %v4212_v36 = vld [vmem:[#allocation2 + $0x1e0] sm:$0x3] }
 0x1cb   :  { %v4342_v0 = vrot.slane %v4341_v7, 1  ;;  %v4355_v37 = vadd.f32 %v4354_v16, %v4353_v47  ;;  %v4373_v9 = vrot.slane %v4372_v12, 4  ;;  %v4379_v25 = vsel %vm3218_vm0, %v4209_v41, 0.0 }
 0x1cc   :  { %v4349_v3 = vrot.slane %v4348_v43, 1  ;;  %v4556_v2 = vcombine.low %v4547_v58, %v4554_v46  ;;  %v4368_v44 = vrot.slane %v4367_v40, 2  ;;  %v4362_v29 = vadd.f32 %v4361_v62, %v4360_v56 }
 0x1cd   :  { %v4343_v34 = vadd.f32 %v4342_v0, %v4341_v7  ;;  %v4356_v55 = vrot.slane %v4355_v37, 1  ;;  %v4374_v8 = vadd.f32 %v4373_v9, %v4372_v12  ;;  %v4380_v38 = vrot.slane %v4379_v25, 4 }
 0x1ce   :  { %v4350_v5 = vadd.f32 %v4349_v3, %v4348_v43  ;;  %v4570_v61 = vrot.slane %v4556_v2, %v9008_v39  ;;  %v4369_v53 = vadd.f32 %v4368_v44, %v4367_v40  ;;  %v4363_v60 = vrot.slane %v4362_v29, 1  ;;  %v4213_v3 = vld [vmem:[#allocation2 + $0x180] sm:$0x3] }
 0x1cf   :  { %v4357_v63 = vadd.f32 %v4356_v55, %v4355_v37  ;;  %v4572_v47 = vcombine.low %v4336_v54, %v4343_v34  ;;  %v4375_v35 = vrot.slane %v4374_v8, 2  ;;  %v4381_v16 = vadd.f32 %v4380_v38, %v4379_v25 }
 0x1d0   :  { %v4386_v58 = vsel %vm3218_vm0, %v4210_v21, 0.0  ;;  %v4571_v41 = vcombine.low %v4563_v50, %v4570_v61  ;;  %v4370_v7 = vrot.slane %v4369_v53, 1  ;;  %v4364_v56 = vadd.f32 %v4363_v60, %v4362_v29  ;;  %v4214_v21 = vld [vmem:[#allocation2 + $0x438] sm:$0x3] }
 0x1d1   :  { %v4573_v46 = vcombine.low %v4350_v5, %v4357_v63  ;;  %v4582_v43 = vrot.slane %v4572_v47, %v9008_v39  ;;  %v4376_v12 = vadd.f32 %v4375_v35, %v4374_v8  ;;  %v4382_v0 = vrot.slane %v4381_v16, 2  ;;  %v4215_v61 = vld [vmem:[#allocation2 + $0x6f8] sm:$0x3] }
 0x1d2   :  { %v4387_v62 = vrot.slane %v4386_v58, 4  ;;  %6791 = vst [vmem:[%s8806_s8 + $0x42] ss:$8 sm:$0xf] %v4571_v41  ;;  %v4371_v54 = vadd.f32 %v4370_v7, %v4369_v53  ;;  %v4393_v37 = vsel %vm3218_vm0, %v4211_v48, 0.0  ;;  %v4400_v40 = vsel %vm3218_vm0, %v4212_v36, 0.0 }
 0x1d3   :  { %6792 = vst [vmem:[%s8806_s8 + $0x42] ss:$8 sm:$0xf0] %v4571_v41  ;;  %v4589_v50 = vrot.slane %v4573_v46, %v9008_v39  ;;  %v4377_v9 = vrot.slane %v4376_v12, 1  ;;  %v4383_v25 = vadd.f32 %v4382_v0, %v4381_v16  ;;  %v4394_v34 = vrot.slane %v4393_v37, 4 }
 0x1d4   :  { %v4388_v2 = vadd.f32 %v4387_v62, %v4386_v58  ;;  %v4574_v55 = vcombine.low %v4364_v56, %v4371_v54  ;;  %v4401_v5 = vrot.slane %v4400_v40, 4  ;;  %v4407_v29 = vsel %vm3218_vm0, %v4213_v3, 0.0  ;;  %v4216_v36 = vld [vmem:[#allocation2 + $0x158] sm:$0x3] }
 0x1d5   :  { %v4604_v44 = vcombine.low %v4582_v43, %v4589_v50  ;;  %v4378_v8 = vadd.f32 %v4377_v9, %v4376_v12  ;;  %v4384_v38 = vrot.slane %v4383_v25, 1  ;;  %v4395_v53 = vadd.f32 %v4394_v34, %v4393_v37  ;;  %v4217_v50 = vld [vmem:[#allocation2 + $0x5a0] sm:$0x3] }
 0x1d6   :  { %v4389_v63 = vrot.slane %v4388_v2, 2  ;;  %v4596_v47 = vrot.slane %v4574_v55, %v9008_v39  ;;  %v4402_v60 = vadd.f32 %v4401_v5, %v4400_v40  ;;  %v4408_v35 = vrot.slane %v4407_v29, 4 }
 0x1d7   :  { %v4612_v48 = vrot.slane %v4604_v44, %v9008_v39  ;;  %v4385_v16 = vadd.f32 %v4384_v38, %v4383_v25  ;;  %v4396_v41 = vrot.slane %v4395_v53, 2  ;;  %v4414_v7 = vsel %vm3218_vm0, %v4214_v21, 0.0 }
 0x1d8   :  { %v4390_v58 = vadd.f32 %v4389_v63, %v4388_v2  ;;  %v4403_v46 = vrot.slane %v4402_v60, 2  ;;  %v4409_v43 = vadd.f32 %v4408_v35, %v4407_v29  ;;  %v4415_v56 = vrot.slane %v4414_v7, 4  ;;  %v4686_v35 = vld [vmem:[#allocation2 + $0x230] sm:$0x3] }
 0x1d9   :  { %v4421_v12 = vsel %vm3218_vm0, %v4215_v61, 0.0  ;;  %v4575_v0 = vcombine.low %v4378_v8, %v4385_v16  ;;  %v4397_v62 = vadd.f32 %v4396_v41, %v4395_v53  ;;  %v4428_v25 = vsel %vm3218_vm0, %v4216_v36, 0.0 }
 0x1da   :  { %v4391_v3 = vrot.slane %v4390_v58, 1  ;;  %v4422_v54 = vrot.slane %v4421_v12, 4  ;;  %v4404_v37 = vadd.f32 %v4403_v46, %v4402_v60  ;;  %v4410_v9 = vrot.slane %v4409_v43, 2 }
 0x1db   :  { %v4416_v40 = vadd.f32 %v4415_v56, %v4414_v7  ;;  %v4603_v2 = vrot.slane %v4575_v0, %v9008_v39  ;;  %v4398_v55 = vrot.slane %v4397_v62, 1  ;;  %v4429_v38 = vrot.slane %v4428_v25, 4 }
 0x1dc   :  { %v4392_v34 = vadd.f32 %v4391_v3, %v4390_v58  ;;  %v4423_v44 = vadd.f32 %v4422_v54, %v4421_v12  ;;  %v4405_v21 = vrot.slane %v4404_v37, 1  ;;  %v4411_v5 = vadd.f32 %v4410_v9, %v4409_v43  ;;  %v4687_v12 = vld [vmem:[#allocation2 + $0x418] sm:$0x3]  ;;  %v4688_v54 = vld [vmem:[#allocation2 + $0x250] sm:$0x3] }
 0x1dd   :  { %v4417_v29 = vrot.slane %v4416_v40, 2  ;;  %v4605_v61 = vcombine.low %v4596_v47, %v4603_v2  ;;  %v4399_v8 = vadd.f32 %v4398_v55, %v4397_v62  ;;  %v4435_v53 = vsel %vm3218_vm0, %v4217_v50, 0.0  ;;  %v4689_v55 = vld [vmem:[#allocation2 + $0x568] sm:$0x3] }
 0x1de   :  { %v4424_v63 = vrot.slane %v4423_v44, 2  ;;  %v4406_v60 = vadd.f32 %v4405_v21, %v4404_v37  ;;  %v4412_v16 = vrot.slane %v4411_v5, 1  ;;  %v4430_v7 = vadd.f32 %v4429_v38, %v4428_v25 }
 0x1df   :  { %v4418_v41 = vadd.f32 %v4417_v29, %v4416_v40  ;;  %v4619_v36 = vrot.slane %v4605_v61, %v9008_v39  ;;  %v4436_v58 = vrot.slane %v4435_v53, 4  ;;  %v4621_v56 = vcombine.low %v4392_v34, %v4399_v8 }
 0x1e0   :  { %v4425_v46 = vadd.f32 %v4424_v63, %v4423_v44  ;;  %v4413_v0 = vadd.f32 %v4412_v16, %v4411_v5  ;;  %v4431_v3 = vrot.slane %v4430_v7, 2  ;;  %v4718_v47 = vsel %vm3218_vm0, %v4686_v35, 0.0  ;;  %v4690_v35 = vld [vmem:[#allocation2 + $0x3b8] sm:$0x3] }
 0x1e1   :  { %v4419_v43 = vrot.slane %v4418_v41, 1  ;;  %v4620_v62 = vcombine.low %v4612_v48, %v4619_v36  ;;  %v4437_v50 = vadd.f32 %v4436_v58, %v4435_v53  ;;  %v4631_v37 = vrot.slane %v4621_v56, %v9008_v39 }
 0x1e2   :  { %v4426_v9 = vrot.slane %v4425_v46, 1  ;;  %v4432_v40 = vadd.f32 %v4431_v3, %v4430_v7  ;;  %v4622_v25 = vcombine.low %v4406_v60, %v4413_v0  ;;  %v4719_v21 = vrot.slane %v4718_v47, 4  ;;  %v4692_v0 = vld [vmem:[#allocation2 + $0x660] sm:$0x3] }
 0x1e3   :  { %v4420_v2 = vadd.f32 %v4419_v43, %v4418_v41  ;;  %6793 = vst [vmem:[%s8806_s8 + $0x82] ss:$8 sm:$0xf] %v4620_v62  ;;  %6794 = vst [vmem:[%s8806_s8 + $0x82] ss:$8 sm:$0xf0] %v4620_v62 }
 0x1e4   :  { %v4427_v34 = vadd.f32 %v4426_v9, %v4425_v46  ;;  %v4438_v44 = vrot.slane %v4437_v50, 2  ;;  %v4725_v48 = vsel %vm3218_vm0, %v4687_v12, 0.0  ;;  %v4732_v5 = vsel %vm3218_vm0, %v4688_v54, 0.0  ;;  %v4691_v12 = vld [vmem:[#allocation2 + $0x268] sm:$0x3] }
 0x1e5   :  { %v4433_v29 = vrot.slane %v4432_v40, 1  ;;  %v4638_v38 = vrot.slane %v4622_v25, %v9008_v39  ;;  %v4720_v61 = vadd.f32 %v4719_v21, %v4718_v47  ;;  %v4726_v8 = vrot.slane %v4725_v48, 4 }
 0x1e6   :  { %v4439_v63 = vadd.f32 %v4438_v44, %v4437_v50  ;;  %v4623_v53 = vcombine.low %v4420_v2, %v4427_v34  ;;  %v4733_v60 = vrot.slane %v4732_v5, 4  ;;  %v4739_v16 = vsel %vm3218_vm0, %v4689_v55, 0.0 }
 0x1e7   :  { %v4434_v41 = vadd.f32 %v4433_v29, %v4432_v40  ;;  %v4653_v7 = vcombine.low %v4631_v37, %v4638_v38  ;;  %v4721_v36 = vrot.slane %v4720_v61, 2  ;;  %v4727_v46 = vadd.f32 %v4726_v8, %v4725_v48  ;;  %v4693_v48 = vld [vmem:[#allocation2 + $0x28] sm:$0x3] }
 0x1e8   :  { %v4440_v58 = vrot.slane %v4439_v63, 1  ;;  %v4645_v56 = vrot.slane %v4623_v53, %v9008_v39  ;;  %v4734_v43 = vadd.f32 %v4733_v60, %v4732_v5  ;;  %v4740_v3 = vrot.slane %v4739_v16, 4 }
 0x1e9   :  { %v4661_v54 = vrot.slane %v4653_v7, %v9008_v39  ;;  %v4722_v47 = vadd.f32 %v4721_v36, %v4720_v61  ;;  %v4728_v62 = vrot.slane %v4727_v46, 2  ;;  %v4746_v9 = vsel %vm3218_vm0, %v4690_v35, 0.0 }
 0x1ea   :  { %v4441_v50 = vadd.f32 %v4440_v58, %v4439_v63  ;;  %v4735_v2 = vrot.slane %v4734_v43, 2  ;;  %v4741_v25 = vadd.f32 %v4740_v3, %v4739_v16  ;;  %v4747_v40 = vrot.slane %v4746_v9, 4 }
 0x1eb   :  { %v4723_v37 = vrot.slane %v4722_v47, 1  ;;  %v4729_v55 = vadd.f32 %v4728_v62, %v4727_v46  ;;  %v4753_v21 = vsel %vm3218_vm0, %v4691_v12, 0.0  ;;  %v4760_v34 = vsel %vm3218_vm0, %v4692_v0, 0.0  ;;  %v4694_v0 = vld [vmem:[#allocation2 + $0x5f0] sm:$0x3] }
 0x1ec   :  { %v4624_v44 = vcombine.low %v4434_v41, %v4441_v50  ;;  %v4736_v5 = vadd.f32 %v4735_v2, %v4734_v43  ;;  %v4742_v29 = vrot.slane %v4741_v25, 2  ;;  %v4748_v38 = vadd.f32 %v4747_v40, %v4746_v9 }
 0x1ed   :  { %v4724_v8 = vadd.f32 %v4723_v37, %v4722_v47  ;;  %v4730_v61 = vrot.slane %v4729_v55, 1  ;;  %v4754_v53 = vrot.slane %v4753_v21, 4  ;;  %v4761_v60 = vrot.slane %v4760_v34, 4 }
 0x1ee   :  { %v4652_v63 = vrot.slane %v4624_v44, %v9008_v39  ;;  %v4737_v35 = vrot.slane %v4736_v5, 1  ;;  %v4743_v16 = vadd.f32 %v4742_v29, %v4741_v25  ;;  %v4749_v7 = vrot.slane %v4748_v38, 2  ;;  %v4695_v25 = vld [vmem:[#allocation2 + $0x4f8] sm:$0x3] }
 0x1ef   :  { %v4731_v36 = vadd.f32 %v4730_v61, %v4729_v55  ;;  %v4755_v46 = vadd.f32 %v4754_v53, %v4753_v21  ;;  %v4762_v58 = vadd.f32 %v4761_v60, %v4760_v34  ;;  %v4767_v12 = vsel %vm3218_vm0, %v4693_v48, 0.0 }
 0x1f0   :  { %v4654_v41 = vcombine.low %v4645_v56, %v4652_v63  ;;  %v4738_v3 = vadd.f32 %v4737_v35, %v4736_v5  ;;  %v4744_v43 = vrot.slane %v4743_v16, 1  ;;  %v4750_v62 = vadd.f32 %v4749_v7, %v4748_v38  ;;  %v4696_v56 = vld [vmem:[#allocation2 + $0x288] sm:$0x3]  ;;  %v4697_v35 = vld [vmem:[#allocation2 + $0x1b0] sm:$0x3] }
 0x1f1   :  { %v4756_v9 = vrot.slane %v4755_v46, 2  ;;  %v4763_v47 = vrot.slane %v4762_v58, 2  ;;  %v4768_v50 = vrot.slane %v4767_v12, 4  ;;  %v4974_v2 = vcombine.low %v4724_v8, %v4731_v36 }
 0x1f2   :  { %v4668_v40 = vrot.slane %v4654_v41, %v9008_v39  ;;  %v4745_v37 = vadd.f32 %v4744_v43, %v4743_v16  ;;  %v4751_v44 = vrot.slane %v4750_v62, 1  ;;  %v4774_v55 = vsel %vm3218_vm0, %v4694_v0, 0.0  ;;  %v4698_v41 = vld [vmem:[#allocation2 + $0x420] sm:$0x3] }
 0x1f3   :  { %v4757_v21 = vadd.f32 %v4756_v9, %v4755_v46  ;;  %v4764_v34 = vadd.f32 %v4763_v47, %v4762_v58  ;;  %v4769_v29 = vadd.f32 %v4768_v50, %v4767_v12  ;;  %v4984_v48 = vrot.slane %v4974_v2, %v9008_v39 }
 0x1f4   :  { %v4669_v5 = vcombine.low %v4661_v54, %v4668_v40  ;;  %v4752_v61 = vadd.f32 %v4751_v44, %v4750_v62  ;;  %v4975_v38 = vcombine.low %v4738_v3, %v4745_v37  ;;  %v4775_v53 = vrot.slane %v4774_v55, 4  ;;  %v4699_v40 = vld [vmem:[#allocation2 + $0x178] sm:$0x3] }
 0x1f5   :  { %v4758_v60 = vrot.slane %v4757_v21, 1  ;;  %v4765_v63 = vrot.slane %v4764_v34, 1  ;;  %v4770_v8 = vrot.slane %v4769_v29, 2  ;;  %v4781_v16 = vsel %vm3218_vm0, %v4695_v25, 0.0 }
 0x1f6   :  { %6795 = vst [vmem:[%s8806_s8 + $0xc2] ss:$8 sm:$0xf] %v4669_v5  ;;  %6796 = vst [vmem:[%s8806_s8 + $0xc2] ss:$8 sm:$0xf0] %v4669_v5  ;;  %v4991_v7 = vrot.slane %v4975_v38, %v9008_v39  ;;  %v4776_v54 = vadd.f32 %v4775_v53, %v4774_v55 }
 0x1f7   :  { %v4782_v36 = vrot.slane %v4781_v16, 4  ;;  %v4788_v46 = vsel %vm3218_vm0, %v4696_v56, 0.0  ;;  %v4759_v58 = vadd.f32 %v4758_v60, %v4757_v21  ;;  %v4766_v12 = vadd.f32 %v4765_v63, %v4764_v34  ;;  %v4700_v56 = vld [vmem:[#allocation2 + $0x390] sm:$0x3] }
 0x1f8   :  { %v4771_v0 = vadd.f32 %v4770_v8, %v4769_v29  ;;  %v4789_v3 = vrot.slane %v4788_v46, 4  ;;  %v5006_v43 = vcombine.low %v4984_v48, %v4991_v7  ;;  %v4777_v62 = vrot.slane %v4776_v54, 2 }
 0x1f9   :  { %v4783_v9 = vadd.f32 %v4782_v36, %v4781_v16  ;;  %v4795_v47 = vsel %vm3218_vm0, %v4697_v35, 0.0  ;;  %v4976_v2 = vcombine.low %v4752_v61, %v4759_v58  ;;  %v4802_v21 = vsel %vm3218_vm0, %v4698_v41, 0.0  ;;  %v4701_v35 = vld [vmem:[#allocation2 + $0x488] sm:$0x3] }
 0x1fa   :  { %v4772_v50 = vrot.slane %v4771_v0, 1  ;;  %v4790_v37 = vadd.f32 %v4789_v3, %v4788_v46  ;;  %v4796_v44 = vrot.slane %v4795_v47, 4  ;;  %v5014_v25 = vrot.slane %v5006_v43, %v9008_v39 }
 0x1fb   :  { %v4778_v55 = vadd.f32 %v4777_v62, %v4776_v54  ;;  %v4784_v5 = vrot.slane %v4783_v9, 2  ;;  %v4998_v29 = vrot.slane %v4976_v2, %v9008_v39  ;;  %v4803_v63 = vrot.slane %v4802_v21, 4 }
 0x1fc   :  { %v4773_v34 = vadd.f32 %v4772_v50, %v4771_v0  ;;  %v4791_v48 = vrot.slane %v4790_v37, 2  ;;  %v4797_v38 = vadd.f32 %v4796_v44, %v4795_v47  ;;  %v4809_v61 = vsel %vm3218_vm0, %v4699_v40, 0.0 }
 0x1fd   :  { %v4779_v53 = vrot.slane %v4778_v55, 1  ;;  %v4785_v60 = vadd.f32 %v4784_v5, %v4783_v9  ;;  %v4810_v36 = vrot.slane %v4809_v61, 4  ;;  %v4804_v58 = vadd.f32 %v4803_v63, %v4802_v21 }
 0x1fe   :  { %v4977_v8 = vcombine.low %v4766_v12, %v4773_v34  ;;  %v4792_v16 = vadd.f32 %v4791_v48, %v4790_v37  ;;  %v4798_v7 = vrot.slane %v4797_v38, 2  ;;  %v4816_v0 = vsel %vm3218_vm0, %v4700_v56, 0.0  ;;  %v4702_v12 = vld [vmem:[#allocation2 + $0x678] sm:$0x3] }
 0x1ff   :  { %v4780_v54 = vadd.f32 %v4779_v53, %v4778_v55  ;;  %v4786_v46 = vrot.slane %v4785_v60, 1  ;;  %v4811_v62 = vadd.f32 %v4810_v36, %v4809_v61  ;;  %v4805_v9 = vrot.slane %v4804_v58, 2 }
 0x200   :  { %v5005_v41 = vrot.slane %v4977_v8, %v9008_v39  ;;  %v4793_v3 = vrot.slane %v4792_v16, 1  ;;  %v4799_v43 = vadd.f32 %v4798_v7, %v4797_v38  ;;  %v4817_v50 = vrot.slane %v4816_v0, 4  ;;  %v4703_v38 = vld [vmem:[#allocation2 + $0x200] sm:$0x3] }
 0x201   :  { %v4787_v47 = vadd.f32 %v4786_v46, %v4785_v60  ;;  %v4823_v2 = vsel %vm3218_vm0, %v4701_v35, 0.0  ;;  %v4812_v5 = vrot.slane %v4811_v62, 2  ;;  %v4806_v55 = vadd.f32 %v4805_v9, %v4804_v58  ;;  %v4704_v46 = vld [vmem:[#allocation2 + $0x5a8] sm:$0x3]  ;;  %v4705_v58 = vld [vmem:[#allocation2 + $0x478] sm:$0x3] }
 0x202   :  { %v5007_v40 = vcombine.low %v4998_v29, %v5005_v41  ;;  %v4794_v37 = vadd.f32 %v4793_v3, %v4792_v16  ;;  %v4800_v44 = vrot.slane %v4799_v43, 1  ;;  %v4818_v34 = vadd.f32 %v4817_v50, %v4816_v0 }
 0x203   :  { %v4824_v21 = vrot.slane %v4823_v2, 4  ;;  %v5023_v48 = vcombine.low %v4780_v54, %v4787_v47  ;;  %v4813_v63 = vadd.f32 %v4812_v5, %v4811_v62  ;;  %v4830_v60 = vsel %vm3218_vm0, %v4702_v12, 0.0  ;;  %v4706_v5 = vld [vmem:[#allocation2 + $0x388] sm:$0x3] }
 0x204   :  { %v5021_v56 = vrot.slane %v5007_v40, %v9008_v39  ;;  %v4801_v53 = vadd.f32 %v4800_v44, %v4799_v43  ;;  %v4807_v61 = vrot.slane %v4806_v55, 1  ;;  %v4819_v8 = vrot.slane %v4818_v34, 2 }
 0x205   :  { %v4825_v7 = vadd.f32 %v4824_v21, %v4823_v2  ;;  %v5033_v35 = vrot.slane %v5023_v48, %v9008_v39  ;;  %v4814_v16 = vrot.slane %v4813_v63, 1  ;;  %v4831_v0 = vrot.slane %v4830_v60, 4 }
 0x206   :  { %v5022_v29 = vcombine.low %v5014_v25, %v5021_v56  ;;  %v5024_v36 = vcombine.low %v4794_v37, %v4801_v53  ;;  %v4808_v41 = vadd.f32 %v4807_v61, %v4806_v55  ;;  %v4820_v54 = vadd.f32 %v4819_v8, %v4818_v34  ;;  %v4707_v56 = vld [vmem:[#allocation2 + $0x3f8] sm:$0x3] }
 0x207   :  { %v4826_v3 = vrot.slane %v4825_v7, 2  ;;  %v4837_v43 = vsel %vm3218_vm0, %v4703_v38, 0.0  ;;  %v4815_v62 = vadd.f32 %v4814_v16, %v4813_v63  ;;  %v4832_v47 = vadd.f32 %v4831_v0, %v4830_v60 }
 0x208   :  { %6797 = vst [vmem:[%s8806_s8 + $0x3] ss:$8 sm:$0xf] %v5022_v29  ;;  %6798 = vst [vmem:[%s8806_s8 + $0x3] ss:$8 sm:$0xf0] %v5022_v29  ;;  %v5040_v25 = vrot.slane %v5024_v36, %v9008_v39 }
 0x209   :  { %v4838_v9 = vrot.slane %v4837_v43, 4  ;;  %v4821_v50 = vrot.slane %v4820_v54, 1  ;;  %v4827_v2 = vadd.f32 %v4826_v3, %v4825_v7  ;;  %v4844_v12 = vsel %vm3218_vm0, %v4704_v46, 0.0  ;;  %v4708_v29 = vld [vmem:[#allocation2 + $0x370] sm:$0x3] }
 0x20a   :  { %v4851_v40 = vsel %vm3218_vm0, %v4705_v58, 0.0  ;;  %v5025_v37 = vcombine.low %v4808_v41, %v4815_v62  ;;  %v5055_v44 = vcombine.low %v5033_v35, %v5040_v25  ;;  %v4833_v55 = vrot.slane %v4832_v47, 2  ;;  %v4709_v3 = vld [vmem:[#allocation2 + $0x308] sm:$0x3] }
 0x20b   :  { %v4839_v34 = vadd.f32 %v4838_v9, %v4837_v43  ;;  %v4822_v21 = vadd.f32 %v4821_v50, %v4820_v54  ;;  %v4828_v48 = vrot.slane %v4827_v2, 1  ;;  %v4845_v53 = vrot.slane %v4844_v12, 4 }
 0x20c   :  { %v4852_v63 = vrot.slane %v4851_v40, 4  ;;  %v5047_v38 = vrot.slane %v5025_v37, %v9008_v39  ;;  %v5063_v60 = vrot.slane %v5055_v44, %v9008_v39  ;;  %v4834_v61 = vadd.f32 %v4833_v55, %v4832_v47 }
 0x20d   :  { %v4840_v8 = vrot.slane %v4839_v34, 2  ;;  %v4829_v7 = vadd.f32 %v4828_v48, %v4827_v2  ;;  %v4846_v16 = vadd.f32 %v4845_v53, %v4844_v12  ;;  %v4858_v35 = vsel %vm3218_vm0, %v4706_v5, 0.0 }
 0x20e   :  { %v4853_v36 = vadd.f32 %v4852_v63, %v4851_v40  ;;  %v4835_v46 = vrot.slane %v4834_v61, 1  ;;  %v4859_v0 = vrot.slane %v4858_v35, 4  ;;  %v4865_v41 = vsel %vm3218_vm0, %v4707_v56, 0.0 }
 0x20f   :  { %v4841_v58 = vadd.f32 %v4840_v8, %v4839_v34  ;;  %v5026_v54 = vcombine.low %v4822_v21, %v4829_v7  ;;  %v4847_v43 = vrot.slane %v4846_v16, 2  ;;  %v4866_v25 = vrot.slane %v4865_v41, 4 }
 0x210   :  { %v4854_v62 = vrot.slane %v4853_v36, 2  ;;  %v4836_v9 = vadd.f32 %v4835_v46, %v4834_v61  ;;  %v4860_v47 = vadd.f32 %v4859_v0, %v4858_v35  ;;  %v4872_v2 = vsel %vm3218_vm0, %v4708_v29, 0.0  ;;  %v4710_v46 = vld [vmem:[#allocation2 + $0x310] sm:$0x3] }
 0x211   :  { %v4842_v50 = vrot.slane %v4841_v58, 1  ;;  %v5054_v12 = vrot.slane %v5026_v54, %v9008_v39  ;;  %v4848_v40 = vadd.f32 %v4847_v43, %v4846_v16  ;;  %v4867_v44 = vadd.f32 %v4866_v25, %v4865_v41 }
 0x212   :  { %v4855_v37 = vadd.f32 %v4854_v62, %v4853_v36  ;;  %v4861_v55 = vrot.slane %v4860_v47, 2  ;;  %v4873_v34 = vrot.slane %v4872_v2, 4  ;;  %v4879_v48 = vsel %vm3218_vm0, %v4709_v3, 0.0  ;;  %v4711_v3 = vld [vmem:[#allocation2 + $0x4c0] sm:$0x3] }
 0x213   :  { %v4843_v5 = vadd.f32 %v4842_v50, %v4841_v58  ;;  %v5056_v21 = vcombine.low %v5047_v38, %v5054_v12  ;;  %v4849_v56 = vrot.slane %v4848_v40, 1  ;;  %v4868_v63 = vrot.slane %v4867_v44, 2  ;;  %v4712_v38 = vld [vmem:[#allocation2 + $0x2a0] sm:$0x3] }
 0x214   :  { %v4856_v53 = vrot.slane %v4855_v37, 1  ;;  %v4862_v8 = vadd.f32 %v4861_v55, %v4860_v47  ;;  %v4874_v61 = vadd.f32 %v4873_v34, %v4872_v2  ;;  %v4880_v7 = vrot.slane %v4879_v48, 4 }
 0x215   :  { %v5072_v35 = vcombine.low %v4836_v9, %v4843_v5  ;;  %v5070_v29 = vrot.slane %v5056_v21, %v9008_v39  ;;  %v4850_v0 = vadd.f32 %v4849_v56, %v4848_v40  ;;  %v4869_v36 = vadd.f32 %v4868_v63, %v4867_v44  ;;  %v4713_v5 = vld [vmem:[#allocation2 + $0xe8] sm:$0x3] }
 0x216   :  { %v4857_v16 = vadd.f32 %v4856_v53, %v4855_v37  ;;  %v4863_v41 = vrot.slane %v4862_v8, 1  ;;  %v4875_v58 = vrot.slane %v4874_v61, 2  ;;  %v4881_v54 = vadd.f32 %v4880_v7, %v4879_v48 }
 0x217   :  { %v5082_v43 = vrot.slane %v5072_v35, %v9008_v39  ;;  %v5071_v62 = vcombine.low %v5063_v60, %v5070_v29  ;;  %v4870_v25 = vrot.slane %v4869_v36, 1  ;;  %v4886_v47 = vsel %vm3218_vm0, %v4710_v46, 0.0  ;;  %v4715_v29 = vld [vmem:[#allocation2 + $0x380] sm:$0x3] }
 0x218   :  { %v5073_v50 = vcombine.low %v4850_v0, %v4857_v16  ;;  %v4864_v2 = vadd.f32 %v4863_v41, %v4862_v8  ;;  %v4876_v9 = vadd.f32 %v4875_v58, %v4874_v61  ;;  %v4882_v12 = vrot.slane %v4881_v54, 2  ;;  %v4714_v8 = vld [vmem:[#allocation2 + $0x100] sm:$0x3] }
 0x219   :  { %v4887_v55 = vrot.slane %v4886_v47, 4  ;;  %6799 = vst [vmem:[%s8806_s8 + $0x43] ss:$8 sm:$0xf] %v5071_v62  ;;  %v4871_v40 = vadd.f32 %v4870_v25, %v4869_v36  ;;  %v4893_v37 = vsel %vm3218_vm0, %v4711_v3, 0.0  ;;  %v4900_v44 = vsel %vm3218_vm0, %v4712_v38, 0.0 }
 0x21a   :  { %6800 = vst [vmem:[%s8806_s8 + $0x43] ss:$8 sm:$0xf0] %v5071_v62  ;;  %v5089_v60 = vrot.slane %v5073_v50, %v9008_v39  ;;  %v4877_v34 = vrot.slane %v4876_v9, 1  ;;  %v4883_v48 = vadd.f32 %v4882_v12, %v4881_v54  ;;  %v4894_v56 = vrot.slane %v4893_v37, 4 }
 0x21b   :  { %v4888_v21 = vadd.f32 %v4887_v55, %v4886_v47  ;;  %v5074_v53 = vcombine.low %v4864_v2, %v4871_v40  ;;  %v4901_v61 = vrot.slane %v4900_v44, 4  ;;  %v4907_v7 = vsel %vm3218_vm0, %v4713_v5, 0.0  ;;  %v4716_v38 = vld [vmem:[#allocation2 + $0x2e8] sm:$0x3] }
 0x21c   :  { %v5104_v63 = vcombine.low %v5082_v43, %v5089_v60  ;;  %v4878_v35 = vadd.f32 %v4877_v34, %v4876_v9  ;;  %v4884_v46 = vrot.slane %v4883_v48, 1  ;;  %v4895_v16 = vadd.f32 %v4894_v56, %v4893_v37  ;;  %v4717_v60 = vld [vmem:[#allocation2 + $0x6b8] sm:$0x3] }
 0x21d   :  { %v4889_v0 = vrot.slane %v4888_v21, 2  ;;  %v5096_v36 = vrot.slane %v5074_v53, %v9008_v39  ;;  %v4902_v58 = vadd.f32 %v4901_v61, %v4900_v44  ;;  %v4908_v3 = vrot.slane %v4907_v7, 4 }
 0x21e   :  { %v5112_v41 = vrot.slane %v5104_v63, %v9008_v39  ;;  %v4885_v54 = vadd.f32 %v4884_v46, %v4883_v48  ;;  %v4896_v25 = vrot.slane %v4895_v16, 2  ;;  %v4914_v43 = vsel %vm3218_vm0, %v4714_v8, 0.0 }
 0x21f   :  { %v4890_v62 = vadd.f32 %v4889_v0, %v4888_v21  ;;  %v4903_v50 = vrot.slane %v4902_v58, 2  ;;  %v4909_v47 = vadd.f32 %v4908_v3, %v4907_v7  ;;  %v4915_v2 = vrot.slane %v4914_v43, 4  ;;  %v5186_v3 = vld [vmem:[#allocation2 + $0x120] sm:$0x3] }
 0x220   :  { %v4921_v9 = vsel %vm3218_vm0, %v4715_v29, 0.0  ;;  %v5075_v12 = vcombine.low %v4878_v35, %v4885_v54  ;;  %v4897_v55 = vadd.f32 %v4896_v25, %v4895_v16  ;;  %v4928_v48 = vsel %vm3218_vm0, %v4716_v38, 0.0 }
 0x221   :  { %v4891_v5 = vrot.slane %v4890_v62, 1  ;;  %v4922_v40 = vrot.slane %v4921_v9, 4  ;;  %v4904_v37 = vadd.f32 %v4903_v50, %v4902_v58  ;;  %v4910_v34 = vrot.slane %v4909_v47, 2 }
 0x222   :  { %v4916_v44 = vadd.f32 %v4915_v2, %v4914_v43  ;;  %v5103_v21 = vrot.slane %v5075_v12, %v9008_v39  ;;  %v4898_v53 = vrot.slane %v4897_v55, 1  ;;  %v4929_v46 = vrot.slane %v4928_v48, 4 }
 0x223   :  { %v4892_v56 = vadd.f32 %v4891_v5, %v4890_v62  ;;  %v4923_v63 = vadd.f32 %v4922_v40, %v4921_v9  ;;  %v4905_v8 = vrot.slane %v4904_v37, 1  ;;  %v4911_v61 = vadd.f32 %v4910_v34, %v4909_v47  ;;  %v5187_v9 = vld [vmem:[#allocation2 + $0x8] sm:$0x3]  ;;  %v5188_v40 = vld [vmem:[#allocation2 + $0x4b8] sm:$0x3] }
 0x224   :  { %v4917_v7 = vrot.slane %v4916_v44, 2  ;;  %v5105_v29 = vcombine.low %v5096_v36, %v5103_v21  ;;  %v4899_v35 = vadd.f32 %v4898_v53, %v4897_v55  ;;  %v4935_v16 = vsel %vm3218_vm0, %v4717_v60, 0.0  ;;  %v5189_v53 = vld [vmem:[#allocation2 + $0x298] sm:$0x3] }
 0x225   :  { %v4924_v0 = vrot.slane %v4923_v63, 2  ;;  %v4906_v58 = vadd.f32 %v4905_v8, %v4904_v37  ;;  %v4912_v54 = vrot.slane %v4911_v61, 1  ;;  %v4930_v43 = vadd.f32 %v4929_v46, %v4928_v48 }
 0x226   :  { %v4918_v25 = vadd.f32 %v4917_v7, %v4916_v44  ;;  %v5119_v38 = vrot.slane %v5105_v29, %v9008_v39  ;;  %v4936_v62 = vrot.slane %v4935_v16, 4  ;;  %v5121_v2 = vcombine.low %v4892_v56, %v4899_v35 }
 0x227   :  { %v4925_v50 = vadd.f32 %v4924_v0, %v4923_v63  ;;  %v4913_v12 = vadd.f32 %v4912_v54, %v4911_v61  ;;  %v4931_v5 = vrot.slane %v4930_v43, 2  ;;  %v5218_v36 = vsel %vm3218_vm0, %v5186_v3, 0.0  ;;  %v5190_v3 = vld [vmem:[#allocation2 + $0x448] sm:$0x3] }
 0x228   :  { %v4919_v47 = vrot.slane %v4918_v25, 1  ;;  %v5120_v55 = vcombine.low %v5112_v41, %v5119_v38  ;;  %v4937_v60 = vadd.f32 %v4936_v62, %v4935_v16  ;;  %v5131_v37 = vrot.slane %v5121_v2, %v9008_v39 }
 0x229   :  { %v4926_v34 = vrot.slane %v4925_v50, 1  ;;  %v4932_v44 = vadd.f32 %v4931_v5, %v4930_v43  ;;  %v5122_v48 = vcombine.low %v4906_v58, %v4913_v12  ;;  %v5219_v8 = vrot.slane %v5218_v36, 4  ;;  %v5192_v12 = vld [vmem:[#allocation2 + $0x6c8] sm:$0x3] }
 0x22a   :  { %v4920_v21 = vadd.f32 %v4919_v47, %v4918_v25  ;;  %6801 = vst [vmem:[%s8806_s8 + $0x83] ss:$8 sm:$0xf] %v5120_v55  ;;  %6802 = vst [vmem:[%s8806_s8 + $0x83] ss:$8 sm:$0xf0] %v5120_v55 }
 0x22b   :  { %v4927_v56 = vadd.f32 %v4926_v34, %v4925_v50  ;;  %v4938_v63 = vrot.slane %v4937_v60, 2  ;;  %v5225_v41 = vsel %vm3218_vm0, %v5187_v9, 0.0  ;;  %v5232_v61 = vsel %vm3218_vm0, %v5188_v40, 0.0  ;;  %v5191_v9 = vld [vmem:[#allocation2 + $0x560] sm:$0x3] }
 0x22c   :  { %v4933_v7 = vrot.slane %v4932_v44, 1  ;;  %v5138_v46 = vrot.slane %v5122_v48, %v9008_v39  ;;  %v5220_v29 = vadd.f32 %v5219_v8, %v5218_v36  ;;  %v5226_v35 = vrot.slane %v5225_v41, 4 }
 0x22d   :  { %v4939_v0 = vadd.f32 %v4938_v63, %v4937_v60  ;;  %v5123_v16 = vcombine.low %v4920_v21, %v4927_v56  ;;  %v5233_v58 = vrot.slane %v5232_v61, 4  ;;  %v5239_v54 = vsel %vm3218_vm0, %v5189_v53, 0.0 }
 0x22e   :  { %v4934_v25 = vadd.f32 %v4933_v7, %v4932_v44  ;;  %v5153_v43 = vcombine.low %v5131_v37, %v5138_v46  ;;  %v5221_v38 = vrot.slane %v5220_v29, 2  ;;  %v5227_v50 = vadd.f32 %v5226_v35, %v5225_v41  ;;  %v5193_v41 = vld [vmem:[#allocation2 + $0x50] sm:$0x3] }
 0x22f   :  { %v4940_v62 = vrot.slane %v4939_v0, 1  ;;  %v5145_v2 = vrot.slane %v5123_v16, %v9008_v39  ;;  %v5234_v47 = vadd.f32 %v5233_v58, %v5232_v61  ;;  %v5240_v5 = vrot.slane %v5239_v54, 4 }
 0x230   :  { %v5161_v40 = vrot.slane %v5153_v43, %v9008_v39  ;;  %v5222_v36 = vadd.f32 %v5221_v38, %v5220_v29  ;;  %v5228_v55 = vrot.slane %v5227_v50, 2  ;;  %v5246_v34 = vsel %vm3218_vm0, %v5190_v3, 0.0 }
 0x231   :  { %v4941_v60 = vadd.f32 %v4940_v62, %v4939_v0  ;;  %v5235_v21 = vrot.slane %v5234_v47, 2  ;;  %v5241_v48 = vadd.f32 %v5240_v5, %v5239_v54  ;;  %v5247_v44 = vrot.slane %v5246_v34, 4 }
 0x232   :  { %v5223_v37 = vrot.slane %v5222_v36, 1  ;;  %v5229_v53 = vadd.f32 %v5228_v55, %v5227_v50  ;;  %v5253_v8 = vsel %vm3218_vm0, %v5191_v9, 0.0  ;;  %v5260_v56 = vsel %vm3218_vm0, %v5192_v12, 0.0  ;;  %v5194_v12 = vld [vmem:[#allocation2 + $0x6a8] sm:$0x3] }
 0x233   :  { %v5124_v63 = vcombine.low %v4934_v25, %v4941_v60  ;;  %v5236_v61 = vadd.f32 %v5235_v21, %v5234_v47  ;;  %v5242_v7 = vrot.slane %v5241_v48, 2  ;;  %v5248_v46 = vadd.f32 %v5247_v44, %v5246_v34 }
 0x234   :  { %v5224_v35 = vadd.f32 %v5223_v37, %v5222_v36  ;;  %v5230_v29 = vrot.slane %v5229_v53, 1  ;;  %v5254_v16 = vrot.slane %v5253_v8, 4  ;;  %v5261_v58 = vrot.slane %v5260_v56, 4 }
 0x235   :  { %v5152_v0 = vrot.slane %v5124_v63, %v9008_v39  ;;  %v5237_v3 = vrot.slane %v5236_v61, 1  ;;  %v5243_v54 = vadd.f32 %v5242_v7, %v5241_v48  ;;  %v5249_v43 = vrot.slane %v5248_v46, 2  ;;  %v5195_v48 = vld [vmem:[#allocation2 + $0x4c8] sm:$0x3] }
 0x236   :  { %v5231_v38 = vadd.f32 %v5230_v29, %v5229_v53  ;;  %v5255_v50 = vadd.f32 %v5254_v16, %v5253_v8  ;;  %v5262_v62 = vadd.f32 %v5261_v58, %v5260_v56  ;;  %v5267_v9 = vsel %vm3218_vm0, %v5193_v41, 0.0 }
 0x237   :  { %v5154_v25 = vcombine.low %v5145_v2, %v5152_v0  ;;  %v5238_v5 = vadd.f32 %v5237_v3, %v5236_v61  ;;  %v5244_v47 = vrot.slane %v5243_v54, 1  ;;  %v5250_v55 = vadd.f32 %v5249_v43, %v5248_v46  ;;  %v5196_v2 = vld [vmem:[#allocation2 + $0x360] sm:$0x3]  ;;  %v5197_v3 = vld [vmem:[#allocation2 + $0xa8] sm:$0x3] }
 0x238   :  { %v5256_v34 = vrot.slane %v5255_v50, 2  ;;  %v5263_v36 = vrot.slane %v5262_v62, 2  ;;  %v5268_v60 = vrot.slane %v5267_v9, 4  ;;  %v5474_v21 = vcombine.low %v5224_v35, %v5231_v38 }
 0x239   :  { %v5168_v44 = vrot.slane %v5154_v25, %v9008_v39  ;;  %v5245_v37 = vadd.f32 %v5244_v47, %v5243_v54  ;;  %v5251_v63 = vrot.slane %v5250_v55, 1  ;;  %v5274_v53 = vsel %vm3218_vm0, %v5194_v12, 0.0  ;;  %v5198_v25 = vld [vmem:[#allocation2 + $0x690] sm:$0x3] }
 0x23a   :  { %v5257_v8 = vadd.f32 %v5256_v34, %v5255_v50  ;;  %v5264_v56 = vadd.f32 %v5263_v36, %v5262_v62  ;;  %v5269_v7 = vadd.f32 %v5268_v60, %v5267_v9  ;;  %v5484_v41 = vrot.slane %v5474_v21, %v9008_v39 }
 0x23b   :  { %v5169_v61 = vcombine.low %v5161_v40, %v5168_v44  ;;  %v5252_v29 = vadd.f32 %v5251_v63, %v5250_v55  ;;  %v5475_v46 = vcombine.low %v5238_v5, %v5245_v37  ;;  %v5275_v16 = vrot.slane %v5274_v53, 4  ;;  %v5199_v44 = vld [vmem:[#allocation2 + $0x658] sm:$0x3] }
 0x23c   :  { %v5258_v58 = vrot.slane %v5257_v8, 1  ;;  %v5265_v0 = vrot.slane %v5264_v56, 1  ;;  %v5270_v35 = vrot.slane %v5269_v7, 2  ;;  %v5281_v54 = vsel %vm3218_vm0, %v5195_v48, 0.0 }
 0x23d   :  { %6803 = vst [vmem:[%s8806_s8 + $0xc3] ss:$8 sm:$0xf] %v5169_v61  ;;  %6804 = vst [vmem:[%s8806_s8 + $0xc3] ss:$8 sm:$0xf0] %v5169_v61  ;;  %v5491_v43 = vrot.slane %v5475_v46, %v9008_v39  ;;  %v5276_v40 = vadd.f32 %v5275_v16, %v5274_v53 }
 0x23e   :  { %v5282_v38 = vrot.slane %v5281_v54, 4  ;;  %v5288_v50 = vsel %vm3218_vm0, %v5196_v2, 0.0  ;;  %v5259_v62 = vadd.f32 %v5258_v58, %v5257_v8  ;;  %v5266_v9 = vadd.f32 %v5265_v0, %v5264_v56  ;;  %v5200_v2 = vld [vmem:[#allocation2 + $0x238] sm:$0x3] }
 0x23f   :  { %v5271_v12 = vadd.f32 %v5270_v35, %v5269_v7  ;;  %v5289_v5 = vrot.slane %v5288_v50, 4  ;;  %v5506_v47 = vcombine.low %v5484_v41, %v5491_v43  ;;  %v5277_v55 = vrot.slane %v5276_v40, 2 }
 0x240   :  { %v5283_v34 = vadd.f32 %v5282_v38, %v5281_v54  ;;  %v5295_v36 = vsel %vm3218_vm0, %v5197_v3, 0.0  ;;  %v5476_v21 = vcombine.low %v5252_v29, %v5259_v62  ;;  %v5302_v8 = vsel %vm3218_vm0, %v5198_v25, 0.0  ;;  %v5201_v3 = vld [vmem:[#allocation2 + $0x620] sm:$0x3] }
 0x241   :  { %v5272_v60 = vrot.slane %v5271_v12, 1  ;;  %v5290_v37 = vadd.f32 %v5289_v5, %v5288_v50  ;;  %v5296_v63 = vrot.slane %v5295_v36, 4  ;;  %v5514_v48 = vrot.slane %v5506_v47, %v9008_v39 }
 0x242   :  { %v5278_v53 = vadd.f32 %v5277_v55, %v5276_v40  ;;  %v5284_v61 = vrot.slane %v5283_v34, 2  ;;  %v5498_v7 = vrot.slane %v5476_v21, %v9008_v39  ;;  %v5303_v0 = vrot.slane %v5302_v8, 4 }
 0x243   :  { %v5273_v56 = vadd.f32 %v5272_v60, %v5271_v12  ;;  %v5291_v41 = vrot.slane %v5290_v37, 2  ;;  %v5297_v46 = vadd.f32 %v5296_v63, %v5295_v36  ;;  %v5309_v29 = vsel %vm3218_vm0, %v5199_v44, 0.0 }
 0x244   :  { %v5279_v16 = vrot.slane %v5278_v53, 1  ;;  %v5285_v58 = vadd.f32 %v5284_v61, %v5283_v34  ;;  %v5310_v38 = vrot.slane %v5309_v29, 4  ;;  %v5304_v62 = vadd.f32 %v5303_v0, %v5302_v8 }
 0x245   :  { %v5477_v35 = vcombine.low %v5266_v9, %v5273_v56  ;;  %v5292_v54 = vadd.f32 %v5291_v41, %v5290_v37  ;;  %v5298_v43 = vrot.slane %v5297_v46, 2  ;;  %v5316_v12 = vsel %vm3218_vm0, %v5200_v2, 0.0  ;;  %v5202_v9 = vld [vmem:[#allocation2 + $0x110] sm:$0x3] }
 0x246   :  { %v5280_v40 = vadd.f32 %v5279_v16, %v5278_v53  ;;  %v5286_v50 = vrot.slane %v5285_v58, 1  ;;  %v5311_v55 = vadd.f32 %v5310_v38, %v5309_v29  ;;  %v5305_v34 = vrot.slane %v5304_v62, 2 }
 0x247   :  { %v5505_v25 = vrot.slane %v5477_v35, %v9008_v39  ;;  %v5293_v5 = vrot.slane %v5292_v54, 1  ;;  %v5299_v47 = vadd.f32 %v5298_v43, %v5297_v46  ;;  %v5317_v60 = vrot.slane %v5316_v12, 4  ;;  %v5203_v46 = vld [vmem:[#allocation2 + $0x520] sm:$0x3] }
 0x248   :  { %v5287_v36 = vadd.f32 %v5286_v50, %v5285_v58  ;;  %v5323_v21 = vsel %vm3218_vm0, %v5201_v3, 0.0  ;;  %v5312_v61 = vrot.slane %v5311_v55, 2  ;;  %v5306_v53 = vadd.f32 %v5305_v34, %v5304_v62  ;;  %v5204_v50 = vld [vmem:[#allocation2 + $0x278] sm:$0x3]  ;;  %v5205_v62 = vld [vmem:[#allocation2] sm:$0x3] }
 0x249   :  { %v5507_v44 = vcombine.low %v5498_v7, %v5505_v25  ;;  %v5294_v37 = vadd.f32 %v5293_v5, %v5292_v54  ;;  %v5300_v63 = vrot.slane %v5299_v47, 1  ;;  %v5318_v56 = vadd.f32 %v5317_v60, %v5316_v12 }
 0x24a   :  { %v5324_v8 = vrot.slane %v5323_v21, 4  ;;  %v5523_v41 = vcombine.low %v5280_v40, %v5287_v36  ;;  %v5313_v0 = vadd.f32 %v5312_v61, %v5311_v55  ;;  %v5330_v58 = vsel %vm3218_vm0, %v5202_v9, 0.0  ;;  %v5206_v61 = vld [vmem:[#allocation2 + $0x2f0] sm:$0x3] }
 0x24b   :  { %v5521_v2 = vrot.slane %v5507_v44, %v9008_v39  ;;  %v5301_v16 = vadd.f32 %v5300_v63, %v5299_v47  ;;  %v5307_v29 = vrot.slane %v5306_v53, 1  ;;  %v5319_v35 = vrot.slane %v5318_v56, 2 }
 0x24c   :  { %v5325_v43 = vadd.f32 %v5324_v8, %v5323_v21  ;;  %v5533_v3 = vrot.slane %v5523_v41, %v9008_v39  ;;  %v5314_v54 = vrot.slane %v5313_v0, 1  ;;  %v5331_v12 = vrot.slane %v5330_v58, 4 }
 0x24d   :  { %v5522_v7 = vcombine.low %v5514_v48, %v5521_v2  ;;  %v5524_v38 = vcombine.low %v5294_v37, %v5301_v16  ;;  %v5308_v25 = vadd.f32 %v5307_v29, %v5306_v53  ;;  %v5320_v40 = vadd.f32 %v5319_v35, %v5318_v56  ;;  %v5207_v2 = vld [vmem:[#allocation2 + $0x5c8] sm:$0x3] }
 0x24e   :  { %v5326_v5 = vrot.slane %v5325_v43, 2  ;;  %v5337_v47 = vsel %vm3218_vm0, %v5203_v46, 0.0  ;;  %v5315_v55 = vadd.f32 %v5314_v54, %v5313_v0  ;;  %v5332_v36 = vadd.f32 %v5331_v12, %v5330_v58 }
 0x24f   :  { %6805 = vst [vmem:[%s8806_s8 + $0x4] ss:$8 sm:$0xf] %v5522_v7  ;;  %6806 = vst [vmem:[%s8806_s8 + $0x4] ss:$8 sm:$0xf0] %v5522_v7  ;;  %v5540_v48 = vrot.slane %v5524_v38, %v9008_v39 }
 0x250   :  { %v5338_v34 = vrot.slane %v5337_v47, 4  ;;  %v5321_v60 = vrot.slane %v5320_v40, 1  ;;  %v5327_v21 = vadd.f32 %v5326_v5, %v5325_v43  ;;  %v5344_v9 = vsel %vm3218_vm0, %v5204_v50, 0.0  ;;  %v5208_v7 = vld [vmem:[#allocation2 + $0x498] sm:$0x3] }
 0x251   :  { %v5351_v44 = vsel %vm3218_vm0, %v5205_v62, 0.0  ;;  %v5525_v37 = vcombine.low %v5308_v25, %v5315_v55  ;;  %v5555_v63 = vcombine.low %v5533_v3, %v5540_v48  ;;  %v5333_v53 = vrot.slane %v5332_v36, 2  ;;  %v5209_v5 = vld [vmem:[#allocation2 + $0x48] sm:$0x3] }
 0x252   :  { %v5339_v56 = vadd.f32 %v5338_v34, %v5337_v47  ;;  %v5322_v8 = vadd.f32 %v5321_v60, %v5320_v40  ;;  %v5328_v41 = vrot.slane %v5327_v21, 1  ;;  %v5345_v16 = vrot.slane %v5344_v9, 4 }
 0x253   :  { %v5352_v0 = vrot.slane %v5351_v44, 4  ;;  %v5547_v46 = vrot.slane %v5525_v37, %v9008_v39  ;;  %v5563_v58 = vrot.slane %v5555_v63, %v9008_v39  ;;  %v5334_v29 = vadd.f32 %v5333_v53, %v5332_v36 }
 0x254   :  { %v5340_v35 = vrot.slane %v5339_v56, 2  ;;  %v5329_v43 = vadd.f32 %v5328_v41, %v5327_v21  ;;  %v5346_v54 = vadd.f32 %v5345_v16, %v5344_v9  ;;  %v5358_v3 = vsel %vm3218_vm0, %v5206_v61, 0.0 }
 0x255   :  { %v5353_v38 = vadd.f32 %v5352_v0, %v5351_v44  ;;  %v5335_v50 = vrot.slane %v5334_v29, 1  ;;  %v5359_v12 = vrot.slane %v5358_v3, 4  ;;  %v5365_v25 = vsel %vm3218_vm0, %v5207_v2, 0.0 }
 0x256   :  { %v5341_v62 = vadd.f32 %v5340_v35, %v5339_v56  ;;  %v5526_v40 = vcombine.low %v5322_v8, %v5329_v43  ;;  %v5347_v47 = vrot.slane %v5346_v54, 2  ;;  %v5366_v48 = vrot.slane %v5365_v25, 4 }
 0x257   :  { %v5354_v55 = vrot.slane %v5353_v38, 2  ;;  %v5336_v34 = vadd.f32 %v5335_v50, %v5334_v29  ;;  %v5360_v36 = vadd.f32 %v5359_v12, %v5358_v3  ;;  %v5372_v21 = vsel %vm3218_vm0, %v5208_v7, 0.0  ;;  %v5210_v50 = vld [vmem:[#allocation2 + $0x570] sm:$0x3] }
 0x258   :  { %v5342_v60 = vrot.slane %v5341_v62, 1  ;;  %v5554_v9 = vrot.slane %v5526_v40, %v9008_v39  ;;  %v5348_v44 = vadd.f32 %v5347_v47, %v5346_v54  ;;  %v5367_v63 = vadd.f32 %v5366_v48, %v5365_v25 }
 0x259   :  { %v5355_v37 = vadd.f32 %v5354_v55, %v5353_v38  ;;  %v5361_v53 = vrot.slane %v5360_v36, 2  ;;  %v5373_v56 = vrot.slane %v5372_v21, 4  ;;  %v5379_v41 = vsel %vm3218_vm0, %v5209_v5, 0.0  ;;  %v5211_v5 = vld [vmem:[#allocation2 + $0x1d8] sm:$0x3] }
 0x25a   :  { %v5343_v61 = vadd.f32 %v5342_v60, %v5341_v62  ;;  %v5556_v8 = vcombine.low %v5547_v46, %v5554_v9  ;;  %v5349_v2 = vrot.slane %v5348_v44, 1  ;;  %v5368_v0 = vrot.slane %v5367_v63, 2  ;;  %v5212_v46 = vld [vmem:[#allocation2 + $0x5e0] sm:$0x3] }
 0x25b   :  { %v5356_v16 = vrot.slane %v5355_v37, 1  ;;  %v5362_v35 = vadd.f32 %v5361_v53, %v5360_v36  ;;  %v5374_v29 = vadd.f32 %v5373_v56, %v5372_v21  ;;  %v5380_v43 = vrot.slane %v5379_v41, 4 }
 0x25c   :  { %v5572_v3 = vcombine.low %v5336_v34, %v5343_v61  ;;  %v5570_v7 = vrot.slane %v5556_v8, %v9008_v39  ;;  %v5350_v12 = vadd.f32 %v5349_v2, %v5348_v44  ;;  %v5369_v38 = vadd.f32 %v5368_v0, %v5367_v63  ;;  %v5213_v61 = vld [vmem:[#allocation2 + $0x6e0] sm:$0x3] }
 0x25d   :  { %v5357_v54 = vadd.f32 %v5356_v16, %v5355_v37  ;;  %v5363_v25 = vrot.slane %v5362_v35, 1  ;;  %v5375_v62 = vrot.slane %v5374_v29, 2  ;;  %v5381_v40 = vadd.f32 %v5380_v43, %v5379_v41 }
 0x25e   :  { %v5582_v47 = vrot.slane %v5572_v3, %v9008_v39  ;;  %v5571_v55 = vcombine.low %v5563_v58, %v5570_v7  ;;  %v5370_v48 = vrot.slane %v5369_v38, 1  ;;  %v5386_v36 = vsel %vm3218_vm0, %v5210_v50, 0.0  ;;  %v5215_v7 = vld [vmem:[#allocation2 + $0x580] sm:$0x3] }
 0x25f   :  { %v5573_v60 = vcombine.low %v5350_v12, %v5357_v54  ;;  %v5364_v21 = vadd.f32 %v5363_v25, %v5362_v35  ;;  %v5376_v34 = vadd.f32 %v5375_v62, %v5374_v29  ;;  %v5382_v9 = vrot.slane %v5381_v40, 2  ;;  %v5214_v35 = vld [vmem:[#allocation2 + $0x78] sm:$0x3] }
 0x260   :  { %v5387_v53 = vrot.slane %v5386_v36, 4  ;;  %6807 = vst [vmem:[%s8806_s8 + $0x44] ss:$8 sm:$0xf] %v5571_v55  ;;  %v5371_v44 = vadd.f32 %v5370_v48, %v5369_v38  ;;  %v5393_v37 = vsel %vm3218_vm0, %v5211_v5, 0.0  ;;  %v5400_v63 = vsel %vm3218_vm0, %v5212_v46, 0.0 }
 0x261   :  { %6808 = vst [vmem:[%s8806_s8 + $0x44] ss:$8 sm:$0xf0] %v5571_v55  ;;  %v5589_v58 = vrot.slane %v5573_v60, %v9008_v39  ;;  %v5377_v56 = vrot.slane %v5376_v34, 1  ;;  %v5383_v41 = vadd.f32 %v5382_v9, %v5381_v40  ;;  %v5394_v2 = vrot.slane %v5393_v37, 4 }
 0x262   :  { %v5388_v8 = vadd.f32 %v5387_v53, %v5386_v36  ;;  %v5574_v16 = vcombine.low %v5364_v21, %v5371_v44  ;;  %v5401_v29 = vrot.slane %v5400_v63, 4  ;;  %v5407_v43 = vsel %vm3218_vm0, %v5213_v61, 0.0  ;;  %v5216_v46 = vld [vmem:[#allocation2 + $0x668] sm:$0x3] }
 0x263   :  { %v5604_v0 = vcombine.low %v5582_v47, %v5589_v58  ;;  %v5378_v3 = vadd.f32 %v5377_v56, %v5376_v34  ;;  %v5384_v50 = vrot.slane %v5383_v41, 1  ;;  %v5395_v54 = vadd.f32 %v5394_v2, %v5393_v37  ;;  %v5217_v58 = vld [vmem:[#allocation2 + $0xf0] sm:$0x3] }
 0x264   :  { %v5389_v12 = vrot.slane %v5388_v8, 2  ;;  %v5596_v38 = vrot.slane %v5574_v16, %v9008_v39  ;;  %v5402_v62 = vadd.f32 %v5401_v29, %v5400_v63  ;;  %v5408_v5 = vrot.slane %v5407_v43, 4 }
 0x265   :  { %v5612_v25 = vrot.slane %v5604_v0, %v9008_v39  ;;  %v5385_v40 = vadd.f32 %v5384_v50, %v5383_v41  ;;  %v5396_v48 = vrot.slane %v5395_v54, 2  ;;  %v5414_v47 = vsel %vm3218_vm0, %v5214_v35, 0.0 }
 0x266   :  { %v5390_v55 = vadd.f32 %v5389_v12, %v5388_v8  ;;  %v5403_v60 = vrot.slane %v5402_v62, 2  ;;  %v5409_v36 = vadd.f32 %v5408_v5, %v5407_v43  ;;  %v5415_v21 = vrot.slane %v5414_v47, 4  ;;  %v5686_v5 = vld [vmem:[#allocation2 + $0x150] sm:$0x3] }
 0x267   :  { %v5421_v34 = vsel %vm3218_vm0, %v5215_v7, 0.0  ;;  %v5575_v9 = vcombine.low %v5378_v3, %v5385_v40  ;;  %v5397_v53 = vadd.f32 %v5396_v48, %v5395_v54  ;;  %v5428_v41 = vsel %vm3218_vm0, %v5216_v46, 0.0 }
 0x268   :  { %v5391_v61 = vrot.slane %v5390_v55, 1  ;;  %v5422_v44 = vrot.slane %v5421_v34, 4  ;;  %v5404_v37 = vadd.f32 %v5403_v60, %v5402_v62  ;;  %v5410_v56 = vrot.slane %v5409_v36, 2 }
 0x269   :  { %v5416_v63 = vadd.f32 %v5415_v21, %v5414_v47  ;;  %v5603_v8 = vrot.slane %v5575_v9, %v9008_v39  ;;  %v5398_v16 = vrot.slane %v5397_v53, 1  ;;  %v5429_v50 = vrot.slane %v5428_v41, 4 }
 0x26a   :  { %v5392_v2 = vadd.f32 %v5391_v61, %v5390_v55  ;;  %v5423_v0 = vadd.f32 %v5422_v44, %v5421_v34  ;;  %v5405_v35 = vrot.slane %v5404_v37, 1  ;;  %v5411_v29 = vadd.f32 %v5410_v56, %v5409_v36  ;;  %v5687_v34 = vld [vmem:[#allocation2 + $0x170] sm:$0x3]  ;;  %v5688_v44 = vld [vmem:[#allocation2 + $0x1a8] sm:$0x3] }
 0x26b   :  { %v5417_v43 = vrot.slane %v5416_v63, 2  ;;  %v5605_v7 = vcombine.low %v5596_v38, %v5603_v8  ;;  %v5399_v3 = vadd.f32 %v5398_v16, %v5397_v53  ;;  %v5435_v54 = vsel %vm3218_vm0, %v5217_v58, 0.0  ;;  %v5689_v16 = vld [vmem:[#allocation2 + $0xd8] sm:$0x3] }
 0x26c   :  { %v5424_v12 = vrot.slane %v5423_v0, 2  ;;  %v5406_v62 = vadd.f32 %v5405_v35, %v5404_v37  ;;  %v5412_v40 = vrot.slane %v5411_v29, 1  ;;  %v5430_v47 = vadd.f32 %v5429_v50, %v5428_v41 }
 0x26d   :  { %v5418_v48 = vadd.f32 %v5417_v43, %v5416_v63  ;;  %v5619_v46 = vrot.slane %v5605_v7, %v9008_v39  ;;  %v5436_v55 = vrot.slane %v5435_v54, 4  ;;  %v5621_v21 = vcombine.low %v5392_v2, %v5399_v3 }
 0x26e   :  { %v5425_v60 = vadd.f32 %v5424_v12, %v5423_v0  ;;  %v5413_v9 = vadd.f32 %v5412_v40, %v5411_v29  ;;  %v5431_v61 = vrot.slane %v5430_v47, 2  ;;  %v5718_v38 = vsel %vm3218_vm0, %v5686_v5, 0.0  ;;  %v5690_v5 = vld [vmem:[#allocation2 + $0x280] sm:$0x3] }
 0x26f   :  { %v5419_v36 = vrot.slane %v5418_v48, 1  ;;  %v5620_v53 = vcombine.low %v5612_v25, %v5619_v46  ;;  %v5437_v58 = vadd.f32 %v5436_v55, %v5435_v54  ;;  %v5631_v37 = vrot.slane %v5621_v21, %v9008_v39 }
 0x270   :  { %v5426_v56 = vrot.slane %v5425_v60, 1  ;;  %v5432_v63 = vadd.f32 %v5431_v61, %v5430_v47  ;;  %v5622_v41 = vcombine.low %v5406_v62, %v5413_v9  ;;  %v5719_v35 = vrot.slane %v5718_v38, 4  ;;  %v5692_v9 = vld [vmem:[#allocation2 + $0x398] sm:$0x3] }
 0x271   :  { %v5420_v8 = vadd.f32 %v5419_v36, %v5418_v48  ;;  %6809 = vst [vmem:[%s8806_s8 + $0x84] ss:$8 sm:$0xf] %v5620_v53  ;;  %6810 = vst [vmem:[%s8806_s8 + $0x84] ss:$8 sm:$0xf0] %v5620_v53 }
 0x272   :  { %v5427_v2 = vadd.f32 %v5426_v56, %v5425_v60  ;;  %v5438_v0 = vrot.slane %v5437_v58, 2  ;;  %v5725_v25 = vsel %vm3218_vm0, %v5687_v34, 0.0  ;;  %v5732_v29 = vsel %vm3218_vm0, %v5688_v44, 0.0  ;;  %v5691_v34 = vld [vmem:[#allocation2 + $0x430] sm:$0x3] }
 0x273   :  { %v5433_v43 = vrot.slane %v5432_v63, 1  ;;  %v5638_v50 = vrot.slane %v5622_v41, %v9008_v39  ;;  %v5720_v7 = vadd.f32 %v5719_v35, %v5718_v38  ;;  %v5726_v3 = vrot.slane %v5725_v25, 4 }
 0x274   :  { %v5439_v12 = vadd.f32 %v5438_v0, %v5437_v58  ;;  %v5623_v54 = vcombine.low %v5420_v8, %v5427_v2  ;;  %v5733_v62 = vrot.slane %v5732_v29, 4  ;;  %v5739_v40 = vsel %vm3218_vm0, %v5689_v16, 0.0 }
 0x275   :  { %v5434_v48 = vadd.f32 %v5433_v43, %v5432_v63  ;;  %v5653_v47 = vcombine.low %v5631_v37, %v5638_v50  ;;  %v5721_v46 = vrot.slane %v5720_v7, 2  ;;  %v5727_v60 = vadd.f32 %v5726_v3, %v5725_v25  ;;  %v5693_v25 = vld [vmem:[#allocation2 + $0x240] sm:$0x3] }
 0x276   :  { %v5440_v55 = vrot.slane %v5439_v12, 1  ;;  %v5645_v21 = vrot.slane %v5623_v54, %v9008_v39  ;;  %v5734_v36 = vadd.f32 %v5733_v62, %v5732_v29  ;;  %v5740_v61 = vrot.slane %v5739_v40, 4 }
 0x277   :  { %v5661_v44 = vrot.slane %v5653_v47, %v9008_v39  ;;  %v5722_v38 = vadd.f32 %v5721_v46, %v5720_v7  ;;  %v5728_v53 = vrot.slane %v5727_v60, 2  ;;  %v5746_v56 = vsel %vm3218_vm0, %v5690_v5, 0.0 }
 0x278   :  { %v5441_v58 = vadd.f32 %v5440_v55, %v5439_v12  ;;  %v5735_v8 = vrot.slane %v5734_v36, 2  ;;  %v5741_v41 = vadd.f32 %v5740_v61, %v5739_v40  ;;  %v5747_v63 = vrot.slane %v5746_v56, 4 }
 0x279   :  { %v5723_v37 = vrot.slane %v5722_v38, 1  ;;  %v5729_v16 = vadd.f32 %v5728_v53, %v5727_v60  ;;  %v5753_v35 = vsel %vm3218_vm0, %v5691_v34, 0.0  ;;  %v5760_v2 = vsel %vm3218_vm0, %v5692_v9, 0.0  ;;  %v5694_v9 = vld [vmem:[#allocation2 + $0x540] sm:$0x3] }
 0x27a   :  { %v5624_v0 = vcombine.low %v5434_v48, %v5441_v58  ;;  %v5736_v29 = vadd.f32 %v5735_v8, %v5734_v36  ;;  %v5742_v43 = vrot.slane %v5741_v41, 2  ;;  %v5748_v50 = vadd.f32 %v5747_v63, %v5746_v56 }
 0x27b   :  { %v5724_v3 = vadd.f32 %v5723_v37, %v5722_v38  ;;  %v5730_v7 = vrot.slane %v5729_v16, 1  ;;  %v5754_v54 = vrot.slane %v5753_v35, 4  ;;  %v5761_v62 = vrot.slane %v5760_v2, 4 }
 0x27c   :  { %v5652_v12 = vrot.slane %v5624_v0, %v9008_v39  ;;  %v5737_v5 = vrot.slane %v5736_v29, 1  ;;  %v5743_v40 = vadd.f32 %v5742_v43, %v5741_v41  ;;  %v5749_v47 = vrot.slane %v5748_v50, 2  ;;  %v5695_v41 = vld [vmem:[#allocation2 + $0x698] sm:$0x3] }
 0x27d   :  { %v5731_v46 = vadd.f32 %v5730_v7, %v5729_v16  ;;  %v5755_v60 = vadd.f32 %v5754_v54, %v5753_v35  ;;  %v5762_v55 = vadd.f32 %v5761_v62, %v5760_v2  ;;  %v5767_v34 = vsel %vm3218_vm0, %v5693_v25, 0.0 }
 0x27e   :  { %v5654_v48 = vcombine.low %v5645_v21, %v5652_v12  ;;  %v5738_v61 = vadd.f32 %v5737_v5, %v5736_v29  ;;  %v5744_v36 = vrot.slane %v5743_v40, 1  ;;  %v5750_v53 = vadd.f32 %v5749_v47, %v5748_v50  ;;  %v5696_v21 = vld [vmem:[#allocation2 + $0x458] sm:$0x3]  ;;  %v5697_v5 = vld [vmem:[#allocation2 + $0x590] sm:$0x3] }
 0x27f   :  { %v5756_v56 = vrot.slane %v5755_v60, 2  ;;  %v5763_v38 = vrot.slane %v5762_v55, 2  ;;  %v5768_v58 = vrot.slane %v5767_v34, 4  ;;  %v5974_v8 = vcombine.low %v5724_v3, %v5731_v46 }
 0x280   :  { %v5668_v63 = vrot.slane %v5654_v48, %v9008_v39  ;;  %v5745_v37 = vadd.f32 %v5744_v36, %v5743_v40  ;;  %v5751_v0 = vrot.slane %v5750_v53, 1  ;;  %v5774_v16 = vsel %vm3218_vm0, %v5694_v9, 0.0  ;;  %v5698_v48 = vld [vmem:[#allocation2 + $0x30] sm:$0x3] }
 0x281   :  { %v5757_v35 = vadd.f32 %v5756_v56, %v5755_v60  ;;  %v5764_v2 = vadd.f32 %v5763_v38, %v5762_v55  ;;  %v5769_v43 = vadd.f32 %v5768_v58, %v5767_v34  ;;  %v5984_v25 = vrot.slane %v5974_v8, %v9008_v39 }
 0x282   :  { %v5669_v29 = vcombine.low %v5661_v44, %v5668_v63  ;;  %v5752_v7 = vadd.f32 %v5751_v0, %v5750_v53  ;;  %v5975_v50 = vcombine.low %v5738_v61, %v5745_v37  ;;  %v5775_v54 = vrot.slane %v5774_v16, 4  ;;  %v5699_v63 = vld [vmem:[#allocation2 + $0x608] sm:$0x3] }
 0x283   :  { %v5758_v62 = vrot.slane %v5757_v35, 1  ;;  %v5765_v12 = vrot.slane %v5764_v2, 1  ;;  %v5770_v3 = vrot.slane %v5769_v43, 2  ;;  %v5781_v40 = vsel %vm3218_vm0, %v5695_v41, 0.0 }
 0x284   :  { %6811 = vst [vmem:[%s8806_s8 + $0xc4] ss:$8 sm:$0xf] %v5669_v29  ;;  %6812 = vst [vmem:[%s8806_s8 + $0xc4] ss:$8 sm:$0xf0] %v5669_v29  ;;  %v5991_v47 = vrot.slane %v5975_v50, %v9008_v39  ;;  %v5776_v44 = vadd.f32 %v5775_v54, %v5774_v16 }
 0x285   :  { %v5782_v46 = vrot.slane %v5781_v40, 4  ;;  %v5788_v60 = vsel %vm3218_vm0, %v5696_v21, 0.0  ;;  %v5759_v55 = vadd.f32 %v5758_v62, %v5757_v35  ;;  %v5766_v34 = vadd.f32 %v5765_v12, %v5764_v2  ;;  %v5700_v21 = vld [vmem:[#allocation2 + $0x10] sm:$0x3] }
 0x286   :  { %v5771_v9 = vadd.f32 %v5770_v3, %v5769_v43  ;;  %v5789_v61 = vrot.slane %v5788_v60, 4  ;;  %v6006_v36 = vcombine.low %v5984_v25, %v5991_v47  ;;  %v5777_v53 = vrot.slane %v5776_v44, 2 }
 0x287   :  { %v5783_v56 = vadd.f32 %v5782_v46, %v5781_v40  ;;  %v5795_v38 = vsel %vm3218_vm0, %v5697_v5, 0.0  ;;  %v5976_v8 = vcombine.low %v5752_v7, %v5759_v55  ;;  %v5802_v35 = vsel %vm3218_vm0, %v5698_v48, 0.0  ;;  %v5701_v5 = vld [vmem:[#allocation2 + $0x4a8] sm:$0x3] }
 0x288   :  { %v5772_v58 = vrot.slane %v5771_v9, 1  ;;  %v5790_v37 = vadd.f32 %v5789_v61, %v5788_v60  ;;  %v5796_v0 = vrot.slane %v5795_v38, 4  ;;  %v6014_v41 = vrot.slane %v6006_v36, %v9008_v39 }
 0x289   :  { %v5778_v16 = vadd.f32 %v5777_v53, %v5776_v44  ;;  %v5784_v29 = vrot.slane %v5783_v56, 2  ;;  %v5998_v43 = vrot.slane %v5976_v8, %v9008_v39  ;;  %v5803_v12 = vrot.slane %v5802_v35, 4 }
 0x28a   :  { %v5773_v2 = vadd.f32 %v5772_v58, %v5771_v9  ;;  %v5791_v25 = vrot.slane %v5790_v37, 2  ;;  %v5797_v50 = vadd.f32 %v5796_v0, %v5795_v38  ;;  %v5809_v7 = vsel %vm3218_vm0, %v5699_v63, 0.0 }
 0x28b   :  { %v5779_v54 = vrot.slane %v5778_v16, 1  ;;  %v5785_v62 = vadd.f32 %v5784_v29, %v5783_v56  ;;  %v5810_v46 = vrot.slane %v5809_v7, 4  ;;  %v5804_v55 = vadd.f32 %v5803_v12, %v5802_v35 }
 0x28c   :  { %v5977_v3 = vcombine.low %v5766_v34, %v5773_v2  ;;  %v5792_v40 = vadd.f32 %v5791_v25, %v5790_v37  ;;  %v5798_v47 = vrot.slane %v5797_v50, 2  ;;  %v5816_v9 = vsel %vm3218_vm0, %v5700_v21, 0.0  ;;  %v5702_v34 = vld [vmem:[#allocation2 + $0x160] sm:$0x3] }
 0x28d   :  { %v5780_v44 = vadd.f32 %v5779_v54, %v5778_v16  ;;  %v5786_v60 = vrot.slane %v5785_v62, 1  ;;  %v5811_v53 = vadd.f32 %v5810_v46, %v5809_v7  ;;  %v5805_v56 = vrot.slane %v5804_v55, 2 }
 0x28e   :  { %v6005_v48 = vrot.slane %v5977_v3, %v9008_v39  ;;  %v5793_v61 = vrot.slane %v5792_v40, 1  ;;  %v5799_v36 = vadd.f32 %v5798_v47, %v5797_v50  ;;  %v5817_v58 = vrot.slane %v5816_v9, 4  ;;  %v5703_v50 = vld [vmem:[#allocation2 + $0x300] sm:$0x3] }
 0x28f   :  { %v5787_v38 = vadd.f32 %v5786_v60, %v5785_v62  ;;  %v5823_v8 = vsel %vm3218_vm0, %v5701_v5, 0.0  ;;  %v5812_v29 = vrot.slane %v5811_v53, 2  ;;  %v5806_v16 = vadd.f32 %v5805_v56, %v5804_v55  ;;  %v5704_v60 = vld [vmem:[#allocation2 + $0x290] sm:$0x3]  ;;  %v5705_v55 = vld [vmem:[#allocation2 + $0x98] sm:$0x3] }
 0x290   :  { %v6007_v63 = vcombine.low %v5998_v43, %v6005_v48  ;;  %v5794_v37 = vadd.f32 %v5793_v61, %v5792_v40  ;;  %v5800_v0 = vrot.slane %v5799_v36, 1  ;;  %v5818_v2 = vadd.f32 %v5817_v58, %v5816_v9 }
 0x291   :  { %v5824_v35 = vrot.slane %v5823_v8, 4  ;;  %v6023_v25 = vcombine.low %v5780_v44, %v5787_v38  ;;  %v5813_v12 = vadd.f32 %v5812_v29, %v5811_v53  ;;  %v5830_v62 = vsel %vm3218_vm0, %v5702_v34, 0.0  ;;  %v5706_v29 = vld [vmem:[#allocation2 + $0x518] sm:$0x3] }
 0x292   :  { %v6021_v21 = vrot.slane %v6007_v63, %v9008_v39  ;;  %v5801_v54 = vadd.f32 %v5800_v0, %v5799_v36  ;;  %v5807_v7 = vrot.slane %v5806_v16, 1  ;;  %v5819_v3 = vrot.slane %v5818_v2, 2 }
 0x293   :  { %v5825_v47 = vadd.f32 %v5824_v35, %v5823_v8  ;;  %v6033_v5 = vrot.slane %v6023_v25, %v9008_v39  ;;  %v5814_v40 = vrot.slane %v5813_v12, 1  ;;  %v5831_v9 = vrot.slane %v5830_v62, 4 }
 0x294   :  { %v6022_v43 = vcombine.low %v6014_v41, %v6021_v21  ;;  %v6024_v46 = vcombine.low %v5794_v37, %v5801_v54  ;;  %v5808_v48 = vadd.f32 %v5807_v7, %v5806_v16  ;;  %v5820_v44 = vadd.f32 %v5819_v3, %v5818_v2  ;;  %v5707_v21 = vld [vmem:[#allocation2 + $0x1c0] sm:$0x3] }
 0x295   :  { %v5826_v61 = vrot.slane %v5825_v47, 2  ;;  %v5837_v36 = vsel %vm3218_vm0, %v5703_v50, 0.0  ;;  %v5815_v53 = vadd.f32 %v5814_v40, %v5813_v12  ;;  %v5832_v38 = vadd.f32 %v5831_v9, %v5830_v62 }
 0x296   :  { %6813 = vst [vmem:[%s8806_s8 + $0x5] ss:$8 sm:$0xf] %v6022_v43  ;;  %6814 = vst [vmem:[%s8806_s8 + $0x5] ss:$8 sm:$0xf0] %v6022_v43  ;;  %v6040_v41 = vrot.slane %v6024_v46, %v9008_v39 }
 0x297   :  { %v5838_v56 = vrot.slane %v5837_v36, 4  ;;  %v5821_v58 = vrot.slane %v5820_v44, 1  ;;  %v5827_v8 = vadd.f32 %v5826_v61, %v5825_v47  ;;  %v5844_v34 = vsel %vm3218_vm0, %v5704_v60, 0.0  ;;  %v5708_v43 = vld [vmem:[#allocation2 + $0x468] sm:$0x3] }
 0x298   :  { %v5851_v63 = vsel %vm3218_vm0, %v5705_v55, 0.0  ;;  %v6025_v37 = vcombine.low %v5808_v48, %v5815_v53  ;;  %v6055_v0 = vcombine.low %v6033_v5, %v6040_v41  ;;  %v5833_v16 = vrot.slane %v5832_v38, 2  ;;  %v5709_v61 = vld [vmem:[#allocation2 + $0x40] sm:$0x3] }
 0x299   :  { %v5839_v2 = vadd.f32 %v5838_v56, %v5837_v36  ;;  %v5822_v35 = vadd.f32 %v5821_v58, %v5820_v44  ;;  %v5828_v25 = vrot.slane %v5827_v8, 1  ;;  %v5845_v54 = vrot.slane %v5844_v34, 4 }
 0x29a   :  { %v5852_v12 = vrot.slane %v5851_v63, 4  ;;  %v6047_v50 = vrot.slane %v6025_v37, %v9008_v39  ;;  %v6063_v62 = vrot.slane %v6055_v0, %v9008_v39  ;;  %v5834_v7 = vadd.f32 %v5833_v16, %v5832_v38 }
 0x29b   :  { %v5840_v3 = vrot.slane %v5839_v2, 2  ;;  %v5829_v47 = vadd.f32 %v5828_v25, %v5827_v8  ;;  %v5846_v40 = vadd.f32 %v5845_v54, %v5844_v34  ;;  %v5858_v5 = vsel %vm3218_vm0, %v5706_v29, 0.0 }
 0x29c   :  { %v5853_v46 = vadd.f32 %v5852_v12, %v5851_v63  ;;  %v5835_v60 = vrot.slane %v5834_v7, 1  ;;  %v5859_v9 = vrot.slane %v5858_v5, 4  ;;  %v5865_v48 = vsel %vm3218_vm0, %v5707_v21, 0.0 }
 0x29d   :  { %v5841_v55 = vadd.f32 %v5840_v3, %v5839_v2  ;;  %v6026_v44 = vcombine.low %v5822_v35, %v5829_v47  ;;  %v5847_v36 = vrot.slane %v5846_v40, 2  ;;  %v5866_v41 = vrot.slane %v5865_v48, 4 }
 0x29e   :  { %v5854_v53 = vrot.slane %v5853_v46, 2  ;;  %v5836_v56 = vadd.f32 %v5835_v60, %v5834_v7  ;;  %v5860_v38 = vadd.f32 %v5859_v9, %v5858_v5  ;;  %v5872_v8 = vsel %vm3218_vm0, %v5708_v43, 0.0  ;;  %v5710_v60 = vld [vmem:[#allocation2 + $0x248] sm:$0x3] }
 0x29f   :  { %v5842_v58 = vrot.slane %v5841_v55, 1  ;;  %v6054_v34 = vrot.slane %v6026_v44, %v9008_v39  ;;  %v5848_v63 = vadd.f32 %v5847_v36, %v5846_v40  ;;  %v5867_v0 = vadd.f32 %v5866_v41, %v5865_v48 }
 0x2a0   :  { %v5855_v37 = vadd.f32 %v5854_v53, %v5853_v46  ;;  %v5861_v16 = vrot.slane %v5860_v38, 2  ;;  %v5873_v2 = vrot.slane %v5872_v8, 4  ;;  %v5879_v25 = vsel %vm3218_vm0, %v5709_v61, 0.0  ;;  %v5711_v61 = vld [vmem:[#allocation2 + $0x400] sm:$0x3] }
 0x2a1   :  { %v5843_v29 = vadd.f32 %v5842_v58, %v5841_v55  ;;  %v6056_v35 = vcombine.low %v6047_v50, %v6054_v34  ;;  %v5849_v21 = vrot.slane %v5848_v63, 1  ;;  %v5868_v12 = vrot.slane %v5867_v0, 2  ;;  %v5712_v50 = vld [vmem:[#allocation2 + $0x2f8] sm:$0x3] }
 0x2a2   :  { %v5856_v54 = vrot.slane %v5855_v37, 1  ;;  %v5862_v3 = vadd.f32 %v5861_v16, %v5860_v38  ;;  %v5874_v7 = vadd.f32 %v5873_v2, %v5872_v8  ;;  %v5880_v47 = vrot.slane %v5879_v25, 4 }
 0x2a3   :  { %v6072_v5 = vcombine.low %v5836_v56, %v5843_v29  ;;  %v6070_v43 = vrot.slane %v6056_v35, %v9008_v39  ;;  %v5850_v9 = vadd.f32 %v5849_v21, %v5848_v63  ;;  %v5869_v46 = vadd.f32 %v5868_v12, %v5867_v0  ;;  %v5713_v29 = vld [vmem:[#allocation2 + $0x3e8] sm:$0x3] }
 0x2a4   :  { %v5857_v40 = vadd.f32 %v5856_v54, %v5855_v37  ;;  %v5863_v48 = vrot.slane %v5862_v3, 1  ;;  %v5875_v55 = vrot.slane %v5874_v7, 2  ;;  %v5881_v44 = vadd.f32 %v5880_v47, %v5879_v25 }
 0x2a5   :  { %v6082_v36 = vrot.slane %v6072_v5, %v9008_v39  ;;  %v6071_v53 = vcombine.low %v6063_v62, %v6070_v43  ;;  %v5870_v41 = vrot.slane %v5869_v46, 1  ;;  %v5886_v38 = vsel %vm3218_vm0, %v5710_v60, 0.0  ;;  %v5715_v43 = vld [vmem:[#allocation2 + $0x530] sm:$0x3] }
 0x2a6   :  { %v6073_v58 = vcombine.low %v5850_v9, %v5857_v40  ;;  %v5864_v8 = vadd.f32 %v5863_v48, %v5862_v3  ;;  %v5876_v56 = vadd.f32 %v5875_v55, %v5874_v7  ;;  %v5882_v34 = vrot.slane %v5881_v44, 2  ;;  %v5714_v3 = vld [vmem:[#allocation2 + $0x168] sm:$0x3] }
 0x2a7   :  { %v5887_v16 = vrot.slane %v5886_v38, 4  ;;  %6815 = vst [vmem:[%s8806_s8 + $0x45] ss:$8 sm:$0xf] %v6071_v53  ;;  %v5871_v63 = vadd.f32 %v5870_v41, %v5869_v46  ;;  %v5893_v37 = vsel %vm3218_vm0, %v5711_v61, 0.0  ;;  %v5900_v0 = vsel %vm3218_vm0, %v5712_v50, 0.0 }
 0x2a8   :  { %6816 = vst [vmem:[%s8806_s8 + $0x45] ss:$8 sm:$0xf0] %v6071_v53  ;;  %v6089_v62 = vrot.slane %v6073_v58, %v9008_v39  ;;  %v5877_v2 = vrot.slane %v5876_v56, 1  ;;  %v5883_v25 = vadd.f32 %v5882_v34, %v5881_v44  ;;  %v5894_v21 = vrot.slane %v5893_v37, 4 }
 0x2a9   :  { %v5888_v35 = vadd.f32 %v5887_v16, %v5886_v38  ;;  %v6074_v54 = vcombine.low %v5864_v8, %v5871_v63  ;;  %v5901_v7 = vrot.slane %v5900_v0, 4  ;;  %v5907_v47 = vsel %vm3218_vm0, %v5713_v29, 0.0  ;;  %v5716_v50 = vld [vmem:[#allocation2 + $0x38] sm:$0x3] }
 0x2aa   :  { %v6104_v12 = vcombine.low %v6082_v36, %v6089_v62  ;;  %v5878_v5 = vadd.f32 %v5877_v2, %v5876_v56  ;;  %v5884_v60 = vrot.slane %v5883_v25, 1  ;;  %v5895_v40 = vadd.f32 %v5894_v21, %v5893_v37  ;;  %v5717_v62 = vld [vmem:[#allocation2 + $0x1d0] sm:$0x3] }
 0x2ab   :  { %v5889_v9 = vrot.slane %v5888_v35, 2  ;;  %v6096_v46 = vrot.slane %v6074_v54, %v9008_v39  ;;  %v5902_v55 = vadd.f32 %v5901_v7, %v5900_v0  ;;  %v5908_v61 = vrot.slane %v5907_v47, 4 }
 0x2ac   :  { %v6112_v48 = vrot.slane %v6104_v12, %v9008_v39  ;;  %v5885_v44 = vadd.f32 %v5884_v60, %v5883_v25  ;;  %v5896_v41 = vrot.slane %v5895_v40, 2  ;;  %v5914_v36 = vsel %vm3218_vm0, %v5714_v3, 0.0 }
 0x2ad   :  { %v5890_v53 = vadd.f32 %v5889_v9, %v5888_v35  ;;  %v5903_v58 = vrot.slane %v5902_v55, 2  ;;  %v5909_v38 = vadd.f32 %v5908_v61, %v5907_v47  ;;  %v5915_v8 = vrot.slane %v5914_v36, 4  ;;  %v6186_v61 = vld [vmem:[#allocation2 + $0x638] sm:$0x3] }
 0x2ae   :  { %v5921_v56 = vsel %vm3218_vm0, %v5715_v43, 0.0  ;;  %v6075_v34 = vcombine.low %v5878_v5, %v5885_v44  ;;  %v5897_v16 = vadd.f32 %v5896_v41, %v5895_v40  ;;  %v5928_v25 = vsel %vm3218_vm0, %v5716_v50, 0.0 }
 0x2af   :  { %v5891_v29 = vrot.slane %v5890_v53, 1  ;;  %v5922_v63 = vrot.slane %v5921_v56, 4  ;;  %v5904_v37 = vadd.f32 %v5903_v58, %v5902_v55  ;;  %v5910_v2 = vrot.slane %v5909_v38, 2 }
 0x2b0   :  { %v5916_v0 = vadd.f32 %v5915_v8, %v5914_v36  ;;  %v6103_v35 = vrot.slane %v6075_v34, %v9008_v39  ;;  %v5898_v54 = vrot.slane %v5897_v16, 1  ;;  %v5929_v60 = vrot.slane %v5928_v25, 4 }
 0x2b1   :  { %v5892_v21 = vadd.f32 %v5891_v29, %v5890_v53  ;;  %v5923_v12 = vadd.f32 %v5922_v63, %v5921_v56  ;;  %v5905_v3 = vrot.slane %v5904_v37, 1  ;;  %v5911_v7 = vadd.f32 %v5910_v2, %v5909_v38  ;;  %v6187_v56 = vld [vmem:[#allocation2 + $0x578] sm:$0x3]  ;;  %v6188_v63 = vld [vmem:[#allocation2 + $0x140] sm:$0x3] }
 0x2b2   :  { %v5917_v47 = vrot.slane %v5916_v0, 2  ;;  %v6105_v43 = vcombine.low %v6096_v46, %v6103_v35  ;;  %v5899_v5 = vadd.f32 %v5898_v54, %v5897_v16  ;;  %v5935_v40 = vsel %vm3218_vm0, %v5717_v62, 0.0  ;;  %v6189_v54 = vld [vmem:[#allocation2 + $0x3a8] sm:$0x3] }
 0x2b3   :  { %v5924_v9 = vrot.slane %v5923_v12, 2  ;;  %v5906_v55 = vadd.f32 %v5905_v3, %v5904_v37  ;;  %v5912_v44 = vrot.slane %v5911_v7, 1  ;;  %v5930_v36 = vadd.f32 %v5929_v60, %v5928_v25 }
 0x2b4   :  { %v5918_v41 = vadd.f32 %v5917_v47, %v5916_v0  ;;  %v6119_v50 = vrot.slane %v6105_v43, %v9008_v39  ;;  %v5936_v53 = vrot.slane %v5935_v40, 4  ;;  %v6121_v8 = vcombine.low %v5892_v21, %v5899_v5 }
 0x2b5   :  { %v5925_v58 = vadd.f32 %v5924_v9, %v5923_v12  ;;  %v5913_v34 = vadd.f32 %v5912_v44, %v5911_v7  ;;  %v5931_v29 = vrot.slane %v5930_v36, 2  ;;  %v6218_v46 = vsel %vm3218_vm0, %v6186_v61, 0.0  ;;  %v6190_v61 = vld [vmem:[#allocation2 + $0x508] sm:$0x3] }
 0x2b6   :  { %v5919_v38 = vrot.slane %v5918_v41, 1  ;;  %v6120_v16 = vcombine.low %v6112_v48, %v6119_v50  ;;  %v5937_v62 = vadd.f32 %v5936_v53, %v5935_v40  ;;  %v6131_v37 = vrot.slane %v6121_v8, %v9008_v39 }
 0x2b7   :  { %v5926_v2 = vrot.slane %v5925_v58, 1  ;;  %v5932_v0 = vadd.f32 %v5931_v29, %v5930_v36  ;;  %v6122_v25 = vcombine.low %v5906_v55, %v5913_v34  ;;  %v6219_v3 = vrot.slane %v6218_v46, 4  ;;  %v6192_v34 = vld [vmem:[#allocation2 + $0x2c8] sm:$0x3] }
 0x2b8   :  { %v5920_v35 = vadd.f32 %v5919_v38, %v5918_v41  ;;  %6817 = vst [vmem:[%s8806_s8 + $0x85] ss:$8 sm:$0xf] %v6120_v16  ;;  %6818 = vst [vmem:[%s8806_s8 + $0x85] ss:$8 sm:$0xf0] %v6120_v16 }
 0x2b9   :  { %v5927_v21 = vadd.f32 %v5926_v2, %v5925_v58  ;;  %v5938_v12 = vrot.slane %v5937_v62, 2  ;;  %v6225_v48 = vsel %vm3218_vm0, %v6187_v56, 0.0  ;;  %v6232_v7 = vsel %vm3218_vm0, %v6188_v63, 0.0  ;;  %v6191_v56 = vld [vmem:[#allocation2 + $0x480] sm:$0x3] }
 0x2ba   :  { %v5933_v47 = vrot.slane %v5932_v0, 1  ;;  %v6138_v60 = vrot.slane %v6122_v25, %v9008_v39  ;;  %v6220_v43 = vadd.f32 %v6219_v3, %v6218_v46  ;;  %v6226_v5 = vrot.slane %v6225_v48, 4 }
 0x2bb   :  { %v5939_v9 = vadd.f32 %v5938_v12, %v5937_v62  ;;  %v6123_v40 = vcombine.low %v5920_v35, %v5927_v21  ;;  %v6233_v55 = vrot.slane %v6232_v7, 4  ;;  %v6239_v44 = vsel %vm3218_vm0, %v6189_v54, 0.0 }
 0x2bc   :  { %v5934_v41 = vadd.f32 %v5933_v47, %v5932_v0  ;;  %v6153_v36 = vcombine.low %v6131_v37, %v6138_v60  ;;  %v6221_v50 = vrot.slane %v6220_v43, 2  ;;  %v6227_v58 = vadd.f32 %v6226_v5, %v6225_v48  ;;  %v6193_v48 = vld [vmem:[#allocation2 + $0x218] sm:$0x3] }
 0x2bd   :  { %v5940_v53 = vrot.slane %v5939_v9, 1  ;;  %v6145_v8 = vrot.slane %v6123_v40, %v9008_v39  ;;  %v6234_v38 = vadd.f32 %v6233_v55, %v6232_v7  ;;  %v6240_v29 = vrot.slane %v6239_v44, 4 }
 0x2be   :  { %v6161_v63 = vrot.slane %v6153_v36, %v9008_v39  ;;  %v6222_v46 = vadd.f32 %v6221_v50, %v6220_v43  ;;  %v6228_v16 = vrot.slane %v6227_v58, 2  ;;  %v6246_v2 = vsel %vm3218_vm0, %v6190_v61, 0.0 }
 0x2bf   :  { %v5941_v62 = vadd.f32 %v5940_v53, %v5939_v9  ;;  %v6235_v35 = vrot.slane %v6234_v38, 2  ;;  %v6241_v25 = vadd.f32 %v6240_v29, %v6239_v44  ;;  %v6247_v0 = vrot.slane %v6246_v2, 4 }
 0x2c0   :  { %v6223_v37 = vrot.slane %v6222_v46, 1  ;;  %v6229_v54 = vadd.f32 %v6228_v16, %v6227_v58  ;;  %v6253_v3 = vsel %vm3218_vm0, %v6191_v56, 0.0  ;;  %v6260_v21 = vsel %vm3218_vm0, %v6192_v34, 0.0  ;;  %v6194_v34 = vld [vmem:[#allocation2 + $0xc0] sm:$0x3] }
 0x2c1   :  { %v6124_v12 = vcombine.low %v5934_v41, %v5941_v62  ;;  %v6236_v7 = vadd.f32 %v6235_v35, %v6234_v38  ;;  %v6242_v47 = vrot.slane %v6241_v25, 2  ;;  %v6248_v60 = vadd.f32 %v6247_v0, %v6246_v2 }
 0x2c2   :  { %v6224_v5 = vadd.f32 %v6223_v37, %v6222_v46  ;;  %v6230_v43 = vrot.slane %v6229_v54, 1  ;;  %v6254_v40 = vrot.slane %v6253_v3, 4  ;;  %v6261_v55 = vrot.slane %v6260_v21, 4 }
 0x2c3   :  { %v6152_v9 = vrot.slane %v6124_v12, %v9008_v39  ;;  %v6237_v61 = vrot.slane %v6236_v7, 1  ;;  %v6243_v44 = vadd.f32 %v6242_v47, %v6241_v25  ;;  %v6249_v36 = vrot.slane %v6248_v60, 2  ;;  %v6195_v25 = vld [vmem:[#allocation2 + $0x138] sm:$0x3] }
 0x2c4   :  { %v6231_v50 = vadd.f32 %v6230_v43, %v6229_v54  ;;  %v6255_v58 = vadd.f32 %v6254_v40, %v6253_v3  ;;  %v6262_v53 = vadd.f32 %v6261_v55, %v6260_v21  ;;  %v6267_v56 = vsel %vm3218_vm0, %v6193_v48, 0.0 }
 0x2c5   :  { %v6154_v41 = vcombine.low %v6145_v8, %v6152_v9  ;;  %v6238_v29 = vadd.f32 %v6237_v61, %v6236_v7  ;;  %v6244_v38 = vrot.slane %v6243_v44, 1  ;;  %v6250_v16 = vadd.f32 %v6249_v36, %v6248_v60  ;;  %v6196_v8 = vld [vmem:[#allocation2 + $0x70] sm:$0x3]  ;;  %v6197_v61 = vld [vmem:[#allocation2 + $0x6c0] sm:$0x3] }
 0x2c6   :  { %v6256_v2 = vrot.slane %v6255_v58, 2  ;;  %v6263_v46 = vrot.slane %v6262_v53, 2  ;;  %v6268_v62 = vrot.slane %v6267_v56, 4  ;;  %v6474_v35 = vcombine.low %v6224_v5, %v6231_v50 }
 0x2c7   :  { %v6168_v0 = vrot.slane %v6154_v41, %v9008_v39  ;;  %v6245_v37 = vadd.f32 %v6244_v38, %v6243_v44  ;;  %v6251_v12 = vrot.slane %v6250_v16, 1  ;;  %v6274_v54 = vsel %vm3218_vm0, %v6194_v34, 0.0  ;;  %v6198_v41 = vld [vmem:[#allocation2 + $0xc8] sm:$0x3] }
 0x2c8   :  { %v6257_v3 = vadd.f32 %v6256_v2, %v6255_v58  ;;  %v6264_v21 = vadd.f32 %v6263_v46, %v6262_v53  ;;  %v6269_v47 = vadd.f32 %v6268_v62, %v6267_v56  ;;  %v6484_v48 = vrot.slane %v6474_v35, %v9008_v39 }
 0x2c9   :  { %v6169_v7 = vcombine.low %v6161_v63, %v6168_v0  ;;  %v6252_v43 = vadd.f32 %v6251_v12, %v6250_v16  ;;  %v6475_v60 = vcombine.low %v6238_v29, %v6245_v37  ;;  %v6275_v40 = vrot.slane %v6274_v54, 4  ;;  %v6199_v0 = vld [vmem:[#allocation2 + $0x1c8] sm:$0x3] }
 0x2ca   :  { %v6258_v55 = vrot.slane %v6257_v3, 1  ;;  %v6265_v9 = vrot.slane %v6264_v21, 1  ;;  %v6270_v5 = vrot.slane %v6269_v47, 2  ;;  %v6281_v44 = vsel %vm3218_vm0, %v6195_v25, 0.0 }
 0x2cb   :  { %6819 = vst [vmem:[%s8806_s8 + $0xc5] ss:$8 sm:$0xf] %v6169_v7  ;;  %6820 = vst [vmem:[%s8806_s8 + $0xc5] ss:$8 sm:$0xf0] %v6169_v7  ;;  %v6491_v36 = vrot.slane %v6475_v60, %v9008_v39  ;;  %v6276_v63 = vadd.f32 %v6275_v40, %v6274_v54 }
 0x2cc   :  { %v6282_v50 = vrot.slane %v6281_v44, 4  ;;  %v6288_v58 = vsel %vm3218_vm0, %v6196_v8, 0.0  ;;  %v6259_v53 = vadd.f32 %v6258_v55, %v6257_v3  ;;  %v6266_v56 = vadd.f32 %v6265_v9, %v6264_v21  ;;  %v6200_v8 = vld [vmem:[#allocation2 + $0x4d0] sm:$0x3] }
 0x2cd   :  { %v6271_v34 = vadd.f32 %v6270_v5, %v6269_v47  ;;  %v6289_v29 = vrot.slane %v6288_v58, 4  ;;  %v6506_v38 = vcombine.low %v6484_v48, %v6491_v36  ;;  %v6277_v16 = vrot.slane %v6276_v63, 2 }
 0x2ce   :  { %v6283_v2 = vadd.f32 %v6282_v50, %v6281_v44  ;;  %v6295_v46 = vsel %vm3218_vm0, %v6197_v61, 0.0  ;;  %v6476_v35 = vcombine.low %v6252_v43, %v6259_v53  ;;  %v6302_v3 = vsel %vm3218_vm0, %v6198_v41, 0.0  ;;  %v6201_v61 = vld [vmem:[#allocation2 + $0x2a8] sm:$0x3] }
 0x2cf   :  { %v6272_v62 = vrot.slane %v6271_v34, 1  ;;  %v6290_v37 = vadd.f32 %v6289_v29, %v6288_v58  ;;  %v6296_v12 = vrot.slane %v6295_v46, 4  ;;  %v6514_v25 = vrot.slane %v6506_v38, %v9008_v39 }
 0x2d0   :  { %v6278_v54 = vadd.f32 %v6277_v16, %v6276_v63  ;;  %v6284_v7 = vrot.slane %v6283_v2, 2  ;;  %v6498_v47 = vrot.slane %v6476_v35, %v9008_v39  ;;  %v6303_v9 = vrot.slane %v6302_v3, 4 }
 0x2d1   :  { %v6273_v21 = vadd.f32 %v6272_v62, %v6271_v34  ;;  %v6291_v48 = vrot.slane %v6290_v37, 2  ;;  %v6297_v60 = vadd.f32 %v6296_v12, %v6295_v46  ;;  %v6309_v43 = vsel %vm3218_vm0, %v6199_v0, 0.0 }
 0x2d2   :  { %v6279_v40 = vrot.slane %v6278_v54, 1  ;;  %v6285_v55 = vadd.f32 %v6284_v7, %v6283_v2  ;;  %v6310_v50 = vrot.slane %v6309_v43, 4  ;;  %v6304_v53 = vadd.f32 %v6303_v9, %v6302_v3 }
 0x2d3   :  { %v6477_v5 = vcombine.low %v6266_v56, %v6273_v21  ;;  %v6292_v44 = vadd.f32 %v6291_v48, %v6290_v37  ;;  %v6298_v36 = vrot.slane %v6297_v60, 2  ;;  %v6316_v34 = vsel %vm3218_vm0, %v6200_v8, 0.0  ;;  %v6202_v56 = vld [vmem:[#allocation2 + $0x470] sm:$0x3] }
 0x2d4   :  { %v6280_v63 = vadd.f32 %v6279_v40, %v6278_v54  ;;  %v6286_v58 = vrot.slane %v6285_v55, 1  ;;  %v6311_v16 = vadd.f32 %v6310_v50, %v6309_v43  ;;  %v6305_v2 = vrot.slane %v6304_v53, 2 }
 0x2d5   :  { %v6505_v41 = vrot.slane %v6477_v5, %v9008_v39  ;;  %v6293_v29 = vrot.slane %v6292_v44, 1  ;;  %v6299_v38 = vadd.f32 %v6298_v36, %v6297_v60  ;;  %v6317_v62 = vrot.slane %v6316_v34, 4  ;;  %v6203_v60 = vld [vmem:[#allocation2 + $0x2d0] sm:$0x3] }
 0x2d6   :  { %v6287_v46 = vadd.f32 %v6286_v58, %v6285_v55  ;;  %v6323_v35 = vsel %vm3218_vm0, %v6201_v61, 0.0  ;;  %v6312_v7 = vrot.slane %v6311_v16, 2  ;;  %v6306_v54 = vadd.f32 %v6305_v2, %v6304_v53  ;;  %v6204_v58 = vld [vmem:[#allocation2 + $0x330] sm:$0x3]  ;;  %v6205_v53 = vld [vmem:[#allocation2 + $0x5b8] sm:$0x3] }
 0x2d7   :  { %v6507_v0 = vcombine.low %v6498_v47, %v6505_v41  ;;  %v6294_v37 = vadd.f32 %v6293_v29, %v6292_v44  ;;  %v6300_v12 = vrot.slane %v6299_v38, 1  ;;  %v6318_v21 = vadd.f32 %v6317_v62, %v6316_v34 }
 0x2d8   :  { %v6324_v3 = vrot.slane %v6323_v35, 4  ;;  %v6523_v48 = vcombine.low %v6280_v63, %v6287_v46  ;;  %v6313_v9 = vadd.f32 %v6312_v7, %v6311_v16  ;;  %v6330_v55 = vsel %vm3218_vm0, %v6202_v56, 0.0  ;;  %v6206_v7 = vld [vmem:[#allocation2 + $0x198] sm:$0x3] }
 0x2d9   :  { %v6521_v8 = vrot.slane %v6507_v0, %v9008_v39  ;;  %v6301_v40 = vadd.f32 %v6300_v12, %v6299_v38  ;;  %v6307_v43 = vrot.slane %v6306_v54, 1  ;;  %v6319_v5 = vrot.slane %v6318_v21, 2 }
 0x2da   :  { %v6325_v36 = vadd.f32 %v6324_v3, %v6323_v35  ;;  %v6533_v61 = vrot.slane %v6523_v48, %v9008_v39  ;;  %v6314_v44 = vrot.slane %v6313_v9, 1  ;;  %v6331_v34 = vrot.slane %v6330_v55, 4 }
 0x2db   :  { %v6522_v47 = vcombine.low %v6514_v25, %v6521_v8  ;;  %v6524_v50 = vcombine.low %v6294_v37, %v6301_v40  ;;  %v6308_v41 = vadd.f32 %v6307_v43, %v6306_v54  ;;  %v6320_v63 = vadd.f32 %v6319_v5, %v6318_v21  ;;  %v6207_v8 = vld [vmem:[#allocation2 + $0x258] sm:$0x3] }
 0x2dc   :  { %v6326_v29 = vrot.slane %v6325_v36, 2  ;;  %v6337_v38 = vsel %vm3218_vm0, %v6203_v60, 0.0  ;;  %v6315_v16 = vadd.f32 %v6314_v44, %v6313_v9  ;;  %v6332_v46 = vadd.f32 %v6331_v34, %v6330_v55 }
 0x2dd   :  { %6821 = vst [vmem:[%s8806_s8 + $0x6] ss:$8 sm:$0xf] %v6522_v47  ;;  %6822 = vst [vmem:[%s8806_s8 + $0x6] ss:$8 sm:$0xf0] %v6522_v47  ;;  %v6540_v25 = vrot.slane %v6524_v50, %v9008_v39 }
 0x2de   :  { %v6338_v2 = vrot.slane %v6337_v38, 4  ;;  %v6321_v62 = vrot.slane %v6320_v63, 1  ;;  %v6327_v35 = vadd.f32 %v6326_v29, %v6325_v36  ;;  %v6344_v56 = vsel %vm3218_vm0, %v6204_v58, 0.0  ;;  %v6208_v47 = vld [vmem:[#allocation2 + $0x558] sm:$0x3] }
 0x2df   :  { %v6351_v0 = vsel %vm3218_vm0, %v6205_v53, 0.0  ;;  %v6525_v37 = vcombine.low %v6308_v41, %v6315_v16  ;;  %v6555_v12 = vcombine.low %v6533_v61, %v6540_v25  ;;  %v6333_v54 = vrot.slane %v6332_v46, 2  ;;  %v6209_v29 = vld [vmem:[#allocation2 + $0x600] sm:$0x3] }
 0x2e0   :  { %v6339_v21 = vadd.f32 %v6338_v2, %v6337_v38  ;;  %v6322_v3 = vadd.f32 %v6321_v62, %v6320_v63  ;;  %v6328_v48 = vrot.slane %v6327_v35, 1  ;;  %v6345_v40 = vrot.slane %v6344_v56, 4 }
 0x2e1   :  { %v6352_v9 = vrot.slane %v6351_v0, 4  ;;  %v6547_v60 = vrot.slane %v6525_v37, %v9008_v39  ;;  %v6563_v55 = vrot.slane %v6555_v12, %v9008_v39  ;;  %v6334_v43 = vadd.f32 %v6333_v54, %v6332_v46 }
 0x2e2   :  { %v6340_v5 = vrot.slane %v6339_v21, 2  ;;  %v6329_v36 = vadd.f32 %v6328_v48, %v6327_v35  ;;  %v6346_v44 = vadd.f32 %v6345_v40, %v6344_v56  ;;  %v6358_v61 = vsel %vm3218_vm0, %v6206_v7, 0.0 }
 0x2e3   :  { %v6353_v50 = vadd.f32 %v6352_v9, %v6351_v0  ;;  %v6335_v58 = vrot.slane %v6334_v43, 1  ;;  %v6359_v34 = vrot.slane %v6358_v61, 4  ;;  %v6365_v41 = vsel %vm3218_vm0, %v6207_v8, 0.0 }
 0x2e4   :  { %v6341_v53 = vadd.f32 %v6340_v5, %v6339_v21  ;;  %v6526_v63 = vcombine.low %v6322_v3, %v6329_v36  ;;  %v6347_v38 = vrot.slane %v6346_v44, 2  ;;  %v6366_v25 = vrot.slane %v6365_v41, 4 }
 0x2e5   :  { %v6354_v16 = vrot.slane %v6353_v50, 2  ;;  %v6336_v2 = vadd.f32 %v6335_v58, %v6334_v43  ;;  %v6360_v46 = vadd.f32 %v6359_v34, %v6358_v61  ;;  %v6372_v35 = vsel %vm3218_vm0, %v6208_v47, 0.0  ;;  %v6210_v58 = vld [vmem:[#allocation2 + $0x618] sm:$0x3] }
 0x2e6   :  { %v6342_v62 = vrot.slane %v6341_v53, 1  ;;  %v6554_v56 = vrot.slane %v6526_v63, %v9008_v39  ;;  %v6348_v0 = vadd.f32 %v6347_v38, %v6346_v44  ;;  %v6367_v12 = vadd.f32 %v6366_v25, %v6365_v41 }
 0x2e7   :  { %v6355_v37 = vadd.f32 %v6354_v16, %v6353_v50  ;;  %v6361_v54 = vrot.slane %v6360_v46, 2  ;;  %v6373_v21 = vrot.slane %v6372_v35, 4  ;;  %v6379_v48 = vsel %vm3218_vm0, %v6209_v29, 0.0  ;;  %v6211_v29 = vld [vmem:[#allocation2 + $0x628] sm:$0x3] }
 0x2e8   :  { %v6343_v7 = vadd.f32 %v6342_v62, %v6341_v53  ;;  %v6556_v3 = vcombine.low %v6547_v60, %v6554_v56  ;;  %v6349_v8 = vrot.slane %v6348_v0, 1  ;;  %v6368_v9 = vrot.slane %v6367_v12, 2  ;;  %v6212_v60 = vld [vmem:[#allocation2 + $0x2e0] sm:$0x3] }
 0x2e9   :  { %v6356_v40 = vrot.slane %v6355_v37, 1  ;;  %v6362_v5 = vadd.f32 %v6361_v54, %v6360_v46  ;;  %v6374_v43 = vadd.f32 %v6373_v21, %v6372_v35  ;;  %v6380_v36 = vrot.slane %v6379_v48, 4 }
 0x2ea   :  { %v6572_v61 = vcombine.low %v6336_v2, %v6343_v7  ;;  %v6570_v47 = vrot.slane %v6556_v3, %v9008_v39  ;;  %v6350_v34 = vadd.f32 %v6349_v8, %v6348_v0  ;;  %v6369_v50 = vadd.f32 %v6368_v9, %v6367_v12  ;;  %v6213_v7 = vld [vmem:[#allocation2 + $0x210] sm:$0x3] }
 0x2eb   :  { %v6357_v44 = vadd.f32 %v6356_v40, %v6355_v37  ;;  %v6363_v41 = vrot.slane %v6362_v5, 1  ;;  %v6375_v53 = vrot.slane %v6374_v43, 2  ;;  %v6381_v63 = vadd.f32 %v6380_v36, %v6379_v48 }
 0x2ec   :  { %v6582_v38 = vrot.slane %v6572_v61, %v9008_v39  ;;  %v6571_v16 = vcombine.low %v6563_v55, %v6570_v47  ;;  %v6370_v25 = vrot.slane %v6369_v50, 1  ;;  %v6386_v46 = vsel %vm3218_vm0, %v6210_v58, 0.0  ;;  %v6215_v47 = vld [vmem:[#allocation2 + $0x6e8] sm:$0x3] }
 0x2ed   :  { %v6573_v62 = vcombine.low %v6350_v34, %v6357_v44  ;;  %v6364_v35 = vadd.f32 %v6363_v41, %v6362_v5  ;;  %v6376_v2 = vadd.f32 %v6375_v53, %v6374_v43  ;;  %v6382_v56 = vrot.slane %v6381_v63, 2  ;;  %v6214_v5 = vld [vmem:[#allocation2 + $0x3e0] sm:$0x3] }
 0x2ee   :  { %v6387_v54 = vrot.slane %v6386_v46, 4  ;;  %6823 = vst [vmem:[%s8806_s8 + $0x46] ss:$8 sm:$0xf] %v6571_v16  ;;  %v6371_v0 = vadd.f32 %v6370_v25, %v6369_v50  ;;  %v6393_v37 = vsel %vm3218_vm0, %v6211_v29, 0.0  ;;  %v6400_v12 = vsel %vm3218_vm0, %v6212_v60, 0.0 }
 0x2ef   :  { %6824 = vst [vmem:[%s8806_s8 + $0x46] ss:$8 sm:$0xf0] %v6571_v16  ;;  %v6589_v55 = vrot.slane %v6573_v62, %v9008_v39  ;;  %v6377_v21 = vrot.slane %v6376_v2, 1  ;;  %v6383_v48 = vadd.f32 %v6382_v56, %v6381_v63  ;;  %v6394_v8 = vrot.slane %v6393_v37, 4 }
 0x2f0   :  { %v6388_v3 = vadd.f32 %v6387_v54, %v6386_v46  ;;  %v6574_v40 = vcombine.low %v6364_v35, %v6371_v0  ;;  %v6401_v43 = vrot.slane %v6400_v12, 4  ;;  %v6407_v36 = vsel %vm3218_vm0, %v6213_v7, 0.0  ;;  %v6216_v60 = vld [vmem:[#allocation2 + $0x1f0] sm:$0x3] }
 0x2f1   :  { %v6604_v9 = vcombine.low %v6582_v38, %v6589_v55  ;;  %v6378_v61 = vadd.f32 %v6377_v21, %v6376_v2  ;;  %v6384_v58 = vrot.slane %v6383_v48, 1  ;;  %v6395_v44 = vadd.f32 %v6394_v8, %v6393_v37  ;;  %v6217_v55 = vld [vmem:[#allocation2 + $0x460] sm:$0x3] }
 0x2f2   :  { %v6389_v34 = vrot.slane %v6388_v3, 2  ;;  %v6596_v50 = vrot.slane %v6574_v40, %v9008_v39  ;;  %v6402_v53 = vadd.f32 %v6401_v43, %v6400_v12  ;;  %v6408_v29 = vrot.slane %v6407_v36, 4 }
 0x2f3   :  { %v6612_v41 = vrot.slane %v6604_v9, %v9008_v39  ;;  %v6385_v63 = vadd.f32 %v6384_v58, %v6383_v48  ;;  %v6396_v25 = vrot.slane %v6395_v44, 2  ;;  %v6414_v38 = vsel %vm3218_vm0, %v6214_v5, 0.0 }
 0x2f4   :  { %v6390_v16 = vadd.f32 %v6389_v34, %v6388_v3  ;;  %v6403_v62 = vrot.slane %v6402_v53, 2  ;;  %v6409_v46 = vadd.f32 %v6408_v29, %v6407_v36  ;;  %v6415_v35 = vrot.slane %v6414_v38, 4 }
 0x2f5   :  { %v6421_v2 = vsel %vm3218_vm0, %v6215_v47, 0.0  ;;  %v6575_v56 = vcombine.low %v6378_v61, %v6385_v63  ;;  %v6397_v54 = vadd.f32 %v6396_v25, %v6395_v44  ;;  %v6428_v48 = vsel %vm3218_vm0, %v6216_v60, 0.0 }
 0x2f6   :  { %v6391_v7 = vrot.slane %v6390_v16, 1  ;;  %v6422_v0 = vrot.slane %v6421_v2, 4  ;;  %v6404_v37 = vadd.f32 %v6403_v62, %v6402_v53  ;;  %v6410_v21 = vrot.slane %v6409_v46, 2 }
 0x2f7   :  { %v6416_v12 = vadd.f32 %v6415_v35, %v6414_v38  ;;  %v6603_v3 = vrot.slane %v6575_v56, %v9008_v39  ;;  %v6398_v40 = vrot.slane %v6397_v54, 1  ;;  %v6429_v58 = vrot.slane %v6428_v48, 4 }
 0x2f8   :  { %v6392_v8 = vadd.f32 %v6391_v7, %v6390_v16  ;;  %v6423_v9 = vadd.f32 %v6422_v0, %v6421_v2  ;;  %v6405_v5 = vrot.slane %v6404_v37, 1  ;;  %v6411_v43 = vadd.f32 %v6410_v21, %v6409_v46 }
 0x2f9   :  { %v6417_v36 = vrot.slane %v6416_v12, 2  ;;  %v6605_v47 = vcombine.low %v6596_v50, %v6603_v3  ;;  %v6399_v61 = vadd.f32 %v6398_v40, %v6397_v54  ;;  %v6435_v44 = vsel %vm3218_vm0, %v6217_v55, 0.0 }
 0x2fa   :  { %v6424_v34 = vrot.slane %v6423_v9, 2  ;;  %v6406_v29 = vadd.f32 %v6405_v5, %v6404_v37  ;;  %v6412_v53 = vrot.slane %v6411_v43, 1  ;;  %v6430_v25 = vadd.f32 %v6429_v58, %v6428_v48 }
 0x2fb   :  { %v6418_v63 = vadd.f32 %v6417_v36, %v6416_v12  ;;  %v6619_v60 = vrot.slane %v6605_v47, %v9008_v39  ;;  %v6436_v62 = vrot.slane %v6435_v44, 4  ;;  %v6621_v16 = vcombine.low %v6392_v8, %v6399_v61 }
 0x2fc   :  { %v6425_v38 = vadd.f32 %v6424_v34, %v6423_v9  ;;  %v6413_v35 = vadd.f32 %v6412_v53, %v6411_v43  ;;  %v6431_v56 = vrot.slane %v6430_v25, 2  ;;  %v1035_v46 = vsub.f32 %v7914_v59, %v7911_v6 }
 0x2fd   :  { %v6419_v2 = vrot.slane %v6418_v63, 1  ;;  %v6620_v50 = vcombine.low %v6612_v41, %v6619_v60  ;;  %v6437_v54 = vadd.f32 %v6436_v62, %v6435_v44  ;;  %v6631_v0 = vrot.slane %v6621_v16, %v9008_v39 }
 0x2fe   :  { %v6426_v7 = vrot.slane %v6425_v38, 1  ;;  %v6432_v37 = vadd.f32 %v6431_v56, %v6430_v25  ;;  %v6622_v21 = vcombine.low %v6406_v29, %v6413_v35  ;;  %v1036_v12 = vsub.f32 %v8030_v13, %v8027_v1 }
 0x2ff   :  { %v6420_v55 = vadd.f32 %v6419_v2, %v6418_v63  ;;  %6825 = vst [vmem:[%s8806_s8 + $0x86] ss:$8 sm:$0xf] %v6620_v50  ;;  %6826 = vst [vmem:[%s8806_s8 + $0x86] ss:$8 sm:$0xf0] %v6620_v50  ;;  %v1037_v41 = vsub.f32 %v7930_v42, %v7927_v57  ;;  %v1038_v48 = vsub.f32 %v8067_v18, %v8064_v11 }
 0x300   :  { %v6427_v6 = vadd.f32 %v6426_v7, %v6425_v38  ;;  %v6438_v59 = vrot.slane %v6437_v54, 2  ;;  %v6433_v3 = vrot.slane %v6432_v37, 1  ;;  %v6638_v8 = vrot.slane %v6622_v21, %v9008_v39 }
 0x301   :  { %v1067_v1 = vcombine.high %v1035_v46, %v1035_v46  ;;  %v1068_v13 = vcombine.high %v1036_v12, %v1036_v12  ;;  %v1069_v5 = vcombine.high %v1037_v41, %v1037_v41  ;;  %v1070_v43 = vcombine.high %v1038_v48, %v1038_v48 }
 0x302   :  { %v6439_v40 = vadd.f32 %v6438_v59, %v6437_v54  ;;  %v6623_v9 = vcombine.low %v6420_v55, %v6427_v6  ;;  %v6434_v36 = vadd.f32 %v6433_v3, %v6432_v37  ;;  %v6653_v58 = vcombine.low %v6631_v0, %v6638_v8 }
 0x303   :  { %v6759_v47 = vpack.c.bf16 %v1067_v1, %v1035_v46  ;;  %v6760_v61 = vpack.c.bf16 %v1068_v13, %v1036_v12  ;;  %v6761_v57 = vpack.c.bf16 %v1069_v5, %v1037_v41  ;;  %v6762_v42 = vpack.c.bf16 %v1070_v43, %v1038_v48 }
 0x304   :  { %v6440_v34 = vrot.slane %v6439_v40, 1  ;;  %v6645_v44 = vrot.slane %v6623_v9, %v9008_v39  ;;  %v6661_v11 = vrot.slane %v6653_v58, %v9008_v39  ;;  %v1039_v53 = vsub.f32 %v7942_v14, %v7939_v30 }
 0x305   :  { %v1173_v18 = vrot.slane %v6759_v47, %v9008_v39  ;;  %v1180_v29 = vrot.slane %v6760_v61, %v9008_v39  ;;  %v1187_v25 = vrot.slane %v6761_v57, %v9008_v39  ;;  %v1194_v60 = vrot.slane %v6762_v42, %v9008_v39  ;;  %v3186_v47 = vld [vmem:[#allocation2 + $0x2b0] sm:$0x3]  ;;  %v9009_v61 = vld [vmem:[#allocation35_spill] sm:$0xff] }
 0x306   :  { %v6441_v63 = vadd.f32 %v6440_v34, %v6439_v40  ;;  %v1040_v38 = vsub.f32 %v8084_v45, %v8081_v10  ;;  %v1041_v16 = vsub.f32 %v7948_v22, %v7945_v28  ;;  %v1042_v35 = vsub.f32 %v8099_v52, %v8096_v49  ;;  %v9011_v57 = vld [vmem:[#allocation3_spill] sm:$0xff] }
 0x307   :  { %v1195_v62 = vcombine.low %v1173_v18, %v1180_v29  ;;  %v1071_v2 = vcombine.high %v1039_v53, %v1039_v53  ;;  %v1196_v46 = vcombine.low %v1187_v25, %v1194_v60  ;;  %v1043_v30 = vsub.f32 %v7964_v23, %v7961_v19  ;;  %v3187_v29 = vld [vmem:[#allocation2 + $0x3b0] sm:$0x3] }
 0x308   :  { %v6624_v56 = vcombine.low %v6434_v36, %v6441_v63  ;;  %v1072_v50 = vcombine.high %v1040_v38, %v1040_v38  ;;  %v1073_v7 = vcombine.high %v1041_v16, %v1041_v16  ;;  %v1074_v54 = vcombine.high %v1042_v35, %v1042_v35 }
 0x309   :  { %v1203_v14 = vrot.slane %v1195_v62, %v9008_v39  ;;  %v6763_v0 = vpack.c.bf16 %v1071_v2, %v1039_v53  ;;  %v1210_v45 = vrot.slane %v1196_v46, %v9008_v39  ;;  %v1044_v22 = vsub.f32 %v8108_v15, %v8105_v20 }
 0x30a   :  { %v6652_v10 = vrot.slane %v6624_v56, %v9008_v39  ;;  %v6764_v28 = vpack.c.bf16 %v1072_v50, %v1040_v38  ;;  %v6765_v49 = vpack.c.bf16 %v1073_v7, %v1041_v16  ;;  %v6766_v52 = vpack.c.bf16 %v1074_v54, %v1042_v35  ;;  %v3188_v16 = vld [vmem:[#allocation2 + $0x4d8] sm:$0x3]  ;;  %v3190_v50 = vld [vmem:[#allocation2 + $0x450] sm:$0x3] }
 0x30b   :  { %v1222_v55 = vrot.slane %v6763_v0, %v9008_v39  ;;  %v1045_v19 = vsub.f32 %v8001_v26, %v7998_v33  ;;  %v1211_v37 = vcombine.low %v1203_v14, %v1210_v45  ;;  %v1046_v12 = vsub.f32 %v8135_v17, %v8132_v51  ;;  %v3189_v54 = vld [vmem:[#allocation2 + $0x18] sm:$0x3]  ;;  %v3191_v0 = vld [vmem:[#allocation2 + $0x328] sm:$0x3] }
 0x30c   :  { %v6654_v23 = vcombine.low %v6645_v44, %v6652_v10  ;;  %v1229_v21 = vrot.slane %v6764_v28, %v9008_v39  ;;  %v1236_v6 = vrot.slane %v6765_v49, %v9008_v39  ;;  %v1243_v59 = vrot.slane %v6766_v52, %v9008_v39  ;;  %v9010_v44 = vld [vmem:[#allocation40_spill] sm:$0xff] }
 0x30d   :  { %v1075_v41 = vcombine.high %v1043_v30, %v1043_v30  ;;  %v1076_v20 = vcombine.high %v1044_v22, %v1044_v22  ;;  %1363 = vst [vmem:[%s8807_s7] sm:$0xff] %v1211_v37  ;;  %v1077_v26 = vcombine.high %v1045_v19, %v1045_v19  ;;  %v1078_v48 = vcombine.high %v1046_v12, %v1046_v12 }
 0x30e   :  { %v6668_v15 = vrot.slane %v6654_v23, %v9008_v39  ;;  %v1244_v33 = vcombine.low %v1222_v55, %v1229_v21  ;;  %v1245_v3 = vcombine.low %v1236_v6, %v1243_v59  ;;  %v1047_v51 = vsub.f32 %v8024_v4, %v8021_v24 }
 0x30f   :  { %v6767_v8 = vpack.c.bf16 %v1075_v41, %v1043_v30  ;;  %v6768_v1 = vpack.c.bf16 %v1076_v20, %v1044_v22  ;;  %v6769_v40 = vpack.c.bf16 %v1077_v26, %v1045_v19  ;;  %v6770_v9 = vpack.c.bf16 %v1078_v48, %v1046_v12  ;;  %v3192_v12 = vld [vmem:[#allocation2 + $0x440] sm:$0x3] }
 0x310   :  { %v6669_v17 = vcombine.low %v6661_v11, %v6668_v15  ;;  %v1252_v13 = vrot.slane %v1244_v33, %v9008_v39  ;;  %v1259_v5 = vrot.slane %v1245_v3, %v9008_v39  ;;  %v1048_v58 = vsub.f32 %v8151_v27, %v8148_v31 }
 0x311   :  { %v1271_v43 = vrot.slane %v6767_v8, %v9008_v39  ;;  %v1278_v36 = vrot.slane %v6768_v1, %v9008_v39  ;;  %v1285_v24 = vrot.slane %v6769_v40, %v9008_v39  ;;  %v1292_v4 = vrot.slane %v6770_v9, %v9008_v39 }
 0x312   :  { %6827 = vst [vmem:[%s8806_s8 + $0xc6] ss:$8 sm:$0xf] %v6669_v17  ;;  %6828 = vst [vmem:[%s8806_s8 + $0xc6] ss:$8 sm:$0xf0] %v6669_v17  ;;  %v1049_v34 = vsub.f32 %v9009_v61, %v8033_v32  ;;  %v1050_v42 = vsub.f32 %v9011_v57, %v9010_v44  ;;  %v1260_v31 = vcombine.low %v1252_v13, %v1259_v5 }
 0x313   :  { %v1293_v27 = vcombine.low %v1271_v43, %v1278_v36  ;;  %v1079_v11 = vcombine.high %v1047_v51, %v1047_v51  ;;  %v1080_v18 = vcombine.high %v1048_v58, %v1048_v58  ;;  %v1294_v53 = vcombine.low %v1285_v24, %v1292_v4 }
 0x314   :  { %v1081_v63 = vcombine.high %v1049_v34, %v1049_v34  ;;  %v1082_v25 = vcombine.high %v1050_v42, %v1050_v42  ;;  %v3219_v60 = vsel %vm3218_vm0, %v3186_v47, 0.0  ;;  %1364 = vst [vmem:[%s8807_s7 + $0x8] sm:$0xff] %v1260_v31  ;;  %v3226_v30 = vsel %vm3218_vm0, %v3187_v29, 0.0 }
 0x315   :  { %v1301_v38 = vrot.slane %v1293_v27, %v9008_v39  ;;  %v6771_v32 = vpack.c.bf16 %v1079_v11, %v1047_v51  ;;  %v6772_v62 = vpack.c.bf16 %v1080_v18, %v1048_v58  ;;  %v3220_v35 = vrot.slane %v3219_v60, 4  ;;  %v3193_v51 = vld [vmem:[#allocation2 + $0x378] sm:$0x3] }
 0x316   :  { %v1308_v2 = vrot.slane %v1294_v53, %v9008_v39  ;;  %v6773_v56 = vpack.c.bf16 %v1081_v63, %v1049_v34  ;;  %v6774_v46 = vpack.c.bf16 %v1082_v25, %v1050_v42  ;;  %v3227_v45 = vrot.slane %v3226_v30, 4  ;;  %v3194_v34 = vld [vmem:[#allocation2 + $0x108] sm:$0x3] }
 0x317   :  { %v1320_v14 = vrot.slane %v6771_v32, %v9008_v39  ;;  %v1327_v7 = vrot.slane %v6772_v62, %v9008_v39  ;;  %v3221_v10 = vadd.f32 %v3220_v35, %v3219_v60  ;;  %v3233_v52 = vsel %vm3218_vm0, %v3188_v16, 0.0  ;;  %v3195_v60 = vld [vmem:[#allocation2 + $0x510] sm:$0x3] }
 0x318   :  { %v1309_v28 = vcombine.low %v1301_v38, %v1308_v2  ;;  %v1334_v22 = vrot.slane %v6773_v56, %v9008_v39  ;;  %v1341_v49 = vrot.slane %v6774_v46, %v9008_v39  ;;  %v3228_v23 = vadd.f32 %v3227_v45, %v3226_v30 }
 0x319   :  { %v1342_v55 = vcombine.low %v1320_v14, %v1327_v7  ;;  %v3222_v19 = vrot.slane %v3221_v10, 2  ;;  %v3234_v37 = vrot.slane %v3233_v52, 4  ;;  %v3240_v6 = vsel %vm3218_vm0, %v3189_v54, 0.0 }
 0x31a   :  { %1365 = vst [vmem:[%s8807_s7 + $0x10] sm:$0xff] %v1309_v28  ;;  %v1343_v21 = vcombine.low %v1334_v22, %v1341_v49  ;;  %v3247_v59 = vsel %vm3218_vm0, %v3190_v50, 0.0  ;;  %v3254_v41 = vsel %vm3218_vm0, %v3191_v0, 0.0  ;;  %v3229_v33 = vrot.slane %v3228_v23, 2  ;;  %v3196_v50 = vld [vmem:[#allocation2 + $0x490] sm:$0x3] }
 0x31b   :  { %v1350_v20 = vrot.slane %v1342_v55, %v9008_v39  ;;  %v3223_v15 = vadd.f32 %v3222_v19, %v3221_v10  ;;  %v3235_v26 = vadd.f32 %v3234_v37, %v3233_v52  ;;  %v3241_v3 = vrot.slane %v3240_v6, 4  ;;  %v3197_v22 = vld [vmem:[#allocation2 + $0x318] sm:$0x3] }
 0x31c   :  { %v1357_v48 = vrot.slane %v1343_v21, %v9008_v39  ;;  %v3248_v8 = vrot.slane %v3247_v59, 4  ;;  %v3255_v1 = vrot.slane %v3254_v41, 4  ;;  %v3230_v13 = vadd.f32 %v3229_v33, %v3228_v23 }
 0x31d   :  { %v3224_v17 = vrot.slane %v3223_v15, 1  ;;  %v3236_v40 = vrot.slane %v3235_v26, 2  ;;  %v3261_v9 = vsel %vm3218_vm0, %v3192_v12, 0.0  ;;  %v3242_v43 = vadd.f32 %v3241_v3, %v3240_v6  ;;  %v3198_v12 = vld [vmem:[#allocation2 + $0x548] sm:$0x3] }
 0x31e   :  { %v1358_v5 = vcombine.low %v1350_v20, %v1357_v48  ;;  %v3249_v36 = vadd.f32 %v3248_v8, %v3247_v59  ;;  %v3256_v58 = vadd.f32 %v3255_v1, %v3254_v41  ;;  %v3231_v24 = vrot.slane %v3230_v13, 1  ;;  %v3199_v3 = vld [vmem:[#allocation2 + $0x500] sm:$0x3] }
 0x31f   :  { %v3225_v47 = vadd.f32 %v3224_v17, %v3223_v15  ;;  %v3237_v4 = vadd.f32 %v3236_v40, %v3235_v26  ;;  %v3262_v61 = vrot.slane %v3261_v9, 4  ;;  %v3243_v44 = vrot.slane %v3242_v43, 2 }
 0x320   :  { %1366 = vst [vmem:[%s8807_s7 + $0x18] sm:$0xff] %v1358_v5  ;;  %v3250_v57 = vrot.slane %v3249_v36, 2  ;;  %v3257_v42 = vrot.slane %v3256_v58, 2  ;;  %v3268_v31 = vsel %vm3218_vm0, %v3193_v51, 0.0  ;;  %v3232_v27 = vadd.f32 %v3231_v24, %v3230_v13  ;;  %v3201_v24 = vld [vmem:[#allocation2 + $0x320] sm:$0x3] }
 0x321   :  { %v3238_v11 = vrot.slane %v3237_v4, 1  ;;  %v3263_v18 = vadd.f32 %v3262_v61, %v3261_v9  ;;  %v3269_v29 = vrot.slane %v3268_v31, 4  ;;  %v3244_v53 = vadd.f32 %v3243_v44, %v3242_v43 }
 0x322   :  { %v3251_v63 = vadd.f32 %v3250_v57, %v3249_v36  ;;  %v3258_v25 = vadd.f32 %v3257_v42, %v3256_v58  ;;  %v3275_v38 = vsel %vm3218_vm0, %v3194_v34, 0.0  ;;  %v3475_v35 = vcombine.low %v3225_v47, %v3232_v27  ;;  %v3200_v47 = vld [vmem:[#allocation2 + $0x6d0] sm:$0x3] }
 0x323   :  { %v3239_v32 = vadd.f32 %v3238_v11, %v3237_v4  ;;  %v3264_v62 = vrot.slane %v3263_v18, 2  ;;  %v3270_v16 = vadd.f32 %v3269_v29, %v3268_v31  ;;  %v3245_v2 = vrot.slane %v3244_v53, 1 }
 0x324   :  { %v3252_v56 = vrot.slane %v3251_v63, 1  ;;  %v3259_v46 = vrot.slane %v3258_v25, 1  ;;  %v3276_v30 = vrot.slane %v3275_v38, 4  ;;  %v3485_v54 = vrot.slane %v3475_v35, %v9008_v39  ;;  %v3202_v35 = vld [vmem:[#allocation2 + $0x2c0] sm:$0x3] }
 0x325   :  { %v3265_v14 = vadd.f32 %v3264_v62, %v3263_v18  ;;  %v3271_v7 = vrot.slane %v3270_v16, 2  ;;  %v3282_v0 = vsel %vm3218_vm0, %v3195_v60, 0.0  ;;  %v3246_v10 = vadd.f32 %v3245_v2, %v3244_v53 }
 0x326   :  { %v3253_v45 = vadd.f32 %v3252_v56, %v3251_v63  ;;  %v3260_v28 = vadd.f32 %v3259_v46, %v3258_v25  ;;  %v3277_v49 = vadd.f32 %v3276_v30, %v3275_v38  ;;  %v3283_v19 = vrot.slane %v3282_v0, 4 }
 0x327   :  { %v3266_v52 = vrot.slane %v3265_v14, 1  ;;  %v3272_v55 = vadd.f32 %v3271_v7, %v3270_v16  ;;  %v3289_v23 = vsel %vm3218_vm0, %v3196_v50, 0.0  ;;  %v3476_v37 = vcombine.low %v3239_v32, %v3246_v10 }
 0x328   :  { %v3477_v21 = vcombine.low %v3253_v45, %v3260_v28  ;;  %v3278_v6 = vrot.slane %v3277_v49, 2  ;;  %v3290_v59 = vrot.slane %v3289_v23, 4  ;;  %v3284_v15 = vadd.f32 %v3283_v19, %v3282_v0  ;;  %v3203_v28 = vld [vmem:[#allocation2 + $0x588] sm:$0x3] }
 0x329   :  { %v3267_v41 = vadd.f32 %v3266_v52, %v3265_v14  ;;  %v3273_v20 = vrot.slane %v3272_v55, 1  ;;  %v3296_v33 = vsel %vm3218_vm0, %v3197_v22, 0.0  ;;  %v3492_v26 = vrot.slane %v3476_v37, %v9008_v39  ;;  %v3204_v22 = vld [vmem:[#allocation2 + $0x598] sm:$0x3] }
 0x32a   :  { %v3499_v48 = vrot.slane %v3477_v21, %v9008_v39  ;;  %v3279_v8 = vadd.f32 %v3278_v6, %v3277_v49  ;;  %v3291_v1 = vadd.f32 %v3290_v59, %v3289_v23  ;;  %v3285_v17 = vrot.slane %v3284_v15, 2  ;;  %v3205_v6 = vld [vmem:[#allocation2 + $0x60] sm:$0x3] }
 0x32b   :  { %v3274_v51 = vadd.f32 %v3273_v20, %v3272_v55  ;;  %v3297_v13 = vrot.slane %v3296_v33, 4  ;;  %v3303_v40 = vsel %vm3218_vm0, %v3198_v12, 0.0  ;;  %v3507_v9 = vcombine.low %v3485_v54, %v3492_v26 }
 0x32c   :  { %v3280_v5 = vrot.slane %v3279_v8, 1  ;;  %v3292_v43 = vrot.slane %v3291_v1, 2  ;;  %v3304_v36 = vrot.slane %v3303_v40, 4  ;;  %v3286_v4 = vadd.f32 %v3285_v17, %v3284_v15 }
 0x32d   :  { %v3478_v58 = vcombine.low %v3267_v41, %v3274_v51  ;;  %v3298_v61 = vadd.f32 %v3297_v13, %v3296_v33  ;;  %v3310_v34 = vsel %vm3218_vm0, %v3199_v3, 0.0  ;;  %v3515_v44 = vrot.slane %v3507_v9, %v9008_v39 }
 0x32e   :  { %v3281_v57 = vadd.f32 %v3280_v5, %v3279_v8  ;;  %v3293_v42 = vadd.f32 %v3292_v43, %v3291_v1  ;;  %v3305_v31 = vadd.f32 %v3304_v36, %v3303_v40  ;;  %v3287_v11 = vrot.slane %v3286_v4, 1 }
 0x32f   :  { %v3506_v27 = vrot.slane %v3478_v58, %v9008_v39  ;;  %v3299_v18 = vrot.slane %v3298_v61, 2  ;;  %v3311_v29 = vrot.slane %v3310_v34, 4  ;;  %v3317_v25 = vsel %vm3218_vm0, %v3200_v47, 0.0  ;;  %v3206_v47 = vld [vmem:[#allocation2 + $0x3c8] sm:$0x3] }
 0x330   :  { %v3294_v53 = vrot.slane %v3293_v42, 1  ;;  %v3306_v63 = vrot.slane %v3305_v31, 2  ;;  %v3324_v60 = vsel %vm3218_vm0, %v3201_v24, 0.0  ;;  %v3288_v32 = vadd.f32 %v3287_v11, %v3286_v4 }
 0x331   :  { %v3508_v38 = vcombine.low %v3499_v48, %v3506_v27  ;;  %v3300_v62 = vadd.f32 %v3299_v18, %v3298_v61  ;;  %v3312_v16 = vadd.f32 %v3311_v29, %v3310_v34  ;;  %v3318_v46 = vrot.slane %v3317_v25, 4 }
 0x332   :  { %v3295_v2 = vadd.f32 %v3294_v53, %v3293_v42  ;;  %v3307_v56 = vadd.f32 %v3306_v63, %v3305_v31  ;;  %v3325_v50 = vrot.slane %v3324_v60, 4  ;;  %v3524_v54 = vcombine.low %v3281_v57, %v3288_v32  ;;  %v3208_v53 = vld [vmem:[#allocation2 + $0x670] sm:$0x3] }
 0x333   :  { %v3522_v30 = vrot.slane %v3508_v38, %v9008_v39  ;;  %v3301_v14 = vrot.slane %v3300_v62, 1  ;;  %v3313_v7 = vrot.slane %v3312_v16, 2  ;;  %v3319_v10 = vadd.f32 %v3318_v46, %v3317_v25 }
 0x334   :  { %v3308_v0 = vrot.slane %v3307_v56, 1  ;;  %v3326_v45 = vadd.f32 %v3325_v50, %v3324_v60  ;;  %v3331_v49 = vsel %vm3218_vm0, %v3202_v35, 0.0  ;;  %v3534_v23 = vrot.slane %v3524_v54, %v9008_v39 }
 0x335   :  { %v3523_v52 = vcombine.low %v3515_v44, %v3522_v30  ;;  %v3302_v55 = vadd.f32 %v3301_v14, %v3300_v62  ;;  %v3314_v19 = vadd.f32 %v3313_v7, %v3312_v16  ;;  %v3320_v21 = vrot.slane %v3319_v10, 2  ;;  %v3207_v44 = vld [vmem:[#allocation2 + $0x6d8] sm:$0x3] }
 0x336   :  { %v3309_v37 = vadd.f32 %v3308_v0, %v3307_v56  ;;  %v3327_v12 = vrot.slane %v3326_v45, 2  ;;  %v3332_v59 = vrot.slane %v3331_v49, 4  ;;  %v3338_v15 = vsel %vm3218_vm0, %v3203_v28, 0.0 }
 0x337   :  { %3675 = vst [vmem:[%s8806_s8] ss:$8 sm:$0xf] %v3523_v52  ;;  %3676 = vst [vmem:[%s8806_s8] ss:$8 sm:$0xf0] %v3523_v52  ;;  %v3315_v41 = vrot.slane %v3314_v19, 1  ;;  %v3525_v20 = vcombine.low %v3295_v2, %v3302_v55  ;;  %v3345_v33 = vsel %vm3218_vm0, %v3204_v22, 0.0  ;;  %v3321_v26 = vadd.f32 %v3320_v21, %v3319_v10 }
 0x338   :  { %v3328_v48 = vadd.f32 %v3327_v12, %v3326_v45  ;;  %v3333_v3 = vadd.f32 %v3332_v59, %v3331_v49  ;;  %v3339_v8 = vrot.slane %v3338_v15, 4  ;;  %v3346_v17 = vrot.slane %v3345_v33, 4  ;;  %v3209_v2 = vld [vmem:[#allocation2 + $0x348] sm:$0x3]  ;;  %v3210_v22 = vld [vmem:[#allocation2 + $0x118] sm:$0x3] }
 0x339   :  { %v3316_v1 = vadd.f32 %v3315_v41, %v3314_v19  ;;  %v3541_v51 = vrot.slane %v3525_v20, %v9008_v39  ;;  %v3352_v13 = vsel %vm3218_vm0, %v3205_v6, 0.0  ;;  %v3322_v40 = vrot.slane %v3321_v26, 1  ;;  %v3211_v20 = vld [vmem:[#allocation2 + $0xa0] sm:$0x3] }
 0x33a   :  { %v3329_v9 = vrot.slane %v3328_v48, 1  ;;  %v3334_v5 = vrot.slane %v3333_v3, 2  ;;  %v3340_v43 = vadd.f32 %v3339_v8, %v3338_v15  ;;  %v3347_v24 = vadd.f32 %v3346_v17, %v3345_v33 }
 0x33b   :  { %v3526_v36 = vcombine.low %v3309_v37, %v3316_v1  ;;  %v3556_v58 = vcombine.low %v3534_v23, %v3541_v51  ;;  %v3353_v4 = vrot.slane %v3352_v13, 4  ;;  %v3323_v61 = vadd.f32 %v3322_v40, %v3321_v26  ;;  %v3212_v51 = vld [vmem:[#allocation2 + $0x1a0] sm:$0x3] }
 0x33c   :  { %v3330_v34 = vadd.f32 %v3329_v9, %v3328_v48  ;;  %v3335_v57 = vadd.f32 %v3334_v5, %v3333_v3  ;;  %v3341_v42 = vrot.slane %v3340_v43, 2  ;;  %v3348_v11 = vrot.slane %v3347_v24, 2 }
 0x33d   :  { %v3548_v31 = vrot.slane %v3526_v36, %v9008_v39  ;;  %v3564_v27 = vrot.slane %v3556_v58, %v9008_v39  ;;  %v3354_v18 = vadd.f32 %v3353_v4, %v3352_v13  ;;  %v3359_v60 = vsel %vm3218_vm0, %v3206_v47, 0.0  ;;  %v3213_v58 = vld [vmem:[#allocation2 + $0x260] sm:$0x3] }
 0x33e   :  { %v3527_v29 = vcombine.low %v3323_v61, %v3330_v34  ;;  %v3336_v63 = vrot.slane %v3335_v57, 1  ;;  %v3342_v25 = vadd.f32 %v3341_v42, %v3340_v43  ;;  %v3349_v38 = vadd.f32 %v3348_v11, %v3347_v24 }
 0x33f   :  { %v3355_v32 = vrot.slane %v3354_v18, 2  ;;  %v3360_v62 = vrot.slane %v3359_v60, 4  ;;  %v3366_v16 = vsel %vm3218_vm0, %v3207_v44, 0.0  ;;  %v3373_v54 = vsel %vm3218_vm0, %v3208_v53, 0.0 }
 0x340   :  { %v3555_v35 = vrot.slane %v3527_v29, %v9008_v39  ;;  %v3337_v56 = vadd.f32 %v3336_v63, %v3335_v57  ;;  %v3343_v46 = vrot.slane %v3342_v25, 1  ;;  %v3367_v50 = vrot.slane %v3366_v16, 4  ;;  %v3215_v63 = vld [vmem:[#allocation2 + $0x3a0] sm:$0x3] }
 0x341   :  { %v3350_v30 = vrot.slane %v3349_v38, 1  ;;  %v3356_v14 = vadd.f32 %v3355_v32, %v3354_v18  ;;  %v3361_v7 = vadd.f32 %v3360_v62, %v3359_v60  ;;  %v3374_v28 = vrot.slane %v3373_v54, 4 }
 0x342   :  { %v3557_v0 = vcombine.low %v3548_v31, %v3555_v35  ;;  %v3344_v10 = vadd.f32 %v3343_v46, %v3342_v25  ;;  %v3368_v45 = vadd.f32 %v3367_v50, %v3366_v16  ;;  %v3380_v19 = vsel %vm3218_vm0, %v3209_v2, 0.0  ;;  %v3214_v31 = vld [vmem:[#allocation2 + $0xe0] sm:$0x3]  ;;  %v3216_v25 = vld [vmem:[#allocation2 + $0x538] sm:$0x3] }
 0x343   :  { %v3351_v49 = vadd.f32 %v3350_v30, %v3349_v38  ;;  %v3357_v52 = vrot.slane %v3356_v14, 1  ;;  %v3362_v55 = vrot.slane %v3361_v7, 2  ;;  %v3375_v21 = vadd.f32 %v3374_v28, %v3373_v54 }
 0x344   :  { %v3571_v23 = vrot.slane %v3557_v0, %v9008_v39  ;;  %v3369_v37 = vrot.slane %v3368_v45, 2  ;;  %v3381_v12 = vrot.slane %v3380_v19, 4  ;;  %v3573_v41 = vcombine.low %v3337_v56, %v3344_v10 }
 0x345   :  { %v3358_v6 = vadd.f32 %v3357_v52, %v3356_v14  ;;  %v3363_v59 = vadd.f32 %v3362_v55, %v3361_v7  ;;  %v3387_v15 = vsel %vm3218_vm0, %v3210_v22, 0.0  ;;  %v3376_v48 = vrot.slane %v3375_v21, 2  ;;  %v3217_v7 = vld [vmem:[#allocation2 + $0x3c0] sm:$0x3] }
 0x346   :  { %v3572_v33 = vcombine.low %v3564_v27, %v3571_v23  ;;  %v3370_v26 = vadd.f32 %v3369_v37, %v3368_v45  ;;  %v3382_v3 = vadd.f32 %v3381_v12, %v3380_v19  ;;  %v3388_v17 = vrot.slane %v3387_v15, 4 }
 0x347   :  { %v3364_v8 = vrot.slane %v3363_v59, 1  ;;  %v3574_v1 = vcombine.low %v3351_v49, %v3358_v6  ;;  %v3377_v40 = vadd.f32 %v3376_v48, %v3375_v21  ;;  %v3394_v5 = vsel %vm3218_vm0, %v3211_v20, 0.0 }
 0x348   :  { %6775 = vst [vmem:[%s8806_s8 + $0x40] ss:$8 sm:$0xf] %v3572_v33  ;;  %6776 = vst [vmem:[%s8806_s8 + $0x40] ss:$8 sm:$0xf0] %v3572_v33  ;;  %v3583_v43 = vrot.slane %v3573_v41, %v9008_v39  ;;  %v3389_v47 = vadd.f32 %v3388_v17, %v3387_v15 }
 0x349   :  { %v3371_v13 = vrot.slane %v3370_v26, 1  ;;  %v3383_v9 = vrot.slane %v3382_v3, 2  ;;  %v3590_v36 = vrot.slane %v3574_v1, %v9008_v39  ;;  %v3395_v24 = vrot.slane %v3394_v5, 4 }
 0x34a   :  { %v3378_v61 = vrot.slane %v3377_v40, 1  ;;  %v3401_v44 = vsel %vm3218_vm0, %v3212_v51, 0.0  ;;  %v3365_v57 = vadd.f32 %v3364_v8, %v3363_v59  ;;  %v3408_v29 = vsel %vm3218_vm0, %v3213_v58, 0.0 }
 0x34b   :  { %v3372_v4 = vadd.f32 %v3371_v13, %v3370_v26  ;;  %v3384_v34 = vadd.f32 %v3383_v9, %v3382_v3  ;;  %v3605_v42 = vcombine.low %v3583_v43, %v3590_v36  ;;  %v3396_v27 = vadd.f32 %v3395_v24, %v3394_v5 }
 0x34c   :  { %v3402_v11 = vrot.slane %v3401_v44, 4  ;;  %v3390_v60 = vrot.slane %v3389_v47, 2  ;;  %v3379_v62 = vadd.f32 %v3378_v61, %v3377_v40  ;;  %v3409_v35 = vrot.slane %v3408_v29, 4 }
 0x34d   :  { %v3385_v18 = vrot.slane %v3384_v34, 1  ;;  %v3575_v53 = vcombine.low %v3365_v57, %v3372_v4  ;;  %v3397_v38 = vrot.slane %v3396_v27, 2  ;;  %v3415_v2 = vsel %vm3218_vm0, %v3214_v31, 0.0 }
 0x34e   :  { %v3403_v32 = vadd.f32 %v3402_v11, %v3401_v44  ;;  %v3613_v56 = vrot.slane %v3605_v42, %v9008_v39  ;;  %v3416_v30 = vrot.slane %v3415_v2, 4  ;;  %v3410_v54 = vadd.f32 %v3409_v35, %v3408_v29 }
 0x34f   :  { %v3386_v16 = vadd.f32 %v3385_v18, %v3384_v34  ;;  %v3398_v46 = vadd.f32 %v3397_v38, %v3396_v27  ;;  %v3422_v0 = vsel %vm3218_vm0, %v3215_v63, 0.0  ;;  %v3429_v10 = vsel %vm3218_vm0, %v3216_v25, 0.0 }
 0x350   :  { %v3404_v50 = vrot.slane %v3403_v32, 2  ;;  %v3597_v45 = vrot.slane %v3575_v53, %v9008_v39  ;;  %v3391_v28 = vadd.f32 %v3390_v60, %v3389_v47  ;;  %v3417_v49 = vadd.f32 %v3416_v30, %v3415_v2 }
 0x351   :  { %v3576_v14 = vcombine.low %v3379_v62, %v3386_v16  ;;  %v3411_v55 = vrot.slane %v3410_v54, 2  ;;  %v3423_v19 = vrot.slane %v3422_v0, 4  ;;  %v3430_v23 = vrot.slane %v3429_v10, 4 }
 0x352   :  { %v3405_v22 = vadd.f32 %v3404_v50, %v3403_v32  ;;  %v3399_v37 = vrot.slane %v3398_v46, 1  ;;  %v3418_v12 = vrot.slane %v3417_v49, 2  ;;  %v3436_v6 = vsel %vm3218_vm0, %v3217_v7, 0.0 }
 0x353   :  { %v3604_v52 = vrot.slane %v3576_v14, %v9008_v39  ;;  %v3412_v41 = vadd.f32 %v3411_v55, %v3410_v54  ;;  %v3424_v20 = vadd.f32 %v3423_v19, %v3422_v0  ;;  %v3431_v15 = vadd.f32 %v3430_v23, %v3429_v10 }
 0x354   :  { %v3406_v21 = vrot.slane %v3405_v22, 1  ;;  %v3392_v33 = vrot.slane %v3391_v28, 1  ;;  %v3419_v26 = vadd.f32 %v3418_v12, %v3417_v49  ;;  %v3437_v48 = vrot.slane %v3436_v6, 4 }
 0x355   :  { %v3606_v59 = vcombine.low %v3597_v45, %v3604_v52  ;;  %v3413_v8 = vrot.slane %v3412_v41, 1  ;;  %v3425_v1 = vrot.slane %v3424_v20, 2  ;;  %v3432_v51 = vrot.slane %v3431_v15, 2 }
 0x356   :  { %v3400_v17 = vadd.f32 %v3399_v37, %v3398_v46  ;;  %v3407_v13 = vadd.f32 %v3406_v21, %v3405_v22  ;;  %v3438_v40 = vadd.f32 %v3437_v48, %v3436_v6  ;;  %v3393_v58 = vadd.f32 %v3392_v33, %v3391_v28 }
 0x357   :  { %v3620_v3 = vrot.slane %v3606_v59, %v9008_v39  ;;  %v3414_v5 = vadd.f32 %v3413_v8, %v3412_v41  ;;  %v3426_v43 = vadd.f32 %v3425_v1, %v3424_v20  ;;  %v3433_v36 = vadd.f32 %v3432_v51, %v3431_v15 }
 0x358   :  { %v3420_v47 = vrot.slane %v3419_v26, 1  ;;  %v3439_v24 = vrot.slane %v3438_v40, 2  ;;  %v3622_v57 = vcombine.low %v3393_v58, %v3400_v17 }
 0x359   :  { %v3621_v9 = vcombine.low %v3613_v56, %v3620_v3  ;;  %v3427_v4 = vrot.slane %v3426_v43, 1  ;;  %v3623_v61 = vcombine.low %v3407_v13, %v3414_v5  ;;  %v3434_v34 = vrot.slane %v3433_v36, 1 }
 0x35a   :  { %v3440_v44 = vadd.f32 %v3439_v24, %v3438_v40  ;;  %v3421_v31 = vadd.f32 %v3420_v47, %v3419_v26  ;;  %v3632_v63 = vrot.slane %v3622_v57, %v9008_v39 }
 0x35b   :  { %6777 = vst [vmem:[%s8806_s8 + $0x80] ss:$8 sm:$0xf] %v3621_v9  ;;  %6778 = vst [vmem:[%s8806_s8 + $0x80] ss:$8 sm:$0xf0] %v3621_v9  ;;  %v3428_v42 = vadd.f32 %v3427_v4, %v3426_v43  ;;  %v3639_v11 = vrot.slane %v3623_v61, %v9008_v39  ;;  %v3435_v18 = vadd.f32 %v3434_v34, %v3433_v36 }
 0x35c   :  { %v3441_v27 = vrot.slane %v3440_v44, 1 }
 0x35d   :  { %v3624_v53 = vcombine.low %v3421_v31, %v3428_v42  ;;  %v3654_v60 = vcombine.low %v3632_v63, %v3639_v11 }
 0x35e   :  { %v3442_v29 = vadd.f32 %v3441_v27, %v3440_v44 }
 0x35f   :  { %v3646_v38 = vrot.slane %v3624_v53, %v9008_v39  ;;  %v3662_v16 = vrot.slane %v3654_v60, %v9008_v39 }
 0x360   :  { %v3625_v25 = vcombine.low %v3435_v18, %v3442_v29 }
 0x362   :  { %v3653_v32 = vrot.slane %v3625_v25, %v9008_v39 }
 0x364   :  { %v3655_v62 = vcombine.low %v3646_v38, %v3653_v32 }
 0x366   :  { %v3669_v35 = vrot.slane %v3655_v62, %v9008_v39 }
 0x368   :  { %v3670_v2 = vcombine.low %v3662_v16, %v3669_v35 }
 0x36a   :  { %6779 = vst [vmem:[%s8806_s8 + $0xc0] ss:$8 sm:$0xf] %v3670_v2  ;;  %6780 = vst [vmem:[%s8806_s8 + $0xc0] ss:$8 sm:$0xf0] %v3670_v2 }

</bundles_post_ra>
